<compile_context>
chip_gen: v5e
topology: v5e:2x2
jax: 0.10.0
libtpu: 0.0.40
codegen_flags: <defaults>
</compile_context>

<pallas_src>
from typing import NamedTuple

import numpy as np
import jax
import jax.numpy as jnp
from jax import lax
from jax.experimental import pallas as pl
from jax.experimental.pallas import tpu as pltpu

BN_EPS = 1e-5
_SLAB_WIDTHS = (128, 256, 512, 1024)   # bf16 matrix slabs, smallest-fit packing


# ---------------------------------------------------------------------------
# init-time dense operator builders (pure numpy, executed once)
# ---------------------------------------------------------------------------

def _conv_dense(w, Hi, Wi, stride, pad, in_chw=False, out_chw=False):
    """Fold Conv2d(weight w [Cout,Cin,kh,kw]) into one per-sample operator
    M[Hi*Wi*Cin, Ho*Wo*Cout] acting on a flattened sample row."""
    Cout, Cin, kh, kw = w.shape
    Ho = (Hi + 2 * pad - kh) // stride + 1
    Wo = (Wi + 2 * pad - kw) // stride + 1
    M = np.zeros((Hi * Wi * Cin, Ho * Wo * Cout), np.float32)
    ci, co = np.arange(Cin), np.arange(Cout)
    for ho in range(Ho):
        for wo in range(Wo):
            for di in range(kh):
                hi = ho * stride + di - pad
                if not (0 <= hi < Hi):
                    continue
                for dj in range(kw):
                    wi = wo * stride + dj - pad
                    if not (0 <= wi < Wi):
                        continue
                    rows = (ci * Hi + hi) * Wi + wi if in_chw else (hi * Wi + wi) * Cin + ci
                    cols = (co * Ho + ho) * Wo + wo if out_chw else (ho * Wo + wo) * Cout + co
                    M[np.ix_(rows, cols)] += w[:, :, di, dj].T
    return M, Ho, Wo


def _convT_dense(w, Hi, Wi, stride):
    """Fold ConvTranspose2d(kernel=stride, pad=0; weight w [Cin,Cout,kh,kw])
    into one per-sample operator (spatial interleave baked in)."""
    Cin, Cout, kh, kw = w.shape
    Ho, Wo = Hi * stride, Wi * stride
    M = np.zeros((Hi * Wi * Cin, Ho * Wo * Cout), np.float32)
    ci, co = np.arange(Cin), np.arange(Cout)
    for h in range(Hi):
        for wv in range(Wi):
            rows = (h * Wi + wv) * Cin + ci
            for di in range(kh):
                for dj in range(kw):
                    cols = ((h * stride + di) * Wo + (wv * stride + dj)) * Cout + co
                    M[np.ix_(rows, cols)] += w[:, :, di, dj]
    return M, Ho, Wo


# ---------------------------------------------------------------------------
# constant slab packer
# ---------------------------------------------------------------------------

class _Slab:
    """Packs matrices of width <= `width` along rows of one 2-D buffer; each
    block's row offset is rounded to `align` so all in-kernel slices are
    tile-aligned, static and zero-cost."""

    def __init__(self, width, dtype, align):
        self.width, self.dtype, self.align = width, dtype, align
        self._blocks, self._off = [], 0

    def add(self, mat):
        mat = np.asarray(mat, np.float32)
        r, c = mat.shape
        assert c <= self.width
        off = self._off
        self._blocks.append((off, mat))
        self._off = off + (-(-r // self.align)) * self.align
        return off

    def finalize(self):
        rows = max((-(-self._off // self.align)) * self.align, self.align)
        buf = np.zeros((rows, self.width), np.float32)
        for off, m in self._blocks:
            buf[off:off + m.shape[0], :m.shape[1]] = m
        return jnp.asarray(buf, dtype=self.dtype)


class _BNLayer(NamedTuple):
    m_slab: int
    m_off: int
    m_rows: int
    m_cols: int      # Fout = Ho*Wo*Cout
    pt_slab: int
    pt_off: int      # P^T block ([Cout, Fout]), 0/1 -> exact in bf16
    p_off: int       # P block in f32 slab ([Fout, Cout])
    cout: int
    gamma_row: int   # row in vec slab, width cout
    beta_row: int    # row in vec slab, width Fout (beta broadcast over spatial)
    inv_count: float


# ---------------------------------------------------------------------------
# parameter / constant construction
# ---------------------------------------------------------------------------

def _init_conv(key, cout, cin, k):
    kw_, kb = jax.random.split(key)
    w = np.asarray(jax.random.normal(kw_, (cout, cin, k, k), jnp.float32))
    w = w * np.float32(1.0 / np.sqrt(cin * k * k))
    b = np.asarray(0.01 * jax.random.normal(kb, (cout,), jnp.float32))
    return w, b


def _init_convT(key, cin, cout, k):
    kw_, kb = jax.random.split(key)
    w = np.asarray(jax.random.normal(kw_, (cin, cout, k, k), jnp.float32))
    w = w * np.float32(1.0 / np.sqrt(cin * k * k))
    b = np.asarray(0.01 * jax.random.normal(kb, (cout,), jnp.float32))
    return w, b


def _init_linear(key, fin, fout):
    kw_, kb = jax.random.split(key)
    w = np.asarray(jax.random.normal(kw_, (fout, fin), jnp.float32))
    w = w * np.float32(1.0 / np.sqrt(fin))
    b = np.asarray(0.01 * jax.random.normal(kb, (fout,), jnp.float32))
    return w, b


def init_vae(key, in_channels, out_channels, enc_base, dec_base,
             img_h, img_w, latent, batch):
    assert img_h % 8 == 0 and img_w % 8 == 0
    h8, w8 = img_h // 8, img_w // 8
    assert h8 == 1 and w8 == 1, "fused kernel assumes img_h//8 == img_w//8 == 1"
    N = batch
    feat_dim = enc_base * 4

    mslabs = [_Slab(w, jnp.bfloat16, 16) for w in _SLAB_WIDTHS]
    pslab = _Slab(64, jnp.float32, 8)
    vec_rows = []
    cost = {"flops": 0, "transc": 0}

    def pick(width):
        for i, w in enumerate(_SLAB_WIDTHS):
            if width <= w:
                return i
        raise ValueError(f"matrix width {width} exceeds largest slab")

    def add_vec(v):
        vec_rows.append(np.asarray(v, np.float32).reshape(-1))
        return len(vec_rows) - 1

    bn_layers = []

    def add_bn_layer(M, cout, Ho, Wo):
        Fin, Fout = M.shape
        Po = Ho * Wo
        si = pick(Fout)
        m_off = mslabs[si].add(M)
        # 0/1 pooling matrix: column order of the layer output is (p-major,
        # c-minor), so P[p*cout + c, c] = 1 reduces spatial -> per-channel.
        P = np.zeros((Fout, cout), np.float32)
        idx = np.arange(Fout)
        P[idx, idx % cout] = 1.0
        p_off = pslab.add(P)
        pt_si = pick(Fout)
        pt_off = mslabs[pt_si].add(P.T)          # exact in bf16 (0/1)
        gamma = np.ones((cout,), np.float32)     # torch BatchNorm2d default affine
        beta = np.zeros((cout,), np.float32)
        g_row = add_vec(gamma)
        b_row = add_vec(np.tile(beta, Po))       # broadcast to (p, c) column order
        bn_layers.append(_BNLayer(si, m_off, Fin, Fout, pt_si, pt_off, p_off,
                                  cout, g_row, b_row, float(1.0 / (N * Po))))
        cost["flops"] += 2 * N * Fin * Fout + 4 * 2 * Fout * cout + 10 * N * Fout
        cost["transc"] += 2 * N * Fout + cout

    keys = jax.random.split(key, 16)
    ki = 0

    # -------------------- encoder --------------------
    Hc, Wc = img_h, img_w
    enc_cfg = [
        (in_channels, enc_base, 3, 1, 1),        # block_1
        (enc_base, enc_base, 4, 2, 1),           # down_1
        (enc_base, enc_base * 2, 3, 1, 1),       # block_2
        (enc_base * 2, enc_base * 2, 4, 2, 1),   # down_2
        (enc_base * 2, enc_base * 4, 3, 1, 1),   # block_3
        (enc_base * 4, enc_base * 4, 4, 2, 1),   # down_3
    ]
    for li, (cin, cout, k, s, p) in enumerate(enc_cfg):
        w, _bias = _init_conv(keys[ki], cout, cin, k); ki += 1
        # Conv bias dropped: a per-channel constant before training-mode BN is
        # exactly cancelled by the batch-mean subtraction.
        M, Ho, Wo = _conv_dense(w, Hc, Wc, s, p, in_chw=(li == 0), out_chw=False)
        add_bn_layer(M, cout, Ho, Wo)
        Hc, Wc = Ho, Wo
    n_enc = len(enc_cfg)

    # merged mu|log_var linear
    w_mv, b_mv = _init_linear(keys[ki], feat_dim, 2 * latent); ki += 1
    mv_slab = pick(2 * latent)
    mv_off = mslabs[mv_slab].add(w_mv.T)
    mv_brow = add_vec(b_mv)
    cost["flops"] += 2 * N * feat_dim * 2 * latent

    # project_z linear
    w_pz, b_pz = _init_linear(keys[ki], latent, dec_base); ki += 1
    pz_slab = pick(dec_base)
    pz_off = mslabs[pz_slab].add(w_pz.T)
    pz_brow = add_vec(b_pz)
    cost["flops"] += 2 * N * latent * dec_base
    cost["transc"] += N * latent

    # -------------------- decoder --------------------
    Hd, Wd = h8, w8
    dec_cfg = [
        ("c", dec_base, dec_base // 2, 3, 1, 1),        # block_1
        ("t", dec_base // 2, dec_base // 2, 2, 2, 0),   # up_1
        ("c", dec_base // 2, dec_base // 4, 3, 1, 1),   # block_2
        ("t", dec_base // 4, dec_base // 4, 2, 2, 0),   # up_2
        ("c", dec_base // 4, dec_base // 8, 3, 1, 1),   # block_3
        ("t", dec_base // 8, dec_base // 8, 2, 2, 0),   # up_3
    ]
    for kind, cin, cout, k, s, p in dec_cfg:
        if kind == "c":
            w, _bias = _init_conv(keys[ki], cout, cin, k); ki += 1
            M, Ho, Wo = _conv_dense(w, Hd, Wd, s, p, False, False)
        else:
            w, _bias = _init_convT(keys[ki], cin, cout, k); ki += 1
            M, Ho, Wo = _convT_dense(w, Hd, Wd, s)
        add_bn_layer(M, cout, Ho, Wo)
        Hd, Wd = Ho, Wo
    assert (Hd, Wd) == (img_h, img_w)

    # merged final_mu | final_log_var (no BN / activation) -> (c, h, w) order
    w_fmu, b_fmu = _init_conv(keys[ki], out_channels, dec_base // 8, 3); ki += 1
    w_flv, b_flv = _init_conv(keys[ki], out_channels, dec_base // 8, 3); ki += 1
    w_f = np.concatenate([w_fmu, w_flv], axis=0)
    b_f = np.concatenate([b_fmu, b_flv], axis=0)
    Mf, Ho, Wo = _conv_dense(w_f, Hd, Wd, 1, 1, in_chw=False, out_chw=True)
    fin_slab = pick(Mf.shape[1])
    fin_off = mslabs[fin_slab].add(Mf)
    fin_rows, fin_cols = Mf.shape
    fin_brow = add_vec(np.repeat(b_f, Ho * Wo))
    cost["flops"] += 2 * N * fin_rows * fin_cols

    vec_width = max(r.size for r in vec_rows)
    vec = np.zeros((len(vec_rows), vec_width), np.float32)
    for i, r in enumerate(vec_rows):
        vec[i, :r.size] = r

    static = dict(
        N=N, H=img_h, W=img_w, c_in=in_channels, c_out=out_channels,
        latent=latent, n_enc=n_enc, bn_layers=tuple(bn_layers),
        mv=(mv_slab, mv_off, feat_dim, 2 * latent, mv_brow),
        pz=(pz_slab, pz_off, latent, dec_base, pz_brow),
        final=(fin_slab, fin_off, fin_rows, fin_cols, fin_brow),
        flops=int(cost["flops"]), transc=int(cost["transc"]),
    )
    params = dict(
        mslabs=tuple(s.finalize() for s in mslabs),
        p_slab=pslab.finalize(),
        vec=jnp.asarray(vec),
    )
    return static, params


# ---------------------------------------------------------------------------
# fused kernel
# ---------------------------------------------------------------------------

def _make_kernel(static):
    bn_layers = static["bn_layers"]
    n_enc = static["n_enc"]
    L = static["latent"]
    mv_slab, mv_off, mv_rows, mv_cols, mv_brow = static["mv"]
    pz_slab, pz_off, pz_rows, pz_cols, pz_brow = static["pz"]
    fin_slab, fin_off, fin_rows, fin_cols, fin_brow = static["final"]

    def bn_silu(x, sp, slabs, p_ref, vec_ref):
        F, C = sp.m_cols, sp.cout
        m = slabs[sp.m_slab][pl.ds(sp.m_off, sp.m_rows), pl.ds(0, F)]
        # one lane-dense bf16 MXU dot per conv / convT layer
        y = jnp.dot(x.astype(jnp.bfloat16), m, preferred_element_type=jnp.float32)
        pmat = p_ref[pl.ds(sp.p_off, F), pl.ds(0, C)]                       # [F, C] f32
        pt = slabs[sp.pt_slab][pl.ds(sp.pt_off, C), pl.ds(0, F)].astype(jnp.float32)
        # training-mode BatchNorm, two-pass (centered) batch statistics
        rs = jnp.sum(y, axis=0, keepdims=True)                              # [1, F]
        mean_c = jnp.dot(rs, pmat, preferred_element_type=jnp.float32) * sp.inv_count
        mean_f = jnp.dot(mean_c, pt, preferred_element_type=jnp.float32)    # [1, F]
        yc = y - mean_f
        ss = jnp.sum(yc * yc, axis=0, keepdims=True)
        var_c = jnp.dot(ss, pmat, preferred_element_type=jnp.float32) * sp.inv_count
        gamma = vec_ref[pl.ds(sp.gamma_row, 1), pl.ds(0, C)]
        scale_c = gamma * lax.rsqrt(var_c + BN_EPS)
        scale_f = jnp.dot(scale_c, pt, preferred_element_type=jnp.float32)
        beta_f = vec_ref[pl.ds(sp.beta_row, 1), pl.ds(0, F)]
        yn = yc * scale_f + beta_f
        # SiLU; the reciprocal runs on the EUP slot (approx: ~2^-12 rel err).
        return yn * pl.reciprocal(1.0 + jnp.exp(-yn), approx=True)

    def kernel(x_ref, eps_ref, s0, s1, s2, s3, p_ref, vec_ref, recon_ref, mulv_ref):
        slabs = (s0, s1, s2, s3)

        # ------------------------- encoder -------------------------
        f = x_ref[...]                                   # [N, Cin*H*W] (NCHW-flat)
        for sp in bn_layers[:n_enc]:
            f = bn_silu(f, sp, slabs, p_ref, vec_ref)

        wm = slabs[mv_slab][pl.ds(mv_off, mv_rows), pl.ds(0, mv_cols)]
        bm = vec_ref[pl.ds(mv_brow, 1), pl.ds(0, mv_cols)]
        mv = jnp.dot(f.astype(jnp.bfloat16), wm,
                     preferred_element_type=jnp.float32) + bm
        mulv_ref[...] = mv                               # merged [N, 2*latent]

        # -------------------- reparametrization --------------------
        mu = mv[:, 0:L]
        log_var = mv[:, L:2 * L]
        # TODO(synk): torch.randn_like is stateful RNG; eps is supplied by the caller.
        z = mu + jnp.exp(0.5 * log_var) * eps_ref[...]

        # ------------------------- decoder -------------------------
        wp = slabs[pz_slab][pl.ds(pz_off, pz_rows), pl.ds(0, pz_cols)]
        bp = vec_ref[pl.ds(pz_brow, 1), pl.ds(0, pz_cols)]
        d = jnp.dot(z.astype(jnp.bfloat16), wp,
                    preferred_element_type=jnp.float32) + bp

        for sp in bn_layers[n_enc:]:
            d = bn_silu(d, sp, slabs, p_ref, vec_ref)

        wf = slabs[fin_slab][pl.ds(fin_off, fin_rows), pl.ds(0, fin_cols)]
        bf = vec_ref[pl.ds(fin_brow, 1), pl.ds(0, fin_cols)]
        recon_ref[...] = (jnp.dot(d.astype(jnp.bfloat16), wf,
                                  preferred_element_type=jnp.float32) + bf)

    return kernel


# ---------------------------------------------------------------------------
# forward: one fused pallas_call for the whole VAE
# ---------------------------------------------------------------------------

def make_forward(static, params):
    kernel = _make_kernel(static)
    N, H, W = static["N"], static["H"], static["W"]
    c_in, c_out, L = static["c_in"], static["c_out"], static["latent"]

    out_shape = (
        jax.ShapeDtypeStruct((N, 2 * c_out * H * W), jnp.float32),   # recon (c,h,w)-flat
        jax.ShapeDtypeStruct((N, 2 * L), jnp.float32),               # mu | log_var
    )
    n_in = 2 + len(params["mslabs"]) + 2
    in_bytes = (N * c_in * H * W + N * L) * 4
    in_bytes += sum(int(np.prod(a.shape)) * a.dtype.itemsize for a in params["mslabs"])
    in_bytes += int(np.prod(params["p_slab"].shape)) * 4
    in_bytes += int(np.prod(params["vec"].shape)) * 4
    out_bytes = sum(int(np.prod(s.shape)) * 4 for s in out_shape)

    call = pl.pallas_call(
        kernel,
        out_shape=out_shape,
        in_specs=[pl.BlockSpec(memory_space=pltpu.MemorySpace.VMEM)] * n_in,
        out_specs=tuple(pl.BlockSpec(memory_space=pltpu.MemorySpace.VMEM)
                        for _ in out_shape),
        cost_estimate=pl.CostEstimate(flops=static["flops"],
                                      transcendentals=static["transc"],
                                      bytes_accessed=in_bytes + out_bytes),
    )

    @jax.jit
    def forward(params, x_nchw, eps):
        # First-layer operator consumes NCHW-flat rows, final operator emits
        # (c, h, w)-flat rows: no transposes needed, only reshapes / slices.
        x2d = x_nchw.reshape(N, c_in * H * W)
        recon2d, mulv = call(x2d, eps, *params["mslabs"],
                             params["p_slab"], params["vec"])
        recon = recon2d.reshape(N, 2 * c_out, H, W)
        return recon[:, :c_out], recon[:, c_out:], mulv[:, :L], mulv[:, L:]

    return forward


# ---------------------------------------------------------------------------
# main
# ---------------------------------------------------------------------------

if __name__ == "__main__":
    key = jax.random.PRNGKey(0)
    kp, kx, ke = jax.random.split(key, 3)

    # small shapes: batch=2, 3 channels, 8x8 image (img//8 == 1), latent=16
    B, Cin, Cout, H, W = 2, 3, 3, 8, 8
    enc_base, dec_base, latent = 16, 32, 16

    static, params = init_vae(kp, Cin, Cout, enc_base, dec_base, H, W, latent, batch=B)
    forward = make_forward(static, params)

    x = jax.random.normal(kx, (B, Cin, H, W), jnp.float32)
    eps = jax.random.normal(ke, (B, latent), jnp.float32)

    recon_mu, recon_log_var, mu, log_var = forward(params, x, eps)
    jax.block_until_ready((recon_mu, recon_log_var, mu, log_var))

    assert recon_mu.shape == (B, Cout, H, W)
    assert recon_log_var.shape == (B, Cout, H, W)
    assert mu.shape == (B, latent) and log_var.shape == (B, latent)
    for t in (recon_mu, recon_log_var, mu, log_var):
        assert bool(jnp.all(jnp.isfinite(t)))
    print("KERNEL_OK")
</pallas_src>

<mosaic_0001>
module attributes {stable_mosaic.version = 11 : i64} {
  func.func @kernel(%arg0: memref<2x192xf32, #tpu.memory_space<vmem>>, %arg1: memref<2x16xf32, #tpu.memory_space<vmem>>, %arg2: memref<1296x128xbf16, #tpu.memory_space<vmem>>, %arg3: memref<1312x256xbf16, #tpu.memory_space<vmem>>, %arg4: memref<544x512xbf16, #tpu.memory_space<vmem>>, %arg5: memref<208x1024xbf16, #tpu.memory_space<vmem>>, %arg6: memref<2800x64xf32, #tpu.memory_space<vmem>>, %arg7: memref<27x1024xf32, #tpu.memory_space<vmem>>, %arg8: memref<2x384xf32, #tpu.memory_space<vmem>>, %arg9: memref<2x32xf32, #tpu.memory_space<vmem>>) attributes {dimension_semantics = [], scalar_prefetch = 0 : i64, scratch_operands = 0 : i64, tpu.core_type = #tpu.core_type<tc>} {
    %c0 = arith.constant 0 : index
    %c0_0 = arith.constant 0 : index
    %0 = vector.load %arg0[%c0, %c0_0] : memref<2x192xf32, #tpu.memory_space<vmem>>, vector<2x192xf32>
    %c0_1 = arith.constant 0 : index
    %c0_2 = arith.constant 0 : index
    %1 = vector.load %arg5[%c0_1, %c0_2] : memref<208x1024xbf16, #tpu.memory_space<vmem>>, vector<192x1024xbf16>
    %2 = arith.truncf %0 : vector<2x192xf32> to vector<2x192xbf16>
    %cst = arith.constant dense<0.000000e+00> : vector<2x1024xf32>
    %3 = tpu.matmul %2, %1, %cst {dimension_numbers = #tpu.dot_dimension_numbers<[1], [0], [0], [1], [0, 0, 1, 1], [], []>} : vector<2x192xbf16>, vector<192x1024xbf16>, vector<2x1024xf32> -> vector<2x1024xf32>
    %c0_3 = arith.constant 0 : index
    %c0_4 = arith.constant 0 : index
    %4 = vector.load %arg6[%c0_3, %c0_4] : memref<2800x64xf32, #tpu.memory_space<vmem>>, vector<1024x16xf32>
    %c192 = arith.constant 192 : index
    %c0_5 = arith.constant 0 : index
    %5 = vector.load %arg5[%c192, %c0_5] : memref<208x1024xbf16, #tpu.memory_space<vmem>>, vector<16x1024xbf16>
    %6 = arith.extf %5 : vector<16x1024xbf16> to vector<16x1024xf32>
    %cst_6 = arith.constant dense<0.000000e+00> : vector<1024xf32>
    %7 = vector.multi_reduction <add>, %3, %cst_6 [0] : vector<2x1024xf32> to vector<1024xf32>
    %8 = vector.shape_cast %7 : vector<1024xf32> to vector<1x1024xf32>
    %cst_7 = arith.constant dense<0.000000e+00> : vector<1x16xf32>
    %9 = tpu.matmul %8, %4, %cst_7 {dimension_numbers = #tpu.dot_dimension_numbers<[1], [0], [0], [1], [0, 0, 1, 1], [], []>} : vector<1x1024xf32>, vector<1024x16xf32>, vector<1x16xf32> -> vector<1x16xf32>
    %cst_8 = arith.constant 7.812500e-03 : f32
    %10 = vector.broadcast %cst_8 : f32 to vector<1x16xf32>
    %11 = arith.mulf %9, %10 : vector<1x16xf32>
    %cst_9 = arith.constant dense<0.000000e+00> : vector<1x1024xf32>
    %12 = tpu.matmul %11, %6, %cst_9 {dimension_numbers = #tpu.dot_dimension_numbers<[1], [0], [0], [1], [0, 0, 1, 1], [], []>} : vector<1x16xf32>, vector<16x1024xf32>, vector<1x1024xf32> -> vector<1x1024xf32>
    %13 = vector.broadcast %12 : vector<1x1024xf32> to vector<2x1024xf32>
    %14 = arith.subf %3, %13 : vector<2x1024xf32>
    %15 = arith.mulf %14, %14 : vector<2x1024xf32>
    %cst_10 = arith.constant dense<0.000000e+00> : vector<1024xf32>
    %16 = vector.multi_reduction <add>, %15, %cst_10 [0] : vector<2x1024xf32> to vector<1024xf32>
    %17 = vector.shape_cast %16 : vector<1024xf32> to vector<1x1024xf32>
    %cst_11 = arith.constant dense<0.000000e+00> : vector<1x16xf32>
    %18 = tpu.matmul %17, %4, %cst_11 {dimension_numbers = #tpu.dot_dimension_numbers<[1], [0], [0], [1], [0, 0, 1, 1], [], []>} : vector<1x1024xf32>, vector<1024x16xf32>, vector<1x16xf32> -> vector<1x16xf32>
    %cst_12 = arith.constant 7.812500e-03 : f32
    %19 = vector.broadcast %cst_12 : f32 to vector<1x16xf32>
    %20 = arith.mulf %18, %19 : vector<1x16xf32>
    %c0_13 = arith.constant 0 : index
    %c0_14 = arith.constant 0 : index
    %21 = vector.load %arg7[%c0_13, %c0_14] : memref<27x1024xf32, #tpu.memory_space<vmem>>, vector<1x16xf32>
    %cst_15 = arith.constant 9.99999974E-6 : f32
    %22 = vector.broadcast %cst_15 : f32 to vector<1x16xf32>
    %23 = arith.addf %20, %22 : vector<1x16xf32>
    %24 = math.rsqrt %23 : vector<1x16xf32>
    %25 = arith.mulf %21, %24 : vector<1x16xf32>
    %cst_16 = arith.constant dense<0.000000e+00> : vector<1x1024xf32>
    %26 = tpu.matmul %25, %6, %cst_16 {dimension_numbers = #tpu.dot_dimension_numbers<[1], [0], [0], [1], [0, 0, 1, 1], [], []>} : vector<1x16xf32>, vector<16x1024xf32>, vector<1x1024xf32> -> vector<1x1024xf32>
    %c1 = arith.constant 1 : index
    %c0_17 = arith.constant 0 : index
    %27 = vector.load %arg7[%c1, %c0_17] : memref<27x1024xf32, #tpu.memory_space<vmem>>, vector<1x1024xf32>
    %28 = vector.broadcast %26 : vector<1x1024xf32> to vector<2x1024xf32>
    %29 = arith.mulf %14, %28 : vector<2x1024xf32>
    %30 = vector.broadcast %27 : vector<1x1024xf32> to vector<2x1024xf32>
    %31 = arith.addf %29, %30 : vector<2x1024xf32>
    %cst_18 = arith.constant 0.000000e+00 : f32
    %32 = vector.broadcast %cst_18 : f32 to vector<2x1024xf32>
    %33 = arith.subf %32, %31 : vector<2x1024xf32>
    %34 = math.exp %33 : vector<2x1024xf32>
    %cst_19 = arith.constant 1.000000e+00 : f32
    %35 = vector.broadcast %cst_19 : f32 to vector<2x1024xf32>
    %36 = arith.addf %35, %34 : vector<2x1024xf32>
    %37 = tpu.reciprocal %36 {approx = true} : vector<2x1024xf32> -> vector<2x1024xf32>
    %38 = arith.mulf %31, %37 : vector<2x1024xf32>
    %c0_20 = arith.constant 0 : index
    %c0_21 = arith.constant 0 : index
    %39 = vector.load %arg3[%c0_20, %c0_21] : memref<1312x256xbf16, #tpu.memory_space<vmem>>, vector<1024x256xbf16>
    %40 = arith.truncf %38 : vector<2x1024xf32> to vector<2x1024xbf16>
    %cst_22 = arith.constant dense<0.000000e+00> : vector<2x256xf32>
    %41 = tpu.matmul %40, %39, %cst_22 {dimension_numbers = #tpu.dot_dimension_numbers<[1], [0], [0], [1], [0, 0, 1, 1], [], []>} : vector<2x1024xbf16>, vector<1024x256xbf16>, vector<2x256xf32> -> vector<2x256xf32>
    %c1024 = arith.constant 1024 : index
    %c0_23 = arith.constant 0 : index
    %42 = vector.load %arg6[%c1024, %c0_23] : memref<2800x64xf32, #tpu.memory_space<vmem>>, vector<256x16xf32>
    %c1024_24 = arith.constant 1024 : index
    %c0_25 = arith.constant 0 : index
    %43 = vector.load %arg3[%c1024_24, %c0_25] : memref<1312x256xbf16, #tpu.memory_space<vmem>>, vector<16x256xbf16>
    %44 = arith.extf %43 : vector<16x256xbf16> to vector<16x256xf32>
    %cst_26 = arith.constant dense<0.000000e+00> : vector<256xf32>
    %45 = vector.multi_reduction <add>, %41, %cst_26 [0] : vector<2x256xf32> to vector<256xf32>
    %46 = vector.shape_cast %45 : vector<256xf32> to vector<1x256xf32>
    %cst_27 = arith.constant dense<0.000000e+00> : vector<1x16xf32>
    %47 = tpu.matmul %46, %42, %cst_27 {dimension_numbers = #tpu.dot_dimension_numbers<[1], [0], [0], [1], [0, 0, 1, 1], [], []>} : vector<1x256xf32>, vector<256x16xf32>, vector<1x16xf32> -> vector<1x16xf32>
    %cst_28 = arith.constant 3.125000e-02 : f32
    %48 = vector.broadcast %cst_28 : f32 to vector<1x16xf32>
    %49 = arith.mulf %47, %48 : vector<1x16xf32>
    %cst_29 = arith.constant dense<0.000000e+00> : vector<1x256xf32>
    %50 = tpu.matmul %49, %44, %cst_29 {dimension_numbers = #tpu.dot_dimension_numbers<[1], [0], [0], [1], [0, 0, 1, 1], [], []>} : vector<1x16xf32>, vector<16x256xf32>, vector<1x256xf32> -> vector<1x256xf32>
    %51 = vector.broadcast %50 : vector<1x256xf32> to vector<2x256xf32>
    %52 = arith.subf %41, %51 : vector<2x256xf32>
    %53 = arith.mulf %52, %52 : vector<2x256xf32>
    %cst_30 = arith.constant dense<0.000000e+00> : vector<256xf32>
    %54 = vector.multi_reduction <add>, %53, %cst_30 [0] : vector<2x256xf32> to vector<256xf32>
    %55 = vector.shape_cast %54 : vector<256xf32> to vector<1x256xf32>
    %cst_31 = arith.constant dense<0.000000e+00> : vector<1x16xf32>
    %56 = tpu.matmul %55, %42, %cst_31 {dimension_numbers = #tpu.dot_dimension_numbers<[1], [0], [0], [1], [0, 0, 1, 1], [], []>} : vector<1x256xf32>, vector<256x16xf32>, vector<1x16xf32> -> vector<1x16xf32>
    %cst_32 = arith.constant 3.125000e-02 : f32
    %57 = vector.broadcast %cst_32 : f32 to vector<1x16xf32>
    %58 = arith.mulf %56, %57 : vector<1x16xf32>
    %c2 = arith.constant 2 : index
    %c0_33 = arith.constant 0 : index
    %59 = vector.load %arg7[%c2, %c0_33] : memref<27x1024xf32, #tpu.memory_space<vmem>>, vector<1x16xf32>
    %cst_34 = arith.constant 9.99999974E-6 : f32
    %60 = vector.broadcast %cst_34 : f32 to vector<1x16xf32>
    %61 = arith.addf %58, %60 : vector<1x16xf32>
    %62 = math.rsqrt %61 : vector<1x16xf32>
    %63 = arith.mulf %59, %62 : vector<1x16xf32>
    %cst_35 = arith.constant dense<0.000000e+00> : vector<1x256xf32>
    %64 = tpu.matmul %63, %44, %cst_35 {dimension_numbers = #tpu.dot_dimension_numbers<[1], [0], [0], [1], [0, 0, 1, 1], [], []>} : vector<1x16xf32>, vector<16x256xf32>, vector<1x256xf32> -> vector<1x256xf32>
    %c3 = arith.constant 3 : index
    %c0_36 = arith.constant 0 : index
    %65 = vector.load %arg7[%c3, %c0_36] : memref<27x1024xf32, #tpu.memory_space<vmem>>, vector<1x256xf32>
    %66 = vector.broadcast %64 : vector<1x256xf32> to vector<2x256xf32>
    %67 = arith.mulf %52, %66 : vector<2x256xf32>
    %68 = vector.broadcast %65 : vector<1x256xf32> to vector<2x256xf32>
    %69 = arith.addf %67, %68 : vector<2x256xf32>
    %cst_37 = arith.constant 0.000000e+00 : f32
    %70 = vector.broadcast %cst_37 : f32 to vector<2x256xf32>
    %71 = arith.subf %70, %69 : vector<2x256xf32>
    %72 = math.exp %71 : vector<2x256xf32>
    %cst_38 = arith.constant 1.000000e+00 : f32
    %73 = vector.broadcast %cst_38 : f32 to vector<2x256xf32>
    %74 = arith.addf %73, %72 : vector<2x256xf32>
    %75 = tpu.reciprocal %74 {approx = true} : vector<2x256xf32> -> vector<2x256xf32>
    %76 = arith.mulf %69, %75 : vector<2x256xf32>
    %c0_39 = arith.constant 0 : index
    %c0_40 = arith.constant 0 : index
    %77 = vector.load %arg4[%c0_39, %c0_40] : memref<544x512xbf16, #tpu.memory_space<vmem>>, vector<256x512xbf16>
    %78 = arith.truncf %76 : vector<2x256xf32> to vector<2x256xbf16>
    %cst_41 = arith.constant dense<0.000000e+00> : vector<2x512xf32>
    %79 = tpu.matmul %78, %77, %cst_41 {dimension_numbers = #tpu.dot_dimension_numbers<[1], [0], [0], [1], [0, 0, 1, 1], [], []>} : vector<2x256xbf16>, vector<256x512xbf16>, vector<2x512xf32> -> vector<2x512xf32>
    %c1280 = arith.constant 1280 : index
    %c0_42 = arith.constant 0 : index
    %80 = vector.load %arg6[%c1280, %c0_42] : memref<2800x64xf32, #tpu.memory_space<vmem>>, vector<512x32xf32>
    %c256 = arith.constant 256 : index
    %c0_43 = arith.constant 0 : index
    %81 = vector.load %arg4[%c256, %c0_43] : memref<544x512xbf16, #tpu.memory_space<vmem>>, vector<32x512xbf16>
    %82 = arith.extf %81 : vector<32x512xbf16> to vector<32x512xf32>
    %cst_44 = arith.constant dense<0.000000e+00> : vector<512xf32>
    %83 = vector.multi_reduction <add>, %79, %cst_44 [0] : vector<2x512xf32> to vector<512xf32>
    %84 = vector.shape_cast %83 : vector<512xf32> to vector<1x512xf32>
    %cst_45 = arith.constant dense<0.000000e+00> : vector<1x32xf32>
    %85 = tpu.matmul %84, %80, %cst_45 {dimension_numbers = #tpu.dot_dimension_numbers<[1], [0], [0], [1], [0, 0, 1, 1], [], []>} : vector<1x512xf32>, vector<512x32xf32>, vector<1x32xf32> -> vector<1x32xf32>
    %cst_46 = arith.constant 3.125000e-02 : f32
    %86 = vector.broadcast %cst_46 : f32 to vector<1x32xf32>
    %87 = arith.mulf %85, %86 : vector<1x32xf32>
    %cst_47 = arith.constant dense<0.000000e+00> : vector<1x512xf32>
    %88 = tpu.matmul %87, %82, %cst_47 {dimension_numbers = #tpu.dot_dimension_numbers<[1], [0], [0], [1], [0, 0, 1, 1], [], []>} : vector<1x32xf32>, vector<32x512xf32>, vector<1x512xf32> -> vector<1x512xf32>
    %89 = vector.broadcast %88 : vector<1x512xf32> to vector<2x512xf32>
    %90 = arith.subf %79, %89 : vector<2x512xf32>
    %91 = arith.mulf %90, %90 : vector<2x512xf32>
    %cst_48 = arith.constant dense<0.000000e+00> : vector<512xf32>
    %92 = vector.multi_reduction <add>, %91, %cst_48 [0] : vector<2x512xf32> to vector<512xf32>
    %93 = vector.shape_cast %92 : vector<512xf32> to vector<1x512xf32>
    %cst_49 = arith.constant dense<0.000000e+00> : vector<1x32xf32>
    %94 = tpu.matmul %93, %80, %cst_49 {dimension_numbers = #tpu.dot_dimension_numbers<[1], [0], [0], [1], [0, 0, 1, 1], [], []>} : vector<1x512xf32>, vector<512x32xf32>, vector<1x32xf32> -> vector<1x32xf32>
    %cst_50 = arith.constant 3.125000e-02 : f32
    %95 = vector.broadcast %cst_50 : f32 to vector<1x32xf32>
    %96 = arith.mulf %94, %95 : vector<1x32xf32>
    %c4 = arith.constant 4 : index
    %c0_51 = arith.constant 0 : index
    %97 = vector.load %arg7[%c4, %c0_51] : memref<27x1024xf32, #tpu.memory_space<vmem>>, vector<1x32xf32>
    %cst_52 = arith.constant 9.99999974E-6 : f32
    %98 = vector.broadcast %cst_52 : f32 to vector<1x32xf32>
    %99 = arith.addf %96, %98 : vector<1x32xf32>
    %100 = math.rsqrt %99 : vector<1x32xf32>
    %101 = arith.mulf %97, %100 : vector<1x32xf32>
    %cst_53 = arith.constant dense<0.000000e+00> : vector<1x512xf32>
    %102 = tpu.matmul %101, %82, %cst_53 {dimension_numbers = #tpu.dot_dimension_numbers<[1], [0], [0], [1], [0, 0, 1, 1], [], []>} : vector<1x32xf32>, vector<32x512xf32>, vector<1x512xf32> -> vector<1x512xf32>
    %c5 = arith.constant 5 : index
    %c0_54 = arith.constant 0 : index
    %103 = vector.load %arg7[%c5, %c0_54] : memref<27x1024xf32, #tpu.memory_space<vmem>>, vector<1x512xf32>
    %104 = vector.broadcast %102 : vector<1x512xf32> to vector<2x512xf32>
    %105 = arith.mulf %90, %104 : vector<2x512xf32>
    %106 = vector.broadcast %103 : vector<1x512xf32> to vector<2x512xf32>
    %107 = arith.addf %105, %106 : vector<2x512xf32>
    %cst_55 = arith.constant 0.000000e+00 : f32
    %108 = vector.broadcast %cst_55 : f32 to vector<2x512xf32>
    %109 = arith.subf %108, %107 : vector<2x512xf32>
    %110 = math.exp %109 : vector<2x512xf32>
    %cst_56 = arith.constant 1.000000e+00 : f32
    %111 = vector.broadcast %cst_56 : f32 to vector<2x512xf32>
    %112 = arith.addf %111, %110 : vector<2x512xf32>
    %113 = tpu.reciprocal %112 {approx = true} : vector<2x512xf32> -> vector<2x512xf32>
    %114 = arith.mulf %107, %113 : vector<2x512xf32>
    %c0_57 = arith.constant 0 : index
    %c0_58 = arith.constant 0 : index
    %115 = vector.load %arg2[%c0_57, %c0_58] : memref<1296x128xbf16, #tpu.memory_space<vmem>>, vector<512x128xbf16>
    %116 = arith.truncf %114 : vector<2x512xf32> to vector<2x512xbf16>
    %cst_59 = arith.constant dense<0.000000e+00> : vector<2x128xf32>
    %117 = tpu.matmul %116, %115, %cst_59 {dimension_numbers = #tpu.dot_dimension_numbers<[1], [0], [0], [1], [0, 0, 1, 1], [], []>} : vector<2x512xbf16>, vector<512x128xbf16>, vector<2x128xf32> -> vector<2x128xf32>
    %c1792 = arith.constant 1792 : index
    %c0_60 = arith.constant 0 : index
    %118 = vector.load %arg6[%c1792, %c0_60] : memref<2800x64xf32, #tpu.memory_space<vmem>>, vector<128x32xf32>
    %c512 = arith.constant 512 : index
    %c0_61 = arith.constant 0 : index
    %119 = vector.load %arg2[%c512, %c0_61] : memref<1296x128xbf16, #tpu.memory_space<vmem>>, vector<32x128xbf16>
    %120 = arith.extf %119 : vector<32x128xbf16> to vector<32x128xf32>
    %cst_62 = arith.constant dense<0.000000e+00> : vector<128xf32>
    %121 = vector.multi_reduction <add>, %117, %cst_62 [0] : vector<2x128xf32> to vector<128xf32>
    %122 = vector.shape_cast %121 : vector<128xf32> to vector<1x128xf32>
    %cst_63 = arith.constant dense<0.000000e+00> : vector<1x32xf32>
    %123 = tpu.matmul %122, %118, %cst_63 {dimension_numbers = #tpu.dot_dimension_numbers<[1], [0], [0], [1], [0, 0, 1, 1], [], []>} : vector<1x128xf32>, vector<128x32xf32>, vector<1x32xf32> -> vector<1x32xf32>
    %cst_64 = arith.constant 1.250000e-01 : f32
    %124 = vector.broadcast %cst_64 : f32 to vector<1x32xf32>
    %125 = arith.mulf %123, %124 : vector<1x32xf32>
    %cst_65 = arith.constant dense<0.000000e+00> : vector<1x128xf32>
    %126 = tpu.matmul %125, %120, %cst_65 {dimension_numbers = #tpu.dot_dimension_numbers<[1], [0], [0], [1], [0, 0, 1, 1], [], []>} : vector<1x32xf32>, vector<32x128xf32>, vector<1x128xf32> -> vector<1x128xf32>
    %127 = vector.broadcast %126 : vector<1x128xf32> to vector<2x128xf32>
    %128 = arith.subf %117, %127 : vector<2x128xf32>
    %129 = arith.mulf %128, %128 : vector<2x128xf32>
    %cst_66 = arith.constant dense<0.000000e+00> : vector<128xf32>
    %130 = vector.multi_reduction <add>, %129, %cst_66 [0] : vector<2x128xf32> to vector<128xf32>
    %131 = vector.shape_cast %130 : vector<128xf32> to vector<1x128xf32>
    %cst_67 = arith.constant dense<0.000000e+00> : vector<1x32xf32>
    %132 = tpu.matmul %131, %118, %cst_67 {dimension_numbers = #tpu.dot_dimension_numbers<[1], [0], [0], [1], [0, 0, 1, 1], [], []>} : vector<1x128xf32>, vector<128x32xf32>, vector<1x32xf32> -> vector<1x32xf32>
    %cst_68 = arith.constant 1.250000e-01 : f32
    %133 = vector.broadcast %cst_68 : f32 to vector<1x32xf32>
    %134 = arith.mulf %132, %133 : vector<1x32xf32>
    %c6 = arith.constant 6 : index
    %c0_69 = arith.constant 0 : index
    %135 = vector.load %arg7[%c6, %c0_69] : memref<27x1024xf32, #tpu.memory_space<vmem>>, vector<1x32xf32>
    %cst_70 = arith.constant 9.99999974E-6 : f32
    %136 = vector.broadcast %cst_70 : f32 to vector<1x32xf32>
    %137 = arith.addf %134, %136 : vector<1x32xf32>
    %138 = math.rsqrt %137 : vector<1x32xf32>
    %139 = arith.mulf %135, %138 : vector<1x32xf32>
    %cst_71 = arith.constant dense<0.000000e+00> : vector<1x128xf32>
    %140 = tpu.matmul %139, %120, %cst_71 {dimension_numbers = #tpu.dot_dimension_numbers<[1], [0], [0], [1], [0, 0, 1, 1], [], []>} : vector<1x32xf32>, vector<32x128xf32>, vector<1x128xf32> -> vector<1x128xf32>
    %c7 = arith.constant 7 : index
    %c0_72 = arith.constant 0 : index
    %141 = vector.load %arg7[%c7, %c0_72] : memref<27x1024xf32, #tpu.memory_space<vmem>>, vector<1x128xf32>
    %142 = vector.broadcast %140 : vector<1x128xf32> to vector<2x128xf32>
    %143 = arith.mulf %128, %142 : vector<2x128xf32>
    %144 = vector.broadcast %141 : vector<1x128xf32> to vector<2x128xf32>
    %145 = arith.addf %143, %144 : vector<2x128xf32>
    %cst_73 = arith.constant 0.000000e+00 : f32
    %146 = vector.broadcast %cst_73 : f32 to vector<2x128xf32>
    %147 = arith.subf %146, %145 : vector<2x128xf32>
    %148 = math.exp %147 : vector<2x128xf32>
    %cst_74 = arith.constant 1.000000e+00 : f32
    %149 = vector.broadcast %cst_74 : f32 to vector<2x128xf32>
    %150 = arith.addf %149, %148 : vector<2x128xf32>
    %151 = tpu.reciprocal %150 {approx = true} : vector<2x128xf32> -> vector<2x128xf32>
    %152 = arith.mulf %145, %151 : vector<2x128xf32>
    %c1040 = arith.constant 1040 : index
    %c0_75 = arith.constant 0 : index
    %153 = vector.load %arg3[%c1040, %c0_75] : memref<1312x256xbf16, #tpu.memory_space<vmem>>, vector<128x256xbf16>
    %154 = arith.truncf %152 : vector<2x128xf32> to vector<2x128xbf16>
    %cst_76 = arith.constant dense<0.000000e+00> : vector<2x256xf32>
    %155 = tpu.matmul %154, %153, %cst_76 {dimension_numbers = #tpu.dot_dimension_numbers<[1], [0], [0], [1], [0, 0, 1, 1], [], []>} : vector<2x128xbf16>, vector<128x256xbf16>, vector<2x256xf32> -> vector<2x256xf32>
    %c1920 = arith.constant 1920 : index
    %c0_77 = arith.constant 0 : index
    %156 = vector.load %arg6[%c1920, %c0_77] : memref<2800x64xf32, #tpu.memory_space<vmem>>, vector<256x64xf32>
    %c1168 = arith.constant 1168 : index
    %c0_78 = arith.constant 0 : index
    %157 = vector.load %arg3[%c1168, %c0_78] : memref<1312x256xbf16, #tpu.memory_space<vmem>>, vector<64x256xbf16>
    %158 = arith.extf %157 : vector<64x256xbf16> to vector<64x256xf32>
    %cst_79 = arith.constant dense<0.000000e+00> : vector<256xf32>
    %159 = vector.multi_reduction <add>, %155, %cst_79 [0] : vector<2x256xf32> to vector<256xf32>
    %160 = vector.shape_cast %159 : vector<256xf32> to vector<1x256xf32>
    %cst_80 = arith.constant dense<0.000000e+00> : vector<1x64xf32>
    %161 = tpu.matmul %160, %156, %cst_80 {dimension_numbers = #tpu.dot_dimension_numbers<[1], [0], [0], [1], [0, 0, 1, 1], [], []>} : vector<1x256xf32>, vector<256x64xf32>, vector<1x64xf32> -> vector<1x64xf32>
    %cst_81 = arith.constant 1.250000e-01 : f32
    %162 = vector.broadcast %cst_81 : f32 to vector<1x64xf32>
    %163 = arith.mulf %161, %162 : vector<1x64xf32>
    %cst_82 = arith.constant dense<0.000000e+00> : vector<1x256xf32>
    %164 = tpu.matmul %163, %158, %cst_82 {dimension_numbers = #tpu.dot_dimension_numbers<[1], [0], [0], [1], [0, 0, 1, 1], [], []>} : vector<1x64xf32>, vector<64x256xf32>, vector<1x256xf32> -> vector<1x256xf32>
    %165 = vector.broadcast %164 : vector<1x256xf32> to vector<2x256xf32>
    %166 = arith.subf %155, %165 : vector<2x256xf32>
    %167 = arith.mulf %166, %166 : vector<2x256xf32>
    %cst_83 = arith.constant dense<0.000000e+00> : vector<256xf32>
    %168 = vector.multi_reduction <add>, %167, %cst_83 [0] : vector<2x256xf32> to vector<256xf32>
    %169 = vector.shape_cast %168 : vector<256xf32> to vector<1x256xf32>
    %cst_84 = arith.constant dense<0.000000e+00> : vector<1x64xf32>
    %170 = tpu.matmul %169, %156, %cst_84 {dimension_numbers = #tpu.dot_dimension_numbers<[1], [0], [0], [1], [0, 0, 1, 1], [], []>} : vector<1x256xf32>, vector<256x64xf32>, vector<1x64xf32> -> vector<1x64xf32>
    %cst_85 = arith.constant 1.250000e-01 : f32
    %171 = vector.broadcast %cst_85 : f32 to vector<1x64xf32>
    %172 = arith.mulf %170, %171 : vector<1x64xf32>
    %c8 = arith.constant 8 : index
    %c0_86 = arith.constant 0 : index
    %173 = vector.load %arg7[%c8, %c0_86] : memref<27x1024xf32, #tpu.memory_space<vmem>>, vector<1x64xf32>
    %cst_87 = arith.constant 9.99999974E-6 : f32
    %174 = vector.broadcast %cst_87 : f32 to vector<1x64xf32>
    %175 = arith.addf %172, %174 : vector<1x64xf32>
    %176 = math.rsqrt %175 : vector<1x64xf32>
    %177 = arith.mulf %173, %176 : vector<1x64xf32>
    %cst_88 = arith.constant dense<0.000000e+00> : vector<1x256xf32>
    %178 = tpu.matmul %177, %158, %cst_88 {dimension_numbers = #tpu.dot_dimension_numbers<[1], [0], [0], [1], [0, 0, 1, 1], [], []>} : vector<1x64xf32>, vector<64x256xf32>, vector<1x256xf32> -> vector<1x256xf32>
    %c9 = arith.constant 9 : index
    %c0_89 = arith.constant 0 : index
    %179 = vector.load %arg7[%c9, %c0_89] : memref<27x1024xf32, #tpu.memory_space<vmem>>, vector<1x256xf32>
    %180 = vector.broadcast %178 : vector<1x256xf32> to vector<2x256xf32>
    %181 = arith.mulf %166, %180 : vector<2x256xf32>
    %182 = vector.broadcast %179 : vector<1x256xf32> to vector<2x256xf32>
    %183 = arith.addf %181, %182 : vector<2x256xf32>
    %cst_90 = arith.constant 0.000000e+00 : f32
    %184 = vector.broadcast %cst_90 : f32 to vector<2x256xf32>
    %185 = arith.subf %184, %183 : vector<2x256xf32>
    %186 = math.exp %185 : vector<2x256xf32>
    %cst_91 = arith.constant 1.000000e+00 : f32
    %187 = vector.broadcast %cst_91 : f32 to vector<2x256xf32>
    %188 = arith.addf %187, %186 : vector<2x256xf32>
    %189 = tpu.reciprocal %188 {approx = true} : vector<2x256xf32> -> vector<2x256xf32>
    %190 = arith.mulf %183, %189 : vector<2x256xf32>
    %c544 = arith.constant 544 : index
    %c0_92 = arith.constant 0 : index
    %191 = vector.load %arg2[%c544, %c0_92] : memref<1296x128xbf16, #tpu.memory_space<vmem>>, vector<256x64xbf16>
    %192 = arith.truncf %190 : vector<2x256xf32> to vector<2x256xbf16>
    %cst_93 = arith.constant dense<0.000000e+00> : vector<2x64xf32>
    %193 = tpu.matmul %192, %191, %cst_93 {dimension_numbers = #tpu.dot_dimension_numbers<[1], [0], [0], [1], [0, 0, 1, 1], [], []>} : vector<2x256xbf16>, vector<256x64xbf16>, vector<2x64xf32> -> vector<2x64xf32>
    %c2176 = arith.constant 2176 : index
    %c0_94 = arith.constant 0 : index
    %194 = vector.load %arg6[%c2176, %c0_94] : memref<2800x64xf32, #tpu.memory_space<vmem>>, vector<64x64xf32>
    %c800 = arith.constant 800 : index
    %c0_95 = arith.constant 0 : index
    %195 = vector.load %arg2[%c800, %c0_95] : memref<1296x128xbf16, #tpu.memory_space<vmem>>, vector<64x64xbf16>
    %196 = arith.extf %195 : vector<64x64xbf16> to vector<64x64xf32>
    %cst_96 = arith.constant dense<0.000000e+00> : vector<64xf32>
    %197 = vector.multi_reduction <add>, %193, %cst_96 [0] : vector<2x64xf32> to vector<64xf32>
    %198 = vector.shape_cast %197 : vector<64xf32> to vector<1x64xf32>
    %cst_97 = arith.constant dense<0.000000e+00> : vector<1x64xf32>
    %199 = tpu.matmul %198, %194, %cst_97 {dimension_numbers = #tpu.dot_dimension_numbers<[1], [0], [0], [1], [0, 0, 1, 1], [], []>} : vector<1x64xf32>, vector<64x64xf32>, vector<1x64xf32> -> vector<1x64xf32>
    %cst_98 = arith.constant 5.000000e-01 : f32
    %200 = vector.broadcast %cst_98 : f32 to vector<1x64xf32>
    %201 = arith.mulf %199, %200 : vector<1x64xf32>
    %cst_99 = arith.constant dense<0.000000e+00> : vector<1x64xf32>
    %202 = tpu.matmul %201, %196, %cst_99 {dimension_numbers = #tpu.dot_dimension_numbers<[1], [0], [0], [1], [0, 0, 1, 1], [], []>} : vector<1x64xf32>, vector<64x64xf32>, vector<1x64xf32> -> vector<1x64xf32>
    %203 = vector.broadcast %202 : vector<1x64xf32> to vector<2x64xf32>
    %204 = arith.subf %193, %203 : vector<2x64xf32>
    %205 = arith.mulf %204, %204 : vector<2x64xf32>
    %cst_100 = arith.constant dense<0.000000e+00> : vector<64xf32>
    %206 = vector.multi_reduction <add>, %205, %cst_100 [0] : vector<2x64xf32> to vector<64xf32>
    %207 = vector.shape_cast %206 : vector<64xf32> to vector<1x64xf32>
    %cst_101 = arith.constant dense<0.000000e+00> : vector<1x64xf32>
    %208 = tpu.matmul %207, %194, %cst_101 {dimension_numbers = #tpu.dot_dimension_numbers<[1], [0], [0], [1], [0, 0, 1, 1], [], []>} : vector<1x64xf32>, vector<64x64xf32>, vector<1x64xf32> -> vector<1x64xf32>
    %cst_102 = arith.constant 5.000000e-01 : f32
    %209 = vector.broadcast %cst_102 : f32 to vector<1x64xf32>
    %210 = arith.mulf %208, %209 : vector<1x64xf32>
    %c10 = arith.constant 10 : index
    %c0_103 = arith.constant 0 : index
    %211 = vector.load %arg7[%c10, %c0_103] : memref<27x1024xf32, #tpu.memory_space<vmem>>, vector<1x64xf32>
    %cst_104 = arith.constant 9.99999974E-6 : f32
    %212 = vector.broadcast %cst_104 : f32 to vector<1x64xf32>
    %213 = arith.addf %210, %212 : vector<1x64xf32>
    %214 = math.rsqrt %213 : vector<1x64xf32>
    %215 = arith.mulf %211, %214 : vector<1x64xf32>
    %cst_105 = arith.constant dense<0.000000e+00> : vector<1x64xf32>
    %216 = tpu.matmul %215, %196, %cst_105 {dimension_numbers = #tpu.dot_dimension_numbers<[1], [0], [0], [1], [0, 0, 1, 1], [], []>} : vector<1x64xf32>, vector<64x64xf32>, vector<1x64xf32> -> vector<1x64xf32>
    %c11 = arith.constant 11 : index
    %c0_106 = arith.constant 0 : index
    %217 = vector.load %arg7[%c11, %c0_106] : memref<27x1024xf32, #tpu.memory_space<vmem>>, vector<1x64xf32>
    %218 = vector.broadcast %216 : vector<1x64xf32> to vector<2x64xf32>
    %219 = arith.mulf %204, %218 : vector<2x64xf32>
    %220 = vector.broadcast %217 : vector<1x64xf32> to vector<2x64xf32>
    %221 = arith.addf %219, %220 : vector<2x64xf32>
    %cst_107 = arith.constant 0.000000e+00 : f32
    %222 = vector.broadcast %cst_107 : f32 to vector<2x64xf32>
    %223 = arith.subf %222, %221 : vector<2x64xf32>
    %224 = math.exp %223 : vector<2x64xf32>
    %cst_108 = arith.constant 1.000000e+00 : f32
    %225 = vector.broadcast %cst_108 : f32 to vector<2x64xf32>
    %226 = arith.addf %225, %224 : vector<2x64xf32>
    %227 = tpu.reciprocal %226 {approx = true} : vector<2x64xf32> -> vector<2x64xf32>
    %228 = arith.mulf %221, %227 : vector<2x64xf32>
    %c864 = arith.constant 864 : index
    %c0_109 = arith.constant 0 : index
    %229 = vector.load %arg2[%c864, %c0_109] : memref<1296x128xbf16, #tpu.memory_space<vmem>>, vector<64x32xbf16>
    %c12 = arith.constant 12 : index
    %c0_110 = arith.constant 0 : index
    %230 = vector.load %arg7[%c12, %c0_110] : memref<27x1024xf32, #tpu.memory_space<vmem>>, vector<1x32xf32>
    %231 = arith.truncf %228 : vector<2x64xf32> to vector<2x64xbf16>
    %cst_111 = arith.constant dense<0.000000e+00> : vector<2x32xf32>
    %232 = tpu.matmul %231, %229, %cst_111 {dimension_numbers = #tpu.dot_dimension_numbers<[1], [0], [0], [1], [0, 0, 1, 1], [], []>} : vector<2x64xbf16>, vector<64x32xbf16>, vector<2x32xf32> -> vector<2x32xf32>
    %233 = vector.broadcast %230 : vector<1x32xf32> to vector<2x32xf32>
    %234 = arith.addf %232, %233 : vector<2x32xf32>
    %c0_112 = arith.constant 0 : index
    %c0_113 = arith.constant 0 : index
    %235 = vector.load %arg9[%c0_112, %c0_113] : memref<2x32xf32, #tpu.memory_space<vmem>>, vector<2x32xf32>
    tpu.vector_store %arg9[%c0_112, %c0_113], %234 {strides = array<i32>} : memref<2x32xf32, #tpu.memory_space<vmem>>, vector<2x32xf32>,
    %236 = vector.extract_strided_slice %234 {offsets = [0, 0], sizes = [2, 16], strides = [1, 1]} : vector<2x32xf32> to vector<2x16xf32>
    %237 = vector.extract_strided_slice %234 {offsets = [0, 16], sizes = [2, 16], strides = [1, 1]} : vector<2x32xf32> to vector<2x16xf32>
    %cst_114 = arith.constant 5.000000e-01 : f32
    %238 = vector.broadcast %cst_114 : f32 to vector<2x16xf32>
    %239 = arith.mulf %238, %237 : vector<2x16xf32>
    %240 = math.exp %239 : vector<2x16xf32>
    %c0_115 = arith.constant 0 : index
    %c0_116 = arith.constant 0 : index
    %241 = vector.load %arg1[%c0_115, %c0_116] : memref<2x16xf32, #tpu.memory_space<vmem>>, vector<2x16xf32>
    %242 = arith.mulf %240, %241 : vector<2x16xf32>
    %243 = arith.addf %236, %242 : vector<2x16xf32>
    %c928 = arith.constant 928 : index
    %c0_117 = arith.constant 0 : index
    %244 = vector.load %arg2[%c928, %c0_117] : memref<1296x128xbf16, #tpu.memory_space<vmem>>, vector<16x32xbf16>
    %c13 = arith.constant 13 : index
    %c0_118 = arith.constant 0 : index
    %245 = vector.load %arg7[%c13, %c0_118] : memref<27x1024xf32, #tpu.memory_space<vmem>>, vector<1x32xf32>
    %246 = arith.truncf %243 : vector<2x16xf32> to vector<2x16xbf16>
    %cst_119 = arith.constant dense<0.000000e+00> : vector<2x32xf32>
    %247 = tpu.matmul %246, %244, %cst_119 {dimension_numbers = #tpu.dot_dimension_numbers<[1], [0], [0], [1], [0, 0, 1, 1], [], []>} : vector<2x16xbf16>, vector<16x32xbf16>, vector<2x32xf32> -> vector<2x32xf32>
    %248 = vector.broadcast %245 : vector<1x32xf32> to vector<2x32xf32>
    %249 = arith.addf %247, %248 : vector<2x32xf32>
    %c944 = arith.constant 944 : index
    %c0_120 = arith.constant 0 : index
    %250 = vector.load %arg2[%c944, %c0_120] : memref<1296x128xbf16, #tpu.memory_space<vmem>>, vector<32x16xbf16>
    %251 = arith.truncf %249 : vector<2x32xf32> to vector<2x32xbf16>
    %cst_121 = arith.constant dense<0.000000e+00> : vector<2x16xf32>
    %252 = tpu.matmul %251, %250, %cst_121 {dimension_numbers = #tpu.dot_dimension_numbers<[1], [0], [0], [1], [0, 0, 1, 1], [], []>} : vector<2x32xbf16>, vector<32x16xbf16>, vector<2x16xf32> -> vector<2x16xf32>
    %c2240 = arith.constant 2240 : index
    %c0_122 = arith.constant 0 : index
    %253 = vector.load %arg6[%c2240, %c0_122] : memref<2800x64xf32, #tpu.memory_space<vmem>>, vector<16x16xf32>
    %c976 = arith.constant 976 : index
    %c0_123 = arith.constant 0 : index
    %254 = vector.load %arg2[%c976, %c0_123] : memref<1296x128xbf16, #tpu.memory_space<vmem>>, vector<16x16xbf16>
    %255 = arith.extf %254 : vector<16x16xbf16> to vector<16x16xf32>
    %cst_124 = arith.constant dense<0.000000e+00> : vector<16xf32>
    %256 = vector.multi_reduction <add>, %252, %cst_124 [0] : vector<2x16xf32> to vector<16xf32>
    %257 = vector.shape_cast %256 : vector<16xf32> to vector<1x16xf32>
    %cst_125 = arith.constant dense<0.000000e+00> : vector<1x16xf32>
    %258 = tpu.matmul %257, %253, %cst_125 {dimension_numbers = #tpu.dot_dimension_numbers<[1], [0], [0], [1], [0, 0, 1, 1], [], []>} : vector<1x16xf32>, vector<16x16xf32>, vector<1x16xf32> -> vector<1x16xf32>
    %cst_126 = arith.constant 5.000000e-01 : f32
    %259 = vector.broadcast %cst_126 : f32 to vector<1x16xf32>
    %260 = arith.mulf %258, %259 : vector<1x16xf32>
    %cst_127 = arith.constant dense<0.000000e+00> : vector<1x16xf32>
    %261 = tpu.matmul %260, %255, %cst_127 {dimension_numbers = #tpu.dot_dimension_numbers<[1], [0], [0], [1], [0, 0, 1, 1], [], []>} : vector<1x16xf32>, vector<16x16xf32>, vector<1x16xf32> -> vector<1x16xf32>
    %262 = vector.broadcast %261 : vector<1x16xf32> to vector<2x16xf32>
    %263 = arith.subf %252, %262 : vector<2x16xf32>
    %264 = arith.mulf %263, %263 : vector<2x16xf32>
    %cst_128 = arith.constant dense<0.000000e+00> : vector<16xf32>
    %265 = vector.multi_reduction <add>, %264, %cst_128 [0] : vector<2x16xf32> to vector<16xf32>
    %266 = vector.shape_cast %265 : vector<16xf32> to vector<1x16xf32>
    %cst_129 = arith.constant dense<0.000000e+00> : vector<1x16xf32>
    %267 = tpu.matmul %266, %253, %cst_129 {dimension_numbers = #tpu.dot_dimension_numbers<[1], [0], [0], [1], [0, 0, 1, 1], [], []>} : vector<1x16xf32>, vector<16x16xf32>, vector<1x16xf32> -> vector<1x16xf32>
    %cst_130 = arith.constant 5.000000e-01 : f32
    %268 = vector.broadcast %cst_130 : f32 to vector<1x16xf32>
    %269 = arith.mulf %267, %268 : vector<1x16xf32>
    %c14 = arith.constant 14 : index
    %c0_131 = arith.constant 0 : index
    %270 = vector.load %arg7[%c14, %c0_131] : memref<27x1024xf32, #tpu.memory_space<vmem>>, vector<1x16xf32>
    %cst_132 = arith.constant 9.99999974E-6 : f32
    %271 = vector.broadcast %cst_132 : f32 to vector<1x16xf32>
    %272 = arith.addf %269, %271 : vector<1x16xf32>
    %273 = math.rsqrt %272 : vector<1x16xf32>
    %274 = arith.mulf %270, %273 : vector<1x16xf32>
    %cst_133 = arith.constant dense<0.000000e+00> : vector<1x16xf32>
    %275 = tpu.matmul %274, %255, %cst_133 {dimension_numbers = #tpu.dot_dimension_numbers<[1], [0], [0], [1], [0, 0, 1, 1], [], []>} : vector<1x16xf32>, vector<16x16xf32>, vector<1x16xf32> -> vector<1x16xf32>
    %c15 = arith.constant 15 : index
    %c0_134 = arith.constant 0 : index
    %276 = vector.load %arg7[%c15, %c0_134] : memref<27x1024xf32, #tpu.memory_space<vmem>>, vector<1x16xf32>
    %277 = vector.broadcast %275 : vector<1x16xf32> to vector<2x16xf32>
    %278 = arith.mulf %263, %277 : vector<2x16xf32>
    %279 = vector.broadcast %276 : vector<1x16xf32> to vector<2x16xf32>
    %280 = arith.addf %278, %279 : vector<2x16xf32>
    %cst_135 = arith.constant 0.000000e+00 : f32
    %281 = vector.broadcast %cst_135 : f32 to vector<2x16xf32>
    %282 = arith.subf %281, %280 : vector<2x16xf32>
    %283 = math.exp %282 : vector<2x16xf32>
    %cst_136 = arith.constant 1.000000e+00 : f32
    %284 = vector.broadcast %cst_136 : f32 to vector<2x16xf32>
    %285 = arith.addf %284, %283 : vector<2x16xf32>
    %286 = tpu.reciprocal %285 {approx = true} : vector<2x16xf32> -> vector<2x16xf32>
    %287 = arith.mulf %280, %286 : vector<2x16xf32>
    %c992 = arith.constant 992 : index
    %c0_137 = arith.constant 0 : index
    %288 = vector.load %arg2[%c992, %c0_137] : memref<1296x128xbf16, #tpu.memory_space<vmem>>, vector<16x64xbf16>
    %289 = arith.truncf %287 : vector<2x16xf32> to vector<2x16xbf16>
    %cst_138 = arith.constant dense<0.000000e+00> : vector<2x64xf32>
    %290 = tpu.matmul %289, %288, %cst_138 {dimension_numbers = #tpu.dot_dimension_numbers<[1], [0], [0], [1], [0, 0, 1, 1], [], []>} : vector<2x16xbf16>, vector<16x64xbf16>, vector<2x64xf32> -> vector<2x64xf32>
    %c2256 = arith.constant 2256 : index
    %c0_139 = arith.constant 0 : index
    %291 = vector.load %arg6[%c2256, %c0_139] : memref<2800x64xf32, #tpu.memory_space<vmem>>, vector<64x16xf32>
    %c1008 = arith.constant 1008 : index
    %c0_140 = arith.constant 0 : index
    %292 = vector.load %arg2[%c1008, %c0_140] : memref<1296x128xbf16, #tpu.memory_space<vmem>>, vector<16x64xbf16>
    %293 = arith.extf %292 : vector<16x64xbf16> to vector<16x64xf32>
    %cst_141 = arith.constant dense<0.000000e+00> : vector<64xf32>
    %294 = vector.multi_reduction <add>, %290, %cst_141 [0] : vector<2x64xf32> to vector<64xf32>
    %295 = vector.shape_cast %294 : vector<64xf32> to vector<1x64xf32>
    %cst_142 = arith.constant dense<0.000000e+00> : vector<1x16xf32>
    %296 = tpu.matmul %295, %291, %cst_142 {dimension_numbers = #tpu.dot_dimension_numbers<[1], [0], [0], [1], [0, 0, 1, 1], [], []>} : vector<1x64xf32>, vector<64x16xf32>, vector<1x16xf32> -> vector<1x16xf32>
    %cst_143 = arith.constant 1.250000e-01 : f32
    %297 = vector.broadcast %cst_143 : f32 to vector<1x16xf32>
    %298 = arith.mulf %296, %297 : vector<1x16xf32>
    %cst_144 = arith.constant dense<0.000000e+00> : vector<1x64xf32>
    %299 = tpu.matmul %298, %293, %cst_144 {dimension_numbers = #tpu.dot_dimension_numbers<[1], [0], [0], [1], [0, 0, 1, 1], [], []>} : vector<1x16xf32>, vector<16x64xf32>, vector<1x64xf32> -> vector<1x64xf32>
    %300 = vector.broadcast %299 : vector<1x64xf32> to vector<2x64xf32>
    %301 = arith.subf %290, %300 : vector<2x64xf32>
    %302 = arith.mulf %301, %301 : vector<2x64xf32>
    %cst_145 = arith.constant dense<0.000000e+00> : vector<64xf32>
    %303 = vector.multi_reduction <add>, %302, %cst_145 [0] : vector<2x64xf32> to vector<64xf32>
    %304 = vector.shape_cast %303 : vector<64xf32> to vector<1x64xf32>
    %cst_146 = arith.constant dense<0.000000e+00> : vector<1x16xf32>
    %305 = tpu.matmul %304, %291, %cst_146 {dimension_numbers = #tpu.dot_dimension_numbers<[1], [0], [0], [1], [0, 0, 1, 1], [], []>} : vector<1x64xf32>, vector<64x16xf32>, vector<1x16xf32> -> vector<1x16xf32>
    %cst_147 = arith.constant 1.250000e-01 : f32
    %306 = vector.broadcast %cst_147 : f32 to vector<1x16xf32>
    %307 = arith.mulf %305, %306 : vector<1x16xf32>
    %c16 = arith.constant 16 : index
    %c0_148 = arith.constant 0 : index
    %308 = vector.load %arg7[%c16, %c0_148] : memref<27x1024xf32, #tpu.memory_space<vmem>>, vector<1x16xf32>
    %cst_149 = arith.constant 9.99999974E-6 : f32
    %309 = vector.broadcast %cst_149 : f32 to vector<1x16xf32>
    %310 = arith.addf %307, %309 : vector<1x16xf32>
    %311 = math.rsqrt %310 : vector<1x16xf32>
    %312 = arith.mulf %308, %311 : vector<1x16xf32>
    %cst_150 = arith.constant dense<0.000000e+00> : vector<1x64xf32>
    %313 = tpu.matmul %312, %293, %cst_150 {dimension_numbers = #tpu.dot_dimension_numbers<[1], [0], [0], [1], [0, 0, 1, 1], [], []>} : vector<1x16xf32>, vector<16x64xf32>, vector<1x64xf32> -> vector<1x64xf32>
    %c17 = arith.constant 17 : index
    %c0_151 = arith.constant 0 : index
    %314 = vector.load %arg7[%c17, %c0_151] : memref<27x1024xf32, #tpu.memory_space<vmem>>, vector<1x64xf32>
    %315 = vector.broadcast %313 : vector<1x64xf32> to vector<2x64xf32>
    %316 = arith.mulf %301, %315 : vector<2x64xf32>
    %317 = vector.broadcast %314 : vector<1x64xf32> to vector<2x64xf32>
    %318 = arith.addf %316, %317 : vector<2x64xf32>
    %cst_152 = arith.constant 0.000000e+00 : f32
    %319 = vector.broadcast %cst_152 : f32 to vector<2x64xf32>
    %320 = arith.subf %319, %318 : vector<2x64xf32>
    %321 = math.exp %320 : vector<2x64xf32>
    %cst_153 = arith.constant 1.000000e+00 : f32
    %322 = vector.broadcast %cst_153 : f32 to vector<2x64xf32>
    %323 = arith.addf %322, %321 : vector<2x64xf32>
    %324 = tpu.reciprocal %323 {approx = true} : vector<2x64xf32> -> vector<2x64xf32>
    %325 = arith.mulf %318, %324 : vector<2x64xf32>
    %c1024_154 = arith.constant 1024 : index
    %c0_155 = arith.constant 0 : index
    %326 = vector.load %arg2[%c1024_154, %c0_155] : memref<1296x128xbf16, #tpu.memory_space<vmem>>, vector<64x32xbf16>
    %327 = arith.truncf %325 : vector<2x64xf32> to vector<2x64xbf16>
    %cst_156 = arith.constant dense<0.000000e+00> : vector<2x32xf32>
    %328 = tpu.matmul %327, %326, %cst_156 {dimension_numbers = #tpu.dot_dimension_numbers<[1], [0], [0], [1], [0, 0, 1, 1], [], []>} : vector<2x64xbf16>, vector<64x32xbf16>, vector<2x32xf32> -> vector<2x32xf32>
    %c2320 = arith.constant 2320 : index
    %c0_157 = arith.constant 0 : index
    %329 = vector.load %arg6[%c2320, %c0_157] : memref<2800x64xf32, #tpu.memory_space<vmem>>, vector<32x8xf32>
    %c1088 = arith.constant 1088 : index
    %c0_158 = arith.constant 0 : index
    %330 = vector.load %arg2[%c1088, %c0_158] : memref<1296x128xbf16, #tpu.memory_space<vmem>>, vector<8x32xbf16>
    %331 = arith.extf %330 : vector<8x32xbf16> to vector<8x32xf32>
    %cst_159 = arith.constant dense<0.000000e+00> : vector<32xf32>
    %332 = vector.multi_reduction <add>, %328, %cst_159 [0] : vector<2x32xf32> to vector<32xf32>
    %333 = vector.shape_cast %332 : vector<32xf32> to vector<1x32xf32>
    %cst_160 = arith.constant dense<0.000000e+00> : vector<1x8xf32>
    %334 = tpu.matmul %333, %329, %cst_160 {dimension_numbers = #tpu.dot_dimension_numbers<[1], [0], [0], [1], [0, 0, 1, 1], [], []>} : vector<1x32xf32>, vector<32x8xf32>, vector<1x8xf32> -> vector<1x8xf32>
    %cst_161 = arith.constant 1.250000e-01 : f32
    %335 = vector.broadcast %cst_161 : f32 to vector<1x8xf32>
    %336 = arith.mulf %334, %335 : vector<1x8xf32>
    %cst_162 = arith.constant dense<0.000000e+00> : vector<1x32xf32>
    %337 = tpu.matmul %336, %331, %cst_162 {dimension_numbers = #tpu.dot_dimension_numbers<[1], [0], [0], [1], [0, 0, 1, 1], [], []>} : vector<1x8xf32>, vector<8x32xf32>, vector<1x32xf32> -> vector<1x32xf32>
    %338 = vector.broadcast %337 : vector<1x32xf32> to vector<2x32xf32>
    %339 = arith.subf %328, %338 : vector<2x32xf32>
    %340 = arith.mulf %339, %339 : vector<2x32xf32>
    %cst_163 = arith.constant dense<0.000000e+00> : vector<32xf32>
    %341 = vector.multi_reduction <add>, %340, %cst_163 [0] : vector<2x32xf32> to vector<32xf32>
    %342 = vector.shape_cast %341 : vector<32xf32> to vector<1x32xf32>
    %cst_164 = arith.constant dense<0.000000e+00> : vector<1x8xf32>
    %343 = tpu.matmul %342, %329, %cst_164 {dimension_numbers = #tpu.dot_dimension_numbers<[1], [0], [0], [1], [0, 0, 1, 1], [], []>} : vector<1x32xf32>, vector<32x8xf32>, vector<1x8xf32> -> vector<1x8xf32>
    %cst_165 = arith.constant 1.250000e-01 : f32
    %344 = vector.broadcast %cst_165 : f32 to vector<1x8xf32>
    %345 = arith.mulf %343, %344 : vector<1x8xf32>
    %c18 = arith.constant 18 : index
    %c0_166 = arith.constant 0 : index
    %346 = vector.load %arg7[%c18, %c0_166] : memref<27x1024xf32, #tpu.memory_space<vmem>>, vector<1x8xf32>
    %cst_167 = arith.constant 9.99999974E-6 : f32
    %347 = vector.broadcast %cst_167 : f32 to vector<1x8xf32>
    %348 = arith.addf %345, %347 : vector<1x8xf32>
    %349 = math.rsqrt %348 : vector<1x8xf32>
    %350 = arith.mulf %346, %349 : vector<1x8xf32>
    %cst_168 = arith.constant dense<0.000000e+00> : vector<1x32xf32>
    %351 = tpu.matmul %350, %331, %cst_168 {dimension_numbers = #tpu.dot_dimension_numbers<[1], [0], [0], [1], [0, 0, 1, 1], [], []>} : vector<1x8xf32>, vector<8x32xf32>, vector<1x32xf32> -> vector<1x32xf32>
    %c19 = arith.constant 19 : index
    %c0_169 = arith.constant 0 : index
    %352 = vector.load %arg7[%c19, %c0_169] : memref<27x1024xf32, #tpu.memory_space<vmem>>, vector<1x32xf32>
    %353 = vector.broadcast %351 : vector<1x32xf32> to vector<2x32xf32>
    %354 = arith.mulf %339, %353 : vector<2x32xf32>
    %355 = vector.broadcast %352 : vector<1x32xf32> to vector<2x32xf32>
    %356 = arith.addf %354, %355 : vector<2x32xf32>
    %cst_170 = arith.constant 0.000000e+00 : f32
    %357 = vector.broadcast %cst_170 : f32 to vector<2x32xf32>
    %358 = arith.subf %357, %356 : vector<2x32xf32>
    %359 = math.exp %358 : vector<2x32xf32>
    %cst_171 = arith.constant 1.000000e+00 : f32
    %360 = vector.broadcast %cst_171 : f32 to vector<2x32xf32>
    %361 = arith.addf %360, %359 : vector<2x32xf32>
    %362 = tpu.reciprocal %361 {approx = true} : vector<2x32xf32> -> vector<2x32xf32>
    %363 = arith.mulf %356, %362 : vector<2x32xf32>
    %c1104 = arith.constant 1104 : index
    %c0_172 = arith.constant 0 : index
    %364 = vector.load %arg2[%c1104, %c0_172] : memref<1296x128xbf16, #tpu.memory_space<vmem>>, vector<32x128xbf16>
    %365 = arith.truncf %363 : vector<2x32xf32> to vector<2x32xbf16>
    %cst_173 = arith.constant dense<0.000000e+00> : vector<2x128xf32>
    %366 = tpu.matmul %365, %364, %cst_173 {dimension_numbers = #tpu.dot_dimension_numbers<[1], [0], [0], [1], [0, 0, 1, 1], [], []>} : vector<2x32xbf16>, vector<32x128xbf16>, vector<2x128xf32> -> vector<2x128xf32>
    %c2352 = arith.constant 2352 : index
    %c0_174 = arith.constant 0 : index
    %367 = vector.load %arg6[%c2352, %c0_174] : memref<2800x64xf32, #tpu.memory_space<vmem>>, vector<128x8xf32>
    %c1136 = arith.constant 1136 : index
    %c0_175 = arith.constant 0 : index
    %368 = vector.load %arg2[%c1136, %c0_175] : memref<1296x128xbf16, #tpu.memory_space<vmem>>, vector<8x128xbf16>
    %369 = arith.extf %368 : vector<8x128xbf16> to vector<8x128xf32>
    %cst_176 = arith.constant dense<0.000000e+00> : vector<128xf32>
    %370 = vector.multi_reduction <add>, %366, %cst_176 [0] : vector<2x128xf32> to vector<128xf32>
    %371 = vector.shape_cast %370 : vector<128xf32> to vector<1x128xf32>
    %cst_177 = arith.constant dense<0.000000e+00> : vector<1x8xf32>
    %372 = tpu.matmul %371, %367, %cst_177 {dimension_numbers = #tpu.dot_dimension_numbers<[1], [0], [0], [1], [0, 0, 1, 1], [], []>} : vector<1x128xf32>, vector<128x8xf32>, vector<1x8xf32> -> vector<1x8xf32>
    %cst_178 = arith.constant 3.125000e-02 : f32
    %373 = vector.broadcast %cst_178 : f32 to vector<1x8xf32>
    %374 = arith.mulf %372, %373 : vector<1x8xf32>
    %cst_179 = arith.constant dense<0.000000e+00> : vector<1x128xf32>
    %375 = tpu.matmul %374, %369, %cst_179 {dimension_numbers = #tpu.dot_dimension_numbers<[1], [0], [0], [1], [0, 0, 1, 1], [], []>} : vector<1x8xf32>, vector<8x128xf32>, vector<1x128xf32> -> vector<1x128xf32>
    %376 = vector.broadcast %375 : vector<1x128xf32> to vector<2x128xf32>
    %377 = arith.subf %366, %376 : vector<2x128xf32>
    %378 = arith.mulf %377, %377 : vector<2x128xf32>
    %cst_180 = arith.constant dense<0.000000e+00> : vector<128xf32>
    %379 = vector.multi_reduction <add>, %378, %cst_180 [0] : vector<2x128xf32> to vector<128xf32>
    %380 = vector.shape_cast %379 : vector<128xf32> to vector<1x128xf32>
    %cst_181 = arith.constant dense<0.000000e+00> : vector<1x8xf32>
    %381 = tpu.matmul %380, %367, %cst_181 {dimension_numbers = #tpu.dot_dimension_numbers<[1], [0], [0], [1], [0, 0, 1, 1], [], []>} : vector<1x128xf32>, vector<128x8xf32>, vector<1x8xf32> -> vector<1x8xf32>
    %cst_182 = arith.constant 3.125000e-02 : f32
    %382 = vector.broadcast %cst_182 : f32 to vector<1x8xf32>
    %383 = arith.mulf %381, %382 : vector<1x8xf32>
    %c20 = arith.constant 20 : index
    %c0_183 = arith.constant 0 : index
    %384 = vector.load %arg7[%c20, %c0_183] : memref<27x1024xf32, #tpu.memory_space<vmem>>, vector<1x8xf32>
    %cst_184 = arith.constant 9.99999974E-6 : f32
    %385 = vector.broadcast %cst_184 : f32 to vector<1x8xf32>
    %386 = arith.addf %383, %385 : vector<1x8xf32>
    %387 = math.rsqrt %386 : vector<1x8xf32>
    %388 = arith.mulf %384, %387 : vector<1x8xf32>
    %cst_185 = arith.constant dense<0.000000e+00> : vector<1x128xf32>
    %389 = tpu.matmul %388, %369, %cst_185 {dimension_numbers = #tpu.dot_dimension_numbers<[1], [0], [0], [1], [0, 0, 1, 1], [], []>} : vector<1x8xf32>, vector<8x128xf32>, vector<1x128xf32> -> vector<1x128xf32>
    %c21 = arith.constant 21 : index
    %c0_186 = arith.constant 0 : index
    %390 = vector.load %arg7[%c21, %c0_186] : memref<27x1024xf32, #tpu.memory_space<vmem>>, vector<1x128xf32>
    %391 = vector.broadcast %389 : vector<1x128xf32> to vector<2x128xf32>
    %392 = arith.mulf %377, %391 : vector<2x128xf32>
    %393 = vector.broadcast %390 : vector<1x128xf32> to vector<2x128xf32>
    %394 = arith.addf %392, %393 : vector<2x128xf32>
    %cst_187 = arith.constant 0.000000e+00 : f32
    %395 = vector.broadcast %cst_187 : f32 to vector<2x128xf32>
    %396 = arith.subf %395, %394 : vector<2x128xf32>
    %397 = math.exp %396 : vector<2x128xf32>
    %cst_188 = arith.constant 1.000000e+00 : f32
    %398 = vector.broadcast %cst_188 : f32 to vector<2x128xf32>
    %399 = arith.addf %398, %397 : vector<2x128xf32>
    %400 = tpu.reciprocal %399 {approx = true} : vector<2x128xf32> -> vector<2x128xf32>
    %401 = arith.mulf %394, %400 : vector<2x128xf32>
    %c1152 = arith.constant 1152 : index
    %c0_189 = arith.constant 0 : index
    %402 = vector.load %arg2[%c1152, %c0_189] : memref<1296x128xbf16, #tpu.memory_space<vmem>>, vector<128x64xbf16>
    %403 = arith.truncf %401 : vector<2x128xf32> to vector<2x128xbf16>
    %cst_190 = arith.constant dense<0.000000e+00> : vector<2x64xf32>
    %404 = tpu.matmul %403, %402, %cst_190 {dimension_numbers = #tpu.dot_dimension_numbers<[1], [0], [0], [1], [0, 0, 1, 1], [], []>} : vector<2x128xbf16>, vector<128x64xbf16>, vector<2x64xf32> -> vector<2x64xf32>
    %c2480 = arith.constant 2480 : index
    %c0_191 = arith.constant 0 : index
    %405 = vector.load %arg6[%c2480, %c0_191] : memref<2800x64xf32, #tpu.memory_space<vmem>>, vector<64x4xf32>
    %c1280_192 = arith.constant 1280 : index
    %c0_193 = arith.constant 0 : index
    %406 = vector.load %arg2[%c1280_192, %c0_193] : memref<1296x128xbf16, #tpu.memory_space<vmem>>, vector<4x64xbf16>
    %407 = arith.extf %406 : vector<4x64xbf16> to vector<4x64xf32>
    %cst_194 = arith.constant dense<0.000000e+00> : vector<64xf32>
    %408 = vector.multi_reduction <add>, %404, %cst_194 [0] : vector<2x64xf32> to vector<64xf32>
    %409 = vector.shape_cast %408 : vector<64xf32> to vector<1x64xf32>
    %cst_195 = arith.constant dense<0.000000e+00> : vector<1x4xf32>
    %410 = tpu.matmul %409, %405, %cst_195 {dimension_numbers = #tpu.dot_dimension_numbers<[1], [0], [0], [1], [0, 0, 1, 1], [], []>} : vector<1x64xf32>, vector<64x4xf32>, vector<1x4xf32> -> vector<1x4xf32>
    %cst_196 = arith.constant 3.125000e-02 : f32
    %411 = vector.broadcast %cst_196 : f32 to vector<1x4xf32>
    %412 = arith.mulf %410, %411 : vector<1x4xf32>
    %cst_197 = arith.constant dense<0.000000e+00> : vector<1x64xf32>
    %413 = tpu.matmul %412, %407, %cst_197 {dimension_numbers = #tpu.dot_dimension_numbers<[1], [0], [0], [1], [0, 0, 1, 1], [], []>} : vector<1x4xf32>, vector<4x64xf32>, vector<1x64xf32> -> vector<1x64xf32>
    %414 = vector.broadcast %413 : vector<1x64xf32> to vector<2x64xf32>
    %415 = arith.subf %404, %414 : vector<2x64xf32>
    %416 = arith.mulf %415, %415 : vector<2x64xf32>
    %cst_198 = arith.constant dense<0.000000e+00> : vector<64xf32>
    %417 = vector.multi_reduction <add>, %416, %cst_198 [0] : vector<2x64xf32> to vector<64xf32>
    %418 = vector.shape_cast %417 : vector<64xf32> to vector<1x64xf32>
    %cst_199 = arith.constant dense<0.000000e+00> : vector<1x4xf32>
    %419 = tpu.matmul %418, %405, %cst_199 {dimension_numbers = #tpu.dot_dimension_numbers<[1], [0], [0], [1], [0, 0, 1, 1], [], []>} : vector<1x64xf32>, vector<64x4xf32>, vector<1x4xf32> -> vector<1x4xf32>
    %cst_200 = arith.constant 3.125000e-02 : f32
    %420 = vector.broadcast %cst_200 : f32 to vector<1x4xf32>
    %421 = arith.mulf %419, %420 : vector<1x4xf32>
    %c22 = arith.constant 22 : index
    %c0_201 = arith.constant 0 : index
    %422 = vector.load %arg7[%c22, %c0_201] : memref<27x1024xf32, #tpu.memory_space<vmem>>, vector<1x4xf32>
    %cst_202 = arith.constant 9.99999974E-6 : f32
    %423 = vector.broadcast %cst_202 : f32 to vector<1x4xf32>
    %424 = arith.addf %421, %423 : vector<1x4xf32>
    %425 = math.rsqrt %424 : vector<1x4xf32>
    %426 = arith.mulf %422, %425 : vector<1x4xf32>
    %cst_203 = arith.constant dense<0.000000e+00> : vector<1x64xf32>
    %427 = tpu.matmul %426, %407, %cst_203 {dimension_numbers = #tpu.dot_dimension_numbers<[1], [0], [0], [1], [0, 0, 1, 1], [], []>} : vector<1x4xf32>, vector<4x64xf32>, vector<1x64xf32> -> vector<1x64xf32>
    %c23 = arith.constant 23 : index
    %c0_204 = arith.constant 0 : index
    %428 = vector.load %arg7[%c23, %c0_204] : memref<27x1024xf32, #tpu.memory_space<vmem>>, vector<1x64xf32>
    %429 = vector.broadcast %427 : vector<1x64xf32> to vector<2x64xf32>
    %430 = arith.mulf %415, %429 : vector<2x64xf32>
    %431 = vector.broadcast %428 : vector<1x64xf32> to vector<2x64xf32>
    %432 = arith.addf %430, %431 : vector<2x64xf32>
    %cst_205 = arith.constant 0.000000e+00 : f32
    %433 = vector.broadcast %cst_205 : f32 to vector<2x64xf32>
    %434 = arith.subf %433, %432 : vector<2x64xf32>
    %435 = math.exp %434 : vector<2x64xf32>
    %cst_206 = arith.constant 1.000000e+00 : f32
    %436 = vector.broadcast %cst_206 : f32 to vector<2x64xf32>
    %437 = arith.addf %436, %435 : vector<2x64xf32>
    %438 = tpu.reciprocal %437 {approx = true} : vector<2x64xf32> -> vector<2x64xf32>
    %439 = arith.mulf %432, %438 : vector<2x64xf32>
    %c1232 = arith.constant 1232 : index
    %c0_207 = arith.constant 0 : index
    %440 = vector.load %arg3[%c1232, %c0_207] : memref<1312x256xbf16, #tpu.memory_space<vmem>>, vector<64x256xbf16>
    %441 = arith.truncf %439 : vector<2x64xf32> to vector<2x64xbf16>
    %cst_208 = arith.constant dense<0.000000e+00> : vector<2x256xf32>
    %442 = tpu.matmul %441, %440, %cst_208 {dimension_numbers = #tpu.dot_dimension_numbers<[1], [0], [0], [1], [0, 0, 1, 1], [], []>} : vector<2x64xbf16>, vector<64x256xbf16>, vector<2x256xf32> -> vector<2x256xf32>
    %c2544 = arith.constant 2544 : index
    %c0_209 = arith.constant 0 : index
    %443 = vector.load %arg6[%c2544, %c0_209] : memref<2800x64xf32, #tpu.memory_space<vmem>>, vector<256x4xf32>
    %c1296 = arith.constant 1296 : index
    %c0_210 = arith.constant 0 : index
    %444 = vector.load %arg3[%c1296, %c0_210] : memref<1312x256xbf16, #tpu.memory_space<vmem>>, vector<4x256xbf16>
    %445 = arith.extf %444 : vector<4x256xbf16> to vector<4x256xf32>
    %cst_211 = arith.constant dense<0.000000e+00> : vector<256xf32>
    %446 = vector.multi_reduction <add>, %442, %cst_211 [0] : vector<2x256xf32> to vector<256xf32>
    %447 = vector.shape_cast %446 : vector<256xf32> to vector<1x256xf32>
    %cst_212 = arith.constant dense<0.000000e+00> : vector<1x4xf32>
    %448 = tpu.matmul %447, %443, %cst_212 {dimension_numbers = #tpu.dot_dimension_numbers<[1], [0], [0], [1], [0, 0, 1, 1], [], []>} : vector<1x256xf32>, vector<256x4xf32>, vector<1x4xf32> -> vector<1x4xf32>
    %cst_213 = arith.constant 7.812500e-03 : f32
    %449 = vector.broadcast %cst_213 : f32 to vector<1x4xf32>
    %450 = arith.mulf %448, %449 : vector<1x4xf32>
    %cst_214 = arith.constant dense<0.000000e+00> : vector<1x256xf32>
    %451 = tpu.matmul %450, %445, %cst_214 {dimension_numbers = #tpu.dot_dimension_numbers<[1], [0], [0], [1], [0, 0, 1, 1], [], []>} : vector<1x4xf32>, vector<4x256xf32>, vector<1x256xf32> -> vector<1x256xf32>
    %452 = vector.broadcast %451 : vector<1x256xf32> to vector<2x256xf32>
    %453 = arith.subf %442, %452 : vector<2x256xf32>
    %454 = arith.mulf %453, %453 : vector<2x256xf32>
    %cst_215 = arith.constant dense<0.000000e+00> : vector<256xf32>
    %455 = vector.multi_reduction <add>, %454, %cst_215 [0] : vector<2x256xf32> to vector<256xf32>
    %456 = vector.shape_cast %455 : vector<256xf32> to vector<1x256xf32>
    %cst_216 = arith.constant dense<0.000000e+00> : vector<1x4xf32>
    %457 = tpu.matmul %456, %443, %cst_216 {dimension_numbers = #tpu.dot_dimension_numbers<[1], [0], [0], [1], [0, 0, 1, 1], [], []>} : vector<1x256xf32>, vector<256x4xf32>, vector<1x4xf32> -> vector<1x4xf32>
    %cst_217 = arith.constant 7.812500e-03 : f32
    %458 = vector.broadcast %cst_217 : f32 to vector<1x4xf32>
    %459 = arith.mulf %457, %458 : vector<1x4xf32>
    %c24 = arith.constant 24 : index
    %c0_218 = arith.constant 0 : index
    %460 = vector.load %arg7[%c24, %c0_218] : memref<27x1024xf32, #tpu.memory_space<vmem>>, vector<1x4xf32>
    %cst_219 = arith.constant 9.99999974E-6 : f32
    %461 = vector.broadcast %cst_219 : f32 to vector<1x4xf32>
    %462 = arith.addf %459, %461 : vector<1x4xf32>
    %463 = math.rsqrt %462 : vector<1x4xf32>
    %464 = arith.mulf %460, %463 : vector<1x4xf32>
    %cst_220 = arith.constant dense<0.000000e+00> : vector<1x256xf32>
    %465 = tpu.matmul %464, %445, %cst_220 {dimension_numbers = #tpu.dot_dimension_numbers<[1], [0], [0], [1], [0, 0, 1, 1], [], []>} : vector<1x4xf32>, vector<4x256xf32>, vector<1x256xf32> -> vector<1x256xf32>
    %c25 = arith.constant 25 : index
    %c0_221 = arith.constant 0 : index
    %466 = vector.load %arg7[%c25, %c0_221] : memref<27x1024xf32, #tpu.memory_space<vmem>>, vector<1x256xf32>
    %467 = vector.broadcast %465 : vector<1x256xf32> to vector<2x256xf32>
    %468 = arith.mulf %453, %467 : vector<2x256xf32>
    %469 = vector.broadcast %466 : vector<1x256xf32> to vector<2x256xf32>
    %470 = arith.addf %468, %469 : vector<2x256xf32>
    %cst_222 = arith.constant 0.000000e+00 : f32
    %471 = vector.broadcast %cst_222 : f32 to vector<2x256xf32>
    %472 = arith.subf %471, %470 : vector<2x256xf32>
    %473 = math.exp %472 : vector<2x256xf32>
    %cst_223 = arith.constant 1.000000e+00 : f32
    %474 = vector.broadcast %cst_223 : f32 to vector<2x256xf32>
    %475 = arith.addf %474, %473 : vector<2x256xf32>
    %476 = tpu.reciprocal %475 {approx = true} : vector<2x256xf32> -> vector<2x256xf32>
    %477 = arith.mulf %470, %476 : vector<2x256xf32>
    %c288 = arith.constant 288 : index
    %c0_224 = arith.constant 0 : index
    %478 = vector.load %arg4[%c288, %c0_224] : memref<544x512xbf16, #tpu.memory_space<vmem>>, vector<256x384xbf16>
    %c26 = arith.constant 26 : index
    %c0_225 = arith.constant 0 : index
    %479 = vector.load %arg7[%c26, %c0_225] : memref<27x1024xf32, #tpu.memory_space<vmem>>, vector<1x384xf32>
    %480 = arith.truncf %477 : vector<2x256xf32> to vector<2x256xbf16>
    %cst_226 = arith.constant dense<0.000000e+00> : vector<2x384xf32>
    %481 = tpu.matmul %480, %478, %cst_226 {dimension_numbers = #tpu.dot_dimension_numbers<[1], [0], [0], [1], [0, 0, 1, 1], [], []>} : vector<2x256xbf16>, vector<256x384xbf16>, vector<2x384xf32> -> vector<2x384xf32>
    %482 = vector.broadcast %479 : vector<1x384xf32> to vector<2x384xf32>
    %483 = arith.addf %481, %482 : vector<2x384xf32>
    %c0_227 = arith.constant 0 : index
    %c0_228 = arith.constant 0 : index
    %484 = vector.load %arg8[%c0_227, %c0_228] : memref<2x384xf32, #tpu.memory_space<vmem>>, vector<2x384xf32>
    tpu.vector_store %arg8[%c0_227, %c0_228], %483 {strides = array<i32>} : memref<2x384xf32, #tpu.memory_space<vmem>>, vector<2x384xf32>,
    return
  }
}

</mosaic_0001>

<bundles_post_ra>
// kernel: forward.1
= control target key start
LH: loop header
LB: loop body
LE: loop exit
PB: predicated region body
PF: predicated region fallthrough
CT: control target
= control target key end

     0   :  { %vm617_vm0 = vcmask 523264   ;;  %vm981_vm1 = vcmask 1041408   ;;  %vm1199_vm2 = vcmask 130048   ;;  %vm3822_vm9 = vcmask 261120   ;;  %s9593_s13 = smov 16   ;;  %s9594_s21 = smov 112   ;;  %s14876_s5 = inlined_call_operand.vmem [shape: bf16[208,1024], index: 5, kind: input, shape index: {}]   ;;  %s14877_s0 = inlined_call_operand.vmem [shape: f32[2,192], index: 0, kind: input, shape index: {}]   ;;  %s14878_s6 = inlined_call_operand.vmem [shape: f32[2800,64], index: 6, kind: input, shape index: {}]   ;;  %s14879_s7 = inlined_call_operand.vmem [shape: f32[27,1024], index: 7, kind: input, shape index: {}]   ;;  %s14880_s3 = inlined_call_operand.vmem [shape: bf16[1312,256], index: 3, kind: input, shape index: {}]   ;;  %s14881_s4 = inlined_call_operand.vmem [shape: bf16[544,512], index: 4, kind: input, shape index: {}]   ;;  %s14882_s2 = inlined_call_operand.vmem [shape: bf16[1296,128], index: 2, kind: input, shape index: {}]   ;;  %s14883_s1 = inlined_call_operand.vmem [shape: f32[2,16], index: 1, kind: input, shape index: {}]   ;;  %s14884_s9 = inlined_call_operand.vmem [shape: f32[2,32], index: 9, kind: output, shape index: {1}]   ;;  %s14885_s8 = inlined_call_operand.vmem [shape: f32[2,384], index: 8, kind: output, shape index: {0}]  }
   0x1   :  { %v7412_v0 = vld [vmem:[%s14876_s5 + $0x1c0] sm:$0xf]  ;;  %v9051_v5 = vld [vmem:[%s14876_s5 + $0x1c4] sm:$0xf]  ;;  %v7420_v44 = vld [vmem:[%s14876_s5 + $0x1c8] sm:$0xf] }
   0x2   :  { %v9055_v1 = vld [vmem:[%s14876_s5 + $0x1dc] sm:$0xf0]  ;;  %v7414_v6 = vld [vmem:[%s14876_s5 + $0x1e0] sm:$0xf0]  ;;  %v9056_v46 = vld [vmem:[%s14876_s5 + $0x1e4] sm:$0xf0] }
   0x3   :  { %v7540_v2 = vld [vmem:[%s14876_s5 + $0x2c0] sm:$0xf]  ;;  %v7413_v3 = vor.u32 %v9055_v1, %v7412_v0  ;;  %v7417_v8 = vor.u32 %v9051_v5, %v7414_v6  ;;  %v9083_v9 = vld [vmem:[%s14876_s5 + $0x2c4] sm:$0xf]  ;;  %v7548_v47 = vld [vmem:[%s14876_s5 + $0x2c8] sm:$0xf]  ;;  %v7421_v54 = vor.u32 %v9056_v46, %v7420_v44 }
   0x4   :  { %v9087_v4 = vld [vmem:[%s14876_s5 + $0x2dc] sm:$0xf0]  ;;  %v7542_v10 = vld [vmem:[%s14876_s5 + $0x2e0] sm:$0xf0]  ;;  %v9088_v48 = vld [vmem:[%s14876_s5 + $0x2e4] sm:$0xf0] }
   0x5   :  { %v7541_v7 = vor.u32 %v9087_v4, %v7540_v2  ;;  %v7380_v11 = vld [vmem:[%s14876_s5 + $0x180] sm:$0xf]  ;;  %621 = vmatpush.bf16.msra.mxu0 %v7413_v3  ;;  %v7545_v12 = vor.u32 %v9083_v9, %v7542_v10  ;;  %647 = vmatpush.bf16.msra.mxu2 %v7417_v8  ;;  %v9043_v18 = vld [vmem:[%s14876_s5 + $0x184] sm:$0xf]  ;;  %v7549_v57 = vor.u32 %v9088_v48, %v7548_v47  ;;  %v7388_v58 = vld [vmem:[%s14876_s5 + $0x188] sm:$0xf] }
   0x6   :  { %v9047_v13 = vld [vmem:[%s14876_s5 + $0x19c] sm:$0xf0]  ;;  %v7382_v19 = vld [vmem:[%s14876_s5 + $0x1a0] sm:$0xf0]  ;;  %v9048_v59 = vld [vmem:[%s14876_s5 + $0x1a4] sm:$0xf0] }
   0x7   :  { %v7508_v14 = vld [vmem:[%s14876_s5 + $0x280] sm:$0xf]  ;;  %638 = vmatpush.bf16.msra.mxu1 %v7541_v7  ;;  %v7381_v16 = vor.u32 %v9047_v13, %v7380_v11  ;;  %v9075_v20 = vld [vmem:[%s14876_s5 + $0x284] sm:$0xf]  ;;  %664 = vmatpush.bf16.msra.mxu3 %v7545_v12  ;;  %v7385_v21 = vor.u32 %v9043_v18, %v7382_v19  ;;  %v7516_v61 = vld [vmem:[%s14876_s5 + $0x288] sm:$0xf]  ;;  %v7389_v2 = vor.u32 %v9048_v59, %v7388_v58 }
   0x8   :  { %v9079_v15 = vld [vmem:[%s14876_s5 + $0x29c] sm:$0xf0]  ;;  %v7510_v22 = vld [vmem:[%s14876_s5 + $0x2a0] sm:$0xf0]  ;;  %v9080_v62 = vld [vmem:[%s14876_s5 + $0x2a4] sm:$0xf0] }
   0x9   :  { %v7509_v17 = vor.u32 %v9079_v15, %v7508_v14  ;;  %v7348_v23 = vld [vmem:[%s14876_s5 + $0x140] sm:$0xf]  ;;  %v7513_v25 = vor.u32 %v9075_v20, %v7510_v22  ;;  %v9035_v28 = vld [vmem:[%s14876_s5 + $0x144] sm:$0xf]  ;;  %622 = vmatpush.bf16.msra.mxu0 %v7381_v16  ;;  %648 = vmatpush.bf16.msra.mxu2 %v7385_v21  ;;  %v7517_v6 = vor.u32 %v9080_v62, %v7516_v61  ;;  %v7356_v7 = vld [vmem:[%s14876_s5 + $0x148] sm:$0xf] }
   0xa   :  { %v9039_v24 = vld [vmem:[%s14876_s5 + $0x15c] sm:$0xf0]  ;;  %v7350_v30 = vld [vmem:[%s14876_s5 + $0x160] sm:$0xf0]  ;;  %v9040_v8 = vld [vmem:[%s14876_s5 + $0x164] sm:$0xf0] }
   0xb   :  { %v7476_v26 = vld [vmem:[%s14876_s5 + $0x240] sm:$0xf]  ;;  %v7349_v29 = vor.u32 %v9039_v24, %v7348_v23  ;;  %v9067_v31 = vld [vmem:[%s14876_s5 + $0x244] sm:$0xf]  ;;  %639 = vmatpush.bf16.msra.mxu1 %v7509_v17  ;;  %v7353_v34 = vor.u32 %v9035_v28, %v7350_v30  ;;  %665 = vmatpush.bf16.msra.mxu3 %v7513_v25  ;;  %v7484_v10 = vld [vmem:[%s14876_s5 + $0x248] sm:$0xf]  ;;  %v7357_v17 = vor.u32 %v9040_v8, %v7356_v7 }
   0xc   :  { %v9071_v27 = vld [vmem:[%s14876_s5 + $0x25c] sm:$0xf0]  ;;  %v7478_v32 = vld [vmem:[%s14876_s5 + $0x260] sm:$0xf0]  ;;  %v9072_v11 = vld [vmem:[%s14876_s5 + $0x264] sm:$0xf0] }
   0xd   :  { %v7477_v33 = vor.u32 %v9071_v27, %v7476_v26  ;;  %v7316_v35 = vld [vmem:[%s14876_s5 + $0x100] sm:$0xf]  ;;  %v7481_v38 = vor.u32 %v9067_v31, %v7478_v32  ;;  %v9027_v40 = vld [vmem:[%s14876_s5 + $0x104] sm:$0xf]  ;;  %623 = vmatpush.bf16.msra.mxu0 %v7349_v29  ;;  %649 = vmatpush.bf16.msra.mxu2 %v7353_v34  ;;  %v7324_v18 = vld [vmem:[%s14876_s5 + $0x108] sm:$0xf]  ;;  %v7485_v21 = vor.u32 %v9072_v11, %v7484_v10 }
   0xe   :  { %v9031_v36 = vld [vmem:[%s14876_s5 + $0x11c] sm:$0xf0]  ;;  %v7318_v41 = vld [vmem:[%s14876_s5 + $0x120] sm:$0xf0]  ;;  %v9032_v19 = vld [vmem:[%s14876_s5 + $0x124] sm:$0xf0] }
   0xf   :  { %v7444_v37 = vld [vmem:[%s14876_s5 + $0x200] sm:$0xf]  ;;  %v9059_v42 = vld [vmem:[%s14876_s5 + $0x204] sm:$0xf]  ;;  %v7317_v45 = vor.u32 %v9031_v36, %v7316_v35  ;;  %640 = vmatpush.bf16.msra.mxu1 %v7477_v33  ;;  %v7321_v50 = vor.u32 %v9027_v40, %v7318_v41  ;;  %666 = vmatpush.bf16.msra.mxu3 %v7481_v38  ;;  %v7452_v20 = vld [vmem:[%s14876_s5 + $0x208] sm:$0xf]  ;;  %v7325_v34 = vor.u32 %v9032_v19, %v7324_v18 }
  0x10   :  { %v9063_v39 = vld [vmem:[%s14876_s5 + $0x21c] sm:$0xf0]  ;;  %v7446_v43 = vld [vmem:[%s14876_s5 + $0x220] sm:$0xf0]  ;;  %v9064_v22 = vld [vmem:[%s14876_s5 + $0x224] sm:$0xf0] }
  0x11   :  { %v7445_v49 = vor.u32 %v9063_v39, %v7444_v37  ;;  %v7284_v51 = vld [vmem:[%s14876_s5 + $0xc0] sm:$0xf]  ;;  %v7449_v53 = vor.u32 %v9059_v42, %v7446_v43  ;;  %v9019_v55 = vld [vmem:[%s14876_s5 + $0xc4] sm:$0xf]  ;;  %624 = vmatpush.bf16.msra.mxu0 %v7317_v45  ;;  %650 = vmatpush.bf16.msra.mxu2 %v7321_v50  ;;  %v7428_v23 = vld [vmem:[%s14876_s5 + $0x1d0] sm:$0xf]  ;;  %v7453_v37 = vor.u32 %v9064_v22, %v7452_v20 }
  0x12   :  { %v9023_v52 = vld [vmem:[%s14876_s5 + $0xdc] sm:$0xf0]  ;;  %v7286_v56 = vld [vmem:[%s14876_s5 + $0xe0] sm:$0xf0]  ;;  %v9057_v24 = vld [vmem:[%s14876_s5 + $0x1ec] sm:$0xf0] }
  0x13   :  { %v7285_v60 = vor.u32 %v9023_v52, %v7284_v51  ;;  %641 = vmatpush.bf16.msra.mxu1 %v7445_v49  ;;  %v7289_v63 = vor.u32 %v9019_v55, %v7286_v56  ;;  %v7252_v0 = vld [vmem:[%s14876_s5 + $0x80] sm:$0xf]  ;;  %667 = vmatpush.bf16.msra.mxu3 %v7449_v53  ;;  %v9011_v3 = vld [vmem:[%s14876_s5 + $0x84] sm:$0xf]  ;;  %v7292_v31 = vld [vmem:[%s14876_s5 + $0xc8] sm:$0xf]  ;;  %v7429_v41 = vor.u32 %v9057_v24, %v7428_v23 }
  0x14   :  { %v9015_v1 = vld [vmem:[%s14876_s5 + $0x9c] sm:$0xf0]  ;;  %v7254_v4 = vld [vmem:[%s14876_s5 + $0xa0] sm:$0xf0]  ;;  %v9052_v32 = vld [vmem:[%s14876_s5 + $0x1cc] sm:$0xf] }
  0x15   :  { %v32_v5 = vld [vmem:[%s14877_s0] sm:$0xf]  ;;  %625 = vmatpush.bf16.msra.mxu0 %v7285_v60  ;;  %v7253_v9 = vor.u32 %v9015_v1, %v7252_v0  ;;  %651 = vmatpush.bf16.msra.mxu2 %v7289_v63  ;;  %v7257_v13 = vor.u32 %v9011_v3, %v7254_v4  ;;  %v9003_v15 = vld [vmem:[%s14876_s5 + $0x44] sm:$0xf]  ;;  %v7422_v35 = vld [vmem:[%s14876_s5 + $0x1e8] sm:$0xf0] }
  0x16   :  { %130 = vst [vmem:[#allocation1] ss:$4 sm:$0xff] %v32_v5  ;;  %v7220_v12 = vld [vmem:[%s14876_s5 + $0x40] sm:$0xf]  ;;  %v7222_v16 = vld [vmem:[%s14876_s5 + $0x60] sm:$0xf0]  ;;  %v7425_v45 = vor.u32 %v9052_v32, %v7422_v35 }
  0x17   :  { %673 = vmatpush.bf16.msrb.mxu1 %v7421_v54  ;;  %690 = vmatpush.bf16.msrb.mxu3 %v7549_v57  ;;  %v9007_v14 = vld [vmem:[%s14876_s5 + $0x5c] sm:$0xf0]  ;;  %v8995_v28 = vld [vmem:[%s14876_s5 + $0x4] sm:$0xf]  ;;  %v7225_v29 = vor.u32 %v9003_v15, %v7222_v16  ;;  %v9024_v38 = vld [vmem:[%s14876_s5 + $0xe4] sm:$0xf0] }
  0x18   :  { %v7221_v25 = vor.u32 %v9007_v14, %v7220_v12  ;;  %v7188_v26 = vld [vmem:[%s14876_s5] sm:$0xf]  ;;  %v7190_v30 = vld [vmem:[%s14876_s5 + $0x20] sm:$0xf0]  ;;  %v9084_v39 = vld [vmem:[%s14876_s5 + $0x2cc] sm:$0xf]  ;;  %v7293_v48 = vor.u32 %v9024_v38, %v7292_v31 }
  0x19   :  { %626 = vmatpush.bf16.msra.mxu0 %v7253_v9  ;;  %v8999_v27 = vld [vmem:[%s14876_s5 + $0x1c] sm:$0xf0]  ;;  %652 = vmatpush.bf16.msra.mxu2 %v7257_v13  ;;  %v7550_v40 = vld [vmem:[%s14876_s5 + $0x2e8] sm:$0xf0]  ;;  %v7396_v43 = vld [vmem:[%s14876_s5 + $0x190] sm:$0xf]  ;;  %v7193_v44 = vor.u32 %v8995_v28, %v7190_v30 }
  0x1a   :  { %v7189_v42 = vor.u32 %v8999_v27, %v7188_v26  ;;  %v9049_v46 = vld [vmem:[%s14876_s5 + $0x1ac] sm:$0xf0]  ;;  %v7553_v49 = vor.u32 %v9084_v39, %v7550_v40  ;;  %v7260_v50 = vld [vmem:[%s14876_s5 + $0x88] sm:$0xf]  ;;  %v9044_v51 = vld [vmem:[%s14876_s5 + $0x18c] sm:$0xf] }
  0x1b   :  { %674 = vmatpush.bf16.msrb.mxu1 %v7389_v2  ;;  %691 = vmatpush.bf16.msrb.mxu3 %v7517_v6  ;;  %v7390_v52 = vld [vmem:[%s14876_s5 + $0x1a8] sm:$0xf0]  ;;  %v9016_v53 = vld [vmem:[%s14876_s5 + $0xa4] sm:$0xf0]  ;;  %v7397_v57 = vor.u32 %v9049_v46, %v7396_v43  ;;  %v7364_v59 = vld [vmem:[%s14876_s5 + $0x150] sm:$0xf] }
  0x1c   :  { %v9076_v54 = vld [vmem:[%s14876_s5 + $0x28c] sm:$0xf]  ;;  %v7393_v58 = vor.u32 %v9044_v51, %v7390_v52  ;;  %v9041_v60 = vld [vmem:[%s14876_s5 + $0x16c] sm:$0xf0]  ;;  %v7261_v61 = vor.u32 %v9016_v53, %v7260_v50  ;;  %v7228_v63 = vld [vmem:[%s14876_s5 + $0x48] sm:$0xf] }
  0x1d   :  { %v132_v33 = vld.sshfl [vmem:[#allocation1 + $0x8] sm:$0xff pattern:$0x73625140]  ;;  %627 = vmatpush.bf16.msra.mxu0 %v7221_v25  ;;  %653 = vmatpush.bf16.msra.mxu2 %v7225_v29  ;;  %v131_v47 = vld.sshfl [vmem:[#allocation1] sm:$0xff pattern:$0x73625140]  ;;  %v7365_v5 = vor.u32 %v9041_v60, %v7364_v59 }
  0x1e   :  { %v9855_v36 = vpack.c.bf16 %v132_v33, %v132_v33  ;;  %v7518_v55 = vld [vmem:[%s14876_s5 + $0x2a8] sm:$0xf0]  ;;  %v9894_v56 = vpack.c.bf16 %v131_v47, %v131_v47  ;;  %v9008_v2 = vld [vmem:[%s14876_s5 + $0x64] sm:$0xf0]  ;;  %v7332_v7 = vld [vmem:[%s14876_s5 + $0x110] sm:$0xf] }
  0x1f   :  { %675 = vmatpush.bf16.msrb.mxu1 %v7357_v17  ;;  %692 = vmatpush.bf16.msrb.mxu3 %v7485_v21  ;;  %v7521_v62 = vor.u32 %v9076_v54, %v7518_v55  ;;  %v9036_v0 = vld [vmem:[%s14876_s5 + $0x14c] sm:$0xf]  ;;  %v9033_v8 = vld [vmem:[%s14876_s5 + $0x12c] sm:$0xf0]  ;;  %v7196_v9 = vld [vmem:[%s14876_s5 + $0x8] sm:$0xf]  ;;  %v7229_v10 = vor.u32 %v9008_v2, %v7228_v63 }
  0x20   :  { %7571 = vmatmul.msk.bf16.vlgmr.msra.gmra.mxu3 %vm617_vm0, %v9855_v36  ;;  %7570 = vmatmul.msk.bf16.vlgmr.msra.gmra.mxu1 %vm617_vm0, %v9855_v36  ;;  %v7358_v1 = vld [vmem:[%s14876_s5 + $0x168] sm:$0xf0]  ;;  %v9000_v12 = vld [vmem:[%s14876_s5 + $0x24] sm:$0xf0]  ;;  %v7556_v17 = vld [vmem:[%s14876_s5 + $0x2d0] sm:$0xf]  ;;  %v7333_v18 = vor.u32 %v9033_v8, %v7332_v7 }
  0x21   :  { %628 = vmatpush.bf16.msra.mxu0 %v7189_v42  ;;  %654 = vmatpush.bf16.msra.mxu2 %v7193_v44  ;;  %v9068_v3 = vld [vmem:[%s14876_s5 + $0x24c] sm:$0xf]  ;;  %v7361_v6 = vor.u32 %v9036_v0, %v7358_v1  ;;  %v9089_v19 = vld [vmem:[%s14876_s5 + $0x2ec] sm:$0xf0]  ;;  %v9053_v20 = vld [vmem:[%s14876_s5 + $0x1d4] sm:$0xf]  ;;  %v7197_v25 = vor.u32 %v9000_v12, %v7196_v9 }
  0x22   :  { %v7486_v4 = vld [vmem:[%s14876_s5 + $0x268] sm:$0xf0]  ;;  %v7430_v21 = vld [vmem:[%s14876_s5 + $0x1f0] sm:$0xf0]  ;;  %v7300_v23 = vld [vmem:[%s14876_s5 + $0xd0] sm:$0xf]  ;;  %v7557_v29 = vor.u32 %v9089_v19, %v7556_v17 }
  0x23   :  { %676 = vmatpush.bf16.msrb.mxu1 %v7325_v34  ;;  %693 = vmatpush.bf16.msrb.mxu3 %v7453_v37  ;;  %v7489_v11 = vor.u32 %v9068_v3, %v7486_v4  ;;  %v9028_v13 = vld [vmem:[%s14876_s5 + $0x10c] sm:$0xf]  ;;  %v9025_v24 = vld [vmem:[%s14876_s5 + $0xec] sm:$0xf0]  ;;  %v7433_v30 = vor.u32 %v9053_v20, %v7430_v21  ;;  %v9045_v34 = vld [vmem:[%s14876_s5 + $0x194] sm:$0xf] }
  0x24   :  { %629 = vmatmul.bf16.vlgmr.msra.gmra.mxu0 %v9894_v56  ;;  %655 = vmatmul.bf16.vlgmr.msra.gmra.mxu2 %v9894_v56  ;;  %v7326_v14 = vld [vmem:[%s14876_s5 + $0x128] sm:$0xf0]  ;;  %v7524_v31 = vld [vmem:[%s14876_s5 + $0x290] sm:$0xf]  ;;  %v7301_v32 = vor.u32 %v9025_v24, %v7300_v23  ;;  %v7398_v35 = vld [vmem:[%s14876_s5 + $0x1b0] sm:$0xf0] }
  0x25   :  { %699 = vmatpush.bf16.msrb.mxu0 %v7425_v45  ;;  %716 = vmatpush.bf16.msrb.mxu2 %v7553_v49  ;;  %v9060_v15 = vld [vmem:[%s14876_s5 + $0x20c] sm:$0xf]  ;;  %v7329_v22 = vor.u32 %v9028_v13, %v7326_v14  ;;  %v9081_v33 = vld [vmem:[%s14876_s5 + $0x2ac] sm:$0xf0]  ;;  %v7401_v43 = vor.u32 %v9045_v34, %v7398_v35  ;;  %v9037_v47 = vld [vmem:[%s14876_s5 + $0x154] sm:$0xf] }
  0x26   :  { %v7454_v16 = vld [vmem:[%s14876_s5 + $0x228] sm:$0xf0]  ;;  %v7268_v38 = vld [vmem:[%s14876_s5 + $0x90] sm:$0xf]  ;;  %v7525_v42 = vor.u32 %v9081_v33, %v7524_v31  ;;  %v7334_v63 = vld [vmem:[%s14876_s5 + $0x130] sm:$0xf0] }
  0x27   :  { %725 = vmatpush.bf16.msra.mxu3 %v7429_v41  ;;  %677 = vmatpush.bf16.msrb.mxu1 %v7293_v48  ;;  %v7457_v26 = vor.u32 %v9060_v15, %v7454_v16  ;;  %v9020_v27 = vld [vmem:[%s14876_s5 + $0xcc] sm:$0xf]  ;;  %v9017_v39 = vld [vmem:[%s14876_s5 + $0xac] sm:$0xf0]  ;;  %v7366_v48 = vld [vmem:[%s14876_s5 + $0x170] sm:$0xf0] }
  0x28   :  { %v7294_v28 = vld [vmem:[%s14876_s5 + $0xe8] sm:$0xf0]  ;;  %v7492_v44 = vld [vmem:[%s14876_s5 + $0x250] sm:$0xf]  ;;  %v7269_v45 = vor.u32 %v9017_v39, %v7268_v38  ;;  %v7369_v55 = vor.u32 %v9037_v47, %v7366_v48  ;;  %v7436_v1 = vld [vmem:[%s14876_s5 + $0x1d8] sm:$0xf] }
  0x29   :  { %700 = vmatpush.bf16.msrb.mxu0 %v7393_v58  ;;  %717 = vmatpush.bf16.msrb.mxu2 %v7521_v62  ;;  %v7297_v37 = vor.u32 %v9020_v27, %v7294_v28  ;;  %v9012_v40 = vld [vmem:[%s14876_s5 + $0x8c] sm:$0xf]  ;;  %v9073_v46 = vld [vmem:[%s14876_s5 + $0x26c] sm:$0xf0]  ;;  %v9029_v62 = vld [vmem:[%s14876_s5 + $0x114] sm:$0xf] }
  0x2a   :  { %v7262_v41 = vld [vmem:[%s14876_s5 + $0xa8] sm:$0xf0]  ;;  %v7236_v50 = vld [vmem:[%s14876_s5 + $0x50] sm:$0xf]  ;;  %v7493_v54 = vor.u32 %v9073_v46, %v7492_v44  ;;  %v9058_v2 = vld [vmem:[%s14876_s5 + $0x1f4] sm:$0xf0]  ;;  %v7337_v8 = vor.u32 %v9029_v62, %v7334_v63 }
  0x2b   :  { %726 = vmatpush.bf16.msra.mxu3 %v7397_v57  ;;  %678 = vmatpush.bf16.msrb.mxu1 %v7261_v61  ;;  %v7265_v49 = vor.u32 %v9012_v40, %v7262_v41  ;;  %v9009_v51 = vld [vmem:[%s14876_s5 + $0x6c] sm:$0xf0]  ;;  %v9004_v52 = vld [vmem:[%s14876_s5 + $0x4c] sm:$0xf]  ;;  %v9085_v9 = vld [vmem:[%s14876_s5 + $0x2d4] sm:$0xf]  ;;  %v7437_v12 = vor.u32 %v9058_v2, %v7436_v1 }
  0x2c   :  { %v7230_v53 = vld [vmem:[%s14876_s5 + $0x68] sm:$0xf0]  ;;  %v7204_v57 = vld [vmem:[%s14876_s5 + $0x10] sm:$0xf]  ;;  %v7237_v60 = vor.u32 %v9009_v51, %v7236_v50  ;;  %v9021_v13 = vld [vmem:[%s14876_s5 + $0xd4] sm:$0xf] }
  0x2d   :  { %701 = vmatpush.bf16.msrb.mxu0 %v7361_v6  ;;  %718 = vmatpush.bf16.msrb.mxu2 %v7489_v11  ;;  %v9001_v58 = vld [vmem:[%s14876_s5 + $0x2c] sm:$0xf0]  ;;  %v7233_v0 = vor.u32 %v9004_v52, %v7230_v53  ;;  %v8996_v3 = vld [vmem:[%s14876_s5 + $0xc] sm:$0xf]  ;;  %v9090_v6 = vld [vmem:[%s14876_s5 + $0x2f4] sm:$0xf0] }
  0x2e   :  { %v7460_v59 = vld [vmem:[%s14876_s5 + $0x210] sm:$0xf]  ;;  %v7198_v4 = vld [vmem:[%s14876_s5 + $0x28] sm:$0xf0]  ;;  %v7205_v11 = vor.u32 %v9001_v58, %v7204_v57  ;;  %v7302_v14 = vld [vmem:[%s14876_s5 + $0xf0] sm:$0xf0] }
  0x2f   :  { %727 = vmatpush.bf16.msra.mxu3 %v7365_v5  ;;  %679 = vmatpush.bf16.msrb.mxu1 %v7229_v10  ;;  %v9065_v61 = vld [vmem:[%s14876_s5 + $0x22c] sm:$0xf0]  ;;  %v7564_v5 = vld [vmem:[%s14876_s5 + $0x2d8] sm:$0xf]  ;;  %v7558_v10 = vld [vmem:[%s14876_s5 + $0x2f0] sm:$0xf0]  ;;  %v7201_v15 = vor.u32 %v8996_v3, %v7198_v4 }
  0x30   :  { %7572 = vmatmul.msk.bf16.vlgmr.msrb.gmra.mxu3 %vm617_vm0, %v9855_v36  ;;  %v7461_v7 = vor.u32 %v9065_v61, %v7460_v59  ;;  %v7404_v16 = vld [vmem:[%s14876_s5 + $0x198] sm:$0xf]  ;;  %v7561_v19 = vor.u32 %v9085_v9, %v7558_v10  ;;  %v9077_v23 = vld [vmem:[%s14876_s5 + $0x294] sm:$0xf]  ;;  %v9086_v58 = vld [vmem:[%s14876_s5 + $0x2dc] sm:$0xf] }
  0x31   :  { %702 = vmatpush.bf16.msrb.mxu0 %v7329_v22  ;;  %719 = vmatpush.bf16.msrb.mxu2 %v7457_v26  ;;  %v9050_v17 = vld [vmem:[%s14876_s5 + $0x1b4] sm:$0xf0]  ;;  %v7305_v22 = vor.u32 %v9021_v13, %v7302_v14  ;;  %v7526_v24 = vld [vmem:[%s14876_s5 + $0x2b0] sm:$0xf0]  ;;  %v7566_v59 = vld [vmem:[%s14876_s5 + $0x2f8] sm:$0xf0] }
  0x32   :  { %v7532_v20 = vld [vmem:[%s14876_s5 + $0x298] sm:$0xf]  ;;  %v9013_v26 = vld [vmem:[%s14876_s5 + $0x94] sm:$0xf]  ;;  %v7529_v31 = vor.u32 %v9077_v23, %v7526_v24  ;;  %v7569_v1 = vor.u32 %v9086_v58, %v7566_v59  ;;  %v9046_v2 = vld [vmem:[%s14876_s5 + $0x19c] sm:$0xf] }
  0x33   :  { %728 = vmatpush.bf16.msra.mxu3 %v7333_v18  ;;  %680 = vmatpush.bf16.msrb.mxu1 %v7197_v25  ;;  %v7565_v18 = vor.u32 %v9090_v6, %v7564_v5  ;;  %v9082_v21 = vld [vmem:[%s14876_s5 + $0x2b4] sm:$0xf0]  ;;  %v7405_v25 = vor.u32 %v9050_v17, %v7404_v16  ;;  %v7270_v27 = vld [vmem:[%s14876_s5 + $0xb0] sm:$0xf0]  ;;  %v7406_v3 = vld [vmem:[%s14876_s5 + $0x1b8] sm:$0xf0] }
  0x34   :  { %7573 = vmatmul.msk.bf16.vlgmr.msrb.gmra.mxu2 %vm617_vm0, %v9855_v36  ;;  %v7372_v28 = vld [vmem:[%s14876_s5 + $0x158] sm:$0xf]  ;;  %v7273_v34 = vor.u32 %v9013_v26, %v7270_v27  ;;  %v9069_v35 = vld [vmem:[%s14876_s5 + $0x254] sm:$0xf]  ;;  %v9078_v6 = vld [vmem:[%s14876_s5 + $0x29c] sm:$0xf]  ;;  %v7409_v9 = vor.u32 %v9046_v2, %v7406_v3 }
  0x35   :  { %751 = vmatpush.bf16.msra.mxu2 %v7433_v30  ;;  %703 = vmatpush.bf16.msrb.mxu0 %v7297_v37  ;;  %v7533_v30 = vor.u32 %v9082_v21, %v7532_v20  ;;  %v9074_v33 = vld [vmem:[%s14876_s5 + $0x274] sm:$0xf0]  ;;  %v7494_v37 = vld [vmem:[%s14876_s5 + $0x270] sm:$0xf0]  ;;  %v9070_v16 = vld [vmem:[%s14876_s5 + $0x25c] sm:$0xf] }
  0x36   :  { %681 = vmatmul.bf16.vlgmr.msrb.gmra.mxu1 %v9894_v56  ;;  %v9005_v39 = vld [vmem:[%s14876_s5 + $0x54] sm:$0xf]  ;;  %v7340_v41 = vld [vmem:[%s14876_s5 + $0x118] sm:$0xf]  ;;  %v7497_v44 = vor.u32 %v9069_v35, %v7494_v37  ;;  %v7502_v17 = vld [vmem:[%s14876_s5 + $0x278] sm:$0xf0] }
  0x37   :  { %742 = vmatpush.bf16.msra.mxu1 %v7557_v29  ;;  %729 = vmatpush.bf16.msra.mxu3 %v7301_v32  ;;  %v9042_v29 = vld [vmem:[%s14876_s5 + $0x174] sm:$0xf0]  ;;  %v7238_v40 = vld [vmem:[%s14876_s5 + $0x70] sm:$0xf0]  ;;  %v9030_v21 = vld [vmem:[%s14876_s5 + $0x11c] sm:$0xf]  ;;  %v7505_v24 = vor.u32 %v9070_v16, %v7502_v17 }
  0x38   :  { %v7500_v32 = vld [vmem:[%s14876_s5 + $0x258] sm:$0xf]  ;;  %v7373_v38 = vor.u32 %v9042_v29, %v7372_v28  ;;  %v7241_v48 = vor.u32 %v9005_v39, %v7238_v40  ;;  %v9061_v50 = vld [vmem:[%s14876_s5 + $0x214] sm:$0xf]  ;;  %v10226_v23 = vld [vmem:[%s14878_s6 + $0x68] sm:$0xff] }
  0x39   :  { %752 = vmatpush.bf16.msra.mxu2 %v7401_v43  ;;  %704 = vmatpush.bf16.msrb.mxu0 %v7265_v49  ;;  %v7501_v43 = vor.u32 %v9074_v33, %v7500_v32  ;;  %v7468_v46 = vld [vmem:[%s14876_s5 + $0x218] sm:$0xf]  ;;  %v7206_v49 = vld [vmem:[%s14876_s5 + $0x30] sm:$0xf0]  ;;  %v9062_v27 = vld [vmem:[%s14876_s5 + $0x21c] sm:$0xf] }
  0x3a   :  { %v9066_v47 = vld [vmem:[%s14876_s5 + $0x234] sm:$0xf0]  ;;  %v7462_v51 = vld [vmem:[%s14876_s5 + $0x230] sm:$0xf0]  ;;  %v7470_v28 = vld [vmem:[%s14876_s5 + $0x238] sm:$0xf0] }
  0x3b   :  { %743 = vmatpush.bf16.msra.mxu1 %v7525_v42  ;;  %730 = vmatpush.bf16.msra.mxu3 %v7269_v45  ;;  %v9034_v42 = vld [vmem:[%s14876_s5 + $0x134] sm:$0xf0]  ;;  %v8997_v45 = vld [vmem:[%s14876_s5 + $0x14] sm:$0xf]  ;;  %v7465_v61 = vor.u32 %v9061_v50, %v7462_v51  ;;  %v10244_v29 = vld [vmem:[%s14878_s6 + $0x60] sm:$0xff]  ;;  %v7473_v35 = vor.u32 %v9062_v27, %v7470_v28 }
  0x3c   :  { %v7341_v52 = vor.u32 %v9034_v42, %v7340_v41  ;;  %v7308_v53 = vld [vmem:[%s14876_s5 + $0xd8] sm:$0xf]  ;;  %v7209_v62 = vor.u32 %v8997_v45, %v7206_v49  ;;  %v9022_v32 = vld [vmem:[%s14876_s5 + $0xdc] sm:$0xf]  ;;  %v10268_v39 = vld [vmem:[%s14878_s6 + $0x50] sm:$0xff] }
  0x3d   :  { %753 = vmatpush.bf16.msra.mxu2 %v7369_v55  ;;  %705 = vmatpush.bf16.msrb.mxu0 %v7233_v0  ;;  %v7438_v55 = vld [vmem:[%s14876_s5 + $0x1f8] sm:$0xf0]  ;;  %v9026_v57 = vld [vmem:[%s14876_s5 + $0xf4] sm:$0xf0]  ;;  %v10280_v42 = vld [vmem:[%s14878_s6 + $0xf0] sm:$0xff] }
  0x3e   :  { %v7309_v0 = vor.u32 %v9026_v57, %v7308_v53  ;;  %v7276_v4 = vld [vmem:[%s14876_s5 + $0x98] sm:$0xf]  ;;  %v7310_v33 = vld [vmem:[%s14876_s5 + $0xf8] sm:$0xf0]  ;;  %v10303_v50 = vld [vmem:[%s14878_s6 + $0x48] sm:$0xff] }
  0x3f   :  { %744 = vmatpush.bf16.msra.mxu1 %v7493_v54  ;;  %731 = vmatpush.bf16.msra.mxu3 %v7237_v60  ;;  %v9054_v54 = vld [vmem:[%s14876_s5 + $0x1dc] sm:$0xf]  ;;  %v7469_v60 = vor.u32 %v9066_v47, %v7468_v46  ;;  %v9018_v5 = vld [vmem:[%s14876_s5 + $0xb4] sm:$0xf0]  ;;  %v10330_v53 = vld [vmem:[%s14878_s6 + $0x170] sm:$0xff] }
  0x40   :  { %v7441_v63 = vor.u32 %v9054_v54, %v7438_v55  ;;  %v7277_v10 = vor.u32 %v9018_v5, %v7276_v4  ;;  %v7244_v14 = vld [vmem:[%s14876_s5 + $0x58] sm:$0xf]  ;;  %v9014_v40 = vld [vmem:[%s14876_s5 + $0x9c] sm:$0xf]  ;;  %v10348_v57 = vld [vmem:[%s14878_s6 + $0x168] sm:$0xff] }
  0x41   :  { %754 = vmatpush.bf16.msra.mxu2 %v7337_v8  ;;  %706 = vmatpush.bf16.msrb.mxu0 %v7201_v15  ;;  %v10186_v8 = vld [vmem:[%s14878_s6 + $0x78] sm:$0xff]  ;;  %v10357_v58 = vld [vmem:[%s14878_s6 + $0x30] sm:$0xff]  ;;  %v10421_v5 = vld [vmem:[%s14878_s6 + $0x148] sm:$0xff] }
  0x42   :  { %v9010_v15 = vld [vmem:[%s14876_s5 + $0x74] sm:$0xf0]  ;;  %v7278_v41 = vld [vmem:[%s14876_s5 + $0xb8] sm:$0xf0]  ;;  %v10362_v59 = vld [vmem:[%s14878_s6 + $0xd0] sm:$0xff] }
  0x43   :  { %745 = vmatpush.bf16.msra.mxu1 %v7461_v7  ;;  %732 = vmatpush.bf16.msra.mxu3 %v7205_v11  ;;  %v7534_v7 = vld [vmem:[%s14876_s5 + $0x2b8] sm:$0xf0]  ;;  %v7245_v20 = vor.u32 %v9010_v15, %v7244_v14  ;;  %v9002_v26 = vld [vmem:[%s14876_s5 + $0x34] sm:$0xf0]  ;;  %v10403_v2 = vld [vmem:[%s14878_s6 + $0x150] sm:$0xff] }
  0x44   :  { %707 = vmatmul.bf16.vlgmr.msrb.gmra.mxu0 %v9894_v56  ;;  %v9038_v11 = vld [vmem:[%s14876_s5 + $0x15c] sm:$0xf]  ;;  %v7537_v13 = vor.u32 %v9078_v6, %v7534_v7  ;;  %v10429_v6 = vld [vmem:[%s14878_s6 + $0x10] sm:$0xff]  ;;  %v10471_v14 = vld [vmem:[%s14878_s6] sm:$0xff] }
  0x45   :  { %768 = vmatpush.bf16.msra.mxu0 %v7561_v19  ;;  %755 = vmatpush.bf16.msra.mxu2 %v7305_v22  ;;  %v7342_v22 = vld [vmem:[%s14876_s5 + $0x138] sm:$0xf0]  ;;  %v10434_v7 = vld [vmem:[%s14878_s6 + $0xb0] sm:$0xff]  ;;  %v10476_v15 = vld [vmem:[%s14878_s6 + $0xa0] sm:$0xff] }
  0x46   :  { %733 = vmatmul.bf16.vlgmr.msra.gmra.mxu3 %v9894_v56  ;;  %7574 = vmatmul.msk.bf16.vlgmr.msra.gmra.mxu1 %vm617_vm0, %v9855_v36  ;;  %v10262_v37 = vld [vmem:[%s14878_s6 + $0xf8] sm:$0xff]  ;;  %14982 = vst [vmem:[#allocation4_spill] sm:$0xff] %v10434_v7  ;;  %v10481_v16 = vld [vmem:[%s14878_s6 + $0x130] sm:$0xff]  ;;  %v10534_v27 = vld [vmem:[%s14878_s6 + $0x1e0] sm:$0xff] }
  0x47   :  { %777 = vmatpush.bf16.msrb.mxu1 %v7437_v12  ;;  %794 = vmatpush.bf16.msrb.mxu3 %v7565_v18  ;;  %v7374_v12 = vld [vmem:[%s14876_s5 + $0x178] sm:$0xf0]  ;;  %v10211_v18 = vld [vmem:[%s14878_s6 + $0x70] sm:$0xff]  ;;  %14985 = vst [vmem:[#allocation7_spill] sm:$0xff] %v10476_v15  ;;  %v10541_v28 = vld [vmem:[%s14878_s6 + $0x268] sm:$0xff] }
  0x48   :  { %v7377_v19 = vor.u32 %v9038_v11, %v7374_v12  ;;  %v7246_v45 = vld [vmem:[%s14876_s5 + $0x78] sm:$0xf0]  ;;  %v10452_v11 = vld [vmem:[%s14878_s6 + $0xa8] sm:$0xff]  ;;  %14986 = vst [vmem:[#allocation8_spill] sm:$0xff] %v10481_v16  ;;  %v10488_v17 = vld [vmem:[%s14878_s6 + $0x1f0] sm:$0xff] }
  0x49   :  { %769 = vmatpush.bf16.msra.mxu0 %v7529_v31  ;;  %756 = vmatpush.bf16.msra.mxu2 %v7273_v34  ;;  %v10256_v34 = vld [vmem:[%s14878_s6 + $0x58] sm:$0xff]  ;;  %14983 = vst [vmem:[#allocation5_spill] sm:$0xff] %v10452_v11 }
  0x4a   :  { %v8998_v47 = vld [vmem:[%s14876_s5 + $0x1c] sm:$0xf]  ;;  %14992 = vst [vmem:[#allocation14_spill] sm:$0xff] %v10534_v27 }
  0x4b   :  { %778 = vmatpush.bf16.msrb.mxu1 %v7405_v25  ;;  %795 = vmatpush.bf16.msrb.mxu3 %v7533_v30  ;;  %v7212_v25 = vld [vmem:[%s14876_s5 + $0x18] sm:$0xf]  ;;  %v7345_v30 = vor.u32 %v9030_v21, %v7342_v22  ;;  %v10505_v21 = vld [vmem:[%s14878_s6 + $0x128] sm:$0xff] }
  0x4c   :  { %v7213_v31 = vor.u32 %v9002_v26, %v7212_v25  ;;  %v10313_v51 = vld [vmem:[%s14878_s6 + $0x178] sm:$0xff]  ;;  %14988 = vst [vmem:[#allocation10_spill] sm:$0xff] %v10505_v21  ;;  %v10510_v22 = vld [vmem:[%s14878_s6 + $0x1e8] sm:$0xff]  ;;  %v10524_v25 = vld [vmem:[%s14878_s6 + $0x90] sm:$0xff] }
  0x4d   :  { %770 = vmatpush.bf16.msra.mxu0 %v7497_v44  ;;  %757 = vmatpush.bf16.msra.mxu2 %v7241_v48  ;;  %v9006_v44 = vld [vmem:[%s14876_s5 + $0x5c] sm:$0xf]  ;;  %14989 = vst [vmem:[#allocation11_spill] sm:$0xff] %v10510_v22  ;;  %v10529_v26 = vld [vmem:[%s14878_s6 + $0x120] sm:$0xff] }
  0x4e   :  { %v7249_v46 = vor.u32 %v9006_v44, %v7246_v45  ;;  %v7214_v48 = vld [vmem:[%s14876_s5 + $0x38] sm:$0xf0]  ;;  %14990 = vst [vmem:[#allocation12_spill] sm:$0xff] %v10524_v25  ;;  %v10596_v44 = vld [vmem:[%s14878_s6 + $0x108] sm:$0xff] }
  0x4f   :  { %779 = vmatpush.bf16.msrb.mxu1 %v7373_v38  ;;  %796 = vmatpush.bf16.msrb.mxu3 %v7501_v43  ;;  %v7313_v38 = vor.u32 %v9022_v32, %v7310_v33  ;;  %v7281_v43 = vor.u32 %v9014_v40, %v7278_v41  ;;  %v7217_v49 = vor.u32 %v8998_v47, %v7214_v48  ;;  %v10336_v54 = vld [vmem:[%s14878_s6 + $0x38] sm:$0xff]  ;;  %v10565_v33 = vld [vmem:[%s14878_s6 + $0x260] sm:$0xff]  ;;  %v10582_v40 = vld [vmem:[%s14878_s6 + $0x1d0] sm:$0xff] }
  0x50   :  { %v10341_v55 = vld [vmem:[%s14878_s6 + $0xd8] sm:$0xff]  ;;  %14991 = vst [vmem:[#allocation13_spill] sm:$0xff] %v10529_v26  ;;  %v10601_v45 = vld [vmem:[%s14878_s6 + $0x1c8] sm:$0xff]  ;;  %v10612_v47 = vld [vmem:[%s14878_s6 + $0x100] sm:$0xff] }
  0x51   :  { %771 = vmatpush.bf16.msra.mxu0 %v7465_v61  ;;  %758 = vmatpush.bf16.msra.mxu2 %v7209_v62  ;;  %v10375_v61 = vld [vmem:[%s14878_s6 + $0x28] sm:$0xff]  ;;  %v10411_v3 = vld [vmem:[%s14878_s6 + $0x18] sm:$0xff]  ;;  %14998 = vst [vmem:[#allocation20_spill] sm:$0xff] %v10582_v40  ;;  %v10617_v48 = vld [vmem:[%s14878_s6 + $0x1c0] sm:$0xff] }
  0x52   :  { %v10380_v62 = vld [vmem:[%s14878_s6 + $0xc8] sm:$0xff]  ;;  %v10416_v4 = vld [vmem:[%s14878_s6 + $0xb8] sm:$0xff]  ;;  %14999 = vst [vmem:[#allocation21_spill] sm:$0xff] %v10596_v44 }
  0x53   :  { %780 = vmatpush.bf16.msrb.mxu1 %v7341_v52  ;;  %797 = vmatpush.bf16.msrb.mxu3 %v7469_v60  ;;  %v10325_v52 = vld [vmem:[%s14878_s6 + $0xe0] sm:$0xff]  ;;  %14981 = vst [vmem:[#allocation3_spill] sm:$0xff] %v10416_v4  ;;  %v10457_v12 = vld [vmem:[%s14878_s6 + $0x138] sm:$0xff] }
  0x54   :  { %759 = vmatmul.bf16.vlgmr.msra.gmra.mxu2 %v9894_v56  ;;  %7575 = vmatmul.msk.bf16.vlgmr.msra.gmra.mxu0 %vm617_vm0, %v9855_v36  ;;  %v10367_v60 = vld [vmem:[%s14878_s6 + $0x160] sm:$0xff]  ;;  %14984 = vst [vmem:[#allocation6_spill] sm:$0xff] %v10457_v12  ;;  %v10558_v32 = vld [vmem:[%s14878_s6 + $0x1d8] sm:$0xff] }
  0x55   :  { %803 = vmatpush.bf16.msrb.mxu0 %v7441_v63  ;;  %820 = vmatpush.bf16.msrb.mxu2 %v7569_v1  ;;  %v10385_v63 = vld [vmem:[%s14878_s6 + $0x158] sm:$0xff]  ;;  %v10398_v1 = vld [vmem:[%s14878_s6 + $0xc0] sm:$0xff]  ;;  %14995 = vst [vmem:[#allocation17_spill] sm:$0xff] %v10558_v32 }
  0x56   :  { %7576 = vmatmul.msk.bf16.vlgmr.msrb.gmra.mxu3 %vm617_vm0, %v9855_v36  ;;  %14980 = vst [vmem:[#allocation2_spill] sm:$0xff] %v10398_v1  ;;  %v10589_v41 = vld [vmem:[%s14878_s6 + $0x258] sm:$0xff] }
  0x57   :  { %781 = vmatpush.bf16.msrb.mxu1 %v7309_v0  ;;  %1038 = vmatpush.msra.mxu3 %v10186_v8  ;;  %v10393_v0 = vld [vmem:[%s14878_s6 + $0x20] sm:$0xff]  ;;  %15000 = vst [vmem:[#allocation22_spill] sm:$0xff] %v10601_v45 }
  0x58   :  { %15001 = vst [vmem:[#allocation23_spill] sm:$0xff] %v10612_v47 }
  0x59   :  { %804 = vmatpush.bf16.msrb.mxu0 %v7409_v9  ;;  %821 = vmatpush.bf16.msrb.mxu2 %v7537_v13  ;;  %v10439_v9 = vld [vmem:[%s14878_s6 + $0x140] sm:$0xff]  ;;  %v10464_v13 = vld [vmem:[%s14878_s6 + $0x1f8] sm:$0xff]  ;;  %15002 = vst [vmem:[#allocation24_spill] sm:$0xff] %v10617_v48 }
  0x5a   :  { %1039 = vmatpush.msra.mxu3 %v10211_v18 }
  0x5b   :  { %782 = vmatpush.bf16.msrb.mxu1 %v7277_v10  ;;  %v10447_v10 = vld [vmem:[%s14878_s6 + $0x8] sm:$0xff] }
  0x5c   :  { %1040 = vmatpush.msra.mxu3 %v10226_v23 }
  0x5d   :  { %805 = vmatpush.bf16.msrb.mxu0 %v7377_v19  ;;  %822 = vmatpush.bf16.msrb.mxu2 %v7505_v24  ;;  %v10493_v19 = vld [vmem:[%s14878_s6 + $0x278] sm:$0xff]  ;;  %v10517_v24 = vld [vmem:[%s14878_s6 + $0x270] sm:$0xff] }
  0x5e   :  { %1041 = vmatpush.msra.mxu3 %v10244_v29 }
  0x5f   :  { %783 = vmatpush.bf16.msrb.mxu1 %v7245_v20  ;;  %v10500_v20 = vld [vmem:[%s14878_s6 + $0x98] sm:$0xff] }
  0x60   :  { %1042 = vmatpush.msra.mxu3 %v10256_v34  ;;  %14987 = vst [vmem:[#allocation9_spill] sm:$0xff] %v10500_v20 }
  0x61   :  { %806 = vmatpush.bf16.msrb.mxu0 %v7345_v30  ;;  %823 = vmatpush.bf16.msrb.mxu2 %v7473_v35  ;;  %v10548_v30 = vld [vmem:[%s14878_s6 + $0x88] sm:$0xff]  ;;  %v10572_v35 = vld [vmem:[%s14878_s6 + $0x80] sm:$0xff] }
  0x62   :  { %1043 = vmatpush.msra.mxu3 %v10268_v39  ;;  %14993 = vst [vmem:[#allocation15_spill] sm:$0xff] %v10548_v30 }
  0x63   :  { %784 = vmatpush.bf16.msrb.mxu1 %v7213_v31  ;;  %v10553_v31 = vld [vmem:[%s14878_s6 + $0x118] sm:$0xff]  ;;  %14996 = vst [vmem:[#allocation18_spill] sm:$0xff] %v10572_v35 }
  0x64   :  { %7577 = vmatmul.msk.bf16.vlgmr.msrb.gmra.mxu2 %vm617_vm0, %v9855_v36  ;;  %v10308_v36 = vld [vmem:[%s14878_s6 + $0xe8] sm:$0xff]  ;;  %1044 = vmatpush.msra.mxu3 %v10303_v50  ;;  %14994 = vst [vmem:[#allocation16_spill] sm:$0xff] %v10553_v31 }
  0x65   :  { %807 = vmatpush.bf16.msrb.mxu0 %v7313_v38  ;;  %1078 = vmatpush.msra.mxu2 %v10313_v51  ;;  %v10577_v38 = vld [vmem:[%s14878_s6 + $0x110] sm:$0xff] }
  0x66   :  { %785 = vmatmul.bf16.vlgmr.msrb.gmra.mxu1 %v9894_v56  ;;  %14997 = vst [vmem:[#allocation19_spill] sm:$0xff] %v10577_v38 }
  0x67   :  { %1058 = vmatpush.msra.mxu1 %v10262_v37  ;;  %1079 = vmatpush.msra.mxu2 %v10330_v53 }
  0x69   :  { %1059 = vmatpush.msra.mxu1 %v10280_v42  ;;  %808 = vmatpush.bf16.msrb.mxu0 %v7281_v43 }
  0x6a   :  { %1080 = vmatpush.msra.mxu2 %v10348_v57 }
  0x6b   :  { %1060 = vmatpush.msra.mxu1 %v10308_v36 }
  0x6c   :  { %1081 = vmatpush.msra.mxu2 %v10367_v60 }
  0x6d   :  { %809 = vmatpush.bf16.msrb.mxu0 %v7249_v46  ;;  %1061 = vmatpush.msra.mxu1 %v10325_v52  ;;  %v10606_v46 = vld [vmem:[%s14878_s6 + $0x250] sm:$0xff] }
  0x6e   :  { %1082 = vmatpush.msra.mxu2 %v10385_v63 }
  0x6f   :  { %1062 = vmatpush.msra.mxu1 %v10341_v55 }
  0x70   :  { %1083 = vmatpush.msra.mxu2 %v10403_v2 }
  0x71   :  { %810 = vmatpush.bf16.msrb.mxu0 %v7217_v49  ;;  %1063 = vmatpush.msra.mxu1 %v10362_v59  ;;  %v10625_v49 = vld [vmem:[%s14878_s6 + $0x248] sm:$0xff] }
  0x72   :  { %1084 = vmatpush.msra.mxu2 %v10421_v5 }
  0x73   :  { %1064 = vmatpush.msra.mxu1 %v10380_v62 }
  0x74   :  { %811 = vmatmul.bf16.vlgmr.msrb.gmra.mxu0 %v9894_v56  ;;  %v10320_v56 = vld [vmem:[%s14878_s6 + $0x40] sm:$0xff]  ;;  %1085 = vmatpush.msra.mxu2 %v10439_v9 }
  0x75   :  { %1045 = vmatpush.msra.mxu3 %v10320_v56  ;;  %1065 = vmatpush.msra.mxu1 %v10398_v1 }
  0x76   :  { %1086 = vmatpush.msra.mxu2 %v10457_v12  ;;  %1098 = vmatpush.msra.mxu0 %v10464_v13 }
  0x77   :  { %1046 = vmatpush.msra.mxu3 %v10336_v54  ;;  %1066 = vmatpush.msra.mxu1 %v10416_v4 }
  0x78   :  { %1087 = vmatpush.msra.mxu2 %v10481_v16  ;;  %1099 = vmatpush.msra.mxu0 %v10488_v17 }
  0x79   :  { %1047 = vmatpush.msra.mxu3 %v10357_v58  ;;  %1067 = vmatpush.msra.mxu1 %v10434_v7 }
  0x7a   :  { %1088 = vmatpush.msra.mxu2 %v10505_v21  ;;  %1100 = vmatpush.msra.mxu0 %v10510_v22 }
  0x7b   :  { %1048 = vmatpush.msra.mxu3 %v10375_v61  ;;  %1068 = vmatpush.msra.mxu1 %v10452_v11  ;;  %v10710_v11 = vld [vmem:[%s14878_s6 + $0x220] sm:$0xff] }
  0x7c   :  { %1089 = vmatpush.msra.mxu2 %v10529_v26  ;;  %1101 = vmatpush.msra.mxu0 %v10534_v27  ;;  %v10704_v26 = vld [vmem:[%s14878_s6 + $0x198] sm:$0xff] }
  0x7d   :  { %1049 = vmatpush.msra.mxu3 %v10393_v0  ;;  %1069 = vmatpush.msra.mxu1 %v10476_v15  ;;  %v10690_v15 = vld [vmem:[%s14878_s6 + $0x228] sm:$0xff]  ;;  %15012 = vst [vmem:[#allocation34_spill] sm:$0xff] %v10704_v26 }
  0x7e   :  { %1090 = vmatpush.msra.mxu2 %v10553_v31  ;;  %1102 = vmatpush.msra.mxu0 %v10558_v32 }
  0x7f   :  { %1050 = vmatpush.msra.mxu3 %v10411_v3  ;;  %1070 = vmatpush.msra.mxu1 %v10500_v20 }
  0x80   :  { %1091 = vmatpush.msra.mxu2 %v10577_v38  ;;  %1103 = vmatpush.msra.mxu0 %v10582_v40  ;;  %v10640_v38 = vld [vmem:[%s14878_s6 + $0x240] sm:$0xff] }
  0x81   :  { %1051 = vmatpush.msra.mxu3 %v10429_v6  ;;  %1071 = vmatpush.msra.mxu1 %v10524_v25 }
  0x82   :  { %1092 = vmatpush.msra.mxu2 %v10596_v44  ;;  %1104 = vmatpush.msra.mxu0 %v10601_v45  ;;  %v10632_v44 = vld [vmem:[%s14878_s6 + $0x1b8] sm:$0xff]  ;;  %v10672_v45 = vld [vmem:[%s14878_s6 + $0x230] sm:$0xff] }
  0x83   :  { %1052 = vmatpush.msra.mxu3 %v10447_v10  ;;  %1072 = vmatpush.msra.mxu1 %v10548_v30  ;;  %15003 = vst [vmem:[#allocation25_spill] sm:$0xff] %v10632_v44 }
  0x84   :  { %1093 = vmatpush.msra.mxu2 %v10612_v47  ;;  %1105 = vmatpush.msra.mxu0 %v10617_v48  ;;  %v10646_v47 = vld [vmem:[%s14878_s6 + $0x1b0] sm:$0xff] }
  0x85   :  { %1053 = vmatpush.msra.mxu3 %v10471_v14  ;;  %1073 = vmatpush.msra.mxu1 %v10572_v35  ;;  %15005 = vst [vmem:[#allocation27_spill] sm:$0xff] %v10646_v47 }
  0x86   :  { %1106 = vmatpush.msra.mxu0 %v10632_v44 }
  0x87   :  { %1118 = vmatpush.msrb.mxu3 %v10493_v19 }
  0x88   :  { %1107 = vmatpush.msra.mxu0 %v10646_v47 }
  0x89   :  { %1119 = vmatpush.msrb.mxu3 %v10517_v24 }
  0x8b   :  { %1120 = vmatpush.msrb.mxu3 %v10541_v28 }
  0x8d   :  { %1121 = vmatpush.msrb.mxu3 %v10565_v33 }
  0x8f   :  { %1122 = vmatpush.msrb.mxu3 %v10589_v41 }
  0x91   :  { %1123 = vmatpush.msrb.mxu3 %v10606_v46 }
  0x93   :  { %1124 = vmatpush.msrb.mxu3 %v10625_v49 }
  0x95   :  { %1125 = vmatpush.msrb.mxu3 %v10640_v38 }
  0x9d   :  { %v643_v43 = vpop.f32.mrf.mxu1 }
  0xa1   :  { %v630_v30 = vpop.f32.mrf.mxu0 }
  0xa2   :  { %v10634_v25 = vadd.f32 %v643_v43, %v630_v30  ;;  %v10654_v30 = vld [vmem:[%s14878_s6 + $0x238] sm:$0xff] }
  0xa3   :  { %v669_v35 = vpop.f32.mrf.mxu3  ;;  %v10659_v43 = vld [vmem:[%s14878_s6 + $0x2f8] sm:$0xff]  ;;  %1126 = vmatpush.msrb.mxu3 %v10654_v30 }
  0xa4   :  { %15004 = vst [vmem:[#allocation26_spill] sm:$0xff] %v10634_v25  ;;  %v982_v48 = vsel %vm981_vm1, %v10634_v25, 0.0  ;;  %1138 = vmatpush.msrb.mxu1 %v10659_v43  ;;  %v10666_v25 = vld [vmem:[%s14878_s6 + $0x1a8] sm:$0xff] }
  0xa5   :  { %15006 = vst [vmem:[#allocation28_spill] sm:$0xff] %v10659_v43  ;;  %v983_v44 = vrot.slane %v982_v48, 4  ;;  %v645_v20 = vpop.f32.mrf.mxu1  ;;  %1108 = vmatpush.msra.mxu0 %v10666_v25  ;;  %v10684_v43 = vld [vmem:[%s14878_s6 + $0x1a0] sm:$0xff]  ;;  %1127 = vmatpush.msrb.mxu3 %v10672_v45 }
  0xa6   :  { %15007 = vst [vmem:[#allocation29_spill] sm:$0xff] %v10666_v25  ;;  %v10677_v20 = vld [vmem:[%s14878_s6 + $0x2f0] sm:$0xff] }
  0xa7   :  { %15008 = vst [vmem:[#allocation30_spill] sm:$0xff] %v10677_v20  ;;  %v984_v47 = vadd.f32 %v983_v44, %v982_v48  ;;  %1139 = vmatpush.msrb.mxu1 %v10677_v20  ;;  %v656_v31 = vpop.f32.mrf.mxu2  ;;  %v10695_v44 = vld [vmem:[%s14878_s6 + $0x2e8] sm:$0xff]  ;;  %1109 = vmatpush.msra.mxu0 %v10684_v43 }
  0xa8   :  { %15009 = vst [vmem:[#allocation31_spill] sm:$0xff] %v10684_v43  ;;  %v10697_v25 = vadd.f32 %v669_v35, %v656_v31  ;;  %1128 = vmatpush.msrb.mxu3 %v10690_v15  ;;  %v10715_v31 = vld [vmem:[%s14878_s6 + $0x2e0] sm:$0xff] }
  0xa9   :  { %15010 = vst [vmem:[#allocation32_spill] sm:$0xff] %v10695_v44  ;;  %v985_v48 = vrot.slane %v984_v47, 2  ;;  %v632_v40 = vpop.f32.mrf.mxu0  ;;  %1140 = vmatpush.msrb.mxu1 %v10695_v44  ;;  %1110 = vmatpush.msra.mxu0 %v10704_v26  ;;  %v10729_v44 = vld [vmem:[%s14878_s6 + $0x378] sm:$0xff]  ;;  %v10753_v26 = vld [vmem:[%s14878_s6 + $0x370] sm:$0xff] }
  0xaa   :  { %15011 = vst [vmem:[#allocation33_spill] sm:$0xff] %v10697_v25  ;;  %v989_v40 = vsel %vm981_vm1, %v10697_v25, 0.0  ;;  %1129 = vmatpush.msrb.mxu3 %v10710_v11  ;;  %1158 = vmatpush.msrb.mxu2 %v10729_v44 }
  0xab   :  { %v671_v20 = vpop.f32.mrf.mxu3  ;;  %15013 = vst [vmem:[#allocation35_spill] sm:$0xff] %v10715_v31  ;;  %v986_v35 = vadd.f32 %v985_v48, %v984_v47  ;;  %1141 = vmatpush.msrb.mxu1 %v10715_v31  ;;  %v990_v43 = vrot.slane %v989_v40, 4  ;;  %v10736_v47 = vld [vmem:[%s14878_s6 + $0x218] sm:$0xff]  ;;  %v10748_v31 = vld [vmem:[%s14878_s6 + $0x188] sm:$0xff] }
  0xac   :  { %v10724_v20 = vld [vmem:[%s14878_s6 + $0x190] sm:$0xff]  ;;  %15015 = vst [vmem:[#allocation37_spill] sm:$0xff] %v10729_v44  ;;  %v10741_v48 = vld [vmem:[%s14878_s6 + $0x2d8] sm:$0xff]  ;;  %1130 = vmatpush.msrb.mxu3 %v10736_v47  ;;  %1159 = vmatpush.msrb.mxu2 %v10753_v26 }
  0xad   :  { %15014 = vst [vmem:[#allocation36_spill] sm:$0xff] %v10724_v20  ;;  %v987_v25 = vrot.slane %v986_v35, 1  ;;  %1111 = vmatpush.msra.mxu0 %v10724_v20  ;;  %1142 = vmatpush.msrb.mxu1 %v10741_v48  ;;  %v991_v44 = vadd.f32 %v990_v43, %v989_v40  ;;  %v10760_v20 = vld [vmem:[%s14878_s6 + $0x210] sm:$0xff]  ;;  %v10772_v43 = vld [vmem:[%s14878_s6 + $0x180] sm:$0xff]  ;;  %v10777_v40 = vld [vmem:[%s14878_s6 + $0x368] sm:$0xff] }
  0xae   :  { %15016 = vst [vmem:[#allocation38_spill] sm:$0xff] %v10741_v48  ;;  %v10765_v48 = vld [vmem:[%s14878_s6 + $0x2d0] sm:$0xff]  ;;  %1131 = vmatpush.msrb.mxu3 %v10760_v20  ;;  %1160 = vmatpush.msrb.mxu2 %v10777_v40 }
  0xaf   :  { %15017 = vst [vmem:[#allocation39_spill] sm:$0xff] %v10748_v31  ;;  %v988_v21 = vadd.f32 %v987_v25, %v986_v35  ;;  %1112 = vmatpush.msra.mxu0 %v10748_v31  ;;  %1143 = vmatpush.msrb.mxu1 %v10765_v48  ;;  %v992_v25 = vrot.slane %v991_v44, 2  ;;  %v658_v35 = vpop.f32.mrf.mxu2  ;;  %v10794_v31 = vld [vmem:[%s14878_s6 + $0x360] sm:$0xff] }
  0xb0   :  { %15018 = vst [vmem:[#allocation40_spill] sm:$0xff] %v10753_v26  ;;  %v10782_v26 = vld [vmem:[%s14878_s6 + $0x208] sm:$0xff]  ;;  %v10800_v35 = vld [vmem:[%s14878_s6 + $0x200] sm:$0xff]  ;;  %1161 = vmatpush.msrb.mxu2 %v10794_v31 }
  0xb1   :  { %15019 = vst [vmem:[#allocation41_spill] sm:$0xff] %v10765_v48  ;;  %v10789_v48 = vld [vmem:[%s14878_s6 + $0x2c8] sm:$0xff]  ;;  %1054 = vmatmul.f32.vlgmr.msra.gmra.mxu3 %v988_v21  ;;  %1113 = vmatpush.msra.mxu0 %v10772_v43  ;;  %v993_v27 = vadd.f32 %v992_v25, %v991_v44  ;;  %v10815_v21 = vld [vmem:[%s14878_s6 + $0x358] sm:$0xff]  ;;  %v10830_v44 = vld [vmem:[%s14878_s6 + $0x350] sm:$0xff] }
  0xb2   :  { %15020 = vst [vmem:[#allocation42_spill] sm:$0xff] %v10772_v43  ;;  %1132 = vmatpush.msrb.mxu3 %v10782_v26  ;;  %1144 = vmatpush.msrb.mxu1 %v10789_v48 }
  0xb3   :  { %v682_v32 = vpop.f32.mrf.mxu1  ;;  %15021 = vst [vmem:[#allocation43_spill] sm:$0xff] %v10777_v40  ;;  %v695_v7 = vpop.f32.mrf.mxu3  ;;  %v10805_v40 = vld [vmem:[%s14878_s6 + $0x2c0] sm:$0xff]  ;;  %v994_v43 = vrot.slane %v993_v27, 1  ;;  %1162 = vmatpush.msrb.mxu2 %v10815_v21 }
  0xb4   :  { %15022 = vst [vmem:[#allocation44_spill] sm:$0xff] %v10789_v48  ;;  %v10807_v16 = vadd.f32 %v695_v7, %v682_v32  ;;  %1133 = vmatpush.msrb.mxu3 %v10800_v35  ;;  %1145 = vmatpush.msrb.mxu1 %v10805_v40  ;;  %v10824_v7 = vld [vmem:[%s14878_s6 + $0x2b8] sm:$0xff] }
  0xb5   :  { %15023 = vst [vmem:[#allocation45_spill] sm:$0xff] %v10794_v31  ;;  %v995_v25 = vadd.f32 %v994_v43, %v993_v27  ;;  %1163 = vmatpush.msrb.mxu2 %v10830_v44  ;;  %v10847_v27 = vld [vmem:[%s14878_s6 + $0x2a8] sm:$0xff] }
  0xb6   :  { %15024 = vst [vmem:[#allocation46_spill] sm:$0xff] %v10805_v40  ;;  %v996_v4 = vsel %vm981_vm1, %v10807_v16, 0.0  ;;  %1146 = vmatpush.msrb.mxu1 %v10824_v7 }
  0xb7   :  { %15025 = vst [vmem:[#allocation47_spill] sm:$0xff] %v10807_v16  ;;  %v997_v32 = vrot.slane %v996_v4, 4  ;;  %v10836_v16 = vld [vmem:[%s14878_s6 + $0x2b0] sm:$0xff]  ;;  %1074 = vmatmul.f32.vlgmr.msra.gmra.mxu1 %v995_v25  ;;  %v721_v31 = vpop.f32.mrf.mxu2  ;;  %v10871_v25 = vld [vmem:[%s14878_s6 + $0x3f8] sm:$0xff] }
  0xb8   :  { %15026 = vst [vmem:[#allocation48_spill] sm:$0xff] %v10815_v21  ;;  %v10842_v21 = vld [vmem:[%s14878_s6 + $0x348] sm:$0xff]  ;;  %1147 = vmatpush.msrb.mxu1 %v10836_v16  ;;  %1178 = vmatpush.msrb.mxu0 %v10871_v25 }
  0xb9   :  { %15027 = vst [vmem:[#allocation49_spill] sm:$0xff] %v10824_v7  ;;  %v998_v40 = vadd.f32 %v997_v32, %v996_v4  ;;  %1164 = vmatpush.msrb.mxu2 %v10842_v21  ;;  %v10854_v4 = vld [vmem:[%s14878_s6 + $0x340] sm:$0xff] }
  0xba   :  { %15028 = vst [vmem:[#allocation50_spill] sm:$0xff] %v10830_v44  ;;  %1148 = vmatpush.msrb.mxu1 %v10847_v27  ;;  %v10904_v44 = vld [vmem:[%s14878_s6 + $0x328] sm:$0xff] }
  0xbb   :  { %15029 = vst [vmem:[#allocation51_spill] sm:$0xff] %v10836_v16  ;;  %v684_v48 = vpop.f32.mrf.mxu1  ;;  %v999_v43 = vrot.slane %v998_v40, 2  ;;  %v697_v7 = vpop.f32.mrf.mxu3  ;;  %1165 = vmatpush.msrb.mxu2 %v10854_v4  ;;  %v10889_v16 = vld [vmem:[%s14878_s6 + $0x3f0] sm:$0xff] }
  0xbc   :  { %15030 = vst [vmem:[#allocation52_spill] sm:$0xff] %v10842_v21  ;;  %v10859_v48 = vld [vmem:[%s14878_s6 + $0x2a0] sm:$0xff]  ;;  %v10866_v7 = vld [vmem:[%s14878_s6 + $0x338] sm:$0xff]  ;;  %1179 = vmatpush.msrb.mxu0 %v10889_v16 }
  0xbd   :  { %15031 = vst [vmem:[#allocation53_spill] sm:$0xff] %v10847_v27  ;;  %v1000_v32 = vadd.f32 %v999_v43, %v998_v40  ;;  %v10877_v40 = vld [vmem:[%s14878_s6 + $0x298] sm:$0xff]  ;;  %1149 = vmatpush.msrb.mxu1 %v10859_v48  ;;  %1166 = vmatpush.msrb.mxu2 %v10866_v7  ;;  %v10884_v27 = vld [vmem:[%s14878_s6 + $0x330] sm:$0xff] }
  0xbe   :  { %15032 = vst [vmem:[#allocation54_spill] sm:$0xff] %v10854_v4 }
  0xbf   :  { %15033 = vst [vmem:[#allocation55_spill] sm:$0xff] %v10859_v48  ;;  %v1001_v43 = vrot.slane %v1000_v32, 1  ;;  %1150 = vmatpush.msrb.mxu1 %v10877_v40  ;;  %1167 = vmatpush.msrb.mxu2 %v10884_v27  ;;  %v723_v22 = vpop.f32.mrf.mxu2 }
  0xc0   :  { %15034 = vst [vmem:[#allocation56_spill] sm:$0xff] %v10866_v7  ;;  %v10928_v22 = vld [vmem:[%s14878_s6 + $0x3e0] sm:$0xff] }
  0xc1   :  { %15035 = vst [vmem:[#allocation57_spill] sm:$0xff] %v10871_v25  ;;  %v708_v4 = vpop.f32.mrf.mxu0  ;;  %v10895_v25 = vld [vmem:[%s14878_s6 + $0x290] sm:$0xff]  ;;  %v1002_v7 = vadd.f32 %v1001_v43, %v1000_v32  ;;  %v10923_v32 = vld [vmem:[%s14878_s6 + $0x320] sm:$0xff]  ;;  %1168 = vmatpush.msrb.mxu2 %v10904_v44 }
  0xc2   :  { %15036 = vst [vmem:[#allocation58_spill] sm:$0xff] %v10877_v40  ;;  %v10897_v48 = vadd.f32 %v721_v31, %v708_v4  ;;  %v10915_v31 = vld [vmem:[%s14878_s6 + $0x288] sm:$0xff]  ;;  %1151 = vmatpush.msrb.mxu1 %v10895_v25  ;;  %v10946_v40 = vld [vmem:[%s14878_s6 + $0x3d8] sm:$0xff] }
  0xc3   :  { %15037 = vst [vmem:[#allocation59_spill] sm:$0xff] %v10884_v27  ;;  %v747_v21 = vpop.f32.mrf.mxu1  ;;  %1094 = vmatmul.f32.vlgmr.msra.gmra.mxu2 %v1002_v7  ;;  %v10935_v7 = vld [vmem:[%s14878_s6 + $0x280] sm:$0xff]  ;;  %v10961_v27 = vld [vmem:[%s14878_s6 + $0x3d0] sm:$0xff] }
  0xc4   :  { %15038 = vst [vmem:[#allocation60_spill] sm:$0xff] %v10889_v16  ;;  %v10909_v16 = vld [vmem:[%s14878_s6 + $0x3e8] sm:$0xff]  ;;  %v1003_v4 = vsel %vm981_vm1, %v10897_v48, 0.0  ;;  %1152 = vmatpush.msrb.mxu1 %v10915_v31  ;;  %1169 = vmatpush.msrb.mxu2 %v10923_v32 }
  0xc5   :  { %15039 = vst [vmem:[#allocation61_spill] sm:$0xff] %v10895_v25  ;;  %1180 = vmatpush.msrb.mxu0 %v10909_v16  ;;  %v1004_v43 = vrot.slane %v1003_v4, 4  ;;  %v10941_v25 = vld [vmem:[%s14878_s6 + $0x318] sm:$0xff] }
  0xc6   :  { %15040 = vst [vmem:[#allocation62_spill] sm:$0xff] %v10897_v48  ;;  %1153 = vmatpush.msrb.mxu1 %v10935_v7  ;;  %1170 = vmatpush.msrb.mxu2 %v10941_v25 }
  0xc7   :  { %15041 = vst [vmem:[#allocation63_spill] sm:$0xff] %v10904_v44  ;;  %1181 = vmatpush.msrb.mxu0 %v10928_v22  ;;  %v1005_v44 = vadd.f32 %v1004_v43, %v1003_v4  ;;  %v10970_v4 = vld [vmem:[%s14878_s6 + $0x3c8] sm:$0xff] }
  0xc8   :  { %15042 = vst [vmem:[#allocation64_spill] sm:$0xff] %v10909_v16 }
  0xc9   :  { %15043 = vst [vmem:[#allocation65_spill] sm:$0xff] %v10915_v31  ;;  %v734_v48 = vpop.f32.mrf.mxu3  ;;  %1182 = vmatpush.msrb.mxu0 %v10946_v40  ;;  %v10956_v31 = vld [vmem:[%s14878_s6 + $0x310] sm:$0xff]  ;;  %v1006_v16 = vrot.slane %v1005_v44, 2 }
  0xca   :  { %15044 = vst [vmem:[#allocation66_spill] sm:$0xff] %v10923_v32  ;;  %v10975_v32 = vld [vmem:[%s14878_s6 + $0x308] sm:$0xff]  ;;  %1171 = vmatpush.msrb.mxu2 %v10956_v31 }
  0xcb   :  { %15045 = vst [vmem:[#allocation67_spill] sm:$0xff] %v10928_v22  ;;  %v10948_v22 = vadd.f32 %v747_v21, %v734_v48  ;;  %v710_v48 = vpop.f32.mrf.mxu0  ;;  %1183 = vmatpush.msrb.mxu0 %v10961_v27 }
  0xcc   :  { %15046 = vst [vmem:[#allocation68_spill] sm:$0xff] %v10935_v7  ;;  %v749_v7 = vpop.f32.mrf.mxu1  ;;  %v10980_v48 = vld [vmem:[%s14878_s6 + $0x3c0] sm:$0xff]  ;;  %1172 = vmatpush.msrb.mxu2 %v10975_v32 }
  0xcd   :  { %15047 = vst [vmem:[#allocation69_spill] sm:$0xff] %v10941_v25  ;;  %v1010_v21 = vsel %vm981_vm1, %v10948_v22, 0.0  ;;  %1184 = vmatpush.msrb.mxu0 %v10970_v4  ;;  %v10987_v7 = vld [vmem:[%s14878_s6 + $0x300] sm:$0xff] }
  0xce   :  { %15048 = vst [vmem:[#allocation70_spill] sm:$0xff] %v10946_v40  ;;  %v1011_v43 = vrot.slane %v1010_v21, 4  ;;  %1173 = vmatpush.msrb.mxu2 %v10987_v7 }
  0xcf   :  { %15049 = vst [vmem:[#allocation71_spill] sm:$0xff] %v10948_v22  ;;  %v1007_v22 = vadd.f32 %v1006_v16, %v1005_v44  ;;  %1185 = vmatpush.msrb.mxu0 %v10980_v48  ;;  %v10994_v16 = vld [vmem:[%s14878_s6 + $0x3b8] sm:$0xff] }
  0xd0   :  { %15050 = vst [vmem:[#allocation72_spill] sm:$0xff] %v10956_v31  ;;  %v1012_v25 = vadd.f32 %v1011_v43, %v1010_v21  ;;  %v11001_v43 = vld [vmem:[%s14878_s6 + $0x3b0] sm:$0xff] }
  0xd1   :  { %15051 = vst [vmem:[#allocation73_spill] sm:$0xff] %v10961_v27  ;;  %v1008_v27 = vrot.slane %v1007_v22, 1  ;;  %v736_v12 = vpop.f32.mrf.mxu3  ;;  %1186 = vmatpush.msrb.mxu0 %v10994_v16 }
  0xd2   :  { %15052 = vst [vmem:[#allocation74_spill] sm:$0xff] %v10970_v4  ;;  %v1013_v40 = vrot.slane %v1012_v25, 2  ;;  %v11007_v12 = vld [vmem:[%s14878_s6 + $0x3a8] sm:$0xff] }
  0xd3   :  { %15053 = vst [vmem:[#allocation75_spill] sm:$0xff] %v10975_v32  ;;  %v1009_v44 = vadd.f32 %v1008_v27, %v1007_v22  ;;  %v773_v32 = vpop.f32.mrf.mxu0  ;;  %1187 = vmatpush.msrb.mxu0 %v11001_v43 }
  0xd4   :  { %15054 = vst [vmem:[#allocation76_spill] sm:$0xff] %v10980_v48  ;;  %v1014_v21 = vadd.f32 %v1013_v40, %v1012_v25  ;;  %v11013_v25 = vld [vmem:[%s14878_s6 + $0x3a0] sm:$0xff] }
  0xd5   :  { %15055 = vst [vmem:[#allocation77_spill] sm:$0xff] %v10987_v7  ;;  %1114 = vmatmul.f32.vlgmr.msra.gmra.mxu0 %v1009_v44 }
  0xd6   :  { %15056 = vst [vmem:[#allocation78_spill] sm:$0xff] %v10994_v16  ;;  %v1015_v48 = vrot.slane %v1014_v21, 1  ;;  %1188 = vmatpush.msrb.mxu0 %v11007_v12 }
  0xd7   :  { %15057 = vst [vmem:[#allocation79_spill] sm:$0xff] %v11001_v43  ;;  %v760_v40 = vpop.f32.mrf.mxu2  ;;  %v11021_v43 = vld [vmem:[%s14878_s6 + $0x398] sm:$0xff] }
  0xd8   :  { %15058 = vst [vmem:[#allocation80_spill] sm:$0xff] %v11007_v12  ;;  %v1016_v27 = vadd.f32 %v1015_v48, %v1014_v21  ;;  %v11015_v22 = vadd.f32 %v773_v32, %v760_v40  ;;  %1189 = vmatpush.msrb.mxu0 %v11013_v25  ;;  %v11026_v48 = vld [vmem:[%s14878_s6 + $0x390] sm:$0xff]  ;;  %v11034_v40 = vld [vmem:[%s14878_s6 + $0x388] sm:$0xff]  ;;  %v11040_v12 = vld [vmem:[%s14878_s6 + $0x380] sm:$0xff] }
  0xd9   :  { %15059 = vst [vmem:[#allocation81_spill] sm:$0xff] %v11013_v25  ;;  %v799_v44 = vpop.f32.mrf.mxu3 }
  0xda   :  { %15060 = vst [vmem:[#allocation82_spill] sm:$0xff] %v11015_v22  ;;  %1134 = vmatmul.f32.vlgmr.msrb.gmra.mxu3 %v1016_v27  ;;  %v1017_v21 = vsel %vm981_vm1, %v11015_v22, 0.0  ;;  %1190 = vmatpush.msrb.mxu0 %v11021_v43 }
  0xdb   :  { %15061 = vst [vmem:[#allocation83_spill] sm:$0xff] %v11021_v43  ;;  %v1018_v32 = vrot.slane %v1017_v21, 4  ;;  %v775_v27 = vpop.f32.mrf.mxu0 }
  0xdc   :  { %15062 = vst [vmem:[#allocation84_spill] sm:$0xff] %v11026_v48  ;;  %1191 = vmatpush.msrb.mxu0 %v11026_v48 }
  0xdd   :  { %v1019_v25 = vadd.f32 %v1018_v32, %v1017_v21 }
  0xde   :  { %1192 = vmatpush.msrb.mxu0 %v11034_v40 }
  0xdf   :  { %v1020_v22 = vrot.slane %v1019_v25, 2  ;;  %v762_v27 = vpop.f32.mrf.mxu2 }
  0xe0   :  { %1193 = vmatpush.msrb.mxu0 %v11040_v12 }
  0xe1   :  { %v801_v16 = vpop.f32.mrf.mxu3  ;;  %v1021_v31 = vadd.f32 %v1020_v22, %v1019_v25 }
  0xe2   :  { %1443 = vmatpush.msra.mxu0 %v10186_v8 }
  0xe3   :  { %v786_v7 = vpop.f32.mrf.mxu1  ;;  %v1022_v32 = vrot.slane %v1021_v31, 1 }
  0xe4   :  { %v11043_v43 = vadd.f32 %v799_v44, %v786_v7  ;;  %1444 = vmatpush.msra.mxu0 %v10211_v18 }
  0xe5   :  { %v1023_v1 = vadd.f32 %v1022_v32, %v1021_v31 }
  0xe6   :  { %v1024_v48 = vsel %vm981_vm1, %v11043_v43, 0.0  ;;  %1445 = vmatpush.msra.mxu0 %v10226_v23 }
  0xe7   :  { %v1025_v21 = vrot.slane %v1024_v48, 4  ;;  %v825_v27 = vpop.f32.mrf.mxu2  ;;  %1154 = vmatmul.f32.vlgmr.msrb.gmra.mxu1 %v1023_v1 }
  0xe8   :  { %1446 = vmatpush.msra.mxu0 %v10244_v29 }
  0xe9   :  { %v1026_v4 = vadd.f32 %v1025_v21, %v1024_v48 }
  0xea   :  { %1447 = vmatpush.msra.mxu0 %v10256_v34 }
  0xeb   :  { %v1027_v7 = vrot.slane %v1026_v4, 2  ;;  %v788_v44 = vpop.f32.mrf.mxu1 }
  0xec   :  { %1448 = vmatpush.msra.mxu0 %v10268_v39 }
  0xed   :  { %v1028_v16 = vadd.f32 %v1027_v7, %v1026_v4 }
  0xee   :  { %1449 = vmatpush.msra.mxu0 %v10303_v50 }
  0xef   :  { %v1029_v25 = vrot.slane %v1028_v16, 1  ;;  %v827_v23 = vpop.f32.mrf.mxu2 }
  0xf0   :  { %1450 = vmatpush.msra.mxu0 %v10320_v56 }
  0xf1   :  { %v1030_v8 = vadd.f32 %v1029_v25, %v1028_v16  ;;  %v812_v22 = vpop.f32.mrf.mxu0 }
  0xf2   :  { %v11055_v18 = vadd.f32 %v825_v27, %v812_v22  ;;  %1451 = vmatpush.msra.mxu0 %v10336_v54  ;;  %v11087_v54 = vld [vmem:[%s14876_s5 + $0x320] sm:$0xff] }
  0xf3   :  { %1174 = vmatmul.f32.vlgmr.msrb.gmra.mxu2 %v1030_v8 }
  0xf4   :  { %v1031_v1 = vsel %vm981_vm1, %v11055_v18, 0.0  ;;  %1452 = vmatpush.msra.mxu0 %v10357_v58  ;;  %v11092_v58 = vld [vmem:[%s14876_s5 + $0x328] sm:$0xff] }
  0xf5   :  { %v1032_v29 = vrot.slane %v1031_v1, 4 }
  0xf6   :  { %1453 = vmatpush.msra.mxu0 %v10375_v61  ;;  %v973_v61 = vunpack.c.l.bf16 %v11087_v54 }
  0xf7   :  { %v1033_v34 = vadd.f32 %v1032_v29, %v1031_v1 }
  0xf8   :  { %1454 = vmatpush.msra.mxu0 %v10393_v0  ;;  %v975_v0 = vunpack.c.l.bf16 %v11092_v58  ;;  %1217 = vmatpush.msra.mxu3 %v973_v61 }
  0xf9   :  { %v1034_v39 = vrot.slane %v1033_v34, 2  ;;  %v814_v31 = vpop.f32.mrf.mxu0 }
  0xfa   :  { %1455 = vmatpush.msra.mxu0 %v10411_v3  ;;  %v976_v3 = vunpack.c.h.bf16 %v11092_v58  ;;  %1257 = vmatpush.msra.mxu1 %v975_v0 }
  0xfb   :  { %v1035_v50 = vadd.f32 %v1034_v39, %v1033_v34 }
  0xfc   :  { %1456 = vmatpush.msra.mxu0 %v10429_v6  ;;  %v11100_v6 = vld [vmem:[%s14876_s5 + $0x300] sm:$0xff]  ;;  %1277 = vmatpush.msra.mxu2 %v976_v3 }
  0xfd   :  { %v1036_v4 = vrot.slane %v1035_v50, 1 }
  0xfe   :  { %1457 = vmatpush.msra.mxu0 %v10447_v10  ;;  %v11105_v10 = vld [vmem:[%s14876_s5 + $0x308] sm:$0xff] }
  0xff   :  { %v1037_v56 = vadd.f32 %v1036_v4, %v1035_v50  ;;  %v15080_v50 = vld [vmem:[#allocation24_spill] sm:$0xff] }
 0x100   :  { %1458 = vmatpush.msra.mxu0 %v10471_v14  ;;  %v967_v14 = vunpack.c.l.bf16 %v11105_v10  ;;  %v15081_v4 = vld [vmem:[#allocation12_spill] sm:$0xff] }
 0x101   :  { %1194 = vmatmul.f32.vlgmr.msrb.gmra.mxu0 %v1037_v56  ;;  %v15082_v56 = vld [vmem:[#allocation21_spill] sm:$0xff] }
 0x102   :  { %1523 = vmatpush.msrb.mxu0 %v10493_v19  ;;  %v974_v19 = vunpack.c.h.bf16 %v11087_v54  ;;  %1258 = vmatpush.msra.mxu1 %v967_v14 }
 0x104   :  { %1524 = vmatpush.msrb.mxu0 %v10517_v24  ;;  %v11120_v24 = vld [vmem:[%s14876_s5 + $0x330] sm:$0xff] }
 0x105   :  { %v977_v1 = vunpack.c.l.bf16 %v11120_v24 }
 0x106   :  { %1525 = vmatpush.msrb.mxu0 %v10541_v28  ;;  %v966_v28 = vunpack.c.h.bf16 %v11100_v6 }
 0x108   :  { %1526 = vmatpush.msrb.mxu0 %v10565_v33  ;;  %v11131_v33 = vld [vmem:[%s14876_s5 + $0x310] sm:$0xff] }
 0x109   :  { %v969_v34 = vunpack.c.l.bf16 %v11131_v33 }
 0x10a   :  { %1527 = vmatpush.msrb.mxu0 %v10589_v41 }
 0x10c   :  { %1528 = vmatpush.msrb.mxu0 %v10606_v46  ;;  %v11143_v46 = vld [vmem:[%s14876_s5 + $0x318] sm:$0xff] }
 0x10d   :  { %v972_v31 = vunpack.c.h.bf16 %v11143_v46 }
 0x10e   :  { %1529 = vmatpush.msrb.mxu0 %v10625_v49  ;;  %v971_v49 = vunpack.c.l.bf16 %v11143_v46 }
 0x110   :  { %1530 = vmatpush.msrb.mxu0 %v10640_v38  ;;  %v978_v38 = vunpack.c.h.bf16 %v11120_v24 }
 0x112   :  { %1531 = vmatpush.msrb.mxu0 %v10654_v30  ;;  %1317 = vmatpush.msrb.mxu1 %v978_v38 }
 0x114   :  { %1532 = vmatpush.msrb.mxu0 %v10672_v45  ;;  %v970_v45 = vunpack.c.h.bf16 %v11131_v33 }
 0x116   :  { %1533 = vmatpush.msrb.mxu0 %v10690_v15  ;;  %v968_v15 = vunpack.c.h.bf16 %v11105_v10  ;;  %1318 = vmatpush.msrb.mxu1 %v970_v45 }
 0x118   :  { %1534 = vmatpush.msrb.mxu0 %v10710_v11  ;;  %v965_v11 = vunpack.c.l.bf16 %v11100_v6  ;;  %1278 = vmatpush.msra.mxu2 %v968_v15 }
 0x11a   :  { %1535 = vmatpush.msrb.mxu0 %v10736_v47  ;;  %1218 = vmatpush.msra.mxu3 %v965_v11 }
 0x11c   :  { %1536 = vmatpush.msrb.mxu0 %v10760_v20  ;;  %1237 = vmatpush.msrb.mxu3 %v974_v19 }
 0x11e   :  { %1537 = vmatpush.msrb.mxu0 %v10782_v26  ;;  %v11125_v26 = vld [vmem:[%s14876_s5 + $0x338] sm:$0xff]  ;;  %1238 = vmatpush.msrb.mxu3 %v966_v28 }
 0x11f   :  { %v979_v41 = vunpack.c.l.bf16 %v11125_v26  ;;  %v980_v39 = vunpack.c.h.bf16 %v11125_v26 }
 0x120   :  { %1538 = vmatpush.msrb.mxu0 %v10800_v35 }
 0x121   :  { %1337 = vmatpush.msrb.mxu2 %v979_v41 }
 0x123   :  { %1338 = vmatpush.msrb.mxu2 %v971_v49 }
 0x134   :  { %v1055_v30 = vpop.f32.mrf.mxu3  ;;  %v1075_v20 = vpop.f32.mrf.mxu1 }
 0x135   :  { %v1076_v35 = vadd.f32 %v1075_v20, %v1055_v30  ;;  %v15083_v30 = vld [vmem:[#allocation25_spill] sm:$0xff]  ;;  %v15084_v20 = vld [vmem:[#allocation15_spill] sm:$0xff] }
 0x146   :  { %v1095_v47 = vpop.f32.mrf.mxu2 }
 0x147   :  { %v1096_v21 = vadd.f32 %v1095_v47, %v1076_v35  ;;  %v15085_v47 = vld [vmem:[#allocation23_spill] sm:$0xff]  ;;  %v15086_v35 = vld [vmem:[#allocation37_spill] sm:$0xff] }
 0x152   :  { %v1115_v48 = vpop.f32.mrf.mxu0 }
 0x153   :  { %v1116_v7 = vadd.f32 %v1115_v48, %v1096_v21  ;;  %v15087_v48 = vld [vmem:[#allocation27_spill] sm:$0xff]  ;;  %v15088_v21 = vld [vmem:[#allocation18_spill] sm:$0xff] }
 0x15d   :  { %v1135_v32 = vpop.f32.mrf.mxu3 }
 0x15e   :  { %v1136_v27 = vadd.f32 %v1135_v32, %v1116_v7  ;;  %v15089_v32 = vld [vmem:[#allocation40_spill] sm:$0xff]  ;;  %v15090_v7 = vld [vmem:[#allocation29_spill] sm:$0xff] }
 0x164   :  { %v1155_v44 = vpop.f32.mrf.mxu1 }
 0x165   :  { %v1156_v25 = vadd.f32 %v1155_v44, %v1136_v27  ;;  %v15091_v44 = vld [vmem:[#allocation28_spill] sm:$0xff]  ;;  %v15092_v27 = vld [vmem:[#allocation43_spill] sm:$0xff] }
 0x176   :  { %v1175_v16 = vpop.f32.mrf.mxu2 }
 0x177   :  { %v1176_v8 = vadd.f32 %v1175_v16, %v1156_v25  ;;  %v15093_v16 = vld [vmem:[#allocation31_spill] sm:$0xff]  ;;  %v15094_v25 = vld [vmem:[#allocation30_spill] sm:$0xff] }
 0x17e   :  { %v1195_v22 = vpop.f32.mrf.mxu0 }
 0x17f   :  { %v1196_v23 = vadd.f32 %v1195_v22, %v1176_v8  ;;  %v15095_v8 = vld [vmem:[#allocation45_spill] sm:$0xff]  ;;  %v15096_v22 = vld [vmem:[#allocation34_spill] sm:$0xff] }
 0x181   :  { %v1198_v29 = vmul.f32 0.0078125, %v1196_v23  ;;  %v15097_v23 = vld [vmem:[#allocation32_spill] sm:$0xff] }
 0x183   :  { %7578 = vmatmul.msk.f32.vlgmr.msra.gmra.mxu3 %vm1199_vm2, %v1198_v29  ;;  %7580 = vmatmul.msk.f32.vlgmr.msra.gmra.mxu1 %vm1199_vm2, %v1198_v29 }
 0x184   :  { %7581 = vmatmul.msk.f32.vlgmr.msra.gmra.mxu2 %vm1199_vm2, %v1198_v29  ;;  %1297 = vmatpush.msra.mxu3 %v977_v1 }
 0x185   :  { %1483 = vmatpush.msra.mxu2 %v10313_v51  ;;  %1463 = vmatpush.msra.mxu1 %v10262_v37  ;;  %v15063_v37 = vld [vmem:[#allocation2_spill] sm:$0xff]  ;;  %v15066_v51 = vld [vmem:[#allocation3_spill] sm:$0xff] }
 0x186   :  { %1298 = vmatpush.msra.mxu3 %v969_v34 }
 0x187   :  { %1484 = vmatpush.msra.mxu2 %v10330_v53  ;;  %1464 = vmatpush.msra.mxu1 %v10280_v42  ;;  %v15064_v42 = vld [vmem:[#allocation6_spill] sm:$0xff] }
 0x188   :  { %v15068_v53 = vld [vmem:[#allocation14_spill] sm:$0xff] }
 0x189   :  { %1485 = vmatpush.msra.mxu2 %v10348_v57  ;;  %1465 = vmatpush.msra.mxu1 %v10308_v36  ;;  %v15065_v36 = vld [vmem:[#allocation11_spill] sm:$0xff]  ;;  %v15070_v57 = vld [vmem:[#allocation10_spill] sm:$0xff] }
 0x18b   :  { %7579 = vmatmul.msk.f32.vlgmr.msrb.gmra.mxu3 %vm1199_vm2, %v1198_v29  ;;  %7583 = vmatmul.msk.f32.vlgmr.msrb.gmra.mxu1 %vm1199_vm2, %v1198_v29 }
 0x18c   :  { %7584 = vmatmul.msk.f32.vlgmr.msrb.gmra.mxu2 %vm1199_vm2, %v1198_v29  ;;  %1357 = vmatpush.msrb.mxu3 %v980_v39 }
 0x18d   :  { %1486 = vmatpush.msra.mxu2 %v10367_v60  ;;  %1466 = vmatpush.msra.mxu1 %v10325_v52  ;;  %v15067_v52 = vld [vmem:[#allocation8_spill] sm:$0xff]  ;;  %v15072_v60 = vld [vmem:[#allocation5_spill] sm:$0xff] }
 0x18e   :  { %1358 = vmatpush.msrb.mxu3 %v972_v31 }
 0x18f   :  { %1487 = vmatpush.msra.mxu2 %v10385_v63  ;;  %1467 = vmatpush.msra.mxu1 %v10341_v55  ;;  %v15069_v55 = vld [vmem:[#allocation4_spill] sm:$0xff] }
 0x190   :  { %v15074_v63 = vld [vmem:[#allocation20_spill] sm:$0xff] }
 0x191   :  { %1488 = vmatpush.msra.mxu2 %v10403_v2  ;;  %1468 = vmatpush.msra.mxu1 %v10362_v59  ;;  %v15071_v59 = vld [vmem:[#allocation17_spill] sm:$0xff]  ;;  %v15075_v2 = vld [vmem:[#allocation7_spill] sm:$0xff] }
 0x193   :  { %7582 = vmatmul.msk.f32.vlgmr.msra.gmra.mxu3 %vm1199_vm2, %v1198_v29  ;;  %1489 = vmatpush.msra.mxu2 %v10421_v5  ;;  %v15076_v5 = vld [vmem:[#allocation16_spill] sm:$0xff] }
 0x194   :  { %1503 = vmatpush.msra.mxu3 %v10464_v13  ;;  %1469 = vmatpush.msra.mxu1 %v10380_v62  ;;  %v15073_v62 = vld [vmem:[#allocation13_spill] sm:$0xff] }
 0x195   :  { %1490 = vmatpush.msra.mxu2 %v10439_v9  ;;  %v15077_v9 = vld [vmem:[#allocation22_spill] sm:$0xff]  ;;  %v15078_v13 = vld [vmem:[#allocation9_spill] sm:$0xff] }
 0x196   :  { %1504 = vmatpush.msra.mxu3 %v10488_v17  ;;  %1470 = vmatpush.msra.mxu1 %v15063_v37  ;;  %v15079_v17 = vld [vmem:[#allocation19_spill] sm:$0xff]  ;;  %v15099_v37 = vld [vmem:[#allocation36_spill] sm:$0xff] }
 0x197   :  { %1491 = vmatpush.msra.mxu2 %v15064_v42  ;;  %v15100_v42 = vld [vmem:[#allocation35_spill] sm:$0xff] }
 0x198   :  { %1505 = vmatpush.msra.mxu3 %v15065_v36  ;;  %1471 = vmatpush.msra.mxu1 %v15066_v51  ;;  %v15101_v36 = vld [vmem:[#allocation50_spill] sm:$0xff]  ;;  %v15102_v51 = vld [vmem:[#allocation39_spill] sm:$0xff] }
 0x199   :  { %1492 = vmatpush.msra.mxu2 %v15067_v52  ;;  %v15103_v52 = vld [vmem:[#allocation38_spill] sm:$0xff] }
 0x19a   :  { %1506 = vmatpush.msra.mxu3 %v15068_v53  ;;  %1472 = vmatpush.msra.mxu1 %v15069_v55  ;;  %v15104_v53 = vld [vmem:[#allocation52_spill] sm:$0xff]  ;;  %v15105_v55 = vld [vmem:[#allocation42_spill] sm:$0xff] }
 0x19b   :  { %7585 = vmatmul.msk.f32.vlgmr.msrb.gmra.mxu3 %vm1199_vm2, %v1198_v29  ;;  %1493 = vmatpush.msra.mxu2 %v15070_v57  ;;  %v15098_v29 = vld [vmem:[#allocation48_spill] sm:$0xff]  ;;  %v15106_v57 = vld [vmem:[#allocation57_spill] sm:$0xff] }
 0x19c   :  { %1507 = vmatpush.msra.mxu3 %v15071_v59  ;;  %1473 = vmatpush.msra.mxu1 %v15072_v60  ;;  %v15107_v59 = vld [vmem:[#allocation41_spill] sm:$0xff]  ;;  %v15108_v60 = vld [vmem:[#allocation54_spill] sm:$0xff] }
 0x19d   :  { %1494 = vmatpush.msra.mxu2 %v15073_v62  ;;  %v15109_v62 = vld [vmem:[#allocation60_spill] sm:$0xff] }
 0x19e   :  { %1508 = vmatpush.msra.mxu3 %v15074_v63  ;;  %1474 = vmatpush.msra.mxu1 %v15075_v2  ;;  %v15110_v63 = vld [vmem:[#allocation44_spill] sm:$0xff] }
 0x19f   :  { %1495 = vmatpush.msra.mxu2 %v15076_v5  ;;  %v15111_v2 = vld [vmem:[#allocation56_spill] sm:$0xff] }
 0x1a0   :  { %1509 = vmatpush.msra.mxu3 %v15077_v9  ;;  %1475 = vmatpush.msra.mxu1 %v15078_v13  ;;  %v15112_v5 = vld [vmem:[#allocation64_spill] sm:$0xff]  ;;  %v15113_v9 = vld [vmem:[#allocation46_spill] sm:$0xff]  ;;  %v15114_v13 = vld [vmem:[#allocation59_spill] sm:$0xff] }
 0x1a1   :  { %1496 = vmatpush.msra.mxu2 %v15079_v17  ;;  %v15115_v17 = vld [vmem:[#allocation67_spill] sm:$0xff] }
 0x1a2   :  { %1510 = vmatpush.msra.mxu3 %v15080_v50  ;;  %1476 = vmatpush.msra.mxu1 %v15081_v4  ;;  %v15116_v50 = vld [vmem:[#allocation49_spill] sm:$0xff]  ;;  %v15117_v4 = vld [vmem:[#allocation63_spill] sm:$0xff] }
 0x1a3   :  { %1497 = vmatpush.msra.mxu2 %v15082_v56  ;;  %v15118_v56 = vld [vmem:[#allocation70_spill] sm:$0xff] }
 0x1a4   :  { %1511 = vmatpush.msra.mxu3 %v15083_v30  ;;  %1477 = vmatpush.msra.mxu1 %v15084_v20  ;;  %v15119_v30 = vld [vmem:[#allocation51_spill] sm:$0xff]  ;;  %v15120_v20 = vld [vmem:[#allocation66_spill] sm:$0xff] }
 0x1a5   :  { %1498 = vmatpush.msra.mxu2 %v15085_v47  ;;  %v15121_v47 = vld [vmem:[#allocation73_spill] sm:$0xff] }
 0x1a6   :  { %1512 = vmatpush.msra.mxu3 %v15087_v48  ;;  %1478 = vmatpush.msra.mxu1 %v15088_v21  ;;  %v15123_v48 = vld [vmem:[#allocation69_spill] sm:$0xff]  ;;  %v15124_v21 = vld [vmem:[#allocation74_spill] sm:$0xff] }
 0x1a7   :  { %1563 = vmatpush.msrb.mxu2 %v15086_v35  ;;  %v15122_v35 = vld [vmem:[#allocation53_spill] sm:$0xff] }
 0x1a8   :  { %1513 = vmatpush.msra.mxu3 %v15090_v7  ;;  %1543 = vmatpush.msrb.mxu1 %v15091_v44  ;;  %v15126_v7 = vld [vmem:[#allocation72_spill] sm:$0xff] }
 0x1a9   :  { %1564 = vmatpush.msrb.mxu2 %v15089_v32  ;;  %v15125_v32 = vld [vmem:[#allocation55_spill] sm:$0xff]  ;;  %v15127_v44 = vld [vmem:[#allocation76_spill] sm:$0xff] }
 0x1aa   :  { %1514 = vmatpush.msra.mxu3 %v15093_v16  ;;  %1544 = vmatpush.msrb.mxu1 %v15094_v25  ;;  %v15129_v16 = vld [vmem:[#allocation75_spill] sm:$0xff]  ;;  %v15130_v25 = vld [vmem:[#allocation78_spill] sm:$0xff] }
 0x1ab   :  { %1565 = vmatpush.msrb.mxu2 %v15092_v27  ;;  %v15128_v27 = vld [vmem:[#allocation58_spill] sm:$0xff] }
 0x1ac   :  { %1515 = vmatpush.msra.mxu3 %v15096_v22  ;;  %1545 = vmatpush.msrb.mxu1 %v15097_v23  ;;  %v15132_v22 = vld [vmem:[#allocation77_spill] sm:$0xff]  ;;  %v15133_v23 = vld [vmem:[#allocation79_spill] sm:$0xff] }
 0x1ad   :  { %1566 = vmatpush.msrb.mxu2 %v15095_v8  ;;  %v15131_v8 = vld [vmem:[#allocation61_spill] sm:$0xff] }
 0x1ae   :  { %1516 = vmatpush.msra.mxu3 %v15099_v37  ;;  %1546 = vmatpush.msrb.mxu1 %v15100_v42  ;;  %v15135_v37 = vld [vmem:[#allocation80_spill] sm:$0xff] }
 0x1af   :  { %1567 = vmatpush.msrb.mxu2 %v15098_v29  ;;  %v15134_v29 = vld [vmem:[#allocation65_spill] sm:$0xff]  ;;  %v15136_v42 = vld [vmem:[#allocation68_spill] sm:$0xff] }
 0x1b0   :  { %1517 = vmatpush.msra.mxu3 %v15102_v51  ;;  %1547 = vmatpush.msrb.mxu1 %v15103_v52  ;;  %v15138_v51 = vld [vmem:[#allocation83_spill] sm:$0xff]  ;;  %v15139_v52 = vld [vmem:[#allocation84_spill] sm:$0xff] }
 0x1b1   :  { %1568 = vmatpush.msrb.mxu2 %v15101_v36  ;;  %v15137_v36 = vld [vmem:[#allocation81_spill] sm:$0xff] }
 0x1b2   :  { %1518 = vmatpush.msra.mxu3 %v15105_v55  ;;  %1548 = vmatpush.msrb.mxu1 %v15107_v59 }
 0x1b3   :  { %1569 = vmatpush.msrb.mxu2 %v15104_v53 }
 0x1b4   :  { %1583 = vmatpush.msrb.mxu3 %v15106_v57  ;;  %1549 = vmatpush.msrb.mxu1 %v15110_v63  ;;  %v15140_v57 = vld [vmem:[#allocation47_spill] sm:$0xff] }
 0x1b5   :  { %1570 = vmatpush.msrb.mxu2 %v15108_v60 }
 0x1b6   :  { %1584 = vmatpush.msrb.mxu3 %v15109_v62  ;;  %1550 = vmatpush.msrb.mxu1 %v15113_v9 }
 0x1b7   :  { %1571 = vmatpush.msrb.mxu2 %v15111_v2 }
 0x1b8   :  { %1585 = vmatpush.msrb.mxu3 %v15112_v5  ;;  %1551 = vmatpush.msrb.mxu1 %v15116_v50  ;;  %v15141_v50 = vld [vmem:[#allocation26_spill] sm:$0xff] }
 0x1b9   :  { %1572 = vmatpush.msrb.mxu2 %v15114_v13 }
 0x1ba   :  { %1586 = vmatpush.msrb.mxu3 %v15115_v17  ;;  %1552 = vmatpush.msrb.mxu1 %v15119_v30 }
 0x1bb   :  { %1573 = vmatpush.msrb.mxu2 %v15117_v4 }
 0x1bc   :  { %1587 = vmatpush.msrb.mxu3 %v15118_v56  ;;  %1553 = vmatpush.msrb.mxu1 %v15122_v35  ;;  %v15142_v56 = vld [vmem:[#allocation62_spill] sm:$0xff] }
 0x1bd   :  { %1574 = vmatpush.msrb.mxu2 %v15120_v20 }
 0x1be   :  { %1588 = vmatpush.msrb.mxu3 %v15121_v47  ;;  %1554 = vmatpush.msrb.mxu1 %v15125_v32  ;;  %v15143_v47 = vld [vmem:[#allocation82_spill] sm:$0xff] }
 0x1bf   :  { %1575 = vmatpush.msrb.mxu2 %v15123_v48 }
 0x1c0   :  { %1589 = vmatpush.msrb.mxu3 %v15124_v21  ;;  %1555 = vmatpush.msrb.mxu1 %v15128_v27 }
 0x1c1   :  { %1576 = vmatpush.msrb.mxu2 %v15126_v7 }
 0x1c2   :  { %1590 = vmatpush.msrb.mxu3 %v15127_v44  ;;  %1556 = vmatpush.msrb.mxu1 %v15131_v8 }
 0x1c3   :  { %1577 = vmatpush.msrb.mxu2 %v15129_v16 }
 0x1c4   :  { %1591 = vmatpush.msrb.mxu3 %v15130_v25  ;;  %1557 = vmatpush.msrb.mxu1 %v15134_v29 }
 0x1c5   :  { %1578 = vmatpush.msrb.mxu2 %v15132_v22 }
 0x1c6   :  { %1592 = vmatpush.msrb.mxu3 %v15133_v23  ;;  %1558 = vmatpush.msrb.mxu1 %v15136_v42 }
 0x1c8   :  { %1593 = vmatpush.msrb.mxu3 %v15135_v37 }
 0x1ca   :  { %1594 = vmatpush.msrb.mxu3 %v15137_v36 }
 0x1cc   :  { %1595 = vmatpush.msrb.mxu3 %v15138_v51 }
 0x1ce   :  { %1596 = vmatpush.msrb.mxu3 %v15139_v52  ;;  %v15144_v52 = vld [vmem:[#allocation33_spill] sm:$0xff] }
 0x1d0   :  { %1597 = vmatpush.msrb.mxu3 %v11034_v40 }
 0x1d2   :  { %1598 = vmatpush.msrb.mxu3 %v11040_v12 }
 0x200   :  { %v1260_v53 = vpop.f32.mrf.mxu1 }
 0x201   :  { %v1365_v55 = vperm.slane %v1260_v53, 0 }
 0x203   :  { %v11277_v59 = vsub.f32 %v15140_v57, %v1365_v55 }
 0x205   :  { %v1381_v60 = vmul.f32 %v11277_v59, %v11277_v59 }
 0x206   :  { %v1220_v62 = vpop.f32.mrf.mxu3 }
 0x207   :  { %v1401_v63 = vsel %vm981_vm1, %v1381_v60, 0.0  ;;  %v1363_v2 = vperm.slane %v1220_v62, 0  ;;  %v1280_v5 = vpop.f32.mrf.mxu2 }
 0x208   :  { %v1402_v9 = vrot.slane %v1401_v63, 4  ;;  %v1366_v13 = vperm.slane %v1280_v5, 0  ;;  %v1320_v17 = vpop.f32.mrf.mxu1 }
 0x209   :  { %v11283_v40 = vsub.f32 %v15141_v50, %v1363_v2  ;;  %v1368_v12 = vperm.slane %v1320_v17, 0 }
 0x20a   :  { %v1403_v4 = vadd.f32 %v1402_v9, %v1401_v63  ;;  %v11286_v30 = vsub.f32 %v15142_v56, %v1366_v13 }
 0x20b   :  { %v1379_v20 = vmul.f32 %v11283_v40, %v11283_v40  ;;  %v11291_v35 = vsub.f32 %v15143_v47, %v1368_v12 }
 0x20c   :  { %v1404_v48 = vrot.slane %v1403_v4, 2  ;;  %v1382_v21 = vmul.f32 %v11286_v30, %v11286_v30 }
 0x20d   :  { %v1387_v32 = vsel %vm981_vm1, %v1379_v20, 0.0  ;;  %v1384_v7 = vmul.f32 %v11291_v35, %v11291_v35 }
 0x20e   :  { %v1388_v44 = vrot.slane %v1387_v32, 4  ;;  %v1408_v27 = vsel %vm981_vm1, %v1382_v21, 0.0  ;;  %v1240_v16 = vpop.f32.mrf.mxu3  ;;  %v1405_v25 = vadd.f32 %v1404_v48, %v1403_v4 }
 0x20f   :  { %v1409_v8 = vrot.slane %v1408_v27, 4  ;;  %v1364_v22 = vperm.slane %v1240_v16, 0  ;;  %v1340_v23 = vpop.f32.mrf.mxu2  ;;  %v1422_v51 = vsel %vm981_vm1, %v1384_v7, 0.0 }
 0x210   :  { %v1389_v29 = vadd.f32 %v1388_v44, %v1387_v32  ;;  %v1369_v37 = vperm.slane %v1340_v23, 0  ;;  %v1406_v42 = vrot.slane %v1405_v25, 1  ;;  %v1423_v2 = vrot.slane %v1422_v51, 4  ;;  %v15145_v44 = vld [vmem:[#allocation71_spill] sm:$0xff] }
 0x211   :  { %v1410_v36 = vadd.f32 %v1409_v8, %v1408_v27  ;;  %v11301_v53 = vsub.f32 %v15144_v52, %v1364_v22 }
 0x212   :  { %v1390_v55 = vrot.slane %v1389_v29, 2  ;;  %v11304_v57 = vsub.f32 %v11043_v43, %v1369_v37  ;;  %v1407_v60 = vadd.f32 %v1406_v42, %v1405_v25  ;;  %v1424_v48 = vadd.f32 %v1423_v2, %v1422_v51 }
 0x213   :  { %v1411_v62 = vrot.slane %v1410_v36, 2  ;;  %v1380_v63 = vmul.f32 %v11301_v53, %v11301_v53 }
 0x214   :  { %v1385_v5 = vmul.f32 %v11304_v57, %v11304_v57  ;;  %1499 = vmatmul.f32.vlgmr.msra.gmra.mxu2 %v1407_v60  ;;  %v1391_v9 = vadd.f32 %v1390_v55, %v1389_v29  ;;  %v1425_v22 = vrot.slane %v1424_v48, 2 }
 0x215   :  { %v1394_v13 = vsel %vm981_vm1, %v1380_v63, 0.0  ;;  %v1412_v17 = vadd.f32 %v1411_v62, %v1410_v36  ;;  %1674 = vmatpush.msra.mxu2 %v975_v0 }
 0x216   :  { %v1395_v50 = vrot.slane %v1394_v13, 4  ;;  %v1429_v43 = vsel %vm981_vm1, %v1385_v5, 0.0  ;;  %v1300_v12 = vpop.f32.mrf.mxu3  ;;  %v1392_v4 = vrot.slane %v1391_v9, 1  ;;  %v1426_v60 = vadd.f32 %v1425_v22, %v1424_v48  ;;  %v9138_v22 = vld [vmem:[%s14880_s3 + $0x174] sm:$0xf0] }
 0x217   :  { %v1430_v56 = vrot.slane %v1429_v43, 4  ;;  %v1367_v20 = vperm.slane %v1300_v12, 0  ;;  %v1413_v47 = vrot.slane %v1412_v17, 1  ;;  %1675 = vmatpush.msra.mxu2 %v967_v14 }
 0x218   :  { %v1396_v21 = vadd.f32 %v1395_v50, %v1394_v13  ;;  %v1393_v32 = vadd.f32 %v1392_v4, %v1391_v9 }
 0x219   :  { %v1431_v7 = vadd.f32 %v1430_v56, %v1429_v43  ;;  %v11317_v27 = vsub.f32 %v15145_v44, %v1367_v20  ;;  %v1414_v16 = vadd.f32 %v1413_v47, %v1412_v17  ;;  %v9106_v44 = vld [vmem:[%s14880_s3 + $0x74] sm:$0xf0] }
 0x21a   :  { %v1397_v0 = vrot.slane %v1396_v21, 2  ;;  %1459 = vmatmul.f32.vlgmr.msra.gmra.mxu0 %v1393_v32 }
 0x21b   :  { %v1432_v25 = vrot.slane %v1431_v7, 2  ;;  %v1383_v8 = vmul.f32 %v11317_v27, %v11317_v27  ;;  %1519 = vmatmul.f32.vlgmr.msra.gmra.mxu3 %v1414_v16  ;;  %1634 = vmatpush.msra.mxu0 %v973_v61  ;;  %v7718_v16 = vld [vmem:[%s14880_s3 + $0xf0] sm:$0xf] }
 0x21c   :  { %v1398_v14 = vadd.f32 %v1397_v0, %v1396_v21  ;;  %1694 = vmatpush.msra.mxu3 %v976_v3  ;;  %v1604_v21 = vld [vmem:[%s14879_s7] ss:$0 sm:$0xff] }
 0x21d   :  { %v1415_v23 = vsel %vm981_vm1, %v1383_v8, 0.0  ;;  %v1433_v29 = vadd.f32 %v1432_v25, %v1431_v7  ;;  %1635 = vmatpush.msra.mxu0 %v965_v11  ;;  %v7654_v7 = vld [vmem:[%s14880_s3 + $0x70] sm:$0xf]  ;;  %v9122_v25 = vld [vmem:[%s14880_s3 + $0xf4] sm:$0xf0] }
 0x21e   :  { %v1416_v37 = vrot.slane %v1415_v23, 4  ;;  %v1360_v42 = vpop.f32.mrf.mxu3  ;;  %v1399_v36 = vrot.slane %v1398_v14, 1  ;;  %1695 = vmatpush.msra.mxu3 %v968_v15  ;;  %v1427_v15 = vrot.slane %v1426_v60, 1  ;;  %v7782_v8 = vld [vmem:[%s14880_s3 + $0x170] sm:$0xf] }
 0x21f   :  { %v1370_v51 = vperm.slane %v1360_v42, 0  ;;  %v1434_v52 = vrot.slane %v1433_v29, 1  ;;  %v7655_v42 = vor.u32 %v9106_v44, %v7654_v7  ;;  %v9130_v7 = vld [vmem:[%s14880_s3 + $0x134] sm:$0xf0]  ;;  %v7814_v44 = vld [vmem:[%s14880_s3 + $0x1b0] sm:$0xf] }
 0x220   :  { %v1417_v61 = vadd.f32 %v1416_v37, %v1415_v23  ;;  %v1400_v55 = vadd.f32 %v1399_v36, %v1398_v14  ;;  %v1428_v13 = vadd.f32 %v1427_v15, %v1426_v60  ;;  %v7846_v14 = vld [vmem:[%s14880_s3 + $0x1f0] sm:$0xf]  ;;  %v9154_v23 = vld [vmem:[%s14880_s3 + $0x1f4] sm:$0xf0]  ;;  %v7719_v36 = vor.u32 %v9122_v25, %v7718_v16  ;;  %v9152_v15 = vld [vmem:[%s14880_s3 + $0x1e4] sm:$0xf0] }
 0x221   :  { %v11331_v58 = vsub.f32 %v11055_v18, %v1370_v51  ;;  %v1435_v3 = vadd.f32 %v1434_v52, %v1433_v29  ;;  %v7646_v51 = vld [vmem:[%s14880_s3 + $0x60] sm:$0xf]  ;;  %v9104_v52 = vld [vmem:[%s14880_s3 + $0x64] sm:$0xf0]  ;;  %v7783_v60 = vor.u32 %v9138_v22, %v7782_v8  ;;  %v9146_v16 = vld [vmem:[%s14880_s3 + $0x1b4] sm:$0xf0] }
 0x222   :  { %v1418_v62 = vrot.slane %v1417_v61, 2  ;;  %1479 = vmatmul.f32.vlgmr.msra.gmra.mxu1 %v1400_v55  ;;  %v9120_v55 = vld [vmem:[%s14880_s3 + $0xe4] sm:$0xf0]  ;;  %v7614_v8 = vld [vmem:[%s14880_s3 + $0x20] sm:$0xf] }
 0x223   :  { %v1386_v11 = vmul.f32 %v11331_v58, %v11331_v58  ;;  %1579 = vmatmul.f32.vlgmr.msrb.gmra.mxu2 %v1435_v3  ;;  %1654 = vmatpush.msra.mxu1 %v974_v19  ;;  %v7847_v3 = vor.u32 %v9154_v23, %v7846_v14  ;;  %v9096_v22 = vld [vmem:[%s14880_s3 + $0x24] sm:$0xf0]  ;;  %v7678_v14 = vld [vmem:[%s14880_s3 + $0xa0] sm:$0xf] }
 0x224   :  { %v1419_v10 = vadd.f32 %v1418_v62, %v1417_v61  ;;  %1754 = vmatpush.msrb.mxu2 %v979_v41  ;;  %v7710_v61 = vld [vmem:[%s14880_s3 + $0xe0] sm:$0xf]  ;;  %v9112_v23 = vld [vmem:[%s14880_s3 + $0xa4] sm:$0xf0] }
 0x225   :  { %v1436_v63 = vsel %vm981_vm1, %v1386_v11, 0.0  ;;  %1655 = vmatpush.msra.mxu1 %v966_v28  ;;  %v7774_v62 = vld [vmem:[%s14880_s3 + $0x160] sm:$0xf]  ;;  %v9136_v11 = vld [vmem:[%s14880_s3 + $0x164] sm:$0xf0] }
 0x226   :  { %v1437_v18 = vrot.slane %v1436_v63, 4  ;;  %v1420_v2 = vrot.slane %v1419_v10, 1  ;;  %1755 = vmatpush.msrb.mxu2 %v971_v49 }
 0x228   :  { %v1438_v5 = vadd.f32 %v1437_v18, %v1436_v63  ;;  %v1421_v9 = vadd.f32 %v1420_v2, %v1419_v10  ;;  %v7838_v10 = vld [vmem:[%s14880_s3 + $0x1e0] sm:$0xf]  ;;  %v7647_v63 = vor.u32 %v9104_v52, %v7646_v51  ;;  %v7711_v18 = vor.u32 %v9120_v55, %v7710_v61  ;;  %v7638_v2 = vld [vmem:[%s14880_s3 + $0x50] sm:$0xf]  ;;  %v9144_v52 = vld [vmem:[%s14880_s3 + $0x1a4] sm:$0xf0] }
 0x229   :  { %v7806_v51 = vld [vmem:[%s14880_s3 + $0x1a0] sm:$0xf]  ;;  %v7615_v61 = vor.u32 %v9096_v22, %v7614_v8  ;;  %v7679_v55 = vor.u32 %v9112_v23, %v7678_v14  ;;  %v7894_v8 = vld [vmem:[%s14880_s3 + $0x250] sm:$0xf]  ;;  %v9166_v22 = vld [vmem:[%s14880_s3 + $0x254] sm:$0xf0] }
 0x22a   :  { %v1439_v54 = vrot.slane %v1438_v5, 2  ;;  %1539 = vmatmul.f32.vlgmr.msrb.gmra.mxu0 %v1421_v9  ;;  %1559 = vmatmul.f32.vlgmr.msrb.gmra.mxu1 %v1428_v13  ;;  %v7702_v9 = vld [vmem:[%s14880_s3 + $0xd0] sm:$0xf]  ;;  %v9118_v13 = vld [vmem:[%s14880_s3 + $0xd4] sm:$0xf0]  ;;  %v7895_v23 = vor.u32 %v9166_v22, %v7894_v8 }
 0x22b   :  { %1714 = vmatpush.msrb.mxu0 %v977_v1  ;;  %1734 = vmatpush.msrb.mxu1 %v978_v38  ;;  %v7958_v14 = vld [vmem:[%s14880_s3 + $0x2d0] sm:$0xf]  ;;  %v7998_v22 = vld [vmem:[%s14880_s3 + $0x320] sm:$0xf] }
 0x22c   :  { %v1440_v19 = vadd.f32 %v1439_v54, %v1438_v5  ;;  %v9102_v5 = vld [vmem:[%s14880_s3 + $0x54] sm:$0xf0]  ;;  %v7775_v54 = vor.u32 %v9136_v11, %v7774_v62  ;;  %v7670_v62 = vld [vmem:[%s14880_s3 + $0x90] sm:$0xf] }
 0x22d   :  { %1715 = vmatpush.msrb.mxu0 %v969_v34  ;;  %1735 = vmatpush.msrb.mxu1 %v970_v45  ;;  %v9110_v11 = vld [vmem:[%s14880_s3 + $0x94] sm:$0xf0] }
 0x22e   :  { %v1441_v6 = vrot.slane %v1440_v19, 1 }
 0x230   :  { %v1442_v28 = vadd.f32 %v1441_v6, %v1440_v19  ;;  %v7839_v19 = vor.u32 %v9152_v15, %v7838_v10  ;;  %v7766_v6 = vld [vmem:[%s14880_s3 + $0x150] sm:$0xf]  ;;  %v7807_v15 = vor.u32 %v9144_v52, %v7806_v51  ;;  %v8094_v51 = vld [vmem:[%s14880_s3 + $0x3e0] sm:$0xf] }
 0x232   :  { %1599 = vmatmul.f32.vlgmr.msrb.gmra.mxu3 %v1442_v28  ;;  %v9134_v28 = vld [vmem:[%s14880_s3 + $0x154] sm:$0xf0] }
 0x233   :  { %1774 = vmatpush.msrb.mxu3 %v980_v39 }
 0x235   :  { %1775 = vmatpush.msrb.mxu3 %v972_v31 }
 0x297   :  { %v1460_v49 = vpop.f32.mrf.mxu0  ;;  %v1500_v38 = vpop.f32.mrf.mxu2 }
 0x29e   :  { %v1520_v17 = vpop.f32.mrf.mxu3 }
 0x29f   :  { %v1480_v41 = vpop.f32.mrf.mxu1 }
 0x2a0   :  { %v1481_v24 = vadd.f32 %v1480_v41, %v1460_v49  ;;  %v7830_v41 = vld [vmem:[%s14880_s3 + $0x1d0] sm:$0xf]  ;;  %v9150_v49 = vld [vmem:[%s14880_s3 + $0x1d4] sm:$0xf0] }
 0x2a2   :  { %v1501_v1 = vadd.f32 %v1500_v38, %v1481_v24  ;;  %v7639_v24 = vor.u32 %v9102_v5, %v7638_v2  ;;  %v7703_v38 = vor.u32 %v9118_v13, %v7702_v9  ;;  %v7598_v2 = vld [vmem:[%s14880_s3] sm:$0xf]  ;;  %v9092_v5 = vld [vmem:[%s14880_s3 + $0x4] sm:$0xf0] }
 0x2a3   :  { %v7662_v9 = vld [vmem:[%s14880_s3 + $0x80] sm:$0xf]  ;;  %v7599_v13 = vor.u32 %v9092_v5, %v7598_v2  ;;  %v8086_v2 = vld [vmem:[%s14880_s3 + $0x3d0] sm:$0xf] }
 0x2a4   :  { %v1521_v34 = vadd.f32 %v1520_v17, %v1501_v1  ;;  %v7630_v1 = vld [vmem:[%s14880_s3 + $0x40] sm:$0xf]  ;;  %v9100_v17 = vld [vmem:[%s14880_s3 + $0x44] sm:$0xf0] }
 0x2a6   :  { %v1580_v12 = vpop.f32.mrf.mxu2 }
 0x2a7   :  { %v1540_v50 = vpop.f32.mrf.mxu0  ;;  %v1560_v33 = vpop.f32.mrf.mxu1 }
 0x2a8   :  { %v1541_v43 = vadd.f32 %v1540_v50, %v1521_v34  ;;  %v7694_v50 = vld [vmem:[%s14880_s3 + $0xc0] sm:$0xf]  ;;  %v9116_v34 = vld [vmem:[%s14880_s3 + $0xc4] sm:$0xf0] }
 0x2aa   :  { %v1561_v45 = vadd.f32 %v1560_v33, %v1541_v43  ;;  %v7767_v43 = vor.u32 %v9134_v28, %v7766_v6  ;;  %v7831_v33 = vor.u32 %v9150_v49, %v7830_v41  ;;  %v9170_v6 = vld [vmem:[%s14880_s3 + $0x274] sm:$0xf0]  ;;  %v7974_v49 = vld [vmem:[%s14880_s3 + $0x2f0] sm:$0xf] }
 0x2ac   :  { %v1581_v4 = vadd.f32 %v1580_v12, %v1561_v45  ;;  %v7758_v45 = vld [vmem:[%s14880_s3 + $0x140] sm:$0xf]  ;;  %v9132_v12 = vld [vmem:[%s14880_s3 + $0x144] sm:$0xf0] }
 0x2b5   :  { %v1600_v56 = vpop.f32.mrf.mxu3 }
 0x2b6   :  { %v1601_v20 = vadd.f32 %v1600_v56, %v1581_v4  ;;  %v7822_v4 = vld [vmem:[%s14880_s3 + $0x1c0] sm:$0xf]  ;;  %v9148_v56 = vld [vmem:[%s14880_s3 + $0x1c4] sm:$0xf0] }
 0x2b8   :  { %v1603_v26 = vmul.f32 0.0078125, %v1601_v20  ;;  %v7631_v20 = vor.u32 %v9100_v17, %v7630_v1  ;;  %v7734_v1 = vld [vmem:[%s14880_s3 + $0x110] sm:$0xf]  ;;  %v9126_v17 = vld [vmem:[%s14880_s3 + $0x114] sm:$0xf0] }
 0x2ba   :  { %v1605_v39 = vadd.f32 1e-05, %v1603_v26  ;;  %v7695_v26 = vor.u32 %v9116_v34, %v7694_v50  ;;  %v7798_v50 = vld [vmem:[%s14880_s3 + $0x190] sm:$0xf]  ;;  %v7735_v34 = vor.u32 %v9126_v17, %v7734_v1  ;;  %v8078_v17 = vld [vmem:[%s14880_s3 + $0x3c0] sm:$0xf] }
 0x2bc   :  { %9467 = vrsqrt.f32 %v1605_v39  ;;  %vm1612_vm4 = vweird.f32 %v1605_v39 }
 0x2c2   :  { %v9468_v46 = vpop.eup %9467 }
 0x2c3   :  { %v1607_v31 = vmul.f32 %v9468_v46, %v1605_v39  ;;  %vm1613_vm3 = vweird.f32 %v9468_v46  ;;  %v7622_v39 = vld [vmem:[%s14880_s3 + $0x30] sm:$0xf] }
 0x2c4   :  { %vm1614_vm5 = vmor %vm1612_vm4, %vm1613_vm3 }
 0x2c5   :  { %v1608_v47 = vmul.f32 %v9468_v46, %v1607_v31  ;;  %v7686_v31 = vld [vmem:[%s14880_s3 + $0xb0] sm:$0xf] }
 0x2c7   :  { %v1609_v48 = vmul.f32 0.5, %v1608_v47  ;;  %v9114_v47 = vld [vmem:[%s14880_s3 + $0xb4] sm:$0xf0] }
 0x2c8   :  { %v7687_v25 = vor.u32 %v9114_v47, %v7686_v31  ;;  %v7790_v31 = vld [vmem:[%s14880_s3 + $0x180] sm:$0xf]  ;;  %v9140_v47 = vld [vmem:[%s14880_s3 + $0x184] sm:$0xf0] }
 0x2c9   :  { %v1610_v32 = vsub.f32 1.5, %v1609_v48  ;;  %v7759_v48 = vor.u32 %v9132_v12, %v7758_v45  ;;  %v7902_v45 = vld [vmem:[%s14880_s3 + $0x260] sm:$0xf]  ;;  %v9168_v12 = vld [vmem:[%s14880_s3 + $0x264] sm:$0xf0] }
 0x2cb   :  { %v1611_v0 = vmul.f32 %v9468_v46, %v1610_v32  ;;  %v7750_v32 = vld [vmem:[%s14880_s3 + $0x130] sm:$0xf] }
 0x2cd   :  { %v1615_v29 = vsel %vm1614_vm5, %v9468_v46, %v1611_v0  ;;  %v9098_v46 = vld [vmem:[%s14880_s3 + $0x34] sm:$0xf0] }
 0x2ce   :  { %v1616_v37 = vmul.f32 %v1615_v29, %v1604_v21  ;;  %v7823_v21 = vor.u32 %v9148_v56, %v7822_v4  ;;  %v7623_v0 = vor.u32 %v9098_v46, %v7622_v39  ;;  %v7751_v29 = vor.u32 %v9130_v7, %v7750_v32  ;;  %v7966_v56 = vld [vmem:[%s14880_s3 + $0x2e0] sm:$0xf]  ;;  %v9124_v46 = vld [vmem:[%s14880_s3 + $0x104] sm:$0xf0]  ;;  %v8038_v32 = vld [vmem:[%s14880_s3 + $0x370] sm:$0xf] }
 0x2cf   :  { %v7903_v4 = vor.u32 %v9168_v12, %v7902_v45  ;;  %v9202_v7 = vld [vmem:[%s14880_s3 + $0x374] sm:$0xf0]  ;;  %v9160_v45 = vld [vmem:[%s14880_s3 + $0x224] sm:$0xf0]  ;;  %v7934_v12 = vld [vmem:[%s14880_s3 + $0x2a0] sm:$0xf] }
 0x2d0   :  { %7586 = vmatmul.msk.f32.vlgmr.msra.gmra.mxu0 %vm1199_vm2, %v1616_v37  ;;  %7587 = vmatmul.msk.f32.vlgmr.msra.gmra.mxu1 %vm1199_vm2, %v1616_v37 }
 0x2d1   :  { %7588 = vmatmul.msk.f32.vlgmr.msra.gmra.mxu2 %vm1199_vm2, %v1616_v37  ;;  %7589 = vmatmul.msk.f32.vlgmr.msra.gmra.mxu3 %vm1199_vm2, %v1616_v37 }
 0x2d2   :  { %2649 = vmatpush.bf16.msra.mxu0 %v7655_v42  ;;  %2662 = vmatpush.bf16.msra.mxu1 %v7719_v36  ;;  %v7742_v42 = vld [vmem:[%s14880_s3 + $0x120] sm:$0xf]  ;;  %v9128_v36 = vld [vmem:[%s14880_s3 + $0x124] sm:$0xf0] }
 0x2d3   :  { %2675 = vmatpush.bf16.msra.mxu2 %v7783_v60  ;;  %2688 = vmatpush.bf16.msra.mxu3 %v7847_v3  ;;  %v7606_v60 = vld [vmem:[%s14880_s3 + $0x10] sm:$0xf]  ;;  %v9094_v3 = vld [vmem:[%s14880_s3 + $0x14] sm:$0xf0]  ;;  %v7743_v10 = vor.u32 %v9128_v36, %v7742_v42  ;;  %v8030_v42 = vld [vmem:[%s14880_s3 + $0x360] sm:$0xf] }
 0x2d4   :  { %v9200_v36 = vld [vmem:[%s14880_s3 + $0x364] sm:$0xf0] }
 0x2d5   :  { %v8031_v52 = vor.u32 %v9200_v36, %v8030_v42  ;;  %v7854_v36 = vld [vmem:[%s14880_s3 + $0x200] sm:$0xf] }
 0x2d6   :  { %2650 = vmatpush.bf16.msra.mxu0 %v7647_v63  ;;  %2663 = vmatpush.bf16.msra.mxu1 %v7711_v18  ;;  %v7607_v63 = vor.u32 %v9094_v3, %v7606_v60  ;;  %v7671_v18 = vor.u32 %v9110_v11, %v7670_v62  ;;  %v7886_v60 = vld [vmem:[%s14880_s3 + $0x240] sm:$0xf]  ;;  %v9164_v3 = vld [vmem:[%s14880_s3 + $0x244] sm:$0xf0] }
 0x2d7   :  { %2676 = vmatpush.bf16.msra.mxu2 %v7775_v54  ;;  %2689 = vmatpush.bf16.msra.mxu3 %v7839_v19  ;;  %v9108_v54 = vld [vmem:[%s14880_s3 + $0x84] sm:$0xf0]  ;;  %v7910_v19 = vld [vmem:[%s14880_s3 + $0x270] sm:$0xf]  ;;  %v7950_v62 = vld [vmem:[%s14880_s3 + $0x2c0] sm:$0xf]  ;;  %v7887_v11 = vor.u32 %v9164_v3, %v7886_v60 }
 0x2d8   :  { %7590 = vmatmul.msk.f32.vlgmr.msrb.gmra.mxu0 %vm1199_vm2, %v1616_v37  ;;  %7591 = vmatmul.msk.f32.vlgmr.msrb.gmra.mxu1 %vm1199_vm2, %v1616_v37  ;;  %v7663_v28 = vor.u32 %v9108_v54, %v7662_v9  ;;  %v7911_v41 = vor.u32 %v9170_v6, %v7910_v19  ;;  %v9214_v9 = vld [vmem:[%s14880_s3 + $0x3d4] sm:$0xf0]  ;;  %v7878_v54 = vld [vmem:[%s14880_s3 + $0x230] sm:$0xf] }
 0x2d9   :  { %7592 = vmatmul.msk.f32.vlgmr.msrb.gmra.mxu2 %vm1199_vm2, %v1616_v37  ;;  %7593 = vmatmul.msk.f32.vlgmr.msrb.gmra.mxu3 %vm1199_vm2, %v1616_v37  ;;  %v7815_v37 = vor.u32 %v9146_v16, %v7814_v44  ;;  %v8102_v44 = vld [vmem:[%s14880_s3 + $0x3f0] sm:$0xf]  ;;  %v8039_v16 = vor.u32 %v9202_v7, %v8038_v32  ;;  %v9162_v19 = vld [vmem:[%s14880_s3 + $0x234] sm:$0xf0] }
 0x2da   :  { %2651 = vmatpush.bf16.msra.mxu0 %v7639_v24  ;;  %2664 = vmatpush.bf16.msra.mxu1 %v7703_v38  ;;  %v9186_v24 = vld [vmem:[%s14880_s3 + $0x2f4] sm:$0xf0]  ;;  %v7942_v6 = vld [vmem:[%s14880_s3 + $0x2b0] sm:$0xf] }
 0x2db   :  { %2677 = vmatpush.bf16.msra.mxu2 %v7767_v43  ;;  %2690 = vmatpush.bf16.msra.mxu3 %v7831_v33  ;;  %v7975_v38 = vor.u32 %v9186_v24, %v7974_v49  ;;  %v9142_v43 = vld [vmem:[%s14880_s3 + $0x194] sm:$0xf0]  ;;  %v8014_v24 = vld [vmem:[%s14880_s3 + $0x340] sm:$0xf]  ;;  %v7862_v32 = vld [vmem:[%s14880_s3 + $0x210] sm:$0xf] }
 0x2dc   :  { %v7799_v33 = vor.u32 %v9142_v43, %v7798_v50  ;;  %v9212_v50 = vld [vmem:[%s14880_s3 + $0x3c4] sm:$0xf0]  ;;  %v9158_v7 = vld [vmem:[%s14880_s3 + $0x214] sm:$0xf0] }
 0x2dd   :  { %v8079_v43 = vor.u32 %v9212_v50, %v8078_v17 }
 0x2de   :  { %2652 = vmatpush.bf16.msra.mxu0 %v7631_v20  ;;  %2665 = vmatpush.bf16.msra.mxu1 %v7695_v26  ;;  %v9184_v20 = vld [vmem:[%s14880_s3 + $0x2e4] sm:$0xf0]  ;;  %v7726_v26 = vld [vmem:[%s14880_s3 + $0x100] sm:$0xf] }
 0x2df   :  { %2678 = vmatpush.bf16.msra.mxu2 %v7759_v48  ;;  %2691 = vmatpush.bf16.msra.mxu3 %v7823_v21  ;;  %v7967_v39 = vor.u32 %v9184_v20, %v7966_v56  ;;  %v7727_v48 = vor.u32 %v9124_v46, %v7726_v26  ;;  %v7791_v21 = vor.u32 %v9140_v47, %v7790_v31  ;;  %v9176_v20 = vld [vmem:[%s14880_s3 + $0x2a4] sm:$0xf0]  ;;  %v9194_v46 = vld [vmem:[%s14880_s3 + $0x334] sm:$0xf0]  ;;  %v8070_v31 = vld [vmem:[%s14880_s3 + $0x3b0] sm:$0xf] }
 0x2e0   :  { %v7935_v26 = vor.u32 %v9176_v20, %v7934_v12 }
 0x2e2   :  { %2653 = vmatpush.bf16.msra.mxu0 %v7623_v0  ;;  %2666 = vmatpush.bf16.msra.mxu1 %v7687_v25  ;;  %v9218_v0 = vld [vmem:[%s14880_s3 + $0x3f4] sm:$0xf0] }
 0x2e3   :  { %2679 = vmatpush.bf16.msra.mxu2 %v7751_v29  ;;  %2692 = vmatpush.bf16.msra.mxu3 %v7815_v37  ;;  %v8103_v25 = vor.u32 %v9218_v0, %v8102_v44  ;;  %v9182_v29 = vld [vmem:[%s14880_s3 + $0x2d4] sm:$0xf0]  ;;  %v7926_v44 = vld [vmem:[%s14880_s3 + $0x290] sm:$0xf]  ;;  %v7863_v0 = vor.u32 %v9158_v7, %v7862_v32 }
 0x2e4   :  { %v7959_v37 = vor.u32 %v9182_v29, %v7958_v14  ;;  %v9192_v14 = vld [vmem:[%s14880_s3 + $0x324] sm:$0xf0] }
 0x2e5   :  { %v7999_v29 = vor.u32 %v9192_v14, %v7998_v22 }
 0x2e6   :  { %2654 = vmatpush.bf16.msra.mxu0 %v7615_v61  ;;  %2667 = vmatpush.bf16.msra.mxu1 %v7679_v55  ;;  %v9216_v61 = vld [vmem:[%s14880_s3 + $0x3e4] sm:$0xf0] }
 0x2e7   :  { %2680 = vmatpush.bf16.msra.mxu2 %v7743_v10  ;;  %2693 = vmatpush.bf16.msra.mxu3 %v7807_v15  ;;  %v8095_v55 = vor.u32 %v9216_v61, %v8094_v51  ;;  %v9180_v10 = vld [vmem:[%s14880_s3 + $0x2c4] sm:$0xf0] }
 0x2e8   :  { %v7951_v15 = vor.u32 %v9180_v10, %v7950_v62  ;;  %v9156_v51 = vld [vmem:[%s14880_s3 + $0x204] sm:$0xf0] }
 0x2e9   :  { %v7855_v3 = vor.u32 %v9156_v51, %v7854_v36  ;;  %v9172_v62 = vld [vmem:[%s14880_s3 + $0x284] sm:$0xf0] }
 0x2ea   :  { %2655 = vmatpush.bf16.msra.mxu0 %v7607_v63  ;;  %2668 = vmatpush.bf16.msra.mxu1 %v7671_v18  ;;  %v8022_v63 = vld [vmem:[%s14880_s3 + $0x350] sm:$0xf]  ;;  %v9198_v18 = vld [vmem:[%s14880_s3 + $0x354] sm:$0xf0] }
 0x2eb   :  { %2681 = vmatpush.bf16.msra.mxu2 %v7735_v34  ;;  %2694 = vmatpush.bf16.msra.mxu3 %v7799_v33  ;;  %v8023_v5 = vor.u32 %v9198_v18, %v8022_v63  ;;  %v7594_v34 = vld [vmem:[%s14879_s7 + $0x1] ss:$8 sm:$0xf] }
 0x2ec   :  { %v7870_v33 = vld [vmem:[%s14880_s3 + $0x220] sm:$0xf]  ;;  %v7990_v18 = vld [vmem:[%s14880_s3 + $0x310] sm:$0xf] }
 0x2ed   :  { %v7871_v56 = vor.u32 %v9160_v45, %v7870_v33 }
 0x2ee   :  { %2656 = vmatpush.bf16.msra.mxu0 %v7599_v13  ;;  %2669 = vmatpush.bf16.msra.mxu1 %v7663_v28  ;;  %v8087_v13 = vor.u32 %v9214_v9, %v8086_v2  ;;  %v7879_v28 = vor.u32 %v9162_v19, %v7878_v54  ;;  %v9190_v2 = vld [vmem:[%s14880_s3 + $0x314] sm:$0xf0] }
 0x2ef   :  { %2682 = vmatpush.bf16.msra.mxu2 %v7727_v48  ;;  %2695 = vmatpush.bf16.msra.mxu3 %v7791_v21  ;;  %v9210_v48 = vld [vmem:[%s14880_s3 + $0x3b4] sm:$0xf0]  ;;  %v7991_v54 = vor.u32 %v9190_v2, %v7990_v18 }
 0x2f0   :  { %v8071_v21 = vor.u32 %v9210_v48, %v8070_v31  ;;  %v9206_v19 = vld [vmem:[%s14880_s3 + $0x394] sm:$0xf0] }
 0x2f2   :  { %2701 = vmatpush.bf16.msrb.mxu0 %v7911_v41  ;;  %2714 = vmatpush.bf16.msrb.mxu1 %v7975_v38  ;;  %v9178_v41 = vld [vmem:[%s14880_s3 + $0x2b4] sm:$0xf0]  ;;  %v9196_v38 = vld [vmem:[%s14880_s3 + $0x344] sm:$0xf0] }
 0x2f3   :  { %2727 = vmatpush.bf16.msrb.mxu2 %v8039_v16  ;;  %2740 = vmatpush.bf16.msrb.mxu3 %v8103_v25  ;;  %v7943_v49 = vor.u32 %v9178_v41, %v7942_v6  ;;  %v8015_v1 = vor.u32 %v9196_v38, %v8014_v24  ;;  %v9174_v25 = vld [vmem:[%s14880_s3 + $0x294] sm:$0xf0]  ;;  %v8046_v38 = vld [vmem:[%s14880_s3 + $0x380] sm:$0xf] }
 0x2f4   :  { %v7927_v8 = vor.u32 %v9174_v25, %v7926_v44 }
 0x2f6   :  { %2702 = vmatpush.bf16.msrb.mxu0 %v7903_v4  ;;  %2715 = vmatpush.bf16.msrb.mxu1 %v7967_v39  ;;  %v7595_v4 = vld [vmem:[%s14879_s7 + $0x1] ss:$8 sm:$0xf0] }
 0x2f7   :  { %2728 = vmatpush.bf16.msrb.mxu2 %v8031_v52  ;;  %2741 = vmatpush.bf16.msrb.mxu3 %v8095_v55  ;;  %v8006_v39 = vld [vmem:[%s14880_s3 + $0x330] sm:$0xf]  ;;  %v11706_v16 = vor.u32 %v7595_v4, %v7594_v34  ;;  %v7918_v52 = vld [vmem:[%s14880_s3 + $0x280] sm:$0xf] }
 0x2f8   :  { %v8007_v47 = vor.u32 %v9194_v46, %v8006_v39  ;;  %v7919_v63 = vor.u32 %v9172_v62, %v7918_v52 }
 0x2f9   :  { %v1801_v55 = vperm.slane %v11706_v16, 0  ;;  %v1804_v33 = vperm.slane %v11706_v16, 3  ;;  %v1805_v20 = vperm.slane %v11706_v16, 4  ;;  %v1806_v39 = vperm.slane %v11706_v16, 5 }
 0x2fa   :  { %2703 = vmatpush.bf16.msrb.mxu0 %v7895_v23  ;;  %2716 = vmatpush.bf16.msrb.mxu1 %v7959_v37  ;;  %v8062_v23 = vld [vmem:[%s14880_s3 + $0x3a0] sm:$0xf]  ;;  %v9208_v37 = vld [vmem:[%s14880_s3 + $0x3a4] sm:$0xf0] }
 0x2fb   :  { %2729 = vmatpush.bf16.msrb.mxu2 %v8023_v5  ;;  %2742 = vmatpush.bf16.msrb.mxu3 %v8087_v13  ;;  %v8063_v42 = vor.u32 %v9208_v37, %v8062_v23  ;;  %v8054_v5 = vld [vmem:[%s14880_s3 + $0x390] sm:$0xf]  ;;  %v1808_v37 = vperm.slane %v11706_v16, 7 }
 0x2fc   :  { %v8055_v6 = vor.u32 %v9206_v19, %v8054_v5  ;;  %v7656_v19 = vld [vmem:[%s14880_s3 + $0x78] sm:$0xf0] }
 0x2fe   :  { %2704 = vmatpush.bf16.msrb.mxu0 %v7887_v11  ;;  %2717 = vmatpush.bf16.msrb.mxu1 %v7951_v15  ;;  %v1802_v15 = vperm.slane %v11706_v16, 1 }
 0x2ff   :  { %2730 = vmatpush.bf16.msrb.mxu2 %v8015_v1  ;;  %2743 = vmatpush.bf16.msrb.mxu3 %v8079_v43  ;;  %v9204_v1 = vld [vmem:[%s14880_s3 + $0x384] sm:$0xf0] }
 0x300   :  { %v8047_v45 = vor.u32 %v9204_v1, %v8046_v38 }
 0x302   :  { %2705 = vmatpush.bf16.msrb.mxu0 %v7879_v28  ;;  %2718 = vmatpush.bf16.msrb.mxu1 %v7943_v49  ;;  %v7982_v49 = vld [vmem:[%s14880_s3 + $0x300] sm:$0xf] }
 0x303   :  { %2731 = vmatpush.bf16.msrb.mxu2 %v8007_v47  ;;  %2744 = vmatpush.bf16.msrb.mxu3 %v8071_v21 }
 0x306   :  { %2706 = vmatpush.bf16.msrb.mxu0 %v7871_v56  ;;  %2719 = vmatpush.bf16.msrb.mxu1 %v7935_v26 }
 0x307   :  { %2732 = vmatpush.bf16.msrb.mxu2 %v7999_v29  ;;  %2745 = vmatpush.bf16.msrb.mxu3 %v8063_v42 }
 0x30a   :  { %2707 = vmatpush.bf16.msrb.mxu0 %v7863_v0  ;;  %2720 = vmatpush.bf16.msrb.mxu1 %v7927_v8 }
 0x30b   :  { %2733 = vmatpush.bf16.msrb.mxu2 %v7991_v54  ;;  %2746 = vmatpush.bf16.msrb.mxu3 %v8055_v6 }
 0x30e   :  { %2708 = vmatpush.bf16.msrb.mxu0 %v7855_v3  ;;  %2721 = vmatpush.bf16.msrb.mxu1 %v7919_v63 }
 0x30f   :  { %2747 = vmatpush.bf16.msrb.mxu3 %v8047_v45 }
 0x34d   :  { %v1637_v61 = vpop.f32.mrf.mxu0  ;;  %v1657_v60 = vpop.f32.mrf.mxu1 }
 0x34e   :  { %v1784_v11 = vperm.slane %v1637_v61, 0  ;;  %v1785_v10 = vperm.slane %v1657_v60, 0 }
 0x350   :  { %v1792_v9 = vmul.f32 %v1784_v11, %v11283_v40  ;;  %v1793_v13 = vmul.f32 %v1785_v10, %v11301_v53  ;;  %v9188_v40 = vld [vmem:[%s14880_s3 + $0x304] sm:$0xf0]  ;;  %v1803_v53 = vperm.slane %v11706_v16, 2 }
 0x351   :  { %v7983_v24 = vor.u32 %v9188_v40, %v7982_v49  ;;  %v9121_v40 = vld [vmem:[%s14880_s3 + $0xf4] sm:$0xf] }
 0x352   :  { %v11751_v28 = vadd.f32 %v1801_v55, %v1792_v9  ;;  %v11753_v41 = vadd.f32 %v1802_v15, %v1793_v13 }
 0x353   :  { %2734 = vmatpush.bf16.msrb.mxu2 %v7983_v24 }
 0x354   :  { %v1825_v17 = vsub.f32 0.0, %v11751_v28  ;;  %v1826_v50 = vsub.f32 0.0, %v11753_v41  ;;  %v1677_v34 = vpop.f32.mrf.mxu2  ;;  %v1697_v43 = vpop.f32.mrf.mxu3 }
 0x355   :  { %v1786_v12 = vperm.slane %v1677_v34, 0  ;;  %v1787_v4 = vperm.slane %v1697_v43, 0  ;;  %v1717_v56 = vpop.f32.mrf.mxu0  ;;  %v1737_v26 = vpop.f32.mrf.mxu1 }
 0x356   :  { %v1833_v46 = vmul.f32 1.442695, %v1825_v17  ;;  %v1835_v31 = vmul.f32 1.442695, %v1826_v50  ;;  %v1788_v47 = vperm.slane %v1717_v56, 0  ;;  %v1789_v48 = vperm.slane %v1737_v26, 0 }
 0x357   :  { %v1794_v21 = vmul.f32 %v1786_v12, %v11277_v59  ;;  %v1795_v32 = vmul.f32 %v1787_v4, %v11286_v30  ;;  %v9103_v12 = vld [vmem:[%s14880_s3 + $0x64] sm:$0xf] }
 0x358   :  { %9469 = vpow2.f32 %v1833_v46  ;;  %v1796_v7 = vmul.f32 %v1788_v47, %v11317_v27  ;;  %v1797_v44 = vmul.f32 %v1789_v48, %v11291_v35  ;;  %v1807_v35 = vperm.slane %v11706_v16, 6  ;;  %v9137_v46 = vld [vmem:[%s14880_s3 + $0x174] sm:$0xf] }
 0x359   :  { %9471 = vpow2.f32 %v1835_v31  ;;  %v11777_v0 = vadd.f32 %v1803_v53, %v1794_v21  ;;  %v11779_v25 = vadd.f32 %v1804_v33, %v1795_v32  ;;  %v7720_v53 = vld [vmem:[%s14880_s3 + $0xf8] sm:$0xf0]  ;;  %v9153_v47 = vld [vmem:[%s14880_s3 + $0x1f4] sm:$0xf] }
 0x35a   :  { %v11781_v8 = vadd.f32 %v1805_v20, %v1796_v7  ;;  %v11783_v22 = vadd.f32 %v1806_v39, %v1797_v44  ;;  %v7723_v45 = vor.u32 %v9121_v40, %v7720_v53  ;;  %v7712_v20 = vld [vmem:[%s14880_s3 + $0xe8] sm:$0xf0]  ;;  %v7784_v31 = vld [vmem:[%s14880_s3 + $0x178] sm:$0xf0]  ;;  %v9101_v7 = vld [vmem:[%s14880_s3 + $0x54] sm:$0xf] }
 0x35b   :  { %v1827_v14 = vsub.f32 0.0, %v11777_v0  ;;  %v1828_v59 = vsub.f32 0.0, %v11779_v25  ;;  %v7848_v32 = vld [vmem:[%s14880_s3 + $0x1f8] sm:$0xf0]  ;;  %v9097_v40 = vld [vmem:[%s14880_s3 + $0x34] sm:$0xf] }
 0x35c   :  { %v1829_v30 = vsub.f32 0.0, %v11781_v8  ;;  %v1830_v23 = vsub.f32 0.0, %v11783_v22  ;;  %v1757_v27 = vpop.f32.mrf.mxu2  ;;  %v1777_v29 = vpop.f32.mrf.mxu3  ;;  %v7640_v44 = vld [vmem:[%s14880_s3 + $0x58] sm:$0xf0] }
 0x35d   :  { %v1837_v42 = vmul.f32 1.442695, %v1827_v14  ;;  %v1839_v36 = vmul.f32 1.442695, %v1828_v59  ;;  %v1790_v51 = vperm.slane %v1757_v27, 0  ;;  %v1791_v52 = vperm.slane %v1777_v29, 0 }
 0x35e   :  { %v9470_v61 = vpop.eup %9469  ;;  %v1841_v55 = vmul.f32 1.442695, %v1829_v30  ;;  %v1843_v15 = vmul.f32 1.442695, %v1830_v23  ;;  %v9117_v30 = vld [vmem:[%s14880_s3 + $0xd4] sm:$0xf] }
 0x35f   :  { %v9472_v60 = vpop.eup %9471  ;;  %v1849_v3 = vadd.f32 1.0, %v9470_v61  ;;  %9473 = vpow2.f32 %v1837_v42  ;;  %v1798_v62 = vmul.f32 %v1790_v51, %v11304_v57  ;;  %v1799_v11 = vmul.f32 %v1791_v52, %v11331_v58  ;;  %v9105_v57 = vld [vmem:[%s14880_s3 + $0x74] sm:$0xf]  ;;  %v7704_v23 = vld [vmem:[%s14880_s3 + $0xd8] sm:$0xf0] }
 0x360   :  { %v1850_v10 = vadd.f32 1.0, %v9472_v60  ;;  %9475 = vpow2.f32 %v1839_v36  ;;  %v7659_v50 = vor.u32 %v9105_v57, %v7656_v19  ;;  %v9135_v42 = vld [vmem:[%s14880_s3 + $0x164] sm:$0xf]  ;;  %v7851_v51 = vor.u32 %v9153_v47, %v7848_v32  ;;  %v7776_v61 = vld [vmem:[%s14880_s3 + $0x168] sm:$0xf0] }
 0x361   :  { %9477 = vrcp.f32 %v1849_v3  ;;  %v11793_v63 = vadd.f32 %v1807_v35, %v1798_v62  ;;  %v11795_v16 = vadd.f32 %v1808_v37, %v1799_v11  ;;  %v7787_v37 = vor.u32 %v9137_v46, %v7784_v31  ;;  %v7840_v3 = vld [vmem:[%s14880_s3 + $0x1e8] sm:$0xf0]  ;;  %v9099_v62 = vld [vmem:[%s14880_s3 + $0x44] sm:$0xf]  ;;  %v9129_v32 = vld [vmem:[%s14880_s3 + $0x134] sm:$0xf] }
 0x362   :  { %9479 = vrcp.f32 %v1850_v10  ;;  %v7643_v52 = vor.u32 %v9101_v7, %v7640_v44  ;;  %v7707_v60 = vor.u32 %v9117_v30, %v7704_v23  ;;  %v7632_v11 = vld [vmem:[%s14880_s3 + $0x48] sm:$0xf0]  ;;  %v9111_v46 = vld [vmem:[%s14880_s3 + $0xa4] sm:$0xf]  ;;  %v7752_v7 = vld [vmem:[%s14880_s3 + $0x138] sm:$0xf0] }
 0x363   :  { %9481 = vpow2.f32 %v1841_v55  ;;  %v1831_v18 = vsub.f32 0.0, %v11793_v63  ;;  %v1832_v2 = vsub.f32 0.0, %v11795_v16  ;;  %v7635_v57 = vor.u32 %v9099_v62, %v7632_v11  ;;  %v7680_v31 = vld [vmem:[%s14880_s3 + $0xa8] sm:$0xf0]  ;;  %v7816_v30 = vld [vmem:[%s14880_s3 + $0x1b8] sm:$0xf0] }
 0x364   :  { %9483 = vpow2.f32 %v1843_v15  ;;  %v9115_v15 = vld [vmem:[%s14880_s3 + $0xc4] sm:$0xf]  ;;  %v9093_v23 = vld [vmem:[%s14880_s3 + $0x14] sm:$0xf]  ;;  %v7600_v11 = vld [vmem:[%s14880_s3 + $0x8] sm:$0xf0] }
 0x365   :  { %v9474_v5 = vpop.eup %9473  ;;  %v1845_v9 = vmul.f32 1.442695, %v1831_v18  ;;  %v1847_v54 = vmul.f32 1.442695, %v1832_v2  ;;  %v7696_v18 = vld [vmem:[%s14880_s3 + $0xc8] sm:$0xf0] }
 0x366   :  { %v9476_v58 = vpop.eup %9475  ;;  %v1851_v13 = vadd.f32 1.0, %v9474_v5  ;;  %v7779_v5 = vor.u32 %v9135_v42, %v7776_v61  ;;  %v7699_v19 = vor.u32 %v9115_v15, %v7696_v18  ;;  %v9091_v62 = vld [vmem:[%s14880_s3 + $0x4] sm:$0xf]  ;;  %v7664_v15 = vld [vmem:[%s14880_s3 + $0x88] sm:$0xf0] }
 0x367   :  { %v9478_v6 = vpop.eup %9477  ;;  %v1852_v49 = vadd.f32 1.0, %v9476_v58  ;;  %9485 = vpow2.f32 %v1845_v9  ;;  %v9133_v58 = vld [vmem:[%s14880_s3 + $0x154] sm:$0xf] }
 0x368   :  { %v9480_v24 = vpop.eup %9479  ;;  %v1865_v38 = vmul.f32 %v9478_v6, %v11751_v28  ;;  %9487 = vrcp.f32 %v1851_v13  ;;  %v7648_v28 = vld [vmem:[%s14880_s3 + $0x68] sm:$0xf0]  ;;  %v7768_v13 = vld [vmem:[%s14880_s3 + $0x158] sm:$0xf0]  ;;  %v9149_v6 = vld [vmem:[%s14880_s3 + $0x1d4] sm:$0xf] }
 0x369   :  { %v9482_v1 = vpop.eup %9481  ;;  %v1866_v17 = vmul.f32 %v9480_v24, %v11753_v41  ;;  %9489 = vrcp.f32 %v1852_v49  ;;  %v9119_v41 = vld [vmem:[%s14880_s3 + $0xe4] sm:$0xf]  ;;  %v7651_v39 = vor.u32 %v9103_v12, %v7648_v28  ;;  %v7832_v49 = vld [vmem:[%s14880_s3 + $0x1d8] sm:$0xf0]  ;;  %v9113_v24 = vld [vmem:[%s14880_s3 + $0xb4] sm:$0xf] }
 0x36a   :  { %v9484_v34 = vpop.eup %9483  ;;  %v1853_v43 = vadd.f32 1.0, %v9482_v1  ;;  %9491 = vpow2.f32 %v1847_v54  ;;  %v11813_v33 = vpack.c.bf16 %v1865_v38, %v1865_v38  ;;  %v7715_v21 = vor.u32 %v9119_v41, %v7712_v20  ;;  %v7688_v38 = vld [vmem:[%s14880_s3 + $0xb8] sm:$0xf0]  ;;  %v9147_v28 = vld [vmem:[%s14880_s3 + $0x1c4] sm:$0xf] }
 0x36b   :  { %v1854_v4 = vadd.f32 1.0, %v9484_v34  ;;  %v11821_v56 = vpack.c.bf16 %v1866_v17, %v1866_v17  ;;  %v7771_v1 = vor.u32 %v9133_v58, %v7768_v13  ;;  %v7835_v17 = vor.u32 %v9149_v6, %v7832_v49  ;;  %v9095_v41 = vld [vmem:[%s14880_s3 + $0x24] sm:$0xf]  ;;  %v9169_v18 = vld [vmem:[%s14880_s3 + $0x274] sm:$0xf] }
 0x36c   :  { %2657 = vmatmul.bf16.vlgmr.msra.gmra.mxu0 %v11813_v33  ;;  %9493 = vrcp.f32 %v1853_v43  ;;  %v7691_v12 = vor.u32 %v9113_v24, %v7688_v38  ;;  %v9125_v13 = vld [vmem:[%s14880_s3 + $0x114] sm:$0xf]  ;;  %v9167_v24 = vld [vmem:[%s14880_s3 + $0x264] sm:$0xf] }
 0x36d   :  { %v9486_v26 = vpop.eup %9485  ;;  %2670 = vmatmul.bf16.vlgmr.msra.gmra.mxu1 %v11821_v56  ;;  %2753 = vmatpush.bf16.msra.mxu0 %v7659_v50  ;;  %9495 = vrcp.f32 %v1854_v4  ;;  %v7760_v50 = vld [vmem:[%s14880_s3 + $0x148] sm:$0xf0]  ;;  %v9141_v49 = vld [vmem:[%s14880_s3 + $0x194] sm:$0xf] }
 0x36e   :  { %v9488_v48 = vpop.eup %9487  ;;  %2766 = vmatpush.bf16.msra.mxu1 %v7723_v45  ;;  %v1855_v29 = vadd.f32 1.0, %v9486_v26  ;;  %v7824_v4 = vld [vmem:[%s14880_s3 + $0x1c8] sm:$0xf0] }
 0x36f   :  { %v9490_v14 = vpop.eup %9489  ;;  %v1867_v59 = vmul.f32 %v9488_v48, %v11777_v0 }
 0x370   :  { %v9492_v27 = vpop.eup %9491  ;;  %v1868_v35 = vmul.f32 %v9490_v14, %v11779_v25  ;;  %v9151_v25 = vld [vmem:[%s14880_s3 + $0x1e4] sm:$0xf]  ;;  %9497 = vrcp.f32 %v1855_v29  ;;  %v7755_v29 = vor.u32 %v9129_v32, %v7752_v7  ;;  %v9181_v32 = vld [vmem:[%s14880_s3 + $0x2d4] sm:$0xf]  ;;  %v7960_v7 = vld [vmem:[%s14880_s3 + $0x2d8] sm:$0xf0] }
 0x371   :  { %v1856_v36 = vadd.f32 1.0, %v9492_v27  ;;  %2754 = vmatpush.bf16.msra.mxu0 %v7651_v39  ;;  %v11860_v0 = vpack.c.bf16 %v1867_v59, %v1867_v59  ;;  %v7843_v9 = vor.u32 %v9151_v25, %v7840_v3  ;;  %v7616_v39 = vld [vmem:[%s14880_s3 + $0x28] sm:$0xf0]  ;;  %v7683_v59 = vor.u32 %v9111_v46, %v7680_v31  ;;  %v9109_v27 = vld [vmem:[%s14880_s3 + $0x94] sm:$0xf] }
 0x372   :  { %2767 = vmatpush.bf16.msra.mxu1 %v7715_v21  ;;  %v11868_v55 = vpack.c.bf16 %v1868_v35, %v1868_v35  ;;  %v9494_v10 = vpop.eup %9493  ;;  %v7827_v21 = vor.u32 %v9147_v28, %v7824_v4  ;;  %v7619_v14 = vor.u32 %v9095_v41, %v7616_v39  ;;  %v7672_v35 = vld [vmem:[%s14880_s3 + $0x98] sm:$0xf0]  ;;  %v7808_v3 = vld [vmem:[%s14880_s3 + $0x1a8] sm:$0xf0]  ;;  %v9201_v4 = vld [vmem:[%s14880_s3 + $0x374] sm:$0xf] }
 0x373   :  { %2683 = vmatmul.bf16.vlgmr.msra.gmra.mxu2 %v11860_v0  ;;  %v9496_v2 = vpop.eup %9495  ;;  %9499 = vrcp.f32 %v1856_v36  ;;  %v1869_v54 = vmul.f32 %v9494_v10, %v11781_v8  ;;  %v7624_v8 = vld [vmem:[%s14880_s3 + $0x38] sm:$0xf0]  ;;  %v9127_v36 = vld [vmem:[%s14880_s3 + $0x124] sm:$0xf]  ;;  %v7792_v28 = vld [vmem:[%s14880_s3 + $0x188] sm:$0xf0] }
 0x374   :  { %2696 = vmatmul.bf16.vlgmr.msra.gmra.mxu3 %v11868_v55  ;;  %2779 = vmatpush.bf16.msra.mxu2 %v7787_v37  ;;  %v1870_v53 = vmul.f32 %v9496_v2, %v11783_v22  ;;  %v9131_v22 = vld [vmem:[%s14880_s3 + $0x144] sm:$0xf]  ;;  %v7627_v45 = vor.u32 %v9097_v40, %v7624_v8  ;;  %v7800_v40 = vld [vmem:[%s14880_s3 + $0x198] sm:$0xf0]  ;;  %v9217_v46 = vld [vmem:[%s14880_s3 + $0x3f4] sm:$0xf] }
 0x375   :  { %2792 = vmatpush.bf16.msra.mxu3 %v7851_v51  ;;  %2755 = vmatpush.bf16.msra.mxu0 %v7643_v52  ;;  %v11919_v43 = vpack.c.bf16 %v1869_v54, %v1869_v54  ;;  %v7763_v47 = vor.u32 %v9131_v22, %v7760_v50  ;;  %v7744_v51 = vld [vmem:[%s14880_s3 + $0x128] sm:$0xf0]  ;;  %v9143_v52 = vld [vmem:[%s14880_s3 + $0x1a4] sm:$0xf]  ;;  %v7736_v54 = vld [vmem:[%s14880_s3 + $0x118] sm:$0xf0]  ;;  %v7803_v50 = vor.u32 %v9141_v49, %v7800_v40 }
 0x376   :  { %2768 = vmatpush.bf16.msra.mxu1 %v7707_v60  ;;  %v9498_v34 = vpop.eup %9497  ;;  %v11930_v26 = vpack.c.bf16 %v1870_v53, %v1870_v53  ;;  %v7675_v60 = vor.u32 %v9109_v27, %v7672_v35  ;;  %v9107_v10 = vld [vmem:[%s14880_s3 + $0x84] sm:$0xf]  ;;  %v7747_v2 = vor.u32 %v9127_v36, %v7744_v51  ;;  %v7811_v58 = vor.u32 %v9143_v52, %v7808_v3  ;;  %v7968_v22 = vld [vmem:[%s14880_s3 + $0x2e8] sm:$0xf0]  ;;  %v8040_v41 = vld [vmem:[%s14880_s3 + $0x378] sm:$0xf0] }
 0x377   :  { %v1871_v48 = vmul.f32 %v9498_v34, %v11793_v63  ;;  %v9145_v63 = vld [vmem:[%s14880_s3 + $0x1b4] sm:$0xf]  ;;  %v7667_v6 = vor.u32 %v9107_v10, %v7664_v15  ;;  %v7739_v38 = vor.u32 %v9125_v13, %v7736_v54  ;;  %v9123_v34 = vld [vmem:[%s14880_s3 + $0x104] sm:$0xf]  ;;  %v8104_v31 = vld [vmem:[%s14880_s3 + $0x3f8] sm:$0xf0] }
 0x378   :  { %2780 = vmatpush.bf16.msra.mxu2 %v7779_v5  ;;  %v7819_v42 = vor.u32 %v9145_v63, %v7816_v30  ;;  %v7912_v5 = vld [vmem:[%s14880_s3 + $0x278] sm:$0xf0]  ;;  %v9199_v63 = vld [vmem:[%s14880_s3 + $0x364] sm:$0xf]  ;;  %v8032_v30 = vld [vmem:[%s14880_s3 + $0x368] sm:$0xf0] }
 0x379   :  { %2793 = vmatpush.bf16.msra.mxu3 %v7843_v9  ;;  %2756 = vmatpush.bf16.msra.mxu0 %v7635_v57  ;;  %v9500_v20 = vpop.eup %9499  ;;  %v11969_v37 = vpack.c.bf16 %v1871_v48, %v1871_v48  ;;  %v9185_v9 = vld [vmem:[%s14880_s3 + $0x2f4] sm:$0xf]  ;;  %v7976_v57 = vld [vmem:[%s14880_s3 + $0x2f8] sm:$0xf0]  ;;  %v7915_v53 = vor.u32 %v9169_v18, %v7912_v5  ;;  %v9163_v27 = vld [vmem:[%s14880_s3 + $0x244] sm:$0xf]  ;;  %v8035_v36 = vor.u32 %v9199_v63, %v8032_v30 }
 0x37a   :  { %2769 = vmatpush.bf16.msra.mxu1 %v7699_v19  ;;  %v1872_v44 = vmul.f32 %v9500_v20, %v11795_v16  ;;  %v7608_v16 = vld [vmem:[%s14880_s3 + $0x18] sm:$0xf0]  ;;  %v7603_v19 = vor.u32 %v9091_v62, %v7600_v11  ;;  %v7979_v8 = vor.u32 %v9185_v9, %v7976_v57  ;;  %v7888_v35 = vld [vmem:[%s14880_s3 + $0x248] sm:$0xf0]  ;;  %v9197_v52 = vld [vmem:[%s14880_s3 + $0x354] sm:$0xf] }
 0x37b   :  { %v7611_v25 = vor.u32 %v9093_v23, %v7608_v16  ;;  %v7963_v16 = vor.u32 %v9181_v32, %v7960_v7  ;;  %v9213_v62 = vld [vmem:[%s14880_s3 + $0x3d4] sm:$0xf]  ;;  %v8088_v11 = vld [vmem:[%s14880_s3 + $0x3d8] sm:$0xf0]  ;;  %v9211_v13 = vld [vmem:[%s14880_s3 + $0x3c4] sm:$0xf] }
 0x37c   :  { %2781 = vmatpush.bf16.msra.mxu2 %v7771_v1  ;;  %2709 = vmatmul.bf16.vlgmr.msrb.gmra.mxu0 %v11919_v43  ;;  %v11980_v61 = vpack.c.bf16 %v1872_v44, %v1872_v44  ;;  %v7904_v1 = vld [vmem:[%s14880_s3 + $0x268] sm:$0xf0]  ;;  %v9161_v10 = vld [vmem:[%s14880_s3 + $0x234] sm:$0xf]  ;;  %v7880_v15 = vld [vmem:[%s14880_s3 + $0x238] sm:$0xf0]  ;;  %v8091_v9 = vor.u32 %v9213_v62, %v8088_v11 }
 0x37d   :  { %2794 = vmatpush.bf16.msra.mxu3 %v7835_v17  ;;  %2722 = vmatmul.bf16.vlgmr.msrb.gmra.mxu1 %v11930_v26  ;;  %v9183_v17 = vld [vmem:[%s14880_s3 + $0x2e4] sm:$0xf]  ;;  %v7907_v20 = vor.u32 %v9167_v24, %v7904_v1  ;;  %v9177_v18 = vld [vmem:[%s14880_s3 + $0x2b4] sm:$0xf]  ;;  %v7883_v57 = vor.u32 %v9161_v10, %v7880_v15  ;;  %v8080_v54 = vld [vmem:[%s14880_s3 + $0x3c8] sm:$0xf0] }
 0x37e   :  { %2757 = vmatpush.bf16.msra.mxu0 %v7627_v45  ;;  %2770 = vmatpush.bf16.msra.mxu1 %v7691_v12  ;;  %v7728_v45 = vld [vmem:[%s14880_s3 + $0x108] sm:$0xf0]  ;;  %v9139_v12 = vld [vmem:[%s14880_s3 + $0x184] sm:$0xf]  ;;  %v7971_v39 = vor.u32 %v9183_v17, %v7968_v22  ;;  %v9193_v24 = vld [vmem:[%s14880_s3 + $0x334] sm:$0xf] }
 0x37f   :  { %v7731_v48 = vor.u32 %v9123_v34, %v7728_v45  ;;  %v7795_v44 = vor.u32 %v9139_v12, %v7792_v28  ;;  %v9175_v49 = vld [vmem:[%s14880_s3 + $0x2a4] sm:$0xf]  ;;  %v7936_v40 = vld [vmem:[%s14880_s3 + $0x2a8] sm:$0xf0]  ;;  %v9209_v22 = vld [vmem:[%s14880_s3 + $0x3b4] sm:$0xf] }
 0x380   :  { %2782 = vmatpush.bf16.msra.mxu2 %v7763_v47  ;;  %v9165_v47 = vld [vmem:[%s14880_s3 + $0x254] sm:$0xf]  ;;  %v7939_v17 = vor.u32 %v9175_v49, %v7936_v40  ;;  %v7864_v45 = vld [vmem:[%s14880_s3 + $0x218] sm:$0xf0]  ;;  %v7856_v32 = vld [vmem:[%s14880_s3 + $0x208] sm:$0xf0] }
 0x381   :  { %2795 = vmatpush.bf16.msra.mxu3 %v7827_v21  ;;  %v7896_v21 = vld [vmem:[%s14880_s3 + $0x258] sm:$0xf0]  ;;  %v9157_v34 = vld [vmem:[%s14880_s3 + $0x214] sm:$0xf]  ;;  %v9171_v7 = vld [vmem:[%s14880_s3 + $0x284] sm:$0xf] }
 0x382   :  { %2758 = vmatpush.bf16.msra.mxu0 %v7619_v14  ;;  %2771 = vmatpush.bf16.msra.mxu1 %v7683_v59  ;;  %v8043_v14 = vor.u32 %v9201_v4, %v8040_v41  ;;  %v8107_v59 = vor.u32 %v9217_v46, %v8104_v31  ;;  %v7899_v23 = vor.u32 %v9165_v47, %v7896_v21  ;;  %v9173_v12 = vld [vmem:[%s14880_s3 + $0x294] sm:$0xf]  ;;  %v7928_v28 = vld [vmem:[%s14880_s3 + $0x298] sm:$0xf0]  ;;  %v9207_v47 = vld [vmem:[%s14880_s3 + $0x3a4] sm:$0xf] }
 0x383   :  { %2735 = vmatmul.bf16.vlgmr.msrb.gmra.mxu2 %v11969_v37  ;;  %v7867_v46 = vor.u32 %v9157_v34, %v7864_v45  ;;  %v7931_v31 = vor.u32 %v9173_v12, %v7928_v28  ;;  %v9155_v21 = vld [vmem:[%s14880_s3 + $0x204] sm:$0xf]  ;;  %v9189_v63 = vld [vmem:[%s14880_s3 + $0x314] sm:$0xf]  ;;  %v7992_v30 = vld [vmem:[%s14880_s3 + $0x318] sm:$0xf0] }
 0x384   :  { %2748 = vmatmul.bf16.vlgmr.msrb.gmra.mxu3 %v11980_v61  ;;  %2783 = vmatpush.bf16.msra.mxu2 %v7755_v29  ;;  %v9179_v29 = vld [vmem:[%s14880_s3 + $0x2c4] sm:$0xf]  ;;  %v12261_v62 = vld [vmem:[%s14878_s6 + $0x448] sm:$0xff] }
 0x385   :  { %2796 = vmatpush.bf16.msra.mxu3 %v7819_v42  ;;  %v7952_v42 = vld [vmem:[%s14880_s3 + $0x2c8] sm:$0xf0]  ;;  %v12268_v10 = vld [vmem:[%s14878_s6 + $0x440] sm:$0xff] }
 0x386   :  { %2759 = vmatpush.bf16.msra.mxu0 %v7611_v25  ;;  %2772 = vmatpush.bf16.msra.mxu1 %v7675_v60  ;;  %v8024_v25 = vld [vmem:[%s14880_s3 + $0x358] sm:$0xf0]  ;;  %v7891_v60 = vor.u32 %v9163_v27, %v7888_v35  ;;  %v7955_v3 = vor.u32 %v9179_v29, %v7952_v42  ;;  %v7995_v27 = vor.u32 %v9189_v63, %v7992_v30  ;;  %v9187_v29 = vld [vmem:[%s14880_s3 + $0x304] sm:$0xf]  ;;  %v7984_v42 = vld [vmem:[%s14880_s3 + $0x308] sm:$0xf0] }
 0x387   :  { %v8027_v5 = vor.u32 %v9197_v52, %v8024_v25  ;;  %v7987_v52 = vor.u32 %v9187_v29, %v7984_v42  ;;  %v12356_v63 = vld [vmem:[%s14878_s6 + $0x4d0] sm:$0xff]  ;;  %v12361_v30 = vld [vmem:[%s14878_s6 + $0x4c8] sm:$0xff] }
 0x388   :  { %2784 = vmatpush.bf16.msra.mxu2 %v7747_v2  ;;  %v7944_v2 = vld [vmem:[%s14880_s3 + $0x2b8] sm:$0xf0] }
 0x389   :  { %2797 = vmatpush.bf16.msra.mxu3 %v7811_v58  ;;  %v7947_v58 = vor.u32 %v9177_v18, %v7944_v2  ;;  %v12274_v18 = vld [vmem:[%s14878_s6 + $0x438] sm:$0xff]  ;;  %v12280_v2 = vld [vmem:[%s14878_s6 + $0x430] sm:$0xff] }
 0x38a   :  { %2760 = vmatpush.bf16.msra.mxu0 %v7603_v19  ;;  %2773 = vmatpush.bf16.msra.mxu1 %v7667_v6  ;;  %v9159_v19 = vld [vmem:[%s14880_s3 + $0x224] sm:$0xf]  ;;  %v7872_v6 = vld [vmem:[%s14880_s3 + $0x228] sm:$0xf0] }
 0x38b   :  { %v7875_v1 = vor.u32 %v9159_v19, %v7872_v6 }
 0x38c   :  { %2785 = vmatpush.bf16.msra.mxu2 %v7739_v38  ;;  %v8008_v38 = vld [vmem:[%s14880_s3 + $0x338] sm:$0xf0] }
 0x38d   :  { %2798 = vmatpush.bf16.msra.mxu3 %v7803_v50  ;;  %2761 = vmatmul.bf16.vlgmr.msra.gmra.mxu0 %v11813_v33  ;;  %v9215_v33 = vld [vmem:[%s14880_s3 + $0x3e4] sm:$0xf]  ;;  %v8072_v50 = vld [vmem:[%s14880_s3 + $0x3b8] sm:$0xf0]  ;;  %v8011_v4 = vor.u32 %v9193_v24, %v8008_v38 }
 0x38e   :  { %2805 = vmatpush.bf16.msrb.mxu0 %v7915_v53  ;;  %2818 = vmatpush.bf16.msrb.mxu1 %v7979_v8  ;;  %v8083_v8 = vor.u32 %v9211_v13, %v8080_v54  ;;  %v8075_v41 = vor.u32 %v9209_v22, %v8072_v50  ;;  %v12309_v13 = vld [vmem:[%s14878_s6 + $0x408] sm:$0xff] }
 0x38f   :  { %2774 = vmatmul.bf16.vlgmr.msra.gmra.mxu1 %v11821_v56  ;;  %v8096_v56 = vld [vmem:[%s14880_s3 + $0x3e8] sm:$0xf0] }
 0x390   :  { %2786 = vmatpush.bf16.msra.mxu2 %v7731_v48  ;;  %v8099_v51 = vor.u32 %v9215_v33, %v8096_v56  ;;  %v8064_v48 = vld [vmem:[%s14880_s3 + $0x3a8] sm:$0xf0]  ;;  %v9205_v33 = vld [vmem:[%s14880_s3 + $0x394] sm:$0xf]  ;;  %v8056_v56 = vld [vmem:[%s14880_s3 + $0x398] sm:$0xf0] }
 0x391   :  { %2799 = vmatpush.bf16.msra.mxu3 %v7795_v44  ;;  %v7920_v44 = vld [vmem:[%s14880_s3 + $0x288] sm:$0xf0]  ;;  %v8059_v35 = vor.u32 %v9205_v33, %v8056_v56 }
 0x392   :  { %2806 = vmatpush.bf16.msrb.mxu0 %v7907_v20  ;;  %2819 = vmatpush.bf16.msrb.mxu1 %v7971_v39  ;;  %v9191_v20 = vld [vmem:[%s14880_s3 + $0x324] sm:$0xf]  ;;  %v8000_v39 = vld [vmem:[%s14880_s3 + $0x328] sm:$0xf0] }
 0x393   :  { %2787 = vmatmul.bf16.vlgmr.msra.gmra.mxu2 %v11860_v0  ;;  %v9195_v0 = vld [vmem:[%s14880_s3 + $0x344] sm:$0xf] }
 0x394   :  { %2831 = vmatpush.bf16.msrb.mxu2 %v8043_v14  ;;  %2800 = vmatmul.bf16.vlgmr.msra.gmra.mxu3 %v11868_v55  ;;  %v8016_v55 = vld [vmem:[%s14880_s3 + $0x348] sm:$0xf0]  ;;  %v8003_v14 = vor.u32 %v9191_v20, %v8000_v39  ;;  %v12330_v20 = vld [vmem:[%s14878_s6 + $0x4f0] sm:$0xff] }
 0x395   :  { %2844 = vmatpush.bf16.msrb.mxu3 %v8107_v59  ;;  %v8019_v53 = vor.u32 %v9195_v0, %v8016_v55  ;;  %v8067_v59 = vor.u32 %v9207_v47, %v8064_v48  ;;  %v12292_v0 = vld [vmem:[%s14878_s6 + $0x420] sm:$0xff] }
 0x396   :  { %2807 = vmatpush.bf16.msrb.mxu0 %v7899_v23  ;;  %2820 = vmatpush.bf16.msrb.mxu1 %v7963_v16  ;;  %v7859_v23 = vor.u32 %v9155_v21, %v7856_v32  ;;  %v7923_v16 = vor.u32 %v9171_v7, %v7920_v44  ;;  %v12343_v48 = vld [vmem:[%s14878_s6 + $0x4e0] sm:$0xff]  ;;  %v12349_v32 = vld [vmem:[%s14878_s6 + $0x4d8] sm:$0xff] }
 0x398   :  { %2832 = vmatpush.bf16.msrb.mxu2 %v8035_v36  ;;  %v9203_v36 = vld [vmem:[%s14880_s3 + $0x384] sm:$0xf] }
 0x399   :  { %2845 = vmatpush.bf16.msrb.mxu3 %v8099_v51  ;;  %v8048_v51 = vld [vmem:[%s14880_s3 + $0x388] sm:$0xf0] }
 0x39a   :  { %2808 = vmatpush.bf16.msrb.mxu0 %v7891_v60  ;;  %2821 = vmatpush.bf16.msrb.mxu1 %v7955_v3  ;;  %v8051_v25 = vor.u32 %v9203_v36, %v8048_v51  ;;  %v12226_v60 = vld [vmem:[%s14878_s6 + $0x478] sm:$0xff]  ;;  %v12255_v3 = vld [vmem:[%s14878_s6 + $0x450] sm:$0xff] }
 0x39b   :  { %v12374_v36 = vld [vmem:[%s14878_s6 + $0x4b8] sm:$0xff]  ;;  %v12380_v51 = vld [vmem:[%s14878_s6 + $0x4b0] sm:$0xff] }
 0x39c   :  { %2833 = vmatpush.bf16.msrb.mxu2 %v8027_v5  ;;  %v12286_v5 = vld [vmem:[%s14878_s6 + $0x428] sm:$0xff] }
 0x39d   :  { %2846 = vmatpush.bf16.msrb.mxu3 %v8091_v9 }
 0x39e   :  { %2809 = vmatpush.bf16.msrb.mxu0 %v7883_v57  ;;  %2822 = vmatpush.bf16.msrb.mxu1 %v7947_v58  ;;  %v12298_v57 = vld [vmem:[%s14878_s6 + $0x418] sm:$0xff]  ;;  %v12304_v58 = vld [vmem:[%s14878_s6 + $0x410] sm:$0xff] }
 0x3a0   :  { %2834 = vmatpush.bf16.msrb.mxu2 %v8019_v53  ;;  %v12316_v53 = vld [vmem:[%s14878_s6 + $0x400] sm:$0xff] }
 0x3a1   :  { %2847 = vmatpush.bf16.msrb.mxu3 %v8083_v8 }
 0x3a2   :  { %2810 = vmatpush.bf16.msrb.mxu0 %v7875_v1  ;;  %2823 = vmatpush.bf16.msrb.mxu1 %v7939_v17  ;;  %v12322_v17 = vld [vmem:[%s14878_s6 + $0x4f8] sm:$0xff] }
 0x3a4   :  { %2835 = vmatpush.bf16.msrb.mxu2 %v8011_v4 }
 0x3a5   :  { %2848 = vmatpush.bf16.msrb.mxu3 %v8075_v41 }
 0x3a6   :  { %2811 = vmatpush.bf16.msrb.mxu0 %v7867_v46  ;;  %2824 = vmatpush.bf16.msrb.mxu1 %v7931_v31  ;;  %v12336_v46 = vld [vmem:[%s14878_s6 + $0x4e8] sm:$0xff] }
 0x3a8   :  { %2836 = vmatpush.bf16.msrb.mxu2 %v8003_v14 }
 0x3a9   :  { %2849 = vmatpush.bf16.msrb.mxu3 %v8067_v59 }
 0x3aa   :  { %2812 = vmatpush.bf16.msrb.mxu0 %v7859_v23  ;;  %2825 = vmatpush.bf16.msrb.mxu1 %v7923_v16 }
 0x3ac   :  { %2837 = vmatpush.bf16.msrb.mxu2 %v7995_v27  ;;  %v12368_v27 = vld [vmem:[%s14878_s6 + $0x4c0] sm:$0xff] }
 0x3ad   :  { %2850 = vmatpush.bf16.msrb.mxu3 %v8059_v35  ;;  %2813 = vmatmul.bf16.vlgmr.msrb.gmra.mxu0 %v11919_v43  ;;  %v12232_v43 = vld [vmem:[%s14878_s6 + $0x470] sm:$0xff] }
 0x3ae   :  { %2826 = vmatmul.bf16.vlgmr.msrb.gmra.mxu1 %v11930_v26  ;;  %2909 = vmatpush.msra.mxu0 %v12226_v60  ;;  %v12237_v26 = vld [vmem:[%s14878_s6 + $0x468] sm:$0xff] }
 0x3af   :  { %2929 = vmatpush.msra.mxu1 %v12322_v17 }
 0x3b0   :  { %2838 = vmatpush.bf16.msrb.mxu2 %v7987_v52  ;;  %2910 = vmatpush.msra.mxu0 %v12232_v43  ;;  %v12386_v52 = vld [vmem:[%s14878_s6 + $0x4a8] sm:$0xff] }
 0x3b1   :  { %2851 = vmatpush.bf16.msrb.mxu3 %v8051_v25  ;;  %2930 = vmatpush.msra.mxu1 %v12330_v20  ;;  %v12392_v25 = vld [vmem:[%s14878_s6 + $0x4a0] sm:$0xff] }
 0x3b2   :  { %2911 = vmatpush.msra.mxu0 %v12237_v26 }
 0x3b3   :  { %2839 = vmatmul.bf16.vlgmr.msrb.gmra.mxu2 %v11969_v37  ;;  %v12243_v37 = vld [vmem:[%s14878_s6 + $0x460] sm:$0xff]  ;;  %2931 = vmatpush.msra.mxu1 %v12336_v46 }
 0x3b4   :  { %2852 = vmatmul.bf16.vlgmr.msrb.gmra.mxu3 %v11980_v61  ;;  %v12249_v61 = vld [vmem:[%s14878_s6 + $0x458] sm:$0xff]  ;;  %2912 = vmatpush.msra.mxu0 %v12243_v37 }
 0x3b5   :  { %2932 = vmatpush.msra.mxu1 %v12343_v48 }
 0x3b6   :  { %2913 = vmatpush.msra.mxu0 %v12249_v61 }
 0x3b7   :  { %2933 = vmatpush.msra.mxu1 %v12349_v32 }
 0x3b8   :  { %2914 = vmatpush.msra.mxu0 %v12255_v3 }
 0x3b9   :  { %2934 = vmatpush.msra.mxu1 %v12356_v63 }
 0x3ba   :  { %2915 = vmatpush.msra.mxu0 %v12261_v62 }
 0x3bb   :  { %2935 = vmatpush.msra.mxu1 %v12361_v30 }
 0x3bc   :  { %2916 = vmatpush.msra.mxu0 %v12268_v10 }
 0x3bd   :  { %2936 = vmatpush.msra.mxu1 %v12368_v27 }
 0x3be   :  { %2917 = vmatpush.msra.mxu0 %v12274_v18 }
 0x3bf   :  { %2937 = vmatpush.msra.mxu1 %v12374_v36 }
 0x3c0   :  { %2918 = vmatpush.msra.mxu0 %v12280_v2 }
 0x3c1   :  { %2938 = vmatpush.msra.mxu1 %v12380_v51 }
 0x3c2   :  { %2919 = vmatpush.msra.mxu0 %v12286_v5 }
 0x3c3   :  { %2939 = vmatpush.msra.mxu1 %v12386_v52 }
 0x3c4   :  { %2920 = vmatpush.msra.mxu0 %v12292_v0 }
 0x3c5   :  { %2940 = vmatpush.msra.mxu1 %v12392_v25 }
 0x3c6   :  { %2921 = vmatpush.msra.mxu0 %v12298_v57 }
 0x3c8   :  { %2922 = vmatpush.msra.mxu0 %v12304_v58 }
 0x3ca   :  { %2923 = vmatpush.msra.mxu0 %v12309_v13 }
 0x3cc   :  { %2924 = vmatpush.msra.mxu0 %v12316_v53 }
 0x3e9   :  { %v2658_v11 = vpop.f32.mrf.mxu0 }
 0x3ea   :  { %v2671_v15 = vpop.f32.mrf.mxu1 }
 0x3eb   :  { %v2672_v19 = vadd.f32 %v2671_v15, %v2658_v11 }
 0x3f1   :  { %v2660_v9 = vpop.f32.mrf.mxu0 }
 0x3f2   :  { %v2673_v55 = vpop.f32.mrf.mxu1  ;;  %v12398_v9 = vld [vmem:[%s14878_s6 + $0x498] sm:$0xff] }
 0x3f3   :  { %2941 = vmatpush.msra.mxu1 %v12398_v9  ;;  %v12404_v55 = vld [vmem:[%s14878_s6 + $0x490] sm:$0xff] }
 0x3f5   :  { %2942 = vmatpush.msra.mxu1 %v12404_v55 }
 0x3f6   :  { %v2684_v54 = vpop.f32.mrf.mxu2 }
 0x3f7   :  { %v2697_v6 = vpop.f32.mrf.mxu3  ;;  %v2685_v49 = vadd.f32 %v2684_v54, %v2672_v19  ;;  %v12410_v54 = vld [vmem:[%s14878_s6 + $0x488] sm:$0xff]  ;;  %v12415_v19 = vld [vmem:[%s14878_s6 + $0x480] sm:$0xff] }
 0x3f8   :  { %2943 = vmatpush.msra.mxu1 %v12410_v54 }
 0x3f9   :  { %v2710_v40 = vpop.f32.mrf.mxu0  ;;  %v2698_v24 = vadd.f32 %v2697_v6, %v2685_v49 }
 0x3fa   :  { %v2723_v8 = vpop.f32.mrf.mxu1  ;;  %2944 = vmatpush.msra.mxu1 %v12415_v19 }
 0x3fb   :  { %v2711_v22 = vadd.f32 %v2710_v40, %v2698_v24 }
 0x3fd   :  { %v2724_v45 = vadd.f32 %v2723_v8, %v2711_v22 }
 0x3fe   :  { %v2686_v38 = vpop.f32.mrf.mxu2 }
 0x3ff   :  { %v2699_v1 = vpop.f32.mrf.mxu3 }
 0x401   :  { %v2712_v50 = vpop.f32.mrf.mxu0 }
 0x402   :  { %v2725_v34 = vpop.f32.mrf.mxu1 }
 0x406   :  { %v2736_v12 = vpop.f32.mrf.mxu2 }
 0x407   :  { %v2737_v28 = vadd.f32 %v2736_v12, %v2724_v45  ;;  %v2749_v4 = vpop.f32.mrf.mxu3 }
 0x409   :  { %v12325_v41 = vadd.f32 %v2749_v4, %v2737_v28 }
 0x40a   :  { %v2762_v39 = vpop.f32.mrf.mxu0 }
 0x40b   :  { %v2895_v31 = vsel %vm981_vm1, %v12325_v41, 0.0 }
 0x40c   :  { %v2775_v47 = vpop.f32.mrf.mxu1  ;;  %v2896_v21 = vrot.slane %v2895_v31, 4 }
 0x40d   :  { %v2776_v6 = vadd.f32 %v2775_v47, %v2762_v39 }
 0x40e   :  { %v2897_v7 = vadd.f32 %v2896_v21, %v2895_v31  ;;  %v2738_v44 = vpop.f32.mrf.mxu2 }
 0x40f   :  { %v2751_v14 = vpop.f32.mrf.mxu3 }
 0x410   :  { %v2898_v59 = vrot.slane %v2897_v7, 2 }
 0x412   :  { %v2899_v23 = vadd.f32 %v2898_v59, %v2897_v7  ;;  %v2764_v16 = vpop.f32.mrf.mxu0 }
 0x413   :  { %v2889_v16 = vld [vmem:[%s14880_s3 + $0x400] sm:$0xff] }
 0x414   :  { %v2777_v33 = vpop.f32.mrf.mxu1  ;;  %v2900_v56 = vrot.slane %v2899_v23, 1 }
 0x416   :  { %v2901_v35 = vadd.f32 %v2900_v56, %v2899_v23  ;;  %v2788_v29 = vpop.f32.mrf.mxu2  ;;  %v2890_v23 = vld [vmem:[%s14880_s3 + $0x408] sm:$0xff] }
 0x417   :  { %v2801_v42 = vpop.f32.mrf.mxu3  ;;  %v2789_v40 = vadd.f32 %v2788_v29, %v2776_v6  ;;  %v2893_v33 = vunpack.c.l.bf16 %v2890_v23  ;;  %v2894_v56 = vunpack.c.h.bf16 %v2890_v23  ;;  %v2892_v29 = vunpack.c.h.bf16 %v2889_v16  ;;  %v8357_v6 = vld [vmem:[%s14881_s4 + $0x1f0] sm:$0xf0] }
 0x418   :  { %2925 = vmatmul.f32.vlgmr.msra.gmra.mxu0 %v2901_v35  ;;  %v2891_v35 = vunpack.c.l.bf16 %v2889_v16  ;;  %v8197_v16 = vld [vmem:[%s14881_s4 + $0xb0] sm:$0xf0] }
 0x419   :  { %v2802_v24 = vadd.f32 %v2801_v42, %v2789_v40  ;;  %2967 = vmatpush.msra.mxu2 %v2893_v33  ;;  %2987 = vmatpush.msra.mxu3 %v2894_v56 }
 0x41a   :  { %3084 = vmatpush.msrb.mxu0 %v2893_v33  ;;  %3104 = vmatpush.msrb.mxu1 %v2894_v56  ;;  %v9271_v33 = vld [vmem:[%s14881_s4 + $0x1a4] sm:$0xf]  ;;  %v8325_v56 = vld [vmem:[%s14881_s4 + $0x1b0] sm:$0xf0] }
 0x41b   :  { %2968 = vmatpush.msra.mxu2 %v2891_v35  ;;  %2988 = vmatpush.msra.mxu3 %v2892_v29 }
 0x41c   :  { %3085 = vmatpush.msrb.mxu0 %v2891_v35  ;;  %3105 = vmatpush.msrb.mxu1 %v2892_v29 }
 0x41d   :  { %3013 = vmatpush.msrb.mxu2 %v12226_v60  ;;  %3033 = vmatpush.msrb.mxu3 %v12322_v17 }
 0x41e   :  { %v2790_v11 = vpop.f32.mrf.mxu2 }
 0x41f   :  { %v2803_v15 = vpop.f32.mrf.mxu3  ;;  %3014 = vmatpush.msrb.mxu2 %v12232_v43  ;;  %3034 = vmatpush.msrb.mxu3 %v12330_v20  ;;  %v9281_v11 = vld [vmem:[%s14881_s4 + $0x1ec] sm:$0xf0] }
 0x420   :  { %v9247_v15 = vld [vmem:[%s14881_s4 + $0xe4] sm:$0xf] }
 0x421   :  { %3015 = vmatpush.msrb.mxu2 %v12237_v26  ;;  %3035 = vmatpush.msrb.mxu3 %v12336_v46 }
 0x423   :  { %3016 = vmatpush.msrb.mxu2 %v12243_v37  ;;  %3036 = vmatpush.msrb.mxu3 %v12343_v48 }
 0x425   :  { %3017 = vmatpush.msrb.mxu2 %v12249_v61  ;;  %3037 = vmatpush.msrb.mxu3 %v12349_v32 }
 0x427   :  { %3018 = vmatpush.msrb.mxu2 %v12255_v3  ;;  %3038 = vmatpush.msrb.mxu3 %v12356_v63 }
 0x429   :  { %3019 = vmatpush.msrb.mxu2 %v12261_v62  ;;  %3039 = vmatpush.msrb.mxu3 %v12361_v30 }
 0x42a   :  { %v2814_v49 = vpop.f32.mrf.mxu0 }
 0x42b   :  { %v2827_v8 = vpop.f32.mrf.mxu1  ;;  %v2815_v38 = vadd.f32 %v2814_v49, %v2802_v24  ;;  %3020 = vmatpush.msrb.mxu2 %v12268_v10  ;;  %3040 = vmatpush.msrb.mxu3 %v12368_v27  ;;  %v8211_v49 = vld [vmem:[%s14881_s4 + $0xc0] sm:$0xf] }
 0x42c   :  { %v8339_v24 = vld [vmem:[%s14881_s4 + $0x1c0] sm:$0xf] }
 0x42d   :  { %v2828_v50 = vadd.f32 %v2827_v8, %v2815_v38  ;;  %3021 = vmatpush.msrb.mxu2 %v12274_v18  ;;  %3041 = vmatpush.msrb.mxu3 %v12374_v36  ;;  %v8227_v36 = vld [vmem:[%s14881_s4 + $0xe0] sm:$0xf]  ;;  %v9245_v8 = vld [vmem:[%s14881_s4 + $0xcc] sm:$0xf0] }
 0x42e   :  { %v9277_v38 = vld [vmem:[%s14881_s4 + $0x1cc] sm:$0xf0] }
 0x42f   :  { %3022 = vmatpush.msrb.mxu2 %v12280_v2  ;;  %3042 = vmatpush.msrb.mxu3 %v12380_v51  ;;  %v9249_v51 = vld [vmem:[%s14881_s4 + $0xec] sm:$0xf0] }
 0x431   :  { %3023 = vmatpush.msrb.mxu2 %v12286_v5  ;;  %3043 = vmatpush.msrb.mxu3 %v12386_v52  ;;  %v8355_v52 = vld [vmem:[%s14881_s4 + $0x1e0] sm:$0xf] }
 0x432   :  { %v2816_v1 = vpop.f32.mrf.mxu0 }
 0x433   :  { %v2829_v22 = vpop.f32.mrf.mxu1  ;;  %3024 = vmatpush.msrb.mxu2 %v12292_v0  ;;  %3044 = vmatpush.msrb.mxu3 %v12392_v25  ;;  %v8228_v25 = vor.u32 %v9249_v51, %v8227_v36  ;;  %v8212_v1 = vor.u32 %v9245_v8, %v8211_v49  ;;  %v8163_v36 = vld [vmem:[%s14881_s4 + $0x60] sm:$0xf]  ;;  %v9233_v51 = vld [vmem:[%s14881_s4 + $0x6c] sm:$0xf0] }
 0x434   :  { %v8340_v22 = vor.u32 %v9277_v38, %v8339_v24  ;;  %v9229_v8 = vld [vmem:[%s14881_s4 + $0x4c] sm:$0xf0]  ;;  %v8275_v24 = vld [vmem:[%s14881_s4 + $0x140] sm:$0xf] }
 0x435   :  { %3025 = vmatpush.msrb.mxu2 %v12298_v57  ;;  %3045 = vmatpush.msrb.mxu3 %v12398_v9  ;;  %v8229_v9 = vld [vmem:[%s14881_s4 + $0xf0] sm:$0xf0] }
 0x436   :  { %v2840_v34 = vpop.f32.mrf.mxu2  ;;  %3521 = vmatpush.bf16.msra.mxu0 %v8228_v25  ;;  %v8164_v25 = vor.u32 %v9233_v51, %v8163_v36  ;;  %v8347_v51 = vld [vmem:[%s14881_s4 + $0x1c8] sm:$0xf] }
 0x437   :  { %v2841_v45 = vadd.f32 %v2840_v34, %v2828_v50  ;;  %v2853_v12 = vpop.f32.mrf.mxu3  ;;  %3026 = vmatpush.msrb.mxu2 %v12304_v58  ;;  %3046 = vmatpush.msrb.mxu3 %v12404_v55  ;;  %v8356_v55 = vor.u32 %v9281_v11, %v8355_v52  ;;  %v9243_v50 = vld [vmem:[%s14881_s4 + $0xc4] sm:$0xf]  ;;  %v8213_v34 = vld [vmem:[%s14881_s4 + $0xd0] sm:$0xf0]  ;;  %v8291_v52 = vld [vmem:[%s14881_s4 + $0x160] sm:$0xf] }
 0x438   :  { %v9265_v11 = vld [vmem:[%s14881_s4 + $0x16c] sm:$0xf0] }
 0x439   :  { %v12419_v28 = vadd.f32 %v2853_v12, %v2841_v45  ;;  %3027 = vmatpush.msrb.mxu2 %v12309_v13  ;;  %3047 = vmatpush.msrb.mxu3 %v12410_v54  ;;  %v8232_v54 = vor.u32 %v9247_v15, %v8229_v9  ;;  %v9275_v45 = vld [vmem:[%s14881_s4 + $0x1c4] sm:$0xf]  ;;  %v8292_v9 = vor.u32 %v9265_v11, %v8291_v52  ;;  %v9278_v52 = vld [vmem:[%s14881_s4 + $0x1d4] sm:$0xf0] }
 0x43a   :  { %3522 = vmatpush.bf16.msra.mxu0 %v8212_v1  ;;  %v9231_v15 = vld [vmem:[%s14881_s4 + $0x64] sm:$0xf]  ;;  %v9261_v1 = vld [vmem:[%s14881_s4 + $0x14c] sm:$0xf0]  ;;  %v8348_v11 = vor.u32 %v9278_v52, %v8347_v51  ;;  %v8139_v51 = vld [vmem:[%s14881_s4 + $0x28] sm:$0xf] }
 0x43b   :  { %v2902_v4 = vsel %vm981_vm1, %v12419_v28, 0.0  ;;  %3028 = vmatpush.msrb.mxu2 %v12316_v53  ;;  %3048 = vmatpush.msrb.mxu3 %v12415_v19  ;;  %v9279_v19 = vld [vmem:[%s14881_s4 + $0x1e4] sm:$0xf] }
 0x43c   :  { %v2903_v31 = vrot.slane %v2902_v4, 4  ;;  %v8360_v40 = vor.u32 %v9279_v19, %v8357_v6  ;;  %v8293_v19 = vld [vmem:[%s14881_s4 + $0x170] sm:$0xf0] }
 0x43e   :  { %v2904_v39 = vadd.f32 %v2903_v31, %v2902_v4  ;;  %v2842_v47 = vpop.f32.mrf.mxu2  ;;  %v8216_v4 = vor.u32 %v9243_v50, %v8213_v34  ;;  %v8341_v31 = vld [vmem:[%s14881_s4 + $0x1d0] sm:$0xf0]  ;;  %v8276_v34 = vor.u32 %v9261_v1, %v8275_v24  ;;  %v9274_v24 = vld [vmem:[%s14881_s4 + $0x1b4] sm:$0xf0]  ;;  %v8205_v1 = vld [vmem:[%s14881_s4 + $0xb8] sm:$0xf0] }
 0x43f   :  { %v2855_v21 = vpop.f32.mrf.mxu3  ;;  %v9241_v47 = vld [vmem:[%s14881_s4 + $0xac] sm:$0xf0]  ;;  %v8149_v50 = vld [vmem:[%s14881_s4 + $0x50] sm:$0xf0] }
 0x440   :  { %v2905_v7 = vrot.slane %v2904_v39, 2 }
 0x442   :  { %v2906_v44 = vadd.f32 %v2905_v7, %v2904_v39  ;;  %v8195_v39 = vld [vmem:[%s14881_s4 + $0xa0] sm:$0xf]  ;;  %v8344_v7 = vor.u32 %v9275_v45, %v8341_v31 }
 0x443   :  { %v8196_v23 = vor.u32 %v9241_v47, %v8195_v39  ;;  %v8131_v31 = vld [vmem:[%s14881_s4 + $0x20] sm:$0xf]  ;;  %v9225_v39 = vld [vmem:[%s14881_s4 + $0x2c] sm:$0xf0] }
 0x444   :  { %v2907_v14 = vrot.slane %v2906_v44, 1  ;;  %v8259_v47 = vld [vmem:[%s14881_s4 + $0x120] sm:$0xf] }
 0x445   :  { %3523 = vmatpush.bf16.msra.mxu0 %v8196_v23 }
 0x446   :  { %v2908_v59 = vadd.f32 %v2907_v14, %v2906_v44  ;;  %v8323_v44 = vld [vmem:[%s14881_s4 + $0x1a0] sm:$0xf]  ;;  %v9273_v14 = vld [vmem:[%s14881_s4 + $0x1ac] sm:$0xf0] }
 0x447   :  { %v8324_v29 = vor.u32 %v9273_v14, %v8323_v44  ;;  %v9223_v44 = vld [vmem:[%s14881_s4 + $0x24] sm:$0xf]  ;;  %v8133_v14 = vld [vmem:[%s14881_s4 + $0x30] sm:$0xf0] }
 0x448   :  { %2945 = vmatmul.f32.vlgmr.msra.gmra.mxu1 %v2908_v59  ;;  %v9239_v59 = vld [vmem:[%s14881_s4 + $0xa4] sm:$0xf]  ;;  %v8136_v23 = vor.u32 %v9223_v44, %v8133_v14  ;;  %v8189_v44 = vld [vmem:[%s14881_s4 + $0x98] sm:$0xf0] }
 0x449   :  { %3534 = vmatpush.bf16.msra.mxu1 %v8356_v55  ;;  %v8165_v55 = vld [vmem:[%s14881_s4 + $0x70] sm:$0xf0] }
 0x44a   :  { %v8168_v6 = vor.u32 %v9231_v15, %v8165_v55  ;;  %v8221_v15 = vld [vmem:[%s14881_s4 + $0xd8] sm:$0xf0] }
 0x44b   :  { %v8349_v55 = vld [vmem:[%s14881_s4 + $0x1d8] sm:$0xf0] }
 0x44d   :  { %3535 = vmatpush.bf16.msra.mxu1 %v8340_v22  ;;  %v9227_v22 = vld [vmem:[%s14881_s4 + $0x44] sm:$0xf] }
 0x44e   :  { %v8152_v45 = vor.u32 %v9227_v22, %v8149_v50 }
 0x451   :  { %3536 = vmatpush.bf16.msra.mxu1 %v8324_v29  ;;  %v9221_v29 = vld [vmem:[%s14881_s4 + $0xc] sm:$0xf0] }
 0x495   :  { %v2926_v60 = vpop.f32.mrf.mxu0 }
 0x4c5   :  { %v2946_v43 = vpop.f32.mrf.mxu1 }
 0x4c6   :  { %v2947_v26 = vadd.f32 %v2946_v43, %v2926_v60  ;;  %v8200_v60 = vor.u32 %v9239_v59, %v8197_v16  ;;  %v8179_v43 = vld [vmem:[%s14881_s4 + $0x80] sm:$0xf]  ;;  %v9255_v16 = vld [vmem:[%s14881_s4 + $0x124] sm:$0xf] }
 0x4c8   :  { %v2949_v37 = vmul.f32 0.03125, %v2947_v26  ;;  %v9237_v26 = vld [vmem:[%s14881_s4 + $0x8c] sm:$0xf0] }
 0x4ca   :  { %8108 = vmatmul.msk.f32.vlgmr.msra.gmra.mxu2 %vm1199_vm2, %v2949_v37  ;;  %8109 = vmatmul.msk.f32.vlgmr.msra.gmra.mxu3 %vm1199_vm2, %v2949_v37  ;;  %v8328_v37 = vor.u32 %v9271_v33, %v8325_v56  ;;  %v8261_v33 = vld [vmem:[%s14881_s4 + $0x130] sm:$0xf0] }
 0x4cb   :  { %3547 = vmatpush.bf16.msra.mxu2 %v8232_v54  ;;  %3560 = vmatpush.bf16.msra.mxu3 %v8360_v40  ;;  %v9263_v54 = vld [vmem:[%s14881_s4 + $0x164] sm:$0xf]  ;;  %v8147_v40 = vld [vmem:[%s14881_s4 + $0x40] sm:$0xf]  ;;  %v8264_v56 = vor.u32 %v9255_v16, %v8261_v33  ;;  %v8317_v16 = vld [vmem:[%s14881_s4 + $0x198] sm:$0xf0] }
 0x4cc   :  { %v8296_v49 = vor.u32 %v9263_v54, %v8293_v19  ;;  %v8148_v38 = vor.u32 %v9229_v8, %v8147_v40  ;;  %v8331_v40 = vld [vmem:[%s14881_s4 + $0x1a8] sm:$0xf] }
 0x4cd   :  { %v8332_v22 = vor.u32 %v9274_v24, %v8331_v40  ;;  %v8269_v24 = vld [vmem:[%s14881_s4 + $0x138] sm:$0xf0] }
 0x4cf   :  { %3548 = vmatpush.bf16.msra.mxu2 %v8216_v4  ;;  %3561 = vmatpush.bf16.msra.mxu3 %v8344_v7  ;;  %v9257_v7 = vld [vmem:[%s14881_s4 + $0x12c] sm:$0xf0] }
 0x4d0   :  { %v8260_v59 = vor.u32 %v9257_v7, %v8259_v47  ;;  %v9236_v7 = vld [vmem:[%s14881_s4 + $0x8c] sm:$0xf] }
 0x4d3   :  { %3549 = vmatpush.bf16.msra.mxu2 %v8200_v60  ;;  %3562 = vmatpush.bf16.msra.mxu3 %v8328_v37  ;;  %v8243_v60 = vld [vmem:[%s14881_s4 + $0x100] sm:$0xf]  ;;  %v9219_v37 = vld [vmem:[%s14881_s4 + $0x4] sm:$0xf] }
 0x54d   :  { %v2970_v61 = vpop.f32.mrf.mxu2  ;;  %v2990_v3 = vpop.f32.mrf.mxu3 }
 0x54e   :  { %v2993_v62 = vperm.slane %v2970_v61, 0  ;;  %v2994_v10 = vperm.slane %v2990_v3, 0  ;;  %v8307_v61 = vld [vmem:[%s14881_s4 + $0x180] sm:$0xf]  ;;  %v9269_v3 = vld [vmem:[%s14881_s4 + $0x18c] sm:$0xf0] }
 0x550   :  { %v12464_v18 = vsub.f32 %v12325_v41, %v2993_v62  ;;  %v12467_v2 = vsub.f32 %v12419_v28, %v2994_v10  ;;  %v9235_v62 = vld [vmem:[%s14881_s4 + $0x84] sm:$0xf] }
 0x552   :  { %v2997_v5 = vmul.f32 %v12464_v18, %v12464_v18  ;;  %v2998_v0 = vmul.f32 %v12467_v2, %v12467_v2 }
 0x554   :  { %v2999_v57 = vsel %vm981_vm1, %v2997_v5, 0.0  ;;  %v3006_v58 = vsel %vm981_vm1, %v2998_v0, 0.0  ;;  %v8181_v5 = vld [vmem:[%s14881_s4 + $0x90] sm:$0xf0]  ;;  %v9267_v0 = vld [vmem:[%s14881_s4 + $0x184] sm:$0xf] }
 0x555   :  { %v3000_v13 = vrot.slane %v2999_v57, 4  ;;  %v3007_v53 = vrot.slane %v3006_v58, 4 }
 0x557   :  { %v3001_v17 = vadd.f32 %v3000_v13, %v2999_v57  ;;  %v3008_v20 = vadd.f32 %v3007_v53, %v3006_v58  ;;  %v8180_v57 = vor.u32 %v9237_v26, %v8179_v43  ;;  %v8309_v58 = vld [vmem:[%s14881_s4 + $0x190] sm:$0xf0]  ;;  %v8308_v13 = vor.u32 %v9269_v3, %v8307_v61  ;;  %v9253_v26 = vld [vmem:[%s14881_s4 + $0x10c] sm:$0xf0] }
 0x558   :  { %v8184_v53 = vor.u32 %v9235_v62, %v8181_v5  ;;  %v8117_v61 = vld [vmem:[%s14881_s4 + $0x10] sm:$0xf0]  ;;  %v8244_v3 = vor.u32 %v9253_v26, %v8243_v60  ;;  %v9234_v60 = vld [vmem:[%s14881_s4 + $0x74] sm:$0xf0] }
 0x559   :  { %v3002_v46 = vrot.slane %v3001_v17, 2  ;;  %v3009_v41 = vrot.slane %v3008_v20, 2  ;;  %3524 = vmatpush.bf16.msra.mxu0 %v8180_v57  ;;  %3537 = vmatpush.bf16.msra.mxu1 %v8308_v13  ;;  %v8120_v62 = vor.u32 %v9219_v37, %v8117_v61  ;;  %v8245_v5 = vld [vmem:[%s14881_s4 + $0x110] sm:$0xf0]  ;;  %v8363_v13 = vld [vmem:[%s14881_s4 + $0x1e8] sm:$0xf] }
 0x55a   :  { %3550 = vmatpush.bf16.msra.mxu2 %v8184_v53  ;;  %v9282_v53 = vld [vmem:[%s14881_s4 + $0x1f4] sm:$0xf0] }
 0x55b   :  { %v3003_v48 = vadd.f32 %v3002_v46, %v3001_v17  ;;  %v3010_v32 = vadd.f32 %v3009_v41, %v3008_v20  ;;  %v8312_v17 = vor.u32 %v9267_v0, %v8309_v58  ;;  %v8235_v0 = vld [vmem:[%s14881_s4 + $0xe8] sm:$0xf]  ;;  %v9250_v58 = vld [vmem:[%s14881_s4 + $0xf4] sm:$0xf0] }
 0x55d   :  { %v3004_v63 = vrot.slane %v3003_v48, 1  ;;  %v3011_v30 = vrot.slane %v3010_v32, 1  ;;  %3563 = vmatpush.bf16.msra.mxu3 %v8312_v17  ;;  %3525 = vmatpush.bf16.msra.mxu0 %v8164_v25  ;;  %v8236_v17 = vor.u32 %v9250_v58, %v8235_v0  ;;  %v9244_v25 = vld [vmem:[%s14881_s4 + $0xcc] sm:$0xf] }
 0x55e   :  { %3538 = vmatpush.bf16.msra.mxu1 %v8292_v9  ;;  %3551 = vmatpush.bf16.msra.mxu2 %v8168_v6  ;;  %v9276_v9 = vld [vmem:[%s14881_s4 + $0x1cc] sm:$0xf]  ;;  %v8224_v54 = vor.u32 %v9244_v25, %v8221_v15  ;;  %v8203_v6 = vld [vmem:[%s14881_s4 + $0xa8] sm:$0xf]  ;;  %v9226_v15 = vld [vmem:[%s14881_s4 + $0x34] sm:$0xf0] }
 0x55f   :  { %v3005_v27 = vadd.f32 %v3004_v63, %v3003_v48  ;;  %v3012_v42 = vadd.f32 %v3011_v30, %v3010_v32  ;;  %v3054_v63 = vld [vmem:[%s14879_s7 + $0x2] ss:$0 sm:$0xff]  ;;  %v8352_v19 = vor.u32 %v9276_v9, %v8349_v55  ;;  %v8267_v9 = vld [vmem:[%s14881_s4 + $0x128] sm:$0xf]  ;;  %v9258_v55 = vld [vmem:[%s14881_s4 + $0x134] sm:$0xf0] }
 0x561   :  { %3029 = vmatmul.f32.vlgmr.msrb.gmra.mxu2 %v3005_v27  ;;  %3049 = vmatmul.f32.vlgmr.msrb.gmra.mxu3 %v3012_v42 }
 0x562   :  { %3564 = vmatpush.bf16.msra.mxu3 %v8296_v49  ;;  %3526 = vmatpush.bf16.msra.mxu0 %v8148_v38  ;;  %v9242_v49 = vld [vmem:[%s14881_s4 + $0xb4] sm:$0xf0]  ;;  %v9240_v38 = vld [vmem:[%s14881_s4 + $0xac] sm:$0xf] }
 0x563   :  { %3539 = vmatpush.bf16.msra.mxu1 %v8276_v34  ;;  %3552 = vmatpush.bf16.msra.mxu2 %v8152_v45  ;;  %v8204_v8 = vor.u32 %v9242_v49, %v8203_v6  ;;  %v8208_v50 = vor.u32 %v9240_v38, %v8205_v1  ;;  %v9272_v34 = vld [vmem:[%s14881_s4 + $0x1ac] sm:$0xf]  ;;  %v8333_v45 = vld [vmem:[%s14881_s4 + $0x1b8] sm:$0xf0]  ;;  %v8140_v38 = vor.u32 %v9226_v15, %v8139_v51  ;;  %v13004_v51 = vld [vmem:[%s14878_s6 + $0x520] sm:$0xff] }
 0x564   :  { %v8141_v6 = vld [vmem:[%s14881_s4 + $0x38] sm:$0xf0]  ;;  %v8268_v1 = vor.u32 %v9258_v55, %v8267_v9  ;;  %v13033_v9 = vld [vmem:[%s14878_s6 + $0x5b0] sm:$0xff] }
 0x565   :  { %v13028_v15 = vld [vmem:[%s14878_s6 + $0x518] sm:$0xff] }
 0x566   :  { %v13038_v55 = vld [vmem:[%s14878_s6 + $0x658] sm:$0xff] }
 0x567   :  { %3540 = vmatpush.bf16.msra.mxu1 %v8260_v59  ;;  %3553 = vmatpush.bf16.msra.mxu2 %v8136_v23  ;;  %v8192_v59 = vor.u32 %v9236_v7, %v8189_v44  ;;  %v9268_v23 = vld [vmem:[%s14881_s4 + $0x18c] sm:$0xf]  ;;  %v8253_v7 = vld [vmem:[%s14881_s4 + $0x118] sm:$0xf0] }
 0x56b   :  { %3541 = vmatpush.bf16.msra.mxu1 %v8244_v3  ;;  %3554 = vmatpush.bf16.msra.mxu2 %v8120_v62  ;;  %v9266_v3 = vld [vmem:[%s14881_s4 + $0x174] sm:$0xf0]  ;;  %v9232_v62 = vld [vmem:[%s14881_s4 + $0x6c] sm:$0xf] }
 0x5e4   :  { %v3030_v12 = vpop.f32.mrf.mxu2  ;;  %v3050_v28 = vpop.f32.mrf.mxu3 }
 0x5e5   :  { %v3051_v21 = vadd.f32 %v3050_v28, %v3030_v12  ;;  %v9259_v12 = vld [vmem:[%s14881_s4 + $0x144] sm:$0xf]  ;;  %v8277_v28 = vld [vmem:[%s14881_s4 + $0x150] sm:$0xf0] }
 0x5e6   :  { %v8280_v4 = vor.u32 %v9259_v12, %v8277_v28  ;;  %v8112_v12 = vld [vmem:[%s14879_s7 + $0x3] ss:$8 sm:$0x3]  ;;  %v8336_v28 = vor.u32 %v9272_v34, %v8333_v45 }
 0x5e7   :  { %v3053_v35 = vmul.f32 0.03125, %v3051_v21  ;;  %v8132_v21 = vor.u32 %v9225_v39, %v8131_v31  ;;  %v9238_v31 = vld [vmem:[%s14881_s4 + $0x94] sm:$0xf0]  ;;  %v8315_v39 = vld [vmem:[%s14881_s4 + $0x188] sm:$0xf]  ;;  %v3117_v33 = vperm.slane %v8112_v12, 0 }
 0x5e8   :  { %3565 = vmatpush.bf16.msra.mxu3 %v8280_v4  ;;  %v8187_v4 = vld [vmem:[%s14881_s4 + $0x88] sm:$0xf] }
 0x5e9   :  { %v3055_v10 = vadd.f32 1e-05, %v3053_v35  ;;  %3527 = vmatpush.bf16.msra.mxu0 %v8132_v21  ;;  %v8115_v35 = vld [vmem:[%s14881_s4] sm:$0xf]  ;;  %v8188_v47 = vor.u32 %v9238_v31, %v8187_v4  ;;  %v9270_v21 = vld [vmem:[%s14881_s4 + $0x194] sm:$0xf0] }
 0x5ea   :  { %v8116_v43 = vor.u32 %v9221_v29, %v8115_v35  ;;  %v8316_v14 = vor.u32 %v9270_v21, %v8315_v39  ;;  %v8320_v35 = vor.u32 %v9268_v23, %v8317_v16  ;;  %v8171_v29 = vld [vmem:[%s14881_s4 + $0x68] sm:$0xf]  ;;  %v9254_v4 = vld [vmem:[%s14881_s4 + $0x114] sm:$0xf0]  ;;  %v9220_v39 = vld [vmem:[%s14881_s4 + $0xc] sm:$0xf] }
 0x5eb   :  { %9501 = vrsqrt.f32 %v3055_v10  ;;  %vm3062_vm7 = vweird.f32 %v3055_v10  ;;  %v8172_v61 = vor.u32 %v9234_v60, %v8171_v29  ;;  %v8251_v34 = vld [vmem:[%s14881_s4 + $0x108] sm:$0xf]  ;;  %v9252_v21 = vld [vmem:[%s14881_s4 + $0x10c] sm:$0xf] }
 0x5ec   :  { %3566 = vmatpush.bf16.msra.mxu3 %v8264_v56  ;;  %v3118_v56 = vperm.slane %v8112_v12, 1  ;;  %v8256_v23 = vor.u32 %v9252_v21, %v8253_v7  ;;  %v13160_v21 = vld [vmem:[%s14878_s6 + $0x580] sm:$0xff]  ;;  %v13165_v7 = vld [vmem:[%s14878_s6 + $0x628] sm:$0xff] }
 0x5ed   :  { %3528 = vmatpush.bf16.msra.mxu0 %v8116_v43  ;;  %v8299_v43 = vld [vmem:[%s14881_s4 + $0x168] sm:$0xf] }
 0x5f1   :  { %v9502_v20 = vpop.eup %9501 }
 0x5f2   :  { %v3057_v46 = vmul.f32 %v9502_v20, %v3055_v10  ;;  %vm3063_vm6 = vweird.f32 %v9502_v20  ;;  %v9251_v10 = vld [vmem:[%s14881_s4 + $0x104] sm:$0xf] }
 0x5f3   :  { %vm3064_vm8 = vmor %vm3062_vm7, %vm3063_vm6  ;;  %v8248_v57 = vor.u32 %v9251_v10, %v8245_v5  ;;  %v8173_v10 = vld [vmem:[%s14881_s4 + $0x78] sm:$0xf0]  ;;  %vm5233_vm6 = vcmask 517120  }
 0x5f4   :  { %v3058_v41 = vmul.f32 %v9502_v20, %v3057_v46  ;;  %v9248_v46 = vld [vmem:[%s14881_s4 + $0xec] sm:$0xf]  ;;  %v8176_v58 = vor.u32 %v9232_v62, %v8173_v10  ;;  %v12877_v62 = vld [vmem:[%s14878_s6 + $0x5f8] sm:$0xff]  ;;  %v12882_v10 = vld [vmem:[%s14878_s6 + $0x570] sm:$0xff] }
 0x5f5   :  { %3567 = vmatpush.bf16.msra.mxu3 %v8248_v57  ;;  %v8300_v57 = vor.u32 %v9266_v3, %v8299_v43  ;;  %v12872_v3 = vld [vmem:[%s14878_s6 + $0x578] sm:$0xff] }
 0x5f6   :  { %v3059_v48 = vmul.f32 0.5, %v3058_v41  ;;  %v8237_v41 = vld [vmem:[%s14881_s4 + $0xf8] sm:$0xf0] }
 0x5f8   :  { %v3060_v32 = vsub.f32 1.5, %v3059_v48  ;;  %v9280_v48 = vld [vmem:[%s14881_s4 + $0x1ec] sm:$0xf] }
 0x5fa   :  { %v3061_v30 = vmul.f32 %v9502_v20, %v3060_v32  ;;  %v8240_v32 = vor.u32 %v9248_v46, %v8237_v41  ;;  %v9230_v46 = vld [vmem:[%s14881_s4 + $0x54] sm:$0xf0]  ;;  %v8283_v41 = vld [vmem:[%s14881_s4 + $0x148] sm:$0xf] }
 0x5fc   :  { %v3065_v27 = vsel %vm3064_vm8, %v9502_v20, %v3061_v30  ;;  %v8364_v20 = vor.u32 %v9282_v53, %v8363_v13  ;;  %v8219_v30 = vld [vmem:[%s14881_s4 + $0xc8] sm:$0xf]  ;;  %3599 = vmatpush.bf16.msrb.mxu2 %v8240_v32  ;;  %v9264_v13 = vld [vmem:[%s14881_s4 + $0x16c] sm:$0xf]  ;;  %v8301_v53 = vld [vmem:[%s14881_s4 + $0x178] sm:$0xf0] }
 0x5fd   :  { %v3066_v42 = vmul.f32 %v3065_v27, %v3054_v63  ;;  %v8365_v63 = vld [vmem:[%s14881_s4 + $0x1f8] sm:$0xf0]  ;;  %v9246_v27 = vld [vmem:[%s14881_s4 + $0xd4] sm:$0xf0] }
 0x5fe   :  { %v8220_v36 = vor.u32 %v9246_v27, %v8219_v30  ;;  %v9228_v30 = vld [vmem:[%s14881_s4 + $0x4c] sm:$0xf]  ;;  %v8157_v27 = vld [vmem:[%s14881_s4 + $0x58] sm:$0xf0] }
 0x5ff   :  { %8110 = vmatmul.msk.f32.vlgmr.msrb.gmra.mxu0 %vm1199_vm2, %v3066_v42  ;;  %8111 = vmatmul.msk.f32.vlgmr.msrb.gmra.mxu1 %vm1199_vm2, %v3066_v42  ;;  %v8368_v42 = vor.u32 %v9280_v48, %v8365_v63  ;;  %v9262_v63 = vld [vmem:[%s14881_s4 + $0x154] sm:$0xf0] }
 0x600   :  { %3573 = vmatpush.bf16.msrb.mxu0 %v8236_v17  ;;  %3586 = vmatpush.bf16.msrb.mxu1 %v8364_v20  ;;  %v8304_v17 = vor.u32 %v9264_v13, %v8301_v53  ;;  %v8155_v20 = vld [vmem:[%s14881_s4 + $0x48] sm:$0xf]  ;;  %v12911_v13 = vld [vmem:[%s14878_s6 + $0x5e0] sm:$0xff]  ;;  %v12918_v53 = vld [vmem:[%s14878_s6 + $0x558] sm:$0xff] }
 0x601   :  { %3612 = vmatpush.bf16.msrb.mxu3 %v8368_v42  ;;  %3600 = vmatpush.bf16.msrb.mxu2 %v8224_v54  ;;  %v8156_v42 = vor.u32 %v9230_v46, %v8155_v20  ;;  %v12930_v20 = vld [vmem:[%s14878_s6 + $0x550] sm:$0xff]  ;;  %v12937_v46 = vld [vmem:[%s14878_s6 + $0x548] sm:$0xff] }
 0x604   :  { %3574 = vmatpush.bf16.msrb.mxu0 %v8220_v36  ;;  %3587 = vmatpush.bf16.msrb.mxu1 %v8348_v11  ;;  %v8284_v36 = vor.u32 %v9262_v63, %v8283_v41  ;;  %v8160_v11 = vor.u32 %v9228_v30, %v8157_v27  ;;  %v12944_v41 = vld [vmem:[%s14878_s6 + $0x540] sm:$0xff]  ;;  %v12960_v63 = vld [vmem:[%s14878_s6 + $0x678] sm:$0xff]  ;;  %v12968_v30 = vld [vmem:[%s14878_s6 + $0x530] sm:$0xff] }
 0x605   :  { %3613 = vmatpush.bf16.msrb.mxu3 %v8352_v19  ;;  %3601 = vmatpush.bf16.msrb.mxu2 %v8208_v50  ;;  %v9224_v19 = vld [vmem:[%s14881_s4 + $0x2c] sm:$0xf]  ;;  %v9222_v50 = vld [vmem:[%s14881_s4 + $0x14] sm:$0xf0] }
 0x606   :  { %v12973_v27 = vld [vmem:[%s14878_s6 + $0x5c8] sm:$0xff] }
 0x608   :  { %3575 = vmatpush.bf16.msrb.mxu0 %v8204_v8  ;;  %3588 = vmatpush.bf16.msrb.mxu1 %v8332_v22  ;;  %v9256_v8 = vld [vmem:[%s14881_s4 + $0x12c] sm:$0xf]  ;;  %v8123_v22 = vld [vmem:[%s14881_s4 + $0x8] sm:$0xf] }
 0x609   :  { %3614 = vmatpush.bf16.msrb.mxu3 %v8336_v28  ;;  %3602 = vmatpush.bf16.msrb.mxu2 %v8192_v59  ;;  %v8144_v28 = vor.u32 %v9224_v19, %v8141_v6  ;;  %v8272_v31 = vor.u32 %v9256_v8, %v8269_v24  ;;  %v8124_v44 = vor.u32 %v9222_v50, %v8123_v22  ;;  %v13052_v19 = vld [vmem:[%s14878_s6 + $0x510] sm:$0xff]  ;;  %v13057_v6 = vld [vmem:[%s14878_s6 + $0x5a8] sm:$0xff]  ;;  %v13081_v24 = vld [vmem:[%s14878_s6 + $0x5a0] sm:$0xff] }
 0x60a   :  { %v13076_v8 = vld [vmem:[%s14878_s6 + $0x508] sm:$0xff]  ;;  %v13100_v22 = vld [vmem:[%s14878_s6 + $0x500] sm:$0xff]  ;;  %v13105_v50 = vld [vmem:[%s14878_s6 + $0x598] sm:$0xff] }
 0x60c   :  { %3576 = vmatpush.bf16.msrb.mxu0 %v8188_v47  ;;  %3589 = vmatpush.bf16.msrb.mxu1 %v8316_v14  ;;  %v8125_v47 = vld [vmem:[%s14881_s4 + $0x18] sm:$0xf0]  ;;  %v8252_v14 = vor.u32 %v9254_v4, %v8251_v34  ;;  %v13110_v34 = vld [vmem:[%s14878_s6 + $0x640] sm:$0xff]  ;;  %v13134_v4 = vld [vmem:[%s14878_s6 + $0x6d0] sm:$0xff] }
 0x60d   :  { %3615 = vmatpush.bf16.msrb.mxu3 %v8320_v35  ;;  %3603 = vmatpush.bf16.msrb.mxu2 %v8176_v58  ;;  %v8128_v59 = vor.u32 %v9220_v39, %v8125_v47  ;;  %v12906_v58 = vld [vmem:[%s14878_s6 + $0x560] sm:$0xff]  ;;  %v13147_v39 = vld [vmem:[%s14878_s6 + $0x630] sm:$0xff]  ;;  %v13152_v47 = vld [vmem:[%s14878_s6 + $0x6c8] sm:$0xff] }
 0x610   :  { %3577 = vmatpush.bf16.msrb.mxu0 %v8172_v61  ;;  %3590 = vmatpush.bf16.msrb.mxu1 %v8300_v57  ;;  %v12899_v57 = vld [vmem:[%s14878_s6 + $0x5e8] sm:$0xff] }
 0x611   :  { %3616 = vmatpush.bf16.msrb.mxu3 %v8304_v17  ;;  %3604 = vmatpush.bf16.msrb.mxu2 %v8160_v11  ;;  %v12923_v17 = vld [vmem:[%s14878_s6 + $0x5d8] sm:$0xff] }
 0x612   :  { %v13021_v11 = vld [vmem:[%s14878_s6 + $0x6f8] sm:$0xff] }
 0x614   :  { %3578 = vmatpush.bf16.msrb.mxu0 %v8156_v42  ;;  %3591 = vmatpush.bf16.msrb.mxu1 %v8284_v36  ;;  %v12978_v42 = vld [vmem:[%s14878_s6 + $0x670] sm:$0xff]  ;;  %v12986_v36 = vld [vmem:[%s14878_s6 + $0x528] sm:$0xff] }
 0x615   :  { %3605 = vmatpush.bf16.msrb.mxu2 %v8144_v28  ;;  %v13129_v28 = vld [vmem:[%s14878_s6 + $0x638] sm:$0xff] }
 0x618   :  { %3579 = vmatpush.bf16.msrb.mxu0 %v8140_v38  ;;  %3592 = vmatpush.bf16.msrb.mxu1 %v8268_v1  ;;  %v13086_v38 = vld [vmem:[%s14878_s6 + $0x648] sm:$0xff]  ;;  %v13093_v1 = vld [vmem:[%s14878_s6 + $0x6e0] sm:$0xff] }
 0x619   :  { %3606 = vmatpush.bf16.msrb.mxu2 %v8128_v59  ;;  %v13183_v59 = vld [vmem:[%s14878_s6 + $0x6b8] sm:$0xff] }
 0x61c   :  { %3580 = vmatpush.bf16.msrb.mxu0 %v8124_v44  ;;  %3593 = vmatpush.bf16.msrb.mxu1 %v8252_v14  ;;  %v13170_v44 = vld [vmem:[%s14878_s6 + $0x6c0] sm:$0xff] }
 0x61d   :  { %v13178_v14 = vld [vmem:[%s14878_s6 + $0x620] sm:$0xff] }
 0x61e   :  { %15146 = vst [vmem:[#allocation2_spill] sm:$0xff] %v13178_v14 }
 0x67c   :  { %v3087_v26 = vpop.f32.mrf.mxu0  ;;  %v3107_v37 = vpop.f32.mrf.mxu1 }
 0x67d   :  { %v3112_v5 = vperm.slane %v3087_v26, 0  ;;  %v3113_v0 = vperm.slane %v3107_v37, 0 }
 0x67f   :  { %v3114_v48 = vmul.f32 %v3112_v5, %v12464_v18  ;;  %v3115_v32 = vmul.f32 %v3113_v0, %v12467_v2  ;;  %v9260_v18 = vld [vmem:[%s14881_s4 + $0x14c] sm:$0xf]  ;;  %v8285_v2 = vld [vmem:[%s14881_s4 + $0x158] sm:$0xf0]  ;;  %v12887_v5 = vld [vmem:[%s14878_s6 + $0x5f0] sm:$0xff] }
 0x680   :  { %v8288_v54 = vor.u32 %v9260_v18, %v8285_v2  ;;  %v12894_v0 = vld [vmem:[%s14878_s6 + $0x568] sm:$0xff]  ;;  %v12991_v18 = vld [vmem:[%s14878_s6 + $0x5c0] sm:$0xff] }
 0x681   :  { %v3121_v52 = vadd.f32 %v3117_v33, %v3114_v48  ;;  %v3122_v25 = vadd.f32 %v3118_v56, %v3115_v32  ;;  %v12950_v48 = vld [vmem:[%s14878_s6 + $0x538] sm:$0xff]  ;;  %v12955_v32 = vld [vmem:[%s14878_s6 + $0x5d0] sm:$0xff]  ;;  %v12996_v2 = vld [vmem:[%s14878_s6 + $0x668] sm:$0xff] }
 0x682   :  { %3617 = vmatpush.bf16.msrb.mxu3 %v8288_v54  ;;  %v13045_v54 = vld [vmem:[%s14878_s6 + $0x6f0] sm:$0xff] }
 0x683   :  { %v3123_v49 = vsub.f32 0.0, %v3121_v52  ;;  %v3124_v40 = vsub.f32 0.0, %v3122_v25 }
 0x685   :  { %v3125_v45 = vmul.f32 1.442695, %v3123_v49  ;;  %v3127_v12 = vmul.f32 1.442695, %v3124_v40  ;;  %v13062_v49 = vld [vmem:[%s14878_s6 + $0x650] sm:$0xff]  ;;  %v13069_v40 = vld [vmem:[%s14878_s6 + $0x6e8] sm:$0xff] }
 0x686   :  { %3618 = vmatpush.bf16.msrb.mxu3 %v8272_v31  ;;  %v13142_v31 = vld [vmem:[%s14878_s6 + $0x588] sm:$0xff] }
 0x687   :  { %9503 = vpow2.f32 %v3125_v45  ;;  %v13117_v45 = vld [vmem:[%s14878_s6 + $0x6d8] sm:$0xff] }
 0x688   :  { %9505 = vpow2.f32 %v3127_v12  ;;  %v13124_v12 = vld [vmem:[%s14878_s6 + $0x590] sm:$0xff] }
 0x68a   :  { %3619 = vmatpush.bf16.msrb.mxu3 %v8256_v23  ;;  %v13190_v23 = vld [vmem:[%s14878_s6 + $0x618] sm:$0xff] }
 0x68b   :  { %15147 = vst [vmem:[#allocation6_spill] sm:$0xff] %v13190_v23 }
 0x68d   :  { %v9504_v16 = vpop.eup %9503 }
 0x68e   :  { %v9506_v33 = vpop.eup %9505  ;;  %v3129_v56 = vadd.f32 1.0, %v9504_v16  ;;  %v13195_v16 = vld [vmem:[%s14878_s6 + $0x6b0] sm:$0xff] }
 0x68f   :  { %v3130_v35 = vadd.f32 1.0, %v9506_v33  ;;  %v13202_v33 = vld [vmem:[%s14878_s6 + $0x610] sm:$0xff] }
 0x690   :  { %9507 = vrcp.f32 %v3129_v56  ;;  %15148 = vst [vmem:[#allocation11_spill] sm:$0xff] %v13202_v33  ;;  %v13207_v56 = vld [vmem:[%s14878_s6 + $0x6a8] sm:$0xff] }
 0x691   :  { %9509 = vrcp.f32 %v3130_v35  ;;  %15149 = vst [vmem:[#allocation3_spill] sm:$0xff] %v13207_v56  ;;  %v13214_v35 = vld [vmem:[%s14878_s6 + $0x608] sm:$0xff] }
 0x692   :  { %15150 = vst [vmem:[#allocation8_spill] sm:$0xff] %v13214_v35 }
 0x696   :  { %v9508_v29 = vpop.eup %9507 }
 0x697   :  { %v9510_v60 = vpop.eup %9509  ;;  %v3133_v43 = vmul.f32 %v9508_v29, %v3121_v52  ;;  %v13009_v52 = vld [vmem:[%s14878_s6 + $0x5b8] sm:$0xff]  ;;  %v13219_v29 = vld [vmem:[%s14878_s6 + $0x6a0] sm:$0xff] }
 0x698   :  { %v3134_v26 = vmul.f32 %v9510_v60, %v3122_v25  ;;  %v13014_v25 = vld [vmem:[%s14878_s6 + $0x660] sm:$0xff]  ;;  %15151 = vst [vmem:[#allocation14_spill] sm:$0xff] %v13219_v29 }
 0x699   :  { %v3199_v37 = vpack.c.bf16 %v3133_v43, %v3133_v43  ;;  %v13226_v43 = vld [vmem:[%s14878_s6 + $0x600] sm:$0xff] }
 0x69a   :  { %v3200_v61 = vpack.c.bf16 %v3134_v26, %v3134_v26  ;;  %15152 = vst [vmem:[#allocation4_spill] sm:$0xff] %v13226_v43  ;;  %v13231_v26 = vld [vmem:[%s14878_s6 + $0x698] sm:$0xff] }
 0x69b   :  { %3529 = vmatmul.bf16.vlgmr.msra.gmra.mxu0 %v3199_v37  ;;  %3555 = vmatmul.bf16.vlgmr.msra.gmra.mxu2 %v3199_v37  ;;  %15153 = vst [vmem:[#allocation10_spill] sm:$0xff] %v13231_v26 }
 0x69c   :  { %3542 = vmatmul.bf16.vlgmr.msra.gmra.mxu1 %v3200_v61  ;;  %3568 = vmatmul.bf16.vlgmr.msra.gmra.mxu3 %v3200_v61 }
 0x69d   :  { %3741 = vmatpush.msra.mxu0 %v12872_v3  ;;  %3761 = vmatpush.msra.mxu1 %v12877_v62 }
 0x69e   :  { %3781 = vmatpush.msra.mxu2 %v12960_v63  ;;  %3801 = vmatpush.msra.mxu3 %v13021_v11 }
 0x69f   :  { %3742 = vmatpush.msra.mxu0 %v12882_v10  ;;  %3762 = vmatpush.msra.mxu1 %v12887_v5 }
 0x6a0   :  { %3782 = vmatpush.msra.mxu2 %v12978_v42  ;;  %3802 = vmatpush.msra.mxu3 %v13045_v54 }
 0x6a1   :  { %3743 = vmatpush.msra.mxu0 %v12894_v0  ;;  %3763 = vmatpush.msra.mxu1 %v12899_v57 }
 0x6a2   :  { %3783 = vmatpush.msra.mxu2 %v12996_v2  ;;  %3803 = vmatpush.msra.mxu3 %v13069_v40 }
 0x6a3   :  { %3744 = vmatpush.msra.mxu0 %v12906_v58  ;;  %3764 = vmatpush.msra.mxu1 %v12911_v13 }
 0x6a4   :  { %3784 = vmatpush.msra.mxu2 %v13014_v25  ;;  %3804 = vmatpush.msra.mxu3 %v13093_v1 }
 0x6a5   :  { %3745 = vmatpush.msra.mxu0 %v12918_v53  ;;  %3765 = vmatpush.msra.mxu1 %v12923_v17 }
 0x6a6   :  { %3785 = vmatpush.msra.mxu2 %v13038_v55  ;;  %3805 = vmatpush.msra.mxu3 %v13117_v45 }
 0x6a7   :  { %3746 = vmatpush.msra.mxu0 %v12930_v20  ;;  %3766 = vmatpush.msra.mxu1 %v12955_v32 }
 0x6a8   :  { %3786 = vmatpush.msra.mxu2 %v13062_v49  ;;  %3806 = vmatpush.msra.mxu3 %v13134_v4 }
 0x6a9   :  { %3747 = vmatpush.msra.mxu0 %v12937_v46  ;;  %3767 = vmatpush.msra.mxu1 %v12973_v27 }
 0x6aa   :  { %3787 = vmatpush.msra.mxu2 %v13086_v38  ;;  %3807 = vmatpush.msra.mxu3 %v13152_v47 }
 0x6ab   :  { %3581 = vmatmul.bf16.vlgmr.msrb.gmra.mxu0 %v3199_v37  ;;  %3607 = vmatmul.bf16.vlgmr.msrb.gmra.mxu2 %v3199_v37 }
 0x6ac   :  { %3594 = vmatmul.bf16.vlgmr.msrb.gmra.mxu1 %v3200_v61  ;;  %3620 = vmatmul.bf16.vlgmr.msrb.gmra.mxu3 %v3200_v61 }
 0x6ad   :  { %3748 = vmatpush.msra.mxu0 %v12944_v41  ;;  %3768 = vmatpush.msra.mxu1 %v12991_v18 }
 0x6ae   :  { %3788 = vmatpush.msra.mxu2 %v13110_v34  ;;  %3808 = vmatpush.msra.mxu3 %v13170_v44 }
 0x6af   :  { %3749 = vmatpush.msra.mxu0 %v12950_v48  ;;  %3769 = vmatpush.msra.mxu1 %v13009_v52 }
 0x6b0   :  { %3789 = vmatpush.msra.mxu2 %v13129_v28  ;;  %3809 = vmatpush.msra.mxu3 %v13183_v59 }
 0x6b1   :  { %3750 = vmatpush.msra.mxu0 %v12968_v30  ;;  %3770 = vmatpush.msra.mxu1 %v13033_v9 }
 0x6b2   :  { %3790 = vmatpush.msra.mxu2 %v13147_v39  ;;  %3810 = vmatpush.msra.mxu3 %v13195_v16 }
 0x6b3   :  { %3751 = vmatpush.msra.mxu0 %v12986_v36  ;;  %3771 = vmatpush.msra.mxu1 %v13057_v6 }
 0x6b4   :  { %3791 = vmatpush.msra.mxu2 %v13165_v7  ;;  %3811 = vmatpush.msra.mxu3 %v13207_v56 }
 0x6b5   :  { %3752 = vmatpush.msra.mxu0 %v13004_v51  ;;  %3772 = vmatpush.msra.mxu1 %v13081_v24 }
 0x6b6   :  { %3792 = vmatpush.msra.mxu2 %v13178_v14  ;;  %3812 = vmatpush.msra.mxu3 %v13219_v29 }
 0x6b7   :  { %3753 = vmatpush.msra.mxu0 %v13028_v15  ;;  %3773 = vmatpush.msra.mxu1 %v13105_v50 }
 0x6b8   :  { %3793 = vmatpush.msra.mxu2 %v13190_v23  ;;  %3813 = vmatpush.msra.mxu3 %v13231_v26 }
 0x6b9   :  { %3754 = vmatpush.msra.mxu0 %v13052_v19  ;;  %3774 = vmatpush.msra.mxu1 %v13124_v12 }
 0x6ba   :  { %3794 = vmatpush.msra.mxu2 %v13202_v33 }
 0x6bb   :  { %3755 = vmatpush.msra.mxu0 %v13076_v8  ;;  %3775 = vmatpush.msra.mxu1 %v13142_v31 }
 0x6bc   :  { %3795 = vmatpush.msra.mxu2 %v13214_v35  ;;  %v13240_v35 = vld [vmem:[%s14878_s6 + $0x690] sm:$0xff] }
 0x6bd   :  { %3756 = vmatpush.msra.mxu0 %v13100_v22  ;;  %3776 = vmatpush.msra.mxu1 %v13160_v21  ;;  %15155 = vst [vmem:[#allocation5_spill] sm:$0xff] %v13240_v35 }
 0x6be   :  { %3796 = vmatpush.msra.mxu2 %v13226_v43  ;;  %3814 = vmatpush.msra.mxu3 %v13240_v35  ;;  %v13254_v43 = vld [vmem:[%s14878_s6 + $0x680] sm:$0xff] }
 0x6c0   :  { %3946 = vmatpush.msrb.mxu2 %v12872_v3 }
 0x6c2   :  { %3947 = vmatpush.msrb.mxu2 %v12882_v10 }
 0x6c4   :  { %3948 = vmatpush.msrb.mxu2 %v12894_v0 }
 0x6c6   :  { %3949 = vmatpush.msrb.mxu2 %v12906_v58 }
 0x6c8   :  { %3950 = vmatpush.msrb.mxu2 %v12918_v53 }
 0x6ca   :  { %3951 = vmatpush.msrb.mxu2 %v12930_v20 }
 0x6cc   :  { %3952 = vmatpush.msrb.mxu2 %v12937_v46 }
 0x6ce   :  { %3953 = vmatpush.msrb.mxu2 %v12944_v41 }
 0x6d0   :  { %3954 = vmatpush.msrb.mxu2 %v12950_v48 }
 0x6d2   :  { %3955 = vmatpush.msrb.mxu2 %v12968_v30 }
 0x6d4   :  { %3956 = vmatpush.msrb.mxu2 %v12986_v36 }
 0x6d6   :  { %3957 = vmatpush.msrb.mxu2 %v13004_v51 }
 0x6d8   :  { %3958 = vmatpush.msrb.mxu2 %v13028_v15 }
 0x6da   :  { %3959 = vmatpush.msrb.mxu2 %v13052_v19  ;;  %v3695_v19 = vld [vmem:[%s14881_s4 + $0x230] sm:$0xff] }
 0x6dc   :  { %3960 = vmatpush.msrb.mxu2 %v13076_v8  ;;  %v3709_v8 = vunpack.c.l.bf16 %v3695_v19 }
 0x6de   :  { %3961 = vmatpush.msrb.mxu2 %v13100_v22  ;;  %3838 = vmatpush.msrb.mxu0 %v3709_v8 }
 0x718   :  { %v3530_v60 = vpop.f32.mrf.mxu0 }
 0x719   :  { %v3543_v37 = vpop.f32.mrf.mxu1 }
 0x71a   :  { %v13233_v61 = vadd.f32 %v3543_v37, %v3530_v60  ;;  %v13249_v60 = vld [vmem:[%s14878_s6 + $0x688] sm:$0xff] }
 0x71b   :  { %15156 = vst [vmem:[#allocation13_spill] sm:$0xff] %v13249_v60  ;;  %3815 = vmatpush.msra.mxu3 %v13249_v60 }
 0x71c   :  { %15154 = vst [vmem:[#allocation17_spill] sm:$0xff] %v13233_v61  ;;  %v3713_v33 = vsel %vm981_vm1, %v13233_v61, 0.0 }
 0x71d   :  { %v3714_v37 = vrot.slane %v3713_v33, 4  ;;  %3816 = vmatpush.msra.mxu3 %v13254_v43 }
 0x71e   :  { %v3556_v26 = vpop.f32.mrf.mxu2 }
 0x71f   :  { %v3715_v3 = vadd.f32 %v3714_v37, %v3713_v33  ;;  %v3569_v61 = vpop.f32.mrf.mxu3  ;;  %3966 = vmatpush.msrb.mxu3 %v12877_v62 }
 0x720   :  { %v13259_v35 = vadd.f32 %v3569_v61, %v3556_v26  ;;  %v3532_v23 = vpop.f32.mrf.mxu0 }
 0x721   :  { %v3716_v29 = vrot.slane %v3715_v3, 2  ;;  %v3545_v14 = vpop.f32.mrf.mxu1  ;;  %3967 = vmatpush.msrb.mxu3 %v12887_v5 }
 0x722   :  { %v3720_v10 = vsel %vm981_vm1, %v13259_v35, 0.0 }
 0x723   :  { %v3717_v56 = vadd.f32 %v3716_v29, %v3715_v3  ;;  %v3721_v60 = vrot.slane %v3720_v10, 4  ;;  %3968 = vmatpush.msrb.mxu3 %v12899_v57 }
 0x725   :  { %v3718_v0 = vrot.slane %v3717_v56, 1  ;;  %v3722_v33 = vadd.f32 %v3721_v60, %v3720_v10  ;;  %3969 = vmatpush.msrb.mxu3 %v12911_v13 }
 0x726   :  { %v3558_v14 = vpop.f32.mrf.mxu2 }
 0x727   :  { %v3719_v23 = vadd.f32 %v3718_v0, %v3717_v56  ;;  %v3723_v62 = vrot.slane %v3722_v33, 2  ;;  %v3571_v26 = vpop.f32.mrf.mxu3  ;;  %3970 = vmatpush.msrb.mxu3 %v12923_v17 }
 0x728   :  { %v3582_v58 = vpop.f32.mrf.mxu0 }
 0x729   :  { %v3724_v29 = vadd.f32 %v3723_v62, %v3722_v33  ;;  %v3595_v61 = vpop.f32.mrf.mxu1  ;;  %3757 = vmatmul.f32.vlgmr.msra.gmra.mxu0 %v3719_v23  ;;  %3971 = vmatpush.msrb.mxu3 %v12955_v32  ;;  %v3689_v33 = vld [vmem:[%s14881_s4 + $0x200] sm:$0xff]  ;;  %v13316_v62 = vld [vmem:[%s14881_s4 + $0x238] sm:$0xff] }
 0x72a   :  { %v13273_v5 = vadd.f32 %v3595_v61, %v3582_v58  ;;  %v3697_v14 = vunpack.c.l.bf16 %v3689_v33  ;;  %v3698_v23 = vunpack.c.h.bf16 %v3689_v33  ;;  %v3711_v26 = vunpack.c.l.bf16 %v13316_v62  ;;  %v13328_v61 = vld [vmem:[%s14881_s4 + $0x218] sm:$0xff] }
 0x72b   :  { %v3725_v57 = vrot.slane %v3724_v29, 1  ;;  %3972 = vmatpush.msrb.mxu3 %v12973_v27  ;;  %v3712_v58 = vunpack.c.h.bf16 %v13316_v62 }
 0x72c   :  { %v3727_v53 = vsel %vm981_vm1, %v13273_v5, 0.0 }
 0x72d   :  { %v3726_v13 = vadd.f32 %v3725_v57, %v3724_v29  ;;  %v3728_v20 = vrot.slane %v3727_v53, 4  ;;  %3973 = vmatpush.msrb.mxu3 %v12991_v18  ;;  %v13323_v29 = vld [vmem:[%s14881_s4 + $0x228] sm:$0xff] }
 0x72e   :  { %v3608_v46 = vpop.f32.mrf.mxu2  ;;  %v3707_v57 = vunpack.c.l.bf16 %v13323_v29 }
 0x72f   :  { %v3729_v17 = vadd.f32 %v3728_v20, %v3727_v53  ;;  %v3621_v56 = vpop.f32.mrf.mxu3  ;;  %3777 = vmatmul.f32.vlgmr.msra.gmra.mxu1 %v3726_v13  ;;  %3974 = vmatpush.msrb.mxu3 %v13009_v52  ;;  %v3708_v53 = vunpack.c.h.bf16 %v13323_v29  ;;  %v13335_v13 = vld [vmem:[%s14881_s4 + $0x208] sm:$0xff]  ;;  %v3703_v20 = vunpack.c.l.bf16 %v13328_v61 }
 0x730   :  { %v13283_v41 = vadd.f32 %v3621_v56, %v3608_v46  ;;  %v3584_v32 = vpop.f32.mrf.mxu0  ;;  %v3704_v46 = vunpack.c.h.bf16 %v13328_v61  ;;  %v3700_v56 = vunpack.c.h.bf16 %v13335_v13 }
 0x731   :  { %v3730_v60 = vrot.slane %v3729_v17, 2  ;;  %v3597_v37 = vpop.f32.mrf.mxu1  ;;  %3975 = vmatpush.msrb.mxu3 %v13033_v9 }
 0x732   :  { %v3734_v48 = vsel %vm981_vm1, %v13283_v41, 0.0 }
 0x733   :  { %v3731_v30 = vadd.f32 %v3730_v60, %v3729_v17  ;;  %v3735_v27 = vrot.slane %v3734_v48, 4  ;;  %3976 = vmatpush.msrb.mxu3 %v13057_v6  ;;  %v3693_v6 = vld [vmem:[%s14881_s4 + $0x220] sm:$0xff]  ;;  %v3699_v17 = vunpack.c.l.bf16 %v13335_v13 }
 0x734   :  { %v3705_v22 = vunpack.c.l.bf16 %v3693_v6 }
 0x735   :  { %v3732_v18 = vrot.slane %v3731_v30, 1  ;;  %v3736_v3 = vadd.f32 %v3735_v27, %v3734_v48  ;;  %3977 = vmatpush.msrb.mxu3 %v13081_v24  ;;  %v3710_v24 = vunpack.c.h.bf16 %v3695_v19 }
 0x736   :  { %v3610_v36 = vpop.f32.mrf.mxu2  ;;  %3839 = vmatpush.msrb.mxu0 %v3705_v22 }
 0x737   :  { %v3733_v10 = vadd.f32 %v3732_v18, %v3731_v30  ;;  %v3737_v52 = vrot.slane %v3736_v3, 2  ;;  %v3623_v0 = vpop.f32.mrf.mxu3  ;;  %3978 = vmatpush.msrb.mxu3 %v13105_v50  ;;  %v3706_v50 = vunpack.c.h.bf16 %v3693_v6  ;;  %3858 = vmatpush.msrb.mxu1 %v3710_v24 }
 0x739   :  { %v3738_v51 = vadd.f32 %v3737_v52, %v3736_v3  ;;  %3797 = vmatmul.f32.vlgmr.msra.gmra.mxu2 %v3733_v10  ;;  %3979 = vmatpush.msrb.mxu3 %v13124_v12  ;;  %v3691_v12 = vld [vmem:[%s14881_s4 + $0x210] sm:$0xff] }
 0x73a   :  { %4055 = vmatpush.msra.mxu2 %v3709_v8  ;;  %3859 = vmatpush.msrb.mxu1 %v3706_v50 }
 0x73b   :  { %v3739_v15 = vrot.slane %v3738_v51, 1  ;;  %3980 = vmatpush.msrb.mxu3 %v13142_v31  ;;  %v3701_v31 = vunpack.c.l.bf16 %v3691_v12 }
 0x73c   :  { %4056 = vmatpush.msra.mxu2 %v3705_v22 }
 0x73d   :  { %v3740_v9 = vadd.f32 %v3739_v15, %v3738_v51  ;;  %3981 = vmatpush.msrb.mxu3 %v13160_v21  ;;  %v3702_v21 = vunpack.c.h.bf16 %v3691_v12  ;;  %3840 = vmatpush.msrb.mxu0 %v3701_v31 }
 0x73e   :  { %4057 = vmatpush.msra.mxu2 %v3701_v31 }
 0x73f   :  { %3817 = vmatmul.f32.vlgmr.msra.gmra.mxu3 %v3740_v9  ;;  %3860 = vmatpush.msrb.mxu1 %v3702_v21 }
 0x740   :  { %4075 = vmatpush.msra.mxu3 %v3710_v24  ;;  %3841 = vmatpush.msrb.mxu0 %v3697_v14 }
 0x741   :  { %3861 = vmatpush.msrb.mxu1 %v3698_v23  ;;  %4058 = vmatpush.msra.mxu2 %v3697_v14 }
 0x742   :  { %4076 = vmatpush.msra.mxu3 %v3706_v50  ;;  %3878 = vmatpush.msra.mxu0 %v3711_v26 }
 0x743   :  { %3898 = vmatpush.msra.mxu1 %v3712_v58 }
 0x744   :  { %4077 = vmatpush.msra.mxu3 %v3702_v21  ;;  %3879 = vmatpush.msra.mxu0 %v3707_v57 }
 0x745   :  { %3899 = vmatpush.msra.mxu1 %v3708_v53 }
 0x746   :  { %4078 = vmatpush.msra.mxu3 %v3698_v23  ;;  %3880 = vmatpush.msra.mxu0 %v3703_v20 }
 0x747   :  { %3900 = vmatpush.msra.mxu1 %v3704_v46 }
 0x748   :  { %3881 = vmatpush.msra.mxu0 %v3699_v17 }
 0x749   :  { %3901 = vmatpush.msra.mxu1 %v3700_v56 }
 0x7a6   :  { %v3758_v60 = vpop.f32.mrf.mxu0 }
 0x7ac   :  { %v3778_v32 = vpop.f32.mrf.mxu1 }
 0x7ad   :  { %v3779_v48 = vadd.f32 %v3778_v32, %v3758_v60 }
 0x7bc   :  { %v3798_v37 = vpop.f32.mrf.mxu2 }
 0x7bd   :  { %v3799_v30 = vadd.f32 %v3798_v37, %v3779_v48 }
 0x7c2   :  { %v3818_v27 = vpop.f32.mrf.mxu3 }
 0x7c3   :  { %v3819_v18 = vadd.f32 %v3818_v27, %v3799_v30 }
 0x7c5   :  { %v3821_v3 = vmul.f32 0.03125, %v3819_v18 }
 0x7c7   :  { %8369 = vmatmul.msk.f32.vlgmr.msrb.gmra.mxu0 %vm3822_vm9, %v3821_v3  ;;  %8370 = vmatmul.msk.f32.vlgmr.msrb.gmra.mxu1 %vm3822_vm9, %v3821_v3 }
 0x7c8   :  { %3986 = vmatpush.msrb.mxu0 %v12960_v63  ;;  %4006 = vmatpush.msrb.mxu1 %v13021_v11  ;;  %v15157_v63 = vld [vmem:[#allocation3_spill] sm:$0xff]  ;;  %v15161_v11 = vld [vmem:[#allocation10_spill] sm:$0xff] }
 0x7ca   :  { %3987 = vmatpush.msrb.mxu0 %v12978_v42  ;;  %4007 = vmatpush.msrb.mxu1 %v13045_v54  ;;  %v15158_v42 = vld [vmem:[#allocation2_spill] sm:$0xff]  ;;  %v15163_v54 = vld [vmem:[#allocation5_spill] sm:$0xff] }
 0x7cc   :  { %3988 = vmatpush.msrb.mxu0 %v12996_v2  ;;  %4008 = vmatpush.msrb.mxu1 %v13069_v40  ;;  %v15159_v2 = vld [vmem:[#allocation14_spill] sm:$0xff]  ;;  %v15165_v40 = vld [vmem:[#allocation13_spill] sm:$0xff] }
 0x7ce   :  { %3989 = vmatpush.msrb.mxu0 %v13014_v25  ;;  %4009 = vmatpush.msrb.mxu1 %v13093_v1  ;;  %v15160_v25 = vld [vmem:[#allocation6_spill] sm:$0xff] }
 0x7cf   :  { %8371 = vmatmul.msk.f32.vlgmr.msra.gmra.mxu0 %vm3822_vm9, %v3821_v3  ;;  %8372 = vmatmul.msk.f32.vlgmr.msra.gmra.mxu1 %vm3822_vm9, %v3821_v3 }
 0x7d0   :  { %3990 = vmatpush.msrb.mxu0 %v13038_v55  ;;  %4010 = vmatpush.msrb.mxu1 %v13117_v45  ;;  %v15162_v55 = vld [vmem:[#allocation11_spill] sm:$0xff] }
 0x7d2   :  { %3991 = vmatpush.msrb.mxu0 %v13062_v49  ;;  %4011 = vmatpush.msrb.mxu1 %v13134_v4  ;;  %v15164_v49 = vld [vmem:[#allocation8_spill] sm:$0xff]  ;;  %v15167_v4 = vld [vmem:[#allocation17_spill] sm:$0xff] }
 0x7d4   :  { %3992 = vmatpush.msrb.mxu0 %v13086_v38  ;;  %4012 = vmatpush.msrb.mxu1 %v13152_v47  ;;  %v15166_v38 = vld [vmem:[#allocation4_spill] sm:$0xff] }
 0x7d6   :  { %3993 = vmatpush.msrb.mxu0 %v13110_v34  ;;  %4013 = vmatpush.msrb.mxu1 %v13170_v44 }
 0x7d8   :  { %3994 = vmatpush.msrb.mxu0 %v13129_v28  ;;  %4014 = vmatpush.msrb.mxu1 %v13183_v59 }
 0x7da   :  { %3995 = vmatpush.msrb.mxu0 %v13147_v39  ;;  %4015 = vmatpush.msrb.mxu1 %v13195_v16 }
 0x7dc   :  { %3996 = vmatpush.msrb.mxu0 %v13165_v7  ;;  %4016 = vmatpush.msrb.mxu1 %v15157_v63 }
 0x7de   :  { %3997 = vmatpush.msrb.mxu0 %v15158_v42  ;;  %4017 = vmatpush.msrb.mxu1 %v15159_v2 }
 0x7e0   :  { %3998 = vmatpush.msrb.mxu0 %v15160_v25  ;;  %4018 = vmatpush.msrb.mxu1 %v15161_v11 }
 0x7e2   :  { %3999 = vmatpush.msrb.mxu0 %v15162_v55  ;;  %4019 = vmatpush.msrb.mxu1 %v15163_v54  ;;  %v4027_v55 = vld [vmem:[%s14879_s7 + $0x4] ss:$0 sm:$0xff] }
 0x7e4   :  { %4000 = vmatpush.msrb.mxu0 %v15164_v49  ;;  %4020 = vmatpush.msrb.mxu1 %v15165_v40 }
 0x7e6   :  { %4001 = vmatpush.msrb.mxu0 %v15166_v38  ;;  %4021 = vmatpush.msrb.mxu1 %v13254_v43  ;;  %v9306_v38 = vld [vmem:[%s14882_s2 + $0xb8] sm:$0xff] }
 0x7e8   :  { %4095 = vmatpush.msra.mxu0 %v3711_v26  ;;  %4115 = vmatpush.msra.mxu1 %v3712_v58 }
 0x7ea   :  { %4096 = vmatpush.msra.mxu0 %v3707_v57  ;;  %4116 = vmatpush.msra.mxu1 %v3708_v53 }
 0x7ec   :  { %4097 = vmatpush.msra.mxu0 %v3703_v20  ;;  %4117 = vmatpush.msra.mxu1 %v3704_v46 }
 0x7ee   :  { %4098 = vmatpush.msra.mxu0 %v3699_v17  ;;  %4118 = vmatpush.msra.mxu1 %v3700_v56 }
 0x844   :  { %v3843_v1 = vpop.f32.mrf.mxu0  ;;  %v3863_v34 = vpop.f32.mrf.mxu1 }
 0x845   :  { %v3906_v45 = vperm.slane %v3843_v1, 0  ;;  %v3907_v28 = vperm.slane %v3863_v34, 0  ;;  %v9314_v1 = vld [vmem:[%s14882_s2 + $0xf8] sm:$0xff]  ;;  %v9305_v34 = vld [vmem:[%s14882_s2 + $0xb0] sm:$0xff] }
 0x847   :  { %v13394_v39 = vsub.f32 %v15167_v4, %v3906_v45  ;;  %v13397_v47 = vsub.f32 %v13259_v35, %v3907_v28  ;;  %v9313_v45 = vld [vmem:[%s14882_s2 + $0xf0] sm:$0xff]  ;;  %v9290_v28 = vld [vmem:[%s14882_s2 + $0x38] sm:$0xff] }
 0x848   :  { %v9298_v4 = vld [vmem:[%s14882_s2 + $0x78] sm:$0xff] }
 0x849   :  { %v3914_v7 = vmul.f32 %v13394_v39, %v13394_v39  ;;  %v3915_v44 = vmul.f32 %v13397_v47, %v13397_v47 }
 0x84b   :  { %v3918_v59 = vsel %vm981_vm1, %v3914_v7, 0.0  ;;  %v3925_v16 = vsel %vm981_vm1, %v3915_v44, 0.0  ;;  %v9304_v7 = vld [vmem:[%s14882_s2 + $0xa8] sm:$0xff] }
 0x84c   :  { %v3919_v43 = vrot.slane %v3918_v59, 4  ;;  %v3926_v36 = vrot.slane %v3925_v16, 4  ;;  %v3883_v10 = vpop.f32.mrf.mxu0  ;;  %v3903_v52 = vpop.f32.mrf.mxu1  ;;  %v9312_v44 = vld [vmem:[%s14882_s2 + $0xe8] sm:$0xff] }
 0x84d   :  { %v3908_v0 = vperm.slane %v3883_v10, 0  ;;  %v3909_v51 = vperm.slane %v3903_v52, 0  ;;  %v9288_v10 = vld [vmem:[%s14882_s2 + $0x28] sm:$0xff] }
 0x84e   :  { %v3920_v15 = vadd.f32 %v3919_v43, %v3918_v59  ;;  %v3927_v9 = vadd.f32 %v3926_v36, %v3925_v16  ;;  %v9289_v59 = vld [vmem:[%s14882_s2 + $0x30] sm:$0xff]  ;;  %v9303_v43 = vld [vmem:[%s14882_s2 + $0xa0] sm:$0xff]  ;;  %v9296_v52 = vld [vmem:[%s14882_s2 + $0x68] sm:$0xff] }
 0x84f   :  { %v13406_v35 = vsub.f32 %v13273_v5, %v3908_v0  ;;  %v13409_v19 = vsub.f32 %v13283_v41, %v3909_v51  ;;  %v9297_v16 = vld [vmem:[%s14882_s2 + $0x70] sm:$0xff]  ;;  %v9311_v36 = vld [vmem:[%s14882_s2 + $0xe0] sm:$0xff]  ;;  %v9302_v0 = vld [vmem:[%s14882_s2 + $0x98] sm:$0xff] }
 0x850   :  { %v3921_v6 = vrot.slane %v3920_v15, 2  ;;  %v3928_v8 = vrot.slane %v3927_v9, 2  ;;  %v9310_v51 = vld [vmem:[%s14882_s2 + $0xd8] sm:$0xff] }
 0x851   :  { %v3916_v24 = vmul.f32 %v13406_v35, %v13406_v35  ;;  %v3917_v22 = vmul.f32 %v13409_v19, %v13409_v19 }
 0x852   :  { %v3922_v50 = vadd.f32 %v3921_v6, %v3920_v15  ;;  %v3929_v12 = vadd.f32 %v3928_v8, %v3927_v9  ;;  %v9287_v15 = vld [vmem:[%s14882_s2 + $0x20] sm:$0xff]  ;;  %v9301_v6 = vld [vmem:[%s14882_s2 + $0x90] sm:$0xff] }
 0x853   :  { %v3932_v31 = vsel %vm981_vm1, %v3916_v24, 0.0  ;;  %v3939_v21 = vsel %vm981_vm1, %v3917_v22, 0.0  ;;  %v9295_v9 = vld [vmem:[%s14882_s2 + $0x60] sm:$0xff]  ;;  %v9309_v8 = vld [vmem:[%s14882_s2 + $0xd0] sm:$0xff]  ;;  %v9286_v24 = vld [vmem:[%s14882_s2 + $0x18] sm:$0xff] }
 0x854   :  { %v3923_v33 = vrot.slane %v3922_v50, 1  ;;  %v3930_v5 = vrot.slane %v3929_v12, 1  ;;  %v3933_v14 = vrot.slane %v3932_v31, 4  ;;  %v3940_v23 = vrot.slane %v3939_v21, 4  ;;  %v9294_v22 = vld [vmem:[%s14882_s2 + $0x58] sm:$0xff] }
 0x856   :  { %v3934_v41 = vadd.f32 %v3933_v14, %v3932_v31  ;;  %v3941_v62 = vadd.f32 %v3940_v23, %v3939_v21  ;;  %v3924_v26 = vadd.f32 %v3923_v33, %v3922_v50  ;;  %v3931_v58 = vadd.f32 %v3930_v5, %v3929_v12  ;;  %v9300_v50 = vld [vmem:[%s14882_s2 + $0x88] sm:$0xff]  ;;  %v9285_v31 = vld [vmem:[%s14882_s2 + $0x10] sm:$0xff]  ;;  %v9299_v33 = vld [vmem:[%s14882_s2 + $0x80] sm:$0xff] }
 0x857   :  { %v9308_v12 = vld [vmem:[%s14882_s2 + $0xc8] sm:$0xff]  ;;  %v9293_v21 = vld [vmem:[%s14882_s2 + $0x50] sm:$0xff]  ;;  %v9307_v5 = vld [vmem:[%s14882_s2 + $0xc0] sm:$0xff] }
 0x858   :  { %v3935_v29 = vrot.slane %v3934_v41, 2  ;;  %v3942_v61 = vrot.slane %v3941_v62, 2  ;;  %3962 = vmatmul.f32.vlgmr.msrb.gmra.mxu2 %v3924_v26  ;;  %3982 = vmatmul.f32.vlgmr.msrb.gmra.mxu3 %v3931_v58  ;;  %v9284_v14 = vld [vmem:[%s14882_s2 + $0x8] sm:$0xff] }
 0x859   :  { %4430 = vmatpush.bf16.msrb.mxu2 %v9290_v28  ;;  %4443 = vmatpush.bf16.msrb.mxu3 %v9298_v4  ;;  %v9292_v23 = vld [vmem:[%s14882_s2 + $0x48] sm:$0xff] }
 0x85a   :  { %v3936_v57 = vadd.f32 %v3935_v29, %v3934_v41  ;;  %v3943_v53 = vadd.f32 %v3942_v61, %v3941_v62  ;;  %v8377_v41 = vld [vmem:[%s14879_s7 + $0x5] ss:$8 sm:$0xf] }
 0x85b   :  { %v4136_v29 = vperm.slane %v8377_v41, 2 }
 0x85c   :  { %v3937_v13 = vrot.slane %v3936_v57, 1  ;;  %v3944_v20 = vrot.slane %v3943_v53, 1 }
 0x85d   :  { %4431 = vmatpush.bf16.msrb.mxu2 %v9289_v59  ;;  %4444 = vmatpush.bf16.msrb.mxu3 %v9297_v16 }
 0x85e   :  { %v3938_v46 = vadd.f32 %v3937_v13, %v3936_v57  ;;  %v3945_v17 = vadd.f32 %v3944_v20, %v3943_v53  ;;  %v4137_v57 = vperm.slane %v8377_v41, 3  ;;  %v9283_v53 = vld [vmem:[%s14882_s2] sm:$0xff] }
 0x85f   :  { %v9291_v13 = vld [vmem:[%s14882_s2 + $0x40] sm:$0xff] }
 0x860   :  { %4002 = vmatmul.f32.vlgmr.msrb.gmra.mxu0 %v3938_v46  ;;  %4022 = vmatmul.f32.vlgmr.msrb.gmra.mxu1 %v3945_v17 }
 0x861   :  { %4456 = vmatpush.bf16.msrb.mxu0 %v9306_v38  ;;  %4469 = vmatpush.bf16.msrb.mxu1 %v9314_v1 }
 0x862   :  { %4432 = vmatpush.bf16.msrb.mxu2 %v9288_v10  ;;  %4445 = vmatpush.bf16.msrb.mxu3 %v9296_v52 }
 0x865   :  { %4457 = vmatpush.bf16.msrb.mxu0 %v9305_v34  ;;  %4470 = vmatpush.bf16.msrb.mxu1 %v9313_v45 }
 0x866   :  { %4433 = vmatpush.bf16.msrb.mxu2 %v9287_v15  ;;  %4446 = vmatpush.bf16.msrb.mxu3 %v9295_v9  ;;  %v4497_v9 = vld [vmem:[%s14878_s6 + $0x778] sm:$0xff] }
 0x869   :  { %4458 = vmatpush.bf16.msrb.mxu0 %v9304_v7  ;;  %4471 = vmatpush.bf16.msrb.mxu1 %v9312_v44 }
 0x86a   :  { %4434 = vmatpush.bf16.msrb.mxu2 %v9286_v24  ;;  %4447 = vmatpush.bf16.msrb.mxu3 %v9294_v22  ;;  %v4494_v24 = vld [vmem:[%s14878_s6 + $0x760] sm:$0xff]  ;;  %v4493_v22 = vld [vmem:[%s14878_s6 + $0x758] sm:$0xff] }
 0x86d   :  { %4459 = vmatpush.bf16.msrb.mxu0 %v9303_v43  ;;  %4472 = vmatpush.bf16.msrb.mxu1 %v9311_v36 }
 0x86e   :  { %4435 = vmatpush.bf16.msrb.mxu2 %v9285_v31  ;;  %4448 = vmatpush.bf16.msrb.mxu3 %v9293_v21  ;;  %v4490_v31 = vld [vmem:[%s14878_s6 + $0x740] sm:$0xff]  ;;  %v4489_v21 = vld [vmem:[%s14878_s6 + $0x738] sm:$0xff] }
 0x871   :  { %4460 = vmatpush.bf16.msrb.mxu0 %v9302_v0  ;;  %4473 = vmatpush.bf16.msrb.mxu1 %v9310_v51 }
 0x872   :  { %4436 = vmatpush.bf16.msrb.mxu2 %v9284_v14  ;;  %4449 = vmatpush.bf16.msrb.mxu3 %v9292_v23  ;;  %v4486_v14 = vld [vmem:[%s14878_s6 + $0x720] sm:$0xff]  ;;  %v4485_v23 = vld [vmem:[%s14878_s6 + $0x718] sm:$0xff] }
 0x875   :  { %4461 = vmatpush.bf16.msrb.mxu0 %v9301_v6  ;;  %4474 = vmatpush.bf16.msrb.mxu1 %v9309_v8  ;;  %v4496_v6 = vld [vmem:[%s14878_s6 + $0x770] sm:$0xff]  ;;  %v4495_v8 = vld [vmem:[%s14878_s6 + $0x768] sm:$0xff] }
 0x876   :  { %4437 = vmatpush.bf16.msrb.mxu2 %v9283_v53  ;;  %4450 = vmatpush.bf16.msrb.mxu3 %v9291_v13 }
 0x879   :  { %4462 = vmatpush.bf16.msrb.mxu0 %v9300_v50  ;;  %4475 = vmatpush.bf16.msrb.mxu1 %v9308_v12  ;;  %v4492_v50 = vld [vmem:[%s14878_s6 + $0x750] sm:$0xff]  ;;  %v4491_v12 = vld [vmem:[%s14878_s6 + $0x748] sm:$0xff] }
 0x87d   :  { %4463 = vmatpush.bf16.msrb.mxu0 %v9299_v33  ;;  %4476 = vmatpush.bf16.msrb.mxu1 %v9307_v5  ;;  %v4488_v33 = vld [vmem:[%s14878_s6 + $0x730] sm:$0xff]  ;;  %v4487_v5 = vld [vmem:[%s14878_s6 + $0x728] sm:$0xff] }
 0x8db   :  { %v3963_v56 = vpop.f32.mrf.mxu2  ;;  %v3983_v32 = vpop.f32.mrf.mxu3 }
 0x8dc   :  { %v3984_v60 = vadd.f32 %v3983_v32, %v3963_v56 }
 0x8dd   :  { %v4003_v37 = vpop.f32.mrf.mxu0  ;;  %v4023_v30 = vpop.f32.mrf.mxu1 }
 0x8de   :  { %v4004_v48 = vadd.f32 %v4003_v37, %v3984_v60 }
 0x8e0   :  { %v4024_v27 = vadd.f32 %v4023_v30, %v4004_v48  ;;  %v4134_v48 = vperm.slane %v8377_v41, 0 }
 0x8e2   :  { %v4026_v18 = vmul.f32 0.03125, %v4024_v27  ;;  %v4135_v27 = vperm.slane %v8377_v41, 1  ;;  %v4484_v41 = vld [vmem:[%s14878_s6 + $0x710] sm:$0xff] }
 0x8e4   :  { %v4028_v3 = vadd.f32 1e-05, %v4026_v18 }
 0x8e6   :  { %9511 = vrsqrt.f32 %v4028_v3  ;;  %vm4035_vm11 = vweird.f32 %v4028_v3 }
 0x8ec   :  { %v9512_v63 = vpop.eup %9511 }
 0x8ed   :  { %v4030_v42 = vmul.f32 %v9512_v63, %v4028_v3  ;;  %vm4036_vm10 = vweird.f32 %v9512_v63 }
 0x8ee   :  { %vm4037_vm12 = vmor %vm4035_vm11, %vm4036_vm10  ;;  %vm5418_vm11 = vcmask 254976  }
 0x8ef   :  { %v4031_v2 = vmul.f32 %v9512_v63, %v4030_v42 }
 0x8f1   :  { %v4032_v25 = vmul.f32 0.5, %v4031_v2 }
 0x8f3   :  { %v4033_v11 = vsub.f32 1.5, %v4032_v25 }
 0x8f5   :  { %v4034_v54 = vmul.f32 %v9512_v63, %v4033_v11 }
 0x8f7   :  { %v4038_v49 = vsel %vm4037_vm12, %v9512_v63, %v4034_v54  ;;  %vm5499_vm12 = vcmask 123904  }
 0x8f8   :  { %v4039_v40 = vmul.f32 %v4038_v49, %v4027_v55 }
 0x8fa   :  { %8373 = vmatmul.msk.f32.vlgmr.msra.gmra.mxu2 %vm3822_vm9, %v4039_v40  ;;  %8374 = vmatmul.msk.f32.vlgmr.msra.gmra.mxu3 %vm3822_vm9, %v4039_v40 }
 0x8fb   :  { %8375 = vmatmul.msk.f32.vlgmr.msra.gmra.mxu0 %vm3822_vm9, %v4039_v40  ;;  %8376 = vmatmul.msk.f32.vlgmr.msra.gmra.mxu1 %vm3822_vm9, %v4039_v40 }
 0x8fc   :  { %4513 = vmatpush.msra.mxu2 %v4497_v9  ;;  %4567 = vmatpush.msra.mxu0 %v4497_v9 }
 0x8fe   :  { %4514 = vmatpush.msra.mxu2 %v4496_v6  ;;  %4568 = vmatpush.msra.mxu0 %v4496_v6  ;;  %v8566_v6 = vld [vmem:[%s14880_s3 + $0x480] sm:$0xf] }
 0x900   :  { %4515 = vmatpush.msra.mxu2 %v4495_v8  ;;  %4569 = vmatpush.msra.mxu0 %v4495_v8  ;;  %v9330_v8 = vld [vmem:[%s14880_s3 + $0x484] sm:$0xf0] }
 0x902   :  { %4516 = vmatpush.msra.mxu2 %v4494_v24  ;;  %4570 = vmatpush.msra.mxu0 %v4494_v24  ;;  %v9329_v24 = vld [vmem:[%s14880_s3 + $0x484] sm:$0xf] }
 0x904   :  { %4517 = vmatpush.msra.mxu2 %v4493_v22  ;;  %4571 = vmatpush.msra.mxu0 %v4493_v22  ;;  %v8567_v22 = vor.u32 %v9330_v8, %v8566_v6  ;;  %v13750_v6 = vld [vmem:[%s14878_s6 + $0x850] sm:$0xff] }
 0x905   :  { %v4767_v8 = vld [vmem:[%s14878_s6 + $0x7d0] sm:$0xff] }
 0x906   :  { %4518 = vmatpush.msra.mxu2 %v4492_v50  ;;  %4572 = vmatpush.msra.mxu0 %v4492_v50  ;;  %v8568_v50 = vld [vmem:[%s14880_s3 + $0x488] sm:$0xf0] }
 0x908   :  { %4519 = vmatpush.msra.mxu2 %v4491_v12  ;;  %4573 = vmatpush.msra.mxu0 %v4491_v12  ;;  %v8571_v12 = vor.u32 %v9329_v24, %v8568_v50  ;;  %v13766_v50 = vld [vmem:[%s14878_s6 + $0x840] sm:$0xff] }
 0x90a   :  { %4520 = vmatpush.msra.mxu2 %v4490_v31  ;;  %4574 = vmatpush.msra.mxu0 %v4490_v31  ;;  %v8558_v31 = vld [vmem:[%s14880_s3 + $0x470] sm:$0xf] }
 0x90b   :  { %4744 = vmatpush.bf16.msra.mxu1 %v8571_v12  ;;  %v13772_v12 = vld [vmem:[%s14878_s6 + $0x838] sm:$0xff] }
 0x90c   :  { %4521 = vmatpush.msra.mxu2 %v4489_v21  ;;  %4575 = vmatpush.msra.mxu0 %v4489_v21  ;;  %v9328_v21 = vld [vmem:[%s14880_s3 + $0x474] sm:$0xf0] }
 0x90e   :  { %4522 = vmatpush.msra.mxu2 %v4488_v33  ;;  %4576 = vmatpush.msra.mxu0 %v4488_v33  ;;  %v9327_v33 = vld [vmem:[%s14880_s3 + $0x474] sm:$0xf] }
 0x910   :  { %4523 = vmatpush.msra.mxu2 %v4487_v5  ;;  %4577 = vmatpush.msra.mxu0 %v4487_v5  ;;  %v8559_v5 = vor.u32 %v9328_v21, %v8558_v31 }
 0x912   :  { %4524 = vmatpush.msra.mxu2 %v4486_v14  ;;  %4578 = vmatpush.msra.mxu0 %v4486_v14  ;;  %v8560_v14 = vld [vmem:[%s14880_s3 + $0x478] sm:$0xf0] }
 0x914   :  { %4525 = vmatpush.msra.mxu2 %v4485_v23  ;;  %4579 = vmatpush.msra.mxu0 %v4485_v23  ;;  %v8563_v23 = vor.u32 %v9327_v33, %v8560_v14 }
 0x916   :  { %4526 = vmatpush.msra.mxu2 %v4484_v41  ;;  %4580 = vmatpush.msra.mxu0 %v4484_v41  ;;  %v8550_v41 = vld [vmem:[%s14880_s3 + $0x460] sm:$0xf] }
 0x917   :  { %4745 = vmatpush.bf16.msra.mxu1 %v8563_v23  ;;  %v4766_v23 = vld [vmem:[%s14878_s6 + $0x7c8] sm:$0xff] }
 0x978   :  { %v4100_v62 = vpop.f32.mrf.mxu0  ;;  %v4120_v26 = vpop.f32.mrf.mxu1 }
 0x979   :  { %v4127_v58 = vperm.slane %v4100_v62, 0  ;;  %v4128_v61 = vperm.slane %v4120_v26, 0  ;;  %v4483_v62 = vld [vmem:[%s14878_s6 + $0x708] sm:$0xff]  ;;  %v4482_v26 = vld [vmem:[%s14878_s6 + $0x700] sm:$0xff] }
 0x97a   :  { %4527 = vmatpush.msra.mxu2 %v4483_v62  ;;  %4581 = vmatpush.msra.mxu0 %v4483_v62  ;;  %v9326_v62 = vld [vmem:[%s14880_s3 + $0x464] sm:$0xf0] }
 0x97b   :  { %v4131_v20 = vmul.f32 %v4127_v58, %v13406_v35  ;;  %v4132_v46 = vmul.f32 %v4128_v61, %v13409_v19  ;;  %v9457_v61 = vld [vmem:[%s14882_s2 + $0x100] sm:$0xff]  }
 0x97c   :  { %4528 = vmatpush.msra.mxu2 %v4482_v26  ;;  %4582 = vmatpush.msra.mxu0 %v4482_v26  ;;  %v9325_v26 = vld [vmem:[%s14880_s3 + $0x464] sm:$0xf] }
 0x97d   :  { %v4144_v17 = vadd.f32 %v4136_v29, %v4131_v20  ;;  %v4145_v56 = vadd.f32 %v4137_v57, %v4132_v46  ;;  %v4060_v32 = vpop.f32.mrf.mxu2  ;;  %v4080_v60 = vpop.f32.mrf.mxu3  ;;  %v9458_v29 = vld [vmem:[%s14882_s2 + $0x108] sm:$0xff]   ;;  %v9428_v20 = vunpack.c.h.bf16 %v9457_v61  ;;  %v9427_v46 = vunpack.c.l.bf16 %v9457_v61 }
 0x97e   :  { %v4125_v37 = vperm.slane %v4060_v32, 0  ;;  %v4126_v30 = vperm.slane %v4080_v60, 0  ;;  %v9432_v53 = vunpack.c.h.bf16 %v9458_v29  ;;  %v9431_v13 = vunpack.c.l.bf16 %v9458_v29  ;;  %v8552_v29 = vld [vmem:[%s14880_s3 + $0x468] sm:$0xf0] }
 0x97f   :  { %v4148_v18 = vsub.f32 0.0, %v4144_v17  ;;  %v4149_v3 = vsub.f32 0.0, %v4145_v56  ;;  %v8555_v61 = vor.u32 %v9325_v26, %v8552_v29  ;;  %v13791_v26 = vld [vmem:[%s14878_s6 + $0x828] sm:$0xff]  ;;  %v13800_v29 = vld [vmem:[%s14878_s6 + $0x820] sm:$0xff] }
 0x980   :  { %v4129_v63 = vmul.f32 %v4125_v37, %v13394_v39  ;;  %v4130_v42 = vmul.f32 %v4126_v30, %v13397_v47  ;;  %4549 = vmatpush.msra.mxu3 %v9432_v53 }
 0x981   :  { %v4154_v2 = vmul.f32 1.442695, %v4148_v18  ;;  %v4156_v35 = vmul.f32 1.442695, %v4149_v3  ;;  %4746 = vmatpush.bf16.msra.mxu1 %v8555_v61  ;;  %v4763_v61 = vld [vmem:[%s14878_s6 + $0x7b0] sm:$0xff] }
 0x982   :  { %v4142_v25 = vadd.f32 %v4134_v48, %v4129_v63  ;;  %v4143_v19 = vadd.f32 %v4135_v27, %v4130_v42  ;;  %4550 = vmatpush.msra.mxu3 %v9431_v13 }
 0x983   :  { %9513 = vpow2.f32 %v4154_v2 }
 0x984   :  { %9515 = vpow2.f32 %v4156_v35  ;;  %v4146_v11 = vsub.f32 0.0, %v4142_v25  ;;  %v4147_v55 = vsub.f32 0.0, %v4143_v19  ;;  %4551 = vmatpush.msra.mxu3 %v9428_v20 }
 0x986   :  { %v4150_v54 = vmul.f32 1.442695, %v4146_v11  ;;  %v4152_v49 = vmul.f32 1.442695, %v4147_v55  ;;  %4552 = vmatpush.msra.mxu3 %v9427_v46 }
 0x988   :  { %9517 = vpow2.f32 %v4150_v54 }
 0x989   :  { %v9514_v40 = vpop.eup %9513  ;;  %9519 = vpow2.f32 %v4152_v49 }
 0x98a   :  { %v9516_v38 = vpop.eup %9515  ;;  %v4160_v1 = vadd.f32 1.0, %v9514_v40 }
 0x98b   :  { %v4161_v34 = vadd.f32 1.0, %v9516_v38 }
 0x98c   :  { %9521 = vrcp.f32 %v4160_v1 }
 0x98d   :  { %9523 = vrcp.f32 %v4161_v34 }
 0x98e   :  { %v9518_v39 = vpop.eup %9517 }
 0x98f   :  { %v9520_v47 = vpop.eup %9519  ;;  %v4158_v45 = vadd.f32 1.0, %v9518_v39 }
 0x990   :  { %v4159_v28 = vadd.f32 1.0, %v9520_v47 }
 0x991   :  { %9525 = vrcp.f32 %v4158_v45 }
 0x992   :  { %v9522_v4 = vpop.eup %9521  ;;  %9527 = vrcp.f32 %v4159_v28 }
 0x993   :  { %v9524_v7 = vpop.eup %9523  ;;  %v4168_v44 = vmul.f32 %v9522_v4, %v4144_v17 }
 0x994   :  { %v4169_v59 = vmul.f32 %v9524_v7, %v4145_v56 }
 0x995   :  { %v4236_v16 = vpack.c.bf16 %v4168_v44, %v4168_v44 }
 0x996   :  { %v4237_v43 = vpack.c.bf16 %v4169_v59, %v4169_v59 }
 0x997   :  { %v9526_v36 = vpop.eup %9525  ;;  %4464 = vmatmul.bf16.vlgmr.msrb.gmra.mxu0 %v4236_v16 }
 0x998   :  { %v9528_v10 = vpop.eup %9527  ;;  %v4166_v52 = vmul.f32 %v9526_v36, %v4142_v25  ;;  %4477 = vmatmul.bf16.vlgmr.msrb.gmra.mxu1 %v4237_v43 }
 0x999   :  { %v4167_v0 = vmul.f32 %v9528_v10, %v4143_v19 }
 0x99a   :  { %v4234_v51 = vpack.c.bf16 %v4166_v52, %v4166_v52 }
 0x99b   :  { %v4235_v15 = vpack.c.bf16 %v4167_v0, %v4167_v0  ;;  %v4588_v0 = vld [vmem:[%s14879_s7 + $0x6] ss:$0 sm:$0xff] }
 0x99c   :  { %4438 = vmatmul.bf16.vlgmr.msrb.gmra.mxu2 %v4234_v51 }
 0x99d   :  { %4451 = vmatmul.bf16.vlgmr.msrb.gmra.mxu3 %v4235_v15 }
 0x99e   :  { %4616 = vmatpush.msrb.mxu3 %v9432_v53  ;;  %v9324_v53 = vld [vmem:[%s14880_s3 + $0x454] sm:$0xf0] }
 0x9a0   :  { %4617 = vmatpush.msrb.mxu3 %v9431_v13  ;;  %v9323_v13 = vld [vmem:[%s14880_s3 + $0x454] sm:$0xf] }
 0x9a2   :  { %4618 = vmatpush.msrb.mxu3 %v9428_v20 }
 0x9a4   :  { %4619 = vmatpush.msrb.mxu3 %v9427_v46  ;;  %v8544_v46 = vld [vmem:[%s14880_s3 + $0x458] sm:$0xf0] }
 0xa14   :  { %v4465_v58 = vpop.f32.mrf.mxu0 }
 0xa15   :  { %v4478_v57 = vpop.f32.mrf.mxu1 }
 0xa1c   :  { %v4467_v17 = vpop.f32.mrf.mxu0 }
 0xa1d   :  { %v4480_v56 = vpop.f32.mrf.mxu1  ;;  %v8547_v17 = vor.u32 %v9323_v13, %v8544_v46  ;;  %v13818_v13 = vld [vmem:[%s14878_s6 + $0x810] sm:$0xff]  ;;  %v13827_v46 = vld [vmem:[%s14878_s6 + $0x808] sm:$0xff] }
 0xa1e   :  { %v8534_v56 = vld [vmem:[%s14880_s3 + $0x440] sm:$0xf] }
 0xa1f   :  { %v4439_v32 = vpop.f32.mrf.mxu2  ;;  %4747 = vmatpush.bf16.msra.mxu1 %v8547_v17  ;;  %v4760_v17 = vld [vmem:[%s14878_s6 + $0x798] sm:$0xff] }
 0xa20   :  { %v4452_v60 = vpop.f32.mrf.mxu3 }
 0xa21   :  { %v4453_v37 = vadd.f32 %v4452_v60, %v4439_v32  ;;  %v9322_v32 = vld [vmem:[%s14880_s3 + $0x444] sm:$0xf0]  ;;  %v9321_v60 = vld [vmem:[%s14880_s3 + $0x444] sm:$0xf] }
 0xa23   :  { %v4466_v48 = vadd.f32 %v4465_v58, %v4453_v37  ;;  %v8551_v58 = vor.u32 %v9326_v62, %v8550_v41  ;;  %v8535_v37 = vor.u32 %v9322_v32, %v8534_v56  ;;  %v13782_v41 = vld [vmem:[%s14878_s6 + $0x830] sm:$0xff]  ;;  %v4765_v62 = vld [vmem:[%s14878_s6 + $0x7c0] sm:$0xff] }
 0xa24   :  { %v13836_v56 = vld [vmem:[%s14878_s6 + $0x800] sm:$0xff]  ;;  %v4759_v32 = vld [vmem:[%s14878_s6 + $0x790] sm:$0xff] }
 0xa25   :  { %v4479_v30 = vadd.f32 %v4478_v57, %v4466_v48  ;;  %v8542_v57 = vld [vmem:[%s14880_s3 + $0x450] sm:$0xf]  ;;  %v8536_v48 = vld [vmem:[%s14880_s3 + $0x448] sm:$0xf0] }
 0xa26   :  { %v8543_v20 = vor.u32 %v9324_v53, %v8542_v57  ;;  %v13809_v57 = vld [vmem:[%s14878_s6 + $0x818] sm:$0xff]  ;;  %v4762_v53 = vld [vmem:[%s14878_s6 + $0x7a8] sm:$0xff] }
 0xa27   :  { %v4506_v27 = vsel %vm981_vm1, %v4479_v30, 0.0  ;;  %v4441_v18 = vpop.f32.mrf.mxu2 }
 0xa28   :  { %v4507_v3 = vrot.slane %v4506_v27, 4  ;;  %v4454_v63 = vpop.f32.mrf.mxu3  ;;  %v9320_v18 = vld [vmem:[%s14880_s3 + $0x434] sm:$0xf0] }
 0xa2a   :  { %v4508_v42 = vadd.f32 %v4507_v3, %v4506_v27  ;;  %v8526_v27 = vld [vmem:[%s14880_s3 + $0x430] sm:$0xf]  ;;  %v9319_v3 = vld [vmem:[%s14880_s3 + $0x434] sm:$0xf] }
 0xa2b   :  { %v8527_v63 = vor.u32 %v9320_v18, %v8526_v27 }
 0xa2c   :  { %v4509_v2 = vrot.slane %v4508_v42, 2 }
 0xa2e   :  { %v4510_v35 = vadd.f32 %v4509_v2, %v4508_v42  ;;  %v8528_v42 = vld [vmem:[%s14880_s3 + $0x438] sm:$0xf0] }
 0xa2f   :  { %v8531_v2 = vor.u32 %v9319_v3, %v8528_v42 }
 0xa30   :  { %v4511_v25 = vrot.slane %v4510_v35, 1 }
 0xa32   :  { %v4512_v19 = vadd.f32 %v4511_v25, %v4510_v35  ;;  %v8518_v35 = vld [vmem:[%s14880_s3 + $0x420] sm:$0xf]  ;;  %v9318_v25 = vld [vmem:[%s14880_s3 + $0x424] sm:$0xf0] }
 0xa34   :  { %4529 = vmatmul.f32.vlgmr.msra.gmra.mxu2 %v4512_v19  ;;  %v9317_v19 = vld [vmem:[%s14880_s3 + $0x424] sm:$0xf] }
 0xab7   :  { %v4530_v11 = vpop.f32.mrf.mxu2 }
 0xab8   :  { %v4533_v55 = vmul.f32 0.125, %v4530_v11  ;;  %v8519_v11 = vor.u32 %v9318_v25, %v8518_v35 }
 0xaba   :  { %8506 = vmatmul.msk.f32.vlgmr.msra.gmra.mxu3 %vm3822_vm9, %v4533_v55  ;;  %v8520_v55 = vld [vmem:[%s14880_s3 + $0x428] sm:$0xf0] }
 0xabb   :  { %4731 = vmatpush.bf16.msra.mxu3 %v8567_v22  ;;  %v13760_v22 = vld [vmem:[%s14878_s6 + $0x848] sm:$0xff] }
 0xabf   :  { %4732 = vmatpush.bf16.msra.mxu3 %v8559_v5 }
 0xac3   :  { %4733 = vmatpush.bf16.msra.mxu3 %v8551_v58  ;;  %v4764_v58 = vld [vmem:[%s14878_s6 + $0x7b8] sm:$0xff] }
 0xac7   :  { %4734 = vmatpush.bf16.msra.mxu3 %v8543_v20  ;;  %v4761_v20 = vld [vmem:[%s14878_s6 + $0x7a0] sm:$0xff] }
 0xacb   :  { %4735 = vmatpush.bf16.msra.mxu3 %v8535_v37  ;;  %v4757_v37 = vld [vmem:[%s14878_s6 + $0x780] sm:$0xff] }
 0xacf   :  { %4736 = vmatpush.bf16.msra.mxu3 %v8527_v63 }
 0xad3   :  { %4737 = vmatpush.bf16.msra.mxu3 %v8519_v11 }
 0xb3d   :  { %v4554_v54 = vpop.f32.mrf.mxu3 }
 0xb3e   :  { %v4557_v49 = vperm.slane %v4554_v54, 0  ;;  %v8523_v54 = vor.u32 %v9317_v19, %v8520_v55 }
 0xb40   :  { %v13583_v40 = vsub.f32 %v4479_v30, %v4557_v49  ;;  %v8539_v30 = vor.u32 %v9321_v60, %v8536_v48  ;;  %v8510_v49 = vld [vmem:[%s14880_s3 + $0x410] sm:$0xf]  ;;  %v4758_v60 = vld [vmem:[%s14878_s6 + $0x788] sm:$0xff] }
 0xb42   :  { %v4559_v38 = vmul.f32 %v13583_v40, %v13583_v40  ;;  %4748 = vmatpush.bf16.msra.mxu1 %v8539_v30 }
 0xb44   :  { %v4560_v1 = vsel %vm981_vm1, %v4559_v38, 0.0  ;;  %v9316_v38 = vld [vmem:[%s14880_s3 + $0x414] sm:$0xf0] }
 0xb45   :  { %v4561_v34 = vrot.slane %v4560_v1, 4 }
 0xb46   :  { %4749 = vmatpush.bf16.msra.mxu1 %v8531_v2 }
 0xb47   :  { %v4562_v39 = vadd.f32 %v4561_v34, %v4560_v1  ;;  %v9315_v1 = vld [vmem:[%s14880_s3 + $0x414] sm:$0xf]  ;;  %v8511_v34 = vor.u32 %v9316_v38, %v8510_v49 }
 0xb49   :  { %v4563_v47 = vrot.slane %v4562_v39, 2  ;;  %4738 = vmatpush.bf16.msra.mxu3 %v8511_v34 }
 0xb4a   :  { %4750 = vmatpush.bf16.msra.mxu1 %v8523_v54 }
 0xb4b   :  { %v4564_v45 = vadd.f32 %v4563_v47, %v4562_v39  ;;  %v8512_v39 = vld [vmem:[%s14880_s3 + $0x418] sm:$0xf0] }
 0xb4c   :  { %v8515_v47 = vor.u32 %v9315_v1, %v8512_v39  ;;  %v4796_v39 = vld [vmem:[%s14880_s3 + $0x4c8] sm:$0xff] }
 0xb4d   :  { %v4565_v28 = vrot.slane %v4564_v45, 1 }
 0xb4e   :  { %4751 = vmatpush.bf16.msra.mxu1 %v8515_v47  ;;  %v4795_v47 = vld [vmem:[%s14880_s3 + $0x4c0] sm:$0xff] }
 0xb4f   :  { %v4566_v4 = vadd.f32 %v4565_v28, %v4564_v45  ;;  %v13691_v45 = vld [vmem:[%s14878_s6 + $0x878] sm:$0xff]  ;;  %v13696_v28 = vld [vmem:[%s14878_s6 + $0x870] sm:$0xff] }
 0xb50   :  { %4847 = vmatpush.msrb.mxu0 %v13691_v45 }
 0xb51   :  { %4583 = vmatmul.f32.vlgmr.msra.gmra.mxu0 %v4566_v4 }
 0xb52   :  { %4848 = vmatpush.msrb.mxu0 %v13696_v28 }
 0xbce   :  { %v4584_v7 = vpop.f32.mrf.mxu0 }
 0xbcf   :  { %v4587_v44 = vmul.f32 0.125, %v4584_v7  ;;  %v13702_v7 = vld [vmem:[%s14878_s6 + $0x7f8] sm:$0xff] }
 0xbd0   :  { %4827 = vmatpush.msrb.mxu2 %v13702_v7 }
 0xbd1   :  { %v4589_v59 = vadd.f32 1e-05, %v4587_v44  ;;  %v13707_v44 = vld [vmem:[%s14878_s6 + $0x7f0] sm:$0xff] }
 0xbd2   :  { %4828 = vmatpush.msrb.mxu2 %v13707_v44 }
 0xbd3   :  { %9529 = vrsqrt.f32 %v4589_v59  ;;  %vm4596_vm14 = vweird.f32 %v4589_v59 }
 0xbd9   :  { %v9530_v16 = vpop.eup %9529 }
 0xbda   :  { %v4591_v43 = vmul.f32 %v9530_v16, %v4589_v59  ;;  %vm4597_vm13 = vweird.f32 %v9530_v16 }
 0xbdb   :  { %vm4598_vm15 = vmor %vm4596_vm14, %vm4597_vm13 }
 0xbdc   :  { %v4592_v36 = vmul.f32 %v9530_v16, %v4591_v43  ;;  %v4624_v43 = vld [vmem:[%s14879_s7 + $0x7] ss:$0 sm:$0xff] }
 0xbde   :  { %v4593_v10 = vmul.f32 0.5, %v4592_v36  ;;  %v13722_v36 = vld [vmem:[%s14878_s6 + $0x7e8] sm:$0xff] }
 0xbdf   :  { %4829 = vmatpush.msrb.mxu2 %v13722_v36 }
 0xbe0   :  { %v4594_v52 = vsub.f32 1.5, %v4593_v10 }
 0xbe2   :  { %v4595_v51 = vmul.f32 %v9530_v16, %v4594_v52  ;;  %v13728_v52 = vld [vmem:[%s14878_s6 + $0x860] sm:$0xff] }
 0xbe4   :  { %v4599_v15 = vsel %vm4598_vm15, %v9530_v16, %v4595_v51  ;;  %v13712_v16 = vld [vmem:[%s14878_s6 + $0x868] sm:$0xff] }
 0xbe5   :  { %v4600_v9 = vmul.f32 %v4599_v15, %v4588_v0  ;;  %4849 = vmatpush.msrb.mxu0 %v13712_v16  ;;  %v13735_v0 = vld [vmem:[%s14878_s6 + $0x7e0] sm:$0xff]  ;;  %v13740_v15 = vld [vmem:[%s14878_s6 + $0x858] sm:$0xff] }
 0xbe6   :  { %4830 = vmatpush.msrb.mxu2 %v13735_v0 }
 0xbe7   :  { %8507 = vmatmul.msk.f32.vlgmr.msrb.gmra.mxu3 %vm3822_vm9, %v4600_v9  ;;  %4850 = vmatpush.msrb.mxu0 %v13728_v52 }
 0xbe9   :  { %4851 = vmatpush.msrb.mxu0 %v13740_v15 }
 0xbeb   :  { %4852 = vmatpush.msrb.mxu0 %v13750_v6 }
 0xbed   :  { %4853 = vmatpush.msrb.mxu0 %v13760_v22 }
 0xbef   :  { %4854 = vmatpush.msrb.mxu0 %v13766_v50 }
 0xbf1   :  { %4855 = vmatpush.msrb.mxu0 %v13772_v12 }
 0xbf3   :  { %4856 = vmatpush.msrb.mxu0 %v13782_v41 }
 0xbf5   :  { %4857 = vmatpush.msrb.mxu0 %v13791_v26 }
 0xbf7   :  { %4858 = vmatpush.msrb.mxu0 %v13800_v29 }
 0xbf9   :  { %4859 = vmatpush.msrb.mxu0 %v13809_v57 }
 0xbfb   :  { %4860 = vmatpush.msrb.mxu0 %v13818_v13 }
 0xbfd   :  { %4861 = vmatpush.msrb.mxu0 %v13827_v46 }
 0xbff   :  { %4862 = vmatpush.msrb.mxu0 %v13836_v56 }
 0xc6a   :  { %v4621_v4 = vpop.f32.mrf.mxu3 }
 0xc6b   :  { %v4625_v59 = vperm.slane %v4621_v4, 0  ;;  %v4794_v4 = vld [vmem:[%s14880_s3 + $0x4b8] sm:$0xff] }
 0xc6d   :  { %v4626_v10 = vmul.f32 %v4625_v59, %v13583_v40  ;;  %v4768_v40 = vld [vmem:[%s14878_s6 + $0x7d8] sm:$0xff]  ;;  %v4809_v59 = vunpack.c.l.bf16 %v4795_v47 }
 0xc6e   :  { %4831 = vmatpush.msrb.mxu2 %v4768_v40 }
 0xc6f   :  { %v4627_v51 = vadd.f32 %v4626_v10, %v4624_v43  ;;  %v4810_v43 = vunpack.c.h.bf16 %v4795_v47  ;;  %v4807_v10 = vunpack.c.l.bf16 %v4794_v4  ;;  %v9346_v47 = vld [vmem:[%s14882_s2 + $0x188] sm:$0xff] }
 0xc70   :  { %4832 = vmatpush.msrb.mxu2 %v4767_v8 }
 0xc71   :  { %v4628_v9 = vsub.f32 0.0, %v4627_v51 }
 0xc72   :  { %4833 = vmatpush.msrb.mxu2 %v4766_v23 }
 0xc73   :  { %v4629_v24 = vmul.f32 1.442695, %v4628_v9 }
 0xc74   :  { %4834 = vmatpush.msrb.mxu2 %v4765_v62 }
 0xc75   :  { %9531 = vpow2.f32 %v4629_v24 }
 0xc76   :  { %4835 = vmatpush.msrb.mxu2 %v4764_v58 }
 0xc78   :  { %4836 = vmatpush.msrb.mxu2 %v4763_v61 }
 0xc7a   :  { %4837 = vmatpush.msrb.mxu2 %v4762_v53 }
 0xc7b   :  { %v9532_v31 = vpop.eup %9531 }
 0xc7c   :  { %v4631_v21 = vadd.f32 1.0, %v9532_v31  ;;  %4838 = vmatpush.msrb.mxu2 %v4761_v20 }
 0xc7e   :  { %9533 = vrcp.f32 %v4631_v21  ;;  %4839 = vmatpush.msrb.mxu2 %v4760_v17 }
 0xc80   :  { %4840 = vmatpush.msrb.mxu2 %v4759_v32 }
 0xc82   :  { %4841 = vmatpush.msrb.mxu2 %v4758_v60 }
 0xc84   :  { %v9534_v33 = vpop.eup %9533  ;;  %4842 = vmatpush.msrb.mxu2 %v4757_v37 }
 0xc85   :  { %v4633_v5 = vmul.f32 %v9534_v33, %v4627_v51  ;;  %v4792_v51 = vld [vmem:[%s14880_s3 + $0x4a8] sm:$0xff] }
 0xc86   :  { %4931 = vmatpush.msra.mxu2 %v13702_v7  ;;  %v4811_v7 = vunpack.c.l.bf16 %v4796_v39  ;;  %v4803_v24 = vunpack.c.l.bf16 %v4792_v51  ;;  %v4804_v31 = vunpack.c.h.bf16 %v4792_v51  ;;  %v9333_v51 = vld [vmem:[%s14882_s2 + $0x120] sm:$0xff] }
 0xc87   :  { %v4650_v14 = vpack.c.bf16 %v4633_v5, %v4633_v5  ;;  %v4790_v5 = vld [vmem:[%s14880_s3 + $0x498] sm:$0xff] }
 0xc88   :  { %4932 = vmatpush.msra.mxu2 %v13707_v44  ;;  %v4812_v44 = vunpack.c.h.bf16 %v4796_v39  ;;  %4879 = vmatpush.msrb.mxu3 %v4811_v7  ;;  %v9338_v39 = vld [vmem:[%s14882_s2 + $0x148] sm:$0xff] }
 0xc89   :  { %4739 = vmatmul.bf16.vlgmr.msra.gmra.mxu3 %v4650_v14  ;;  %4752 = vmatmul.bf16.vlgmr.msra.gmra.mxu1 %v4650_v14  ;;  %v4799_v14 = vunpack.c.l.bf16 %v4790_v5 }
 0xc8a   :  { %4933 = vmatpush.msra.mxu2 %v13722_v36  ;;  %v4793_v36 = vld [vmem:[%s14880_s3 + $0x4b0] sm:$0xff]  ;;  %4899 = vmatpush.msrb.mxu1 %v4812_v44 }
 0xc8b   :  { %4996 = vmatpush.msra.mxu0 %v4811_v7  ;;  %4880 = vmatpush.msrb.mxu3 %v4809_v59  ;;  %v4806_v9 = vunpack.c.h.bf16 %v4793_v36  ;;  %v9345_v7 = vld [vmem:[%s14882_s2 + $0x180] sm:$0xff] }
 0xc8c   :  { %4934 = vmatpush.msra.mxu2 %v13735_v0  ;;  %v4808_v0 = vunpack.c.h.bf16 %v4794_v4  ;;  %4900 = vmatpush.msrb.mxu1 %v4810_v43  ;;  %v9337_v4 = vld [vmem:[%s14882_s2 + $0x140] sm:$0xff] }
 0xc8d   :  { %4997 = vmatpush.msra.mxu0 %v4809_v59  ;;  %4881 = vmatpush.msrb.mxu3 %v4807_v10  ;;  %v9344_v59 = vld [vmem:[%s14882_s2 + $0x178] sm:$0xff] }
 0xc8e   :  { %4935 = vmatpush.msra.mxu2 %v4768_v40  ;;  %v4805_v40 = vunpack.c.l.bf16 %v4793_v36  ;;  %4901 = vmatpush.msrb.mxu1 %v4808_v0  ;;  %v9343_v36 = vld [vmem:[%s14882_s2 + $0x170] sm:$0xff] }
 0xc8f   :  { %4998 = vmatpush.msra.mxu0 %v4807_v10  ;;  %v9334_v10 = vld [vmem:[%s14882_s2 + $0x128] sm:$0xff] }
 0xc90   :  { %4936 = vmatpush.msra.mxu2 %v4767_v8  ;;  %v4791_v8 = vld [vmem:[%s14880_s3 + $0x4a0] sm:$0xff]  ;;  %4882 = vmatpush.msrb.mxu3 %v4805_v40 }
 0xc91   :  { %4902 = vmatpush.msrb.mxu1 %v4806_v9  ;;  %v4801_v21 = vunpack.c.l.bf16 %v4791_v8  ;;  %4999 = vmatpush.msra.mxu0 %v4805_v40  ;;  %v4802_v33 = vunpack.c.h.bf16 %v4791_v8  ;;  %v9341_v40 = vld [vmem:[%s14882_s2 + $0x160] sm:$0xff]  ;;  %v9340_v8 = vld [vmem:[%s14882_s2 + $0x158] sm:$0xff] }
 0xc92   :  { %4937 = vmatpush.msra.mxu2 %v4766_v23  ;;  %4883 = vmatpush.msrb.mxu3 %v4803_v24  ;;  %v4800_v23 = vunpack.c.h.bf16 %v4790_v5 }
 0xc93   :  { %4903 = vmatpush.msrb.mxu1 %v4804_v31  ;;  %5000 = vmatpush.msra.mxu0 %v4803_v24  ;;  %v9331_v24 = vld [vmem:[%s14882_s2 + $0x110] sm:$0xff] }
 0xc94   :  { %4938 = vmatpush.msra.mxu2 %v4765_v62  ;;  %4884 = vmatpush.msrb.mxu3 %v4801_v21  ;;  %v4789_v62 = vld [vmem:[%s14880_s3 + $0x490] sm:$0xff] }
 0xc95   :  { %4904 = vmatpush.msrb.mxu1 %v4802_v33  ;;  %5001 = vmatpush.msra.mxu0 %v4801_v21  ;;  %v8576_v21 = vld [vmem:[%s14879_s7 + $0x41] ss:$8 sm:$0x3] }
 0xc96   :  { %4939 = vmatpush.msra.mxu2 %v4764_v58  ;;  %4885 = vmatpush.msrb.mxu3 %v4799_v14  ;;  %v4797_v58 = vunpack.c.l.bf16 %v4789_v62 }
 0xc97   :  { %4905 = vmatpush.msrb.mxu1 %v4800_v23  ;;  %5002 = vmatpush.msra.mxu0 %v4799_v14 }
 0xc98   :  { %4940 = vmatpush.msra.mxu2 %v4763_v61  ;;  %v4798_v61 = vunpack.c.h.bf16 %v4789_v62  ;;  %4886 = vmatpush.msrb.mxu3 %v4797_v58 }
 0xc99   :  { %5003 = vmatpush.msra.mxu0 %v4797_v58  ;;  %v5036_v58 = vperm.slane %v8576_v21, 1 }
 0xc9a   :  { %4941 = vmatpush.msra.mxu2 %v4762_v53  ;;  %4906 = vmatpush.msrb.mxu1 %v4798_v61 }
 0xc9b   :  { %4951 = vmatpush.msra.mxu3 %v13691_v45 }
 0xc9c   :  { %4942 = vmatpush.msra.mxu2 %v4761_v20  ;;  %5016 = vmatpush.msra.mxu1 %v4812_v44  ;;  %v9336_v44 = vld [vmem:[%s14882_s2 + $0x138] sm:$0xff] }
 0xc9d   :  { %4952 = vmatpush.msra.mxu3 %v13696_v28 }
 0xc9e   :  { %4943 = vmatpush.msra.mxu2 %v4760_v17  ;;  %5017 = vmatpush.msra.mxu1 %v4810_v43  ;;  %v9335_v43 = vld [vmem:[%s14882_s2 + $0x130] sm:$0xff] }
 0xc9f   :  { %4953 = vmatpush.msra.mxu3 %v13712_v16 }
 0xca0   :  { %4944 = vmatpush.msra.mxu2 %v4759_v32  ;;  %5018 = vmatpush.msra.mxu1 %v4808_v0  ;;  %v9342_v0 = vld [vmem:[%s14882_s2 + $0x168] sm:$0xff] }
 0xca1   :  { %4954 = vmatpush.msra.mxu3 %v13728_v52 }
 0xca2   :  { %4945 = vmatpush.msra.mxu2 %v4758_v60  ;;  %5019 = vmatpush.msra.mxu1 %v4806_v9  ;;  %v9332_v9 = vld [vmem:[%s14882_s2 + $0x118] sm:$0xff] }
 0xca3   :  { %4955 = vmatpush.msra.mxu3 %v13740_v15 }
 0xca4   :  { %4946 = vmatpush.msra.mxu2 %v4757_v37  ;;  %5020 = vmatpush.msra.mxu1 %v4804_v31  ;;  %v9339_v31 = vld [vmem:[%s14882_s2 + $0x150] sm:$0xff] }
 0xca5   :  { %4956 = vmatpush.msra.mxu3 %v13750_v6 }
 0xca6   :  { %5021 = vmatpush.msra.mxu1 %v4802_v33 }
 0xca7   :  { %4957 = vmatpush.msra.mxu3 %v13760_v22 }
 0xca8   :  { %5022 = vmatpush.msra.mxu1 %v4800_v23  ;;  %v5035_v23 = vperm.slane %v8576_v21, 0 }
 0xca9   :  { %4958 = vmatpush.msra.mxu3 %v13766_v50 }
 0xcaa   :  { %5023 = vmatpush.msra.mxu1 %v4798_v61 }
 0xcab   :  { %4959 = vmatpush.msra.mxu3 %v13772_v12 }
 0xcad   :  { %4960 = vmatpush.msra.mxu3 %v13782_v41 }
 0xcaf   :  { %4961 = vmatpush.msra.mxu3 %v13791_v26 }
 0xcb1   :  { %4962 = vmatpush.msra.mxu3 %v13800_v29 }
 0xcb3   :  { %4963 = vmatpush.msra.mxu3 %v13809_v57 }
 0xcb5   :  { %4964 = vmatpush.msra.mxu3 %v13818_v13 }
 0xcb7   :  { %4965 = vmatpush.msra.mxu3 %v13827_v46 }
 0xcb9   :  { %4966 = vmatpush.msra.mxu3 %v13836_v56 }
 0xd06   :  { %v13852_v48 = vpop.f32.mrf.mxu1 }
 0xd07   :  { %v4820_v30 = vsel %vm981_vm1, %v13852_v48, 0.0 }
 0xd08   :  { %v4821_v27 = vrot.slane %v4820_v30, 4 }
 0xd0a   :  { %v4822_v18 = vadd.f32 %v4821_v27, %v4820_v30 }
 0xd0c   :  { %v4823_v3 = vrot.slane %v4822_v18, 2  ;;  %v13856_v63 = vpop.f32.mrf.mxu3 }
 0xd0d   :  { %v4813_v42 = vsel %vm981_vm1, %v13856_v63, 0.0 }
 0xd0e   :  { %v4824_v2 = vadd.f32 %v4823_v3, %v4822_v18  ;;  %v4814_v35 = vrot.slane %v4813_v42, 4  ;;  %v4755_v25 = vpop.f32.mrf.mxu1 }
 0xd10   :  { %v4825_v19 = vrot.slane %v4824_v2, 1  ;;  %v4815_v11 = vadd.f32 %v4814_v35, %v4813_v42 }
 0xd12   :  { %v4826_v55 = vadd.f32 %v4825_v19, %v4824_v2  ;;  %v4816_v54 = vrot.slane %v4815_v11, 2 }
 0xd14   :  { %v4817_v49 = vadd.f32 %v4816_v54, %v4815_v11  ;;  %v4742_v38 = vpop.f32.mrf.mxu3  ;;  %4863 = vmatmul.f32.vlgmr.msrb.gmra.mxu0 %v4826_v55 }
 0xd15   :  { %5183 = vmatpush.bf16.msrb.mxu0 %v9338_v39 }
 0xd16   :  { %v4818_v1 = vrot.slane %v4817_v49, 1 }
 0xd18   :  { %v4819_v34 = vadd.f32 %v4818_v1, %v4817_v49  ;;  %v4972_v49 = vld [vmem:[%s14879_s7 + $0x40] ss:$0 sm:$0xff] }
 0xd19   :  { %5184 = vmatpush.bf16.msrb.mxu0 %v9337_v4 }
 0xd1a   :  { %4843 = vmatmul.f32.vlgmr.msrb.gmra.mxu2 %v4819_v34 }
 0xd1d   :  { %5185 = vmatpush.bf16.msrb.mxu0 %v9336_v44 }
 0xd21   :  { %5186 = vmatpush.bf16.msrb.mxu0 %v9335_v43  ;;  %v9459_v43 = vld [vmem:[%s14882_s2 + $0x190] sm:$0xff]  }
 0xd25   :  { %5187 = vmatpush.bf16.msrb.mxu0 %v9334_v10  ;;  %v9435_v10 = vunpack.c.l.bf16 %v9459_v43 }
 0xd29   :  { %5188 = vmatpush.bf16.msrb.mxu0 %v9333_v51 }
 0xd2d   :  { %5189 = vmatpush.bf16.msrb.mxu0 %v9332_v9 }
 0xd31   :  { %5190 = vmatpush.bf16.msrb.mxu0 %v9331_v24 }
 0xd91   :  { %v4864_v45 = vpop.f32.mrf.mxu0 }
 0xd9d   :  { %v4844_v28 = vpop.f32.mrf.mxu2 }
 0xd9e   :  { %v4865_v16 = vadd.f32 %v4864_v45, %v4844_v28 }
 0xda0   :  { %v4867_v52 = vmul.f32 0.125, %v4865_v16 }
 0xda2   :  { %8572 = vmatmul.msk.f32.vlgmr.msrb.gmra.mxu3 %vm617_vm0, %v4867_v52  ;;  %8573 = vmatmul.msk.f32.vlgmr.msrb.gmra.mxu1 %vm617_vm0, %v4867_v52 }
 0xda3   :  { %5196 = vmatpush.bf16.msrb.mxu1 %v9346_v47 }
 0xda7   :  { %5197 = vmatpush.bf16.msrb.mxu1 %v9345_v7 }
 0xdab   :  { %5198 = vmatpush.bf16.msrb.mxu1 %v9344_v59 }
 0xdaf   :  { %5199 = vmatpush.bf16.msrb.mxu1 %v9343_v36  ;;  %v9436_v36 = vunpack.c.h.bf16 %v9459_v43 }
 0xdb3   :  { %5200 = vmatpush.bf16.msrb.mxu1 %v9342_v0 }
 0xdb7   :  { %5201 = vmatpush.bf16.msrb.mxu1 %v9341_v40 }
 0xdbb   :  { %5202 = vmatpush.bf16.msrb.mxu1 %v9340_v8 }
 0xdbf   :  { %5203 = vmatpush.bf16.msrb.mxu1 %v9339_v31 }
 0xe1f   :  { %v4908_v15 = vpop.f32.mrf.mxu1 }
 0xe20   :  { %v4912_v6 = vperm.slane %v4908_v15, 0 }
 0xe22   :  { %v13903_v22 = vsub.f32 %v13852_v48, %v4912_v6 }
 0xe24   :  { %v4916_v50 = vmul.f32 %v13903_v22, %v13903_v22 }
 0xe25   :  { %v4888_v12 = vpop.f32.mrf.mxu3 }
 0xe26   :  { %v4924_v41 = vsel %vm981_vm1, %v4916_v50, 0.0  ;;  %v4911_v26 = vperm.slane %v4888_v12, 0 }
 0xe27   :  { %v4925_v29 = vrot.slane %v4924_v41, 4 }
 0xe28   :  { %v13909_v57 = vsub.f32 %v13856_v63, %v4911_v26 }
 0xe29   :  { %v4926_v53 = vadd.f32 %v4925_v29, %v4924_v41 }
 0xe2a   :  { %v4915_v13 = vmul.f32 %v13909_v57, %v13909_v57 }
 0xe2b   :  { %v4927_v20 = vrot.slane %v4926_v53, 2 }
 0xe2c   :  { %v4917_v46 = vsel %vm981_vm1, %v4915_v13, 0.0 }
 0xe2d   :  { %v4928_v17 = vadd.f32 %v4927_v20, %v4926_v53  ;;  %v4918_v56 = vrot.slane %v4917_v46, 4 }
 0xe2f   :  { %v4929_v32 = vrot.slane %v4928_v17, 1  ;;  %v4919_v60 = vadd.f32 %v4918_v56, %v4917_v46  ;;  %v5215_v56 = vld [vmem:[%s14878_s6 + $0x8b0] sm:$0xff] }
 0xe31   :  { %v4930_v37 = vadd.f32 %v4929_v32, %v4928_v17  ;;  %v4920_v48 = vrot.slane %v4919_v60, 2  ;;  %v5216_v17 = vld [vmem:[%s14878_s6 + $0x8b8] sm:$0xff]  ;;  %v5214_v32 = vld [vmem:[%s14878_s6 + $0x8a8] sm:$0xff] }
 0xe32   :  { %5252 = vmatpush.msrb.mxu2 %v5216_v17 }
 0xe33   :  { %v4921_v30 = vadd.f32 %v4920_v48, %v4919_v60  ;;  %4967 = vmatmul.f32.vlgmr.msra.gmra.mxu3 %v4930_v37  ;;  %v5213_v60 = vld [vmem:[%s14878_s6 + $0x8a0] sm:$0xff]  ;;  %v5212_v37 = vld [vmem:[%s14878_s6 + $0x898] sm:$0xff]  ;;  %v5211_v48 = vld [vmem:[%s14878_s6 + $0x890] sm:$0xff] }
 0xe34   :  { %5253 = vmatpush.msrb.mxu2 %v5215_v56 }
 0xe35   :  { %v4922_v27 = vrot.slane %v4921_v30, 1 }
 0xe36   :  { %5254 = vmatpush.msrb.mxu2 %v5214_v32 }
 0xe37   :  { %v4923_v18 = vadd.f32 %v4922_v27, %v4921_v30  ;;  %v5210_v30 = vld [vmem:[%s14878_s6 + $0x888] sm:$0xff]  ;;  %v5209_v27 = vld [vmem:[%s14878_s6 + $0x880] sm:$0xff] }
 0xe38   :  { %5255 = vmatpush.msrb.mxu2 %v5213_v60 }
 0xe39   :  { %4947 = vmatmul.f32.vlgmr.msra.gmra.mxu2 %v4923_v18  ;;  %v9462_v18 = vld [vmem:[%s14882_s2 + $0x1a8] sm:$0xff]  }
 0xe3a   :  { %5256 = vmatpush.msrb.mxu2 %v5212_v37 }
 0xe3c   :  { %5257 = vmatpush.msrb.mxu2 %v5211_v48 }
 0xe3e   :  { %5258 = vmatpush.msrb.mxu2 %v5210_v30 }
 0xe40   :  { %5259 = vmatpush.msrb.mxu2 %v5209_v27 }
 0xe42   :  { %5309 = vmatpush.msra.mxu2 %v5216_v17  ;;  %v5358_v17 = vld [vmem:[%s14879_s7 + $0x43] ss:$0 sm:$0xff] }
 0xe44   :  { %5310 = vmatpush.msra.mxu2 %v5215_v56 }
 0xe46   :  { %5311 = vmatpush.msra.mxu2 %v5214_v32 }
 0xe48   :  { %5312 = vmatpush.msra.mxu2 %v5213_v60 }
 0xe4a   :  { %5313 = vmatpush.msra.mxu2 %v5212_v37 }
 0xe4c   :  { %5314 = vmatpush.msra.mxu2 %v5211_v48 }
 0xe4e   :  { %5315 = vmatpush.msra.mxu2 %v5210_v30 }
 0xe50   :  { %5316 = vmatpush.msra.mxu2 %v5209_v27 }
 0xeb6   :  { %v4968_v3 = vpop.f32.mrf.mxu3 }
 0xebc   :  { %v4948_v63 = vpop.f32.mrf.mxu2 }
 0xebd   :  { %v4969_v42 = vadd.f32 %v4968_v3, %v4948_v63  ;;  %v9461_v3 = vld [vmem:[%s14882_s2 + $0x1a0] sm:$0xff]   ;;  %v9448_v63 = vunpack.c.h.bf16 %v9462_v18 }
 0xebf   :  { %v4971_v2 = vmul.f32 0.125, %v4969_v42  ;;  %v9447_v42 = vunpack.c.l.bf16 %v9462_v18  ;;  %5276 = vmatpush.msrb.mxu3 %v9448_v63 }
 0xec1   :  { %v4973_v35 = vadd.f32 1e-05, %v4971_v2  ;;  %v9444_v2 = vunpack.c.h.bf16 %v9461_v3  ;;  %5277 = vmatpush.msrb.mxu3 %v9447_v42 }
 0xec3   :  { %9535 = vrsqrt.f32 %v4973_v35  ;;  %vm4980_vm4 = vweird.f32 %v4973_v35  ;;  %5278 = vmatpush.msrb.mxu3 %v9444_v2 }
 0xec9   :  { %v9536_v25 = vpop.eup %9535 }
 0xeca   :  { %v4975_v19 = vmul.f32 %v9536_v25, %v4973_v35  ;;  %vm4981_vm3 = vweird.f32 %v9536_v25  ;;  %v9460_v35 = vld [vmem:[%s14882_s2 + $0x198] sm:$0xff]  }
 0xecb   :  { %vm4982_vm5 = vmor %vm4980_vm4, %vm4981_vm3 }
 0xecc   :  { %v4976_v11 = vmul.f32 %v9536_v25, %v4975_v19  ;;  %v9440_v19 = vunpack.c.h.bf16 %v9460_v35 }
 0xece   :  { %v4977_v55 = vmul.f32 0.5, %v4976_v11  ;;  %v9439_v11 = vunpack.c.l.bf16 %v9460_v35 }
 0xed0   :  { %v4978_v54 = vsub.f32 1.5, %v4977_v55 }
 0xed2   :  { %v4979_v38 = vmul.f32 %v9536_v25, %v4978_v54 }
 0xed4   :  { %v4983_v1 = vsel %vm4982_vm5, %v9536_v25, %v4979_v38  ;;  %v9443_v25 = vunpack.c.l.bf16 %v9461_v3 }
 0xed5   :  { %v4984_v34 = vmul.f32 %v4983_v1, %v4972_v49 }
 0xed6   :  { %5279 = vmatpush.msrb.mxu3 %v9443_v25 }
 0xed7   :  { %8574 = vmatmul.msk.f32.vlgmr.msra.gmra.mxu0 %vm617_vm0, %v4984_v34  ;;  %8575 = vmatmul.msk.f32.vlgmr.msra.gmra.mxu1 %vm617_vm0, %v4984_v34 }
 0xed8   :  { %5280 = vmatpush.msrb.mxu3 %v9440_v19 }
 0xeda   :  { %5281 = vmatpush.msrb.mxu3 %v9439_v11 }
 0xedc   :  { %5282 = vmatpush.msrb.mxu3 %v9436_v36 }
 0xede   :  { %5283 = vmatpush.msrb.mxu3 %v9435_v10 }
 0xee0   :  { %5346 = vmatpush.msra.mxu3 %v9448_v63  ;;  %v9351_v63 = vld [vmem:[%s14882_s2 + $0x1d0] sm:$0xff] }
 0xee1   :  { %5454 = vmatpush.bf16.msra.mxu1 %v9351_v63 }
 0xee2   :  { %5347 = vmatpush.msra.mxu3 %v9447_v42  ;;  %v5376_v42 = vld [vmem:[%s14879_s7 + $0x44] ss:$0 sm:$0xff] }
 0xee4   :  { %5348 = vmatpush.msra.mxu3 %v9444_v2 }
 0xee6   :  { %5349 = vmatpush.msra.mxu3 %v9443_v25 }
 0xee8   :  { %5350 = vmatpush.msra.mxu3 %v9440_v19 }
 0xeea   :  { %5351 = vmatpush.msra.mxu3 %v9439_v11 }
 0xeec   :  { %5352 = vmatpush.msra.mxu3 %v9436_v36  ;;  %v5494_v36 = vld [vmem:[%s14878_s6 + $0x8c8] sm:$0xff] }
 0xeee   :  { %5353 = vmatpush.msra.mxu3 %v9435_v10  ;;  %v5493_v10 = vld [vmem:[%s14878_s6 + $0x8c0] sm:$0xff] }
 0xf54   :  { %v5005_v33 = vpop.f32.mrf.mxu0  ;;  %v5025_v5 = vpop.f32.mrf.mxu1 }
 0xf55   :  { %v5030_v14 = vperm.slane %v5005_v33, 0  ;;  %v5031_v62 = vperm.slane %v5025_v5, 0 }
 0xf57   :  { %v5032_v61 = vmul.f32 %v5030_v14, %v13909_v57  ;;  %v5033_v45 = vmul.f32 %v5031_v62, %v13903_v22 }
 0xf59   :  { %v5039_v28 = vadd.f32 %v5035_v23, %v5032_v61  ;;  %v5040_v16 = vadd.f32 %v5036_v58, %v5033_v45 }
 0xf5b   :  { %v5041_v52 = vsub.f32 0.0, %v5039_v28  ;;  %v5042_v15 = vsub.f32 0.0, %v5040_v16 }
 0xf5d   :  { %v5043_v6 = vmul.f32 1.442695, %v5041_v52  ;;  %v5045_v50 = vmul.f32 1.442695, %v5042_v15 }
 0xf5f   :  { %9537 = vpow2.f32 %v5043_v6 }
 0xf60   :  { %9539 = vpow2.f32 %v5045_v50  ;;  %v5322_v50 = vld [vmem:[%s14879_s7 + $0x42] ss:$0 sm:$0xff] }
 0xf65   :  { %v9538_v12 = vpop.eup %9537 }
 0xf66   :  { %v9540_v41 = vpop.eup %9539  ;;  %v5047_v26 = vadd.f32 1.0, %v9538_v12 }
 0xf67   :  { %v5048_v29 = vadd.f32 1.0, %v9540_v41 }
 0xf68   :  { %9541 = vrcp.f32 %v5047_v26 }
 0xf69   :  { %9543 = vrcp.f32 %v5048_v29  ;;  %v9350_v29 = vld [vmem:[%s14882_s2 + $0x1c8] sm:$0xff] }
 0xf6a   :  { %5409 = vmatpush.bf16.msra.mxu0 %v9350_v29 }
 0xf6e   :  { %v9542_v53 = vpop.eup %9541 }
 0xf6f   :  { %v9544_v13 = vpop.eup %9543  ;;  %v5051_v20 = vmul.f32 %v9542_v53, %v5039_v28  ;;  %v9349_v53 = vld [vmem:[%s14882_s2 + $0x1c0] sm:$0xff] }
 0xf70   :  { %v5052_v57 = vmul.f32 %v9544_v13, %v5040_v16  ;;  %5410 = vmatpush.bf16.msra.mxu0 %v9349_v53  ;;  %v9348_v13 = vld [vmem:[%s14882_s2 + $0x1b8] sm:$0xff] }
 0xf71   :  { %v5085_v46 = vpack.c.bf16 %v5051_v20, %v5051_v20  ;;  %v9347_v20 = vld [vmem:[%s14882_s2 + $0x1b0] sm:$0xff] }
 0xf72   :  { %v5086_v22 = vpack.c.bf16 %v5052_v57, %v5052_v57  ;;  %v5423_v57 = vld [vmem:[%s14883_s1] sm:$0x3] }
 0xf73   :  { %5191 = vmatmul.bf16.vlgmr.msrb.gmra.mxu0 %v5085_v46  ;;  %5425 = vrot.lane.b32.xlu0 %v5423_v57, %s9593_s13 }
 0xf74   :  { %5204 = vmatmul.bf16.vlgmr.msrb.gmra.mxu1 %v5086_v22  ;;  %5411 = vmatpush.bf16.msra.mxu0 %v9348_v13 }
 0xf78   :  { %5412 = vmatpush.bf16.msra.mxu0 %v9347_v20 }
 0xf7c   :  { %5581 = vmatpush.msrb.mxu0 %v5494_v36 }
 0xf7e   :  { %5582 = vmatpush.msrb.mxu0 %v5493_v10 }
 0xff0   :  { %v5192_v55 = vpop.f32.mrf.mxu0 }
 0xff1   :  { %v5205_v54 = vpop.f32.mrf.mxu1 }
 0xff2   :  { %v5206_v49 = vadd.f32 %v5205_v54, %v5192_v55  ;;  %v5426_v55 = vpop.permute.xlu0 %5425 }
 0xff4   :  { %v5234_v38 = vsel %vm5233_vm6, %v5206_v49, 0.0 }
 0xff5   :  { %v5235_v1 = vrot.slane %v5234_v38, 4 }
 0xff7   :  { %v5236_v34 = vadd.f32 %v5235_v1, %v5234_v38  ;;  %v9353_v38 = vld [vmem:[%s14882_s2 + $0x1e0] sm:$0xff] }
 0xff8   :  { %v5194_v39 = vpop.f32.mrf.mxu0 }
 0xff9   :  { %v5237_v47 = vrot.slane %v5236_v34, 2  ;;  %v5207_v4 = vpop.f32.mrf.mxu1 }
 0xffa   :  { %v5436_v4 = vld [vmem:[%s14879_s7 + $0x45] ss:$0 sm:$0xff] }
 0xffb   :  { %v5238_v7 = vadd.f32 %v5237_v47, %v5236_v34  ;;  %v9352_v47 = vld [vmem:[%s14882_s2 + $0x1d8] sm:$0xff] }
 0xffd   :  { %v5239_v44 = vrot.slane %v5238_v7, 1 }
 0xfff   :  { %v5240_v59 = vadd.f32 %v5239_v44, %v5238_v7 }
0x1001   :  { %8641 = vmatmul.msk.f32.vlgmr.msrb.gmra.mxu2 %vm617_vm0, %v5240_v59 }
0x1002   :  { %5486 = vmatpush.bf16.msrb.mxu2 %v9353_v38  ;;  %v5664_v38 = vld [vmem:[%s14878_s6 + $0x8f8] sm:$0xff] }
0x1006   :  { %5487 = vmatpush.bf16.msrb.mxu2 %v9352_v47  ;;  %v5660_v47 = vld [vmem:[%s14878_s6 + $0x8d8] sm:$0xff] }
0x1084   :  { %v5261_v0 = vpop.f32.mrf.mxu2 }
0x1085   :  { %v5264_v51 = vmul.f32 0.5, %v5261_v0  ;;  %v9463_v0 = vld [vmem:[%s14882_s2 + $0x1e8] sm:$0xff]  }
0x1087   :  { %8642 = vmatmul.msk.f32.vlgmr.msrb.gmra.mxu3 %vm617_vm0, %v5264_v51  ;;  %v9452_v51 = vunpack.c.h.bf16 %v9463_v0 }
0x1088   :  { %5524 = vmatpush.msrb.mxu3 %v5494_v36 }
0x1089   :  { %5618 = vmatpush.msrb.mxu1 %v9452_v51 }
0x108a   :  { %5525 = vmatpush.msrb.mxu3 %v5493_v10 }
0x110a   :  { %v5285_v40 = vpop.f32.mrf.mxu3 }
0x110b   :  { %v5288_v9 = vperm.slane %v5285_v40, 0  ;;  %v9451_v40 = vunpack.c.l.bf16 %v9463_v0 }
0x110d   :  { %v5289_v8 = vsub.f32 %v5206_v49, %v5288_v9  ;;  %5619 = vmatpush.msrb.mxu1 %v9451_v40 }
0x110f   :  { %v5290_v24 = vmul.f32 %v5289_v8, %v5289_v8 }
0x1111   :  { %v5291_v31 = vsel %vm5233_vm6, %v5290_v24, 0.0 }
0x1112   :  { %v5292_v21 = vrot.slane %v5291_v31, 4 }
0x1114   :  { %v5293_v33 = vadd.f32 %v5292_v21, %v5291_v31 }
0x1116   :  { %v5294_v5 = vrot.slane %v5293_v33, 2 }
0x1118   :  { %v5295_v14 = vadd.f32 %v5294_v5, %v5293_v33 }
0x111a   :  { %v5296_v23 = vrot.slane %v5295_v14, 1 }
0x111c   :  { %v5297_v62 = vadd.f32 %v5296_v23, %v5295_v14 }
0x111e   :  { %8643 = vmatmul.msk.f32.vlgmr.msra.gmra.mxu2 %vm617_vm0, %v5297_v62 }
0x11a1   :  { %v5318_v58 = vpop.f32.mrf.mxu2 }
0x11a2   :  { %v5321_v61 = vmul.f32 0.5, %v5318_v58 }
0x11a4   :  { %v5323_v45 = vadd.f32 1e-05, %v5321_v61 }
0x11a6   :  { %9545 = vrsqrt.f32 %v5323_v45  ;;  %vm5330_vm8 = vweird.f32 %v5323_v45 }
0x11ac   :  { %v9546_v28 = vpop.eup %9545 }
0x11ad   :  { %v5325_v16 = vmul.f32 %v9546_v28, %v5323_v45  ;;  %vm5331_vm7 = vweird.f32 %v9546_v28 }
0x11ae   :  { %vm5332_vm10 = vmor %vm5330_vm8, %vm5331_vm7 }
0x11af   :  { %v5326_v52 = vmul.f32 %v9546_v28, %v5325_v16 }
0x11b1   :  { %v5327_v15 = vmul.f32 0.5, %v5326_v52 }
0x11b3   :  { %v5328_v6 = vsub.f32 1.5, %v5327_v15 }
0x11b5   :  { %v5329_v12 = vmul.f32 %v9546_v28, %v5328_v6 }
0x11b7   :  { %v5333_v41 = vsel %vm5332_vm10, %v9546_v28, %v5329_v12 }
0x11b8   :  { %v5334_v26 = vmul.f32 %v5333_v41, %v5322_v50 }
0x11ba   :  { %8644 = vmatmul.msk.f32.vlgmr.msra.gmra.mxu3 %vm617_vm0, %v5334_v26 }
0x11bb   :  { %5548 = vmatpush.msra.mxu3 %v9452_v51 }
0x11bd   :  { %5549 = vmatpush.msra.mxu3 %v9451_v40 }
0x123d   :  { %v5355_v46 = vpop.f32.mrf.mxu3 }
0x123e   :  { %v5359_v22 = vperm.slane %v5355_v46, 0 }
0x1240   :  { %v5360_v56 = vmul.f32 %v5359_v22, %v5289_v8 }
0x1242   :  { %v5361_v32 = vadd.f32 %v5360_v56, %v5358_v17  ;;  %v5588_v56 = vld [vmem:[%s14879_s7 + $0x46] ss:$0 sm:$0xff] }
0x1244   :  { %v5362_v60 = vsub.f32 0.0, %v5361_v32 }
0x1246   :  { %v5363_v37 = vmul.f32 1.442695, %v5362_v60 }
0x1248   :  { %9547 = vpow2.f32 %v5363_v37 }
0x124e   :  { %v9548_v48 = vpop.eup %9547 }
0x124f   :  { %v5365_v30 = vadd.f32 1.0, %v9548_v48  ;;  %v9354_v48 = vld [vmem:[%s14882_s2 + $0x1f0] sm:$0xff] }
0x1250   :  { %5653 = vmatpush.bf16.msra.mxu2 %v9354_v48  ;;  %v5795_v48 = vld [vmem:[%s14879_s7 + $0x81] ss:$0 sm:$0xff] }
0x1251   :  { %9549 = vrcp.f32 %v5365_v30  ;;  %v5666_v30 = vld [vmem:[%s14878_s6 + $0x908] sm:$0xff] }
0x1257   :  { %v9550_v27 = vpop.eup %9549 }
0x1258   :  { %v5367_v18 = vmul.f32 %v9550_v27, %v5361_v32 }
0x125a   :  { %v5377_v3 = vpack.c.bf16 %v5367_v18, %v5367_v18 }
0x125c   :  { %8661 = vmatmul.msk.bf16.vlgmr.msra.gmra.mxu0 %vm617_vm0, %v5377_v3  ;;  %v5624_v3 = vld [vmem:[%s14879_s7 + $0x47] ss:$0 sm:$0xff] }
0x12d9   :  { %v5414_v2 = vpop.f32.mrf.mxu0 }
0x12da   :  { %v5415_v35 = vadd.f32 %v5414_v2, %v5376_v42 }
0x12dc   :  { %v5420_v25 = vmul.f32 0.5, %v5415_v35  ;;  %5419 = vst.msk [vmem:[%s14884_s9] sm:$0x3] %vm5418_vm11, %v5415_v35 }
0x12de   :  { %v5421_v19 = vmul.f32 1.442695, %v5420_v25 }
0x12e0   :  { %9551 = vpow2.f32 %v5421_v19 }
0x12e1   :  { %v5416_v11 = vpop.f32.mrf.mxu0 }
0x12e6   :  { %v9552_v54 = vpop.eup %9551 }
0x12e7   :  { %v5428_v49 = vmul.f32 %v9552_v54, %v5426_v55 }
0x12e9   :  { %5430 = vrot.lane.b32.xlu0 %v5428_v49, %s9594_s21  ;;  %v5665_v49 = vld [vmem:[%s14878_s6 + $0x900] sm:$0xff] }
0x135b   :  { %v5431_v1 = vpop.permute.xlu0 %5430 }
0x135c   :  { %v5433_v34 = vadd.f32 %v5431_v1, %v5415_v35  ;;  %v5663_v1 = vld [vmem:[%s14878_s6 + $0x8f0] sm:$0xff] }
0x135e   :  { %v5437_v39 = vpack.c.bf16 %v5433_v34, %v5433_v34  ;;  %v5662_v34 = vld [vmem:[%s14878_s6 + $0x8e8] sm:$0xff] }
0x1360   :  { %8666 = vmatmul.msk.bf16.vlgmr.msra.gmra.mxu1 %vm1199_vm2, %v5437_v39  ;;  %v5661_v39 = vld [vmem:[%s14878_s6 + $0x8e0] sm:$0xff] }
0x1361   :  { %5746 = vmatpush.msra.mxu1 %v5666_v30 }
0x1363   :  { %5747 = vmatpush.msra.mxu1 %v5665_v49 }
0x1365   :  { %5748 = vmatpush.msra.mxu1 %v5664_v38 }
0x1367   :  { %5749 = vmatpush.msra.mxu1 %v5663_v1 }
0x1369   :  { %5750 = vmatpush.msra.mxu1 %v5662_v34 }
0x136b   :  { %5751 = vmatpush.msra.mxu1 %v5661_v39 }
0x136d   :  { %5752 = vmatpush.msra.mxu1 %v5660_v47 }
0x13dd   :  { %v5456_v7 = vpop.f32.mrf.mxu1 }
0x13de   :  { %v5457_v44 = vadd.f32 %v5456_v7, %v5436_v4  ;;  %v5659_v4 = vld [vmem:[%s14878_s6 + $0x8d0] sm:$0xff]  ;;  %v9464_v7 = vld [vmem:[%s14882_s2 + $0x1f8] sm:$0xff]  }
0x13df   :  { %5753 = vmatpush.msra.mxu1 %v5659_v4 }
0x13e0   :  { %v5464_v59 = vpack.c.bf16 %v5457_v44, %v5457_v44  ;;  %v9456_v44 = vunpack.c.h.bf16 %v9464_v7 }
0x13e2   :  { %8675 = vmatmul.msk.bf16.vlgmr.msrb.gmra.mxu2 %vm3822_vm9, %v5464_v59  ;;  %v9455_v59 = vunpack.c.l.bf16 %v9464_v7  ;;  %5719 = vmatpush.msra.mxu0 %v9456_v44 }
0x13e4   :  { %5720 = vmatpush.msra.mxu0 %v9455_v59 }
0x13e5   :  { %v5458_v43 = vpop.f32.mrf.mxu1 }
0x1465   :  { %v5489_v9 = vpop.f32.mrf.mxu2 }
0x1466   :  { %v5500_v8 = vsel %vm5499_vm12, %v5489_v9, 0.0 }
0x1467   :  { %v5501_v24 = vrot.slane %v5500_v8, 4 }
0x1469   :  { %v5502_v31 = vadd.f32 %v5501_v24, %v5500_v8 }
0x146b   :  { %v5503_v21 = vrot.slane %v5502_v31, 2 }
0x146d   :  { %v5504_v33 = vadd.f32 %v5503_v21, %v5502_v31  ;;  %v5491_v5 = vpop.f32.mrf.mxu2 }
0x146f   :  { %v5505_v14 = vrot.slane %v5504_v33, 1 }
0x1471   :  { %v5506_v23 = vadd.f32 %v5505_v14, %v5504_v33 }
0x1473   :  { %8676 = vmatmul.msk.f32.vlgmr.msrb.gmra.mxu3 %vm1199_vm2, %v5506_v23 }
0x1474   :  { %5689 = vmatpush.msrb.mxu3 %v5666_v30 }
0x1476   :  { %5690 = vmatpush.msrb.mxu3 %v5665_v49  ;;  %v5858_v49 = vld [vmem:[%s14882_s2 + $0x220] sm:$0xf] }
0x1478   :  { %5691 = vmatpush.msrb.mxu3 %v5664_v38  ;;  %v5859_v38 = vunpack.c.l.bf16 %v5858_v49  ;;  %v6029_v49 = vld [vmem:[%s14878_s6 + $0x938] sm:$0xff] }
0x147a   :  { %5692 = vmatpush.msrb.mxu3 %v5663_v1 }
0x147c   :  { %5693 = vmatpush.msrb.mxu3 %v5662_v34 }
0x147e   :  { %5694 = vmatpush.msrb.mxu3 %v5661_v39 }
0x1480   :  { %5695 = vmatpush.msrb.mxu3 %v5660_v47 }
0x1482   :  { %5696 = vmatpush.msrb.mxu3 %v5659_v4 }
0x14f6   :  { %v5527_v62 = vpop.f32.mrf.mxu3 }
0x14f7   :  { %v5530_v58 = vmul.f32 0.5, %v5527_v62 }
0x14f9   :  { %8677 = vmatmul.msk.f32.vlgmr.msra.gmra.mxu3 %vm1199_vm2, %v5530_v58 }
0x157c   :  { %v5551_v61 = vpop.f32.mrf.mxu3 }
0x157d   :  { %v5554_v45 = vperm.slane %v5551_v61, 0 }
0x157f   :  { %v5555_v28 = vsub.f32 %v5489_v9, %v5554_v45 }
0x1581   :  { %v5556_v16 = vmul.f32 %v5555_v28, %v5555_v28 }
0x1583   :  { %v5557_v52 = vsel %vm5499_vm12, %v5556_v16, 0.0 }
0x1584   :  { %v5558_v15 = vrot.slane %v5557_v52, 4 }
0x1586   :  { %v5559_v6 = vadd.f32 %v5558_v15, %v5557_v52 }
0x1588   :  { %v5560_v50 = vrot.slane %v5559_v6, 2 }
0x158a   :  { %v5561_v12 = vadd.f32 %v5560_v50, %v5559_v6 }
0x158c   :  { %v5562_v41 = vrot.slane %v5561_v12, 1 }
0x158e   :  { %v5563_v26 = vadd.f32 %v5562_v41, %v5561_v12 }
0x1590   :  { %8678 = vmatmul.msk.f32.vlgmr.msrb.gmra.mxu0 %vm1199_vm2, %v5563_v26 }
0x1591   :  { %5789 = vmatpush.msrb.mxu0 %v9456_v44 }
0x1593   :  { %5790 = vmatpush.msrb.mxu0 %v9455_v59 }
0x160d   :  { %v5584_v29 = vpop.f32.mrf.mxu0 }
0x160e   :  { %v5587_v53 = vmul.f32 0.5, %v5584_v29 }
0x1610   :  { %v5589_v13 = vadd.f32 1e-05, %v5587_v53 }
0x1612   :  { %9553 = vrsqrt.f32 %v5589_v13  ;;  %vm5596_vm14 = vweird.f32 %v5589_v13 }
0x1618   :  { %v9554_v20 = vpop.eup %9553 }
0x1619   :  { %v5591_v57 = vmul.f32 %v9554_v20, %v5589_v13  ;;  %vm5597_vm13 = vweird.f32 %v9554_v20  ;;  %v5759_v13 = vld [vmem:[%s14879_s7 + $0x80] ss:$0 sm:$0xff] }
0x161a   :  { %vm5598_vm15 = vmor %vm5596_vm14, %vm5597_vm13  ;;  %vm6297_vm13 = vcmask 1043456   ;;  %vm6293_vm14 = vcmask 31744  }
0x161b   :  { %v5592_v46 = vmul.f32 %v9554_v20, %v5591_v57 }
0x161d   :  { %v5593_v22 = vmul.f32 0.5, %v5592_v46 }
0x161f   :  { %v5594_v17 = vsub.f32 1.5, %v5593_v22  ;;  %v9358_v22 = vld [vmem:[%s14882_s2 + $0x218] sm:$0xff] }
0x1620   :  { %5845 = vmatpush.bf16.msrb.mxu2 %v9358_v22 }
0x1621   :  { %v5595_v32 = vmul.f32 %v9554_v20, %v5594_v17  ;;  %v9357_v17 = vld [vmem:[%s14882_s2 + $0x210] sm:$0xff] }
0x1623   :  { %v5599_v60 = vsel %vm5598_vm15, %v9554_v20, %v5595_v32  ;;  %v9355_v32 = vld [vmem:[%s14882_s2 + $0x200] sm:$0xff] }
0x1624   :  { %v5600_v37 = vmul.f32 %v5599_v60, %v5588_v56  ;;  %5846 = vmatpush.bf16.msrb.mxu2 %v9357_v17  ;;  %v9356_v56 = vld [vmem:[%s14882_s2 + $0x208] sm:$0xff]  ;;  %v6040_v17 = vld [vmem:[%s14878_s6 + $0x990] sm:$0xff] }
0x1626   :  { %8679 = vmatmul.msk.f32.vlgmr.msrb.gmra.mxu1 %vm1199_vm2, %v5600_v37 }
0x1628   :  { %5847 = vmatpush.bf16.msrb.mxu2 %v9356_v56 }
0x162c   :  { %5848 = vmatpush.bf16.msrb.mxu2 %v9355_v32  ;;  %v6039_v32 = vld [vmem:[%s14878_s6 + $0x988] sm:$0xff] }
0x16a3   :  { %v5621_v27 = vpop.f32.mrf.mxu1 }
0x16a4   :  { %v5625_v18 = vperm.slane %v5621_v27, 0 }
0x16a6   :  { %v5626_v63 = vmul.f32 %v5625_v18, %v5555_v28 }
0x16a8   :  { %v5627_v42 = vadd.f32 %v5626_v63, %v5624_v3 }
0x16aa   :  { %v5628_v2 = vsub.f32 0.0, %v5627_v42 }
0x16ac   :  { %v5629_v35 = vmul.f32 1.442695, %v5628_v2 }
0x16ae   :  { %9555 = vpow2.f32 %v5629_v35 }
0x16b4   :  { %v9556_v25 = vpop.eup %9555 }
0x16b5   :  { %v5631_v19 = vadd.f32 1.0, %v9556_v25 }
0x16b7   :  { %9557 = vrcp.f32 %v5631_v19  ;;  %v5857_v19 = vld [vmem:[%s14878_s6 + $0x928] sm:$0xff] }
0x16b8   :  { %5882 = vmatpush.msra.mxu3 %v5857_v19  ;;  %5940 = vmatpush.msrb.mxu1 %v5857_v19  ;;  %v6033_v19 = vld [vmem:[%s14878_s6 + $0x958] sm:$0xff] }
0x16bd   :  { %v9558_v11 = vpop.eup %9557 }
0x16be   :  { %v5633_v55 = vmul.f32 %v9558_v11, %v5627_v42  ;;  %v5856_v11 = vld [vmem:[%s14878_s6 + $0x920] sm:$0xff] }
0x16bf   :  { %5883 = vmatpush.msra.mxu3 %v5856_v11  ;;  %5941 = vmatpush.msrb.mxu1 %v5856_v11  ;;  %v6032_v11 = vld [vmem:[%s14878_s6 + $0x950] sm:$0xff] }
0x16c0   :  { %v5636_v54 = vpack.c.bf16 %v5633_v55, %v5633_v55  ;;  %v5855_v55 = vld [vmem:[%s14878_s6 + $0x918] sm:$0xff] }
0x16c1   :  { %5884 = vmatpush.msra.mxu3 %v5855_v55  ;;  %5942 = vmatpush.msrb.mxu1 %v5855_v55  ;;  %v6031_v55 = vld [vmem:[%s14878_s6 + $0x948] sm:$0xff] }
0x16c2   :  { %8684 = vmatmul.msk.bf16.vlgmr.msra.gmra.mxu2 %vm1199_vm2, %v5636_v54  ;;  %v5854_v54 = vld [vmem:[%s14878_s6 + $0x910] sm:$0xff] }
0x16c3   :  { %5885 = vmatpush.msra.mxu3 %v5854_v54  ;;  %5943 = vmatpush.msrb.mxu1 %v5854_v54  ;;  %v6030_v54 = vld [vmem:[%s14878_s6 + $0x940] sm:$0xff] }
0x1745   :  { %v5655_v43 = vpop.f32.mrf.mxu2 }
0x1746   :  { %v5671_v36 = vsel %vm5233_vm6, %v5655_v43, 0.0 }
0x1747   :  { %v5672_v10 = vrot.slane %v5671_v36, 4 }
0x1749   :  { %v5673_v0 = vadd.f32 %v5672_v10, %v5671_v36 }
0x174b   :  { %v5674_v51 = vrot.slane %v5673_v0, 2 }
0x174d   :  { %v5675_v40 = vadd.f32 %v5674_v51, %v5673_v0  ;;  %v5657_v9 = vpop.f32.mrf.mxu2 }
0x174f   :  { %v5676_v8 = vrot.slane %v5675_v40, 1 }
0x1751   :  { %v5677_v24 = vadd.f32 %v5676_v8, %v5675_v40 }
0x1753   :  { %8685 = vmatmul.msk.f32.vlgmr.msrb.gmra.mxu3 %vm617_vm0, %v5677_v24 }
0x1754   :  { %5980 = vmatpush.msrb.mxu3 %v5859_v38 }
0x17d6   :  { %v5698_v31 = vpop.f32.mrf.mxu3 }
0x17d7   :  { %v5701_v21 = vmul.f32 0.125, %v5698_v31 }
0x17d9   :  { %8686 = vmatmul.msk.f32.vlgmr.msra.gmra.mxu0 %vm1199_vm2, %v5701_v21 }
0x17da   :  { %5910 = vmatpush.msra.mxu0 %v5859_v38  ;;  %v6028_v38 = vld [vmem:[%s14878_s6 + $0x930] sm:$0xff] }
0x1856   :  { %v5722_v33 = vpop.f32.mrf.mxu0 }
0x1857   :  { %v5725_v5 = vperm.slane %v5722_v33, 0 }
0x1859   :  { %v5726_v14 = vsub.f32 %v5655_v43, %v5725_v5 }
0x185b   :  { %v5727_v23 = vmul.f32 %v5726_v14, %v5726_v14 }
0x185d   :  { %v5728_v62 = vsel %vm5233_vm6, %v5727_v23, 0.0 }
0x185e   :  { %v5729_v58 = vrot.slane %v5728_v62, 4 }
0x1860   :  { %v5730_v61 = vadd.f32 %v5729_v58, %v5728_v62 }
0x1862   :  { %v5731_v45 = vrot.slane %v5730_v61, 2 }
0x1864   :  { %v5732_v28 = vadd.f32 %v5731_v45, %v5730_v61 }
0x1866   :  { %v5733_v16 = vrot.slane %v5732_v28, 1 }
0x1868   :  { %v5734_v52 = vadd.f32 %v5733_v16, %v5732_v28 }
0x186a   :  { %8687 = vmatmul.msk.f32.vlgmr.msra.gmra.mxu1 %vm617_vm0, %v5734_v52 }
0x18e7   :  { %v5755_v15 = vpop.f32.mrf.mxu1 }
0x18e8   :  { %v5758_v6 = vmul.f32 0.125, %v5755_v15  ;;  %v5949_v15 = vld [vmem:[%s14879_s7 + $0x82] ss:$0 sm:$0xff] }
0x18ea   :  { %v5760_v50 = vadd.f32 1e-05, %v5758_v6 }
0x18ec   :  { %9559 = vrsqrt.f32 %v5760_v50  ;;  %vm5767_vm4 = vweird.f32 %v5760_v50 }
0x18f2   :  { %v9560_v12 = vpop.eup %9559 }
0x18f3   :  { %v5762_v41 = vmul.f32 %v9560_v12, %v5760_v50  ;;  %vm5768_vm3 = vweird.f32 %v9560_v12 }
0x18f4   :  { %vm5769_vm5 = vmor %vm5767_vm4, %vm5768_vm3 }
0x18f5   :  { %v5763_v26 = vmul.f32 %v9560_v12, %v5762_v41  ;;  %v9360_v41 = vld [vmem:[%s14882_s2 + $0x230] sm:$0xff] }
0x18f7   :  { %v5764_v29 = vmul.f32 0.5, %v5763_v26  ;;  %v9359_v26 = vld [vmem:[%s14882_s2 + $0x228] sm:$0xff] }
0x18f9   :  { %v5765_v53 = vsub.f32 1.5, %v5764_v29  ;;  %v6043_v29 = vld [vmem:[%s14878_s6 + $0x9a8] sm:$0xff] }
0x18fa   :  { %6053 = vmatpush.msra.mxu2 %v6043_v29 }
0x18fb   :  { %v5766_v20 = vmul.f32 %v9560_v12, %v5765_v53  ;;  %v6042_v53 = vld [vmem:[%s14878_s6 + $0x9a0] sm:$0xff] }
0x18fc   :  { %6054 = vmatpush.msra.mxu2 %v6042_v53 }
0x18fd   :  { %v5770_v57 = vsel %vm5769_vm5, %v9560_v12, %v5766_v20 }
0x18fe   :  { %v5771_v46 = vmul.f32 %v5770_v57, %v5759_v13  ;;  %v6041_v57 = vld [vmem:[%s14878_s6 + $0x998] sm:$0xff] }
0x18ff   :  { %6055 = vmatpush.msra.mxu2 %v6041_v57 }
0x1900   :  { %8688 = vmatmul.msk.f32.vlgmr.msrb.gmra.mxu0 %vm1199_vm2, %v5771_v46  ;;  %vm5891_vm2 = vcmask 64512   ;;  %v5985_v46 = vld [vmem:[%s14879_s7 + $0x83] ss:$0 sm:$0xff] }
0x1901   :  { %6021 = vmatpush.bf16.msrb.mxu0 %v9360_v41  ;;  %6056 = vmatpush.msra.mxu2 %v6040_v17 }
0x1903   :  { %6057 = vmatpush.msra.mxu2 %v6039_v32 }
0x1905   :  { %6022 = vmatpush.bf16.msrb.mxu0 %v9359_v26 }
0x197d   :  { %v5792_v60 = vpop.f32.mrf.mxu0 }
0x197e   :  { %v5796_v37 = vperm.slane %v5792_v60, 0 }
0x1980   :  { %v5797_v30 = vmul.f32 %v5796_v37, %v5726_v14  ;;  %v6038_v37 = vld [vmem:[%s14878_s6 + $0x980] sm:$0xff] }
0x1981   :  { %6058 = vmatpush.msra.mxu2 %v6038_v37 }
0x1982   :  { %v5798_v27 = vadd.f32 %v5797_v30, %v5795_v48  ;;  %v6037_v30 = vld [vmem:[%s14878_s6 + $0x978] sm:$0xff] }
0x1983   :  { %6059 = vmatpush.msra.mxu2 %v6037_v30 }
0x1984   :  { %v5799_v18 = vsub.f32 0.0, %v5798_v27 }
0x1986   :  { %v5800_v3 = vmul.f32 1.442695, %v5799_v18  ;;  %v6035_v18 = vld [vmem:[%s14878_s6 + $0x968] sm:$0xff] }
0x1988   :  { %9561 = vpow2.f32 %v5800_v3 }
0x198e   :  { %v9562_v63 = vpop.eup %9561 }
0x198f   :  { %v5802_v42 = vadd.f32 1.0, %v9562_v63 }
0x1991   :  { %9563 = vrcp.f32 %v5802_v42 }
0x1997   :  { %v9564_v2 = vpop.eup %9563 }
0x1998   :  { %v5804_v35 = vmul.f32 %v9564_v2, %v5798_v27  ;;  %v6036_v27 = vld [vmem:[%s14878_s6 + $0x970] sm:$0xff] }
0x1999   :  { %6060 = vmatpush.msra.mxu2 %v6036_v27 }
0x199a   :  { %v5813_v25 = vpack.c.bf16 %v5804_v35, %v5804_v35 }
0x199b   :  { %6061 = vmatpush.msra.mxu2 %v6035_v18 }
0x199c   :  { %8705 = vmatmul.msk.bf16.vlgmr.msrb.gmra.mxu2 %vm617_vm0, %v5813_v25  ;;  %v6034_v25 = vld [vmem:[%s14878_s6 + $0x960] sm:$0xff] }
0x199d   :  { %6062 = vmatpush.msra.mxu2 %v6034_v25 }
0x199f   :  { %6063 = vmatpush.msra.mxu2 %v6033_v19 }
0x19a1   :  { %6064 = vmatpush.msra.mxu2 %v6032_v11 }
0x19a3   :  { %6065 = vmatpush.msra.mxu2 %v6031_v55 }
0x19a5   :  { %6066 = vmatpush.msra.mxu2 %v6030_v54 }
0x19a7   :  { %6067 = vmatpush.msra.mxu2 %v6029_v49 }
0x19a9   :  { %6068 = vmatpush.msra.mxu2 %v6028_v38 }
0x1a1f   :  { %v5850_v1 = vpop.f32.mrf.mxu2 }
0x1a20   :  { %v5860_v34 = vsel %vm5418_vm11, %v5850_v1, 0.0 }
0x1a21   :  { %v5861_v39 = vrot.slane %v5860_v34, 4 }
0x1a23   :  { %v5862_v47 = vadd.f32 %v5861_v39, %v5860_v34 }
0x1a25   :  { %v5863_v4 = vrot.slane %v5862_v47, 2 }
0x1a27   :  { %v5864_v7 = vadd.f32 %v5863_v4, %v5862_v47  ;;  %v5852_v44 = vpop.f32.mrf.mxu2 }
0x1a29   :  { %v5865_v59 = vrot.slane %v5864_v7, 1 }
0x1a2b   :  { %v5866_v43 = vadd.f32 %v5865_v59, %v5864_v7 }
0x1a2d   :  { %8706 = vmatmul.msk.f32.vlgmr.msra.gmra.mxu3 %vm3822_vm9, %v5866_v43 }
0x1a2e   :  { %6107 = vmatpush.msra.mxu3 %v6043_v29  ;;  %v9368_v29 = vld [vmem:[%s14882_s2 + $0x278] sm:$0xff] }
0x1a30   :  { %6108 = vmatpush.msra.mxu3 %v6042_v53  ;;  %v9367_v53 = vld [vmem:[%s14882_s2 + $0x270] sm:$0xff] }
0x1a32   :  { %6109 = vmatpush.msra.mxu3 %v6041_v57  ;;  %v9364_v57 = vld [vmem:[%s14882_s2 + $0x258] sm:$0xff] }
0x1a34   :  { %6110 = vmatpush.msra.mxu3 %v6040_v17  ;;  %v9361_v17 = vld [vmem:[%s14882_s2 + $0x240] sm:$0xff] }
0x1a36   :  { %6111 = vmatpush.msra.mxu3 %v6039_v32 }
0x1a38   :  { %6112 = vmatpush.msra.mxu3 %v6038_v37  ;;  %v6164_v37 = vld [vmem:[%s14879_s7 + $0x85] ss:$0 sm:$0xff] }
0x1a3a   :  { %6113 = vmatpush.msra.mxu3 %v6037_v30 }
0x1a3c   :  { %6114 = vmatpush.msra.mxu3 %v6036_v27 }
0x1a3e   :  { %6115 = vmatpush.msra.mxu3 %v6035_v18 }
0x1a40   :  { %6116 = vmatpush.msra.mxu3 %v6034_v25  ;;  %v6258_v25 = vld [vmem:[%s14878_s6 + $0x9e0] sm:$0xff] }
0x1a42   :  { %6117 = vmatpush.msra.mxu3 %v6033_v19  ;;  %v6257_v19 = vld [vmem:[%s14878_s6 + $0x9d8] sm:$0xff] }
0x1a44   :  { %6118 = vmatpush.msra.mxu3 %v6032_v11  ;;  %v6256_v11 = vld [vmem:[%s14878_s6 + $0x9d0] sm:$0xff] }
0x1a46   :  { %6119 = vmatpush.msra.mxu3 %v6031_v55  ;;  %v6255_v55 = vld [vmem:[%s14878_s6 + $0x9c8] sm:$0xff] }
0x1a48   :  { %6120 = vmatpush.msra.mxu3 %v6030_v54  ;;  %v6254_v54 = vld [vmem:[%s14878_s6 + $0x9c0] sm:$0xff] }
0x1a4a   :  { %6121 = vmatpush.msra.mxu3 %v6029_v49  ;;  %v6253_v49 = vld [vmem:[%s14878_s6 + $0x9b8] sm:$0xff] }
0x1a4c   :  { %6122 = vmatpush.msra.mxu3 %v6028_v38  ;;  %v6252_v38 = vld [vmem:[%s14878_s6 + $0x9b0] sm:$0xff] }
0x1ab0   :  { %v5887_v36 = vpop.f32.mrf.mxu3 }
0x1ab1   :  { %v5890_v10 = vmul.f32 0.125, %v5887_v36 }
0x1ab3   :  { %8707 = vmatmul.msk.f32.vlgmr.msra.gmra.mxu0 %vm5891_vm2, %v5890_v10 }
0x1ab4   :  { %6239 = vmatpush.bf16.msra.mxu0 %v9368_v29  ;;  %v8785_v29 = vld [vmem:[%s14880_s3 + $0x500] sm:$0xf] }
0x1ab8   :  { %6240 = vmatpush.bf16.msra.mxu0 %v9367_v53  ;;  %v9376_v53 = vld [vmem:[%s14880_s3 + $0x504] sm:$0xf0] }
0x1b30   :  { %v5912_v0 = vpop.f32.mrf.mxu0 }
0x1b31   :  { %v5915_v51 = vperm.slane %v5912_v0, 0 }
0x1b33   :  { %v5916_v40 = vsub.f32 %v5850_v1, %v5915_v51  ;;  %v6044_v1 = vld [vmem:[%s14882_s2 + $0x238] sm:$0xf] }
0x1b34   :  { %v6045_v34 = vunpack.c.l.bf16 %v6044_v1  ;;  %v6260_v1 = vld [vmem:[%s14882_s2 + $0x280] sm:$0x3] }
0x1b35   :  { %v5917_v9 = vmul.f32 %v5916_v40, %v5916_v40 }
0x1b36   :  { %6092 = vmatpush.msra.mxu1 %v6045_v34 }
0x1b37   :  { %v5918_v8 = vsel %vm5418_vm11, %v5917_v9, 0.0 }
0x1b38   :  { %v5919_v24 = vrot.slane %v5918_v8, 4 }
0x1b3a   :  { %v5920_v31 = vadd.f32 %v5919_v24, %v5918_v8 }
0x1b3c   :  { %v5921_v21 = vrot.slane %v5920_v31, 2 }
0x1b3e   :  { %v5922_v33 = vadd.f32 %v5921_v21, %v5920_v31 }
0x1b40   :  { %v5923_v5 = vrot.slane %v5922_v33, 1 }
0x1b42   :  { %v5924_v14 = vadd.f32 %v5923_v5, %v5922_v33 }
0x1b44   :  { %8708 = vmatmul.msk.f32.vlgmr.msrb.gmra.mxu1 %vm3822_vm9, %v5924_v14 }
0x1b45   :  { %6159 = vmatpush.msrb.mxu1 %v6045_v34  ;;  %v6261_v34 = vunpack.c.l.bf16 %v6260_v1  ;;  %v14362_v1 = vld [vmem:[%s14878_s6 + $0xa60] sm:$0xff] }
0x1b47   :  { %8754 = vmatpush.msk.msrb.mxu2 %vm6297_vm13, %v6261_v34 }
0x1bc1   :  { %v5945_v23 = vpop.f32.mrf.mxu1 }
0x1bc2   :  { %v5948_v62 = vmul.f32 0.125, %v5945_v23 }
0x1bc4   :  { %v5950_v58 = vadd.f32 1e-05, %v5948_v62 }
0x1bc6   :  { %9565 = vrsqrt.f32 %v5950_v58  ;;  %vm5957_vm8 = vweird.f32 %v5950_v58 }
0x1bcc   :  { %v9566_v61 = vpop.eup %9565 }
0x1bcd   :  { %v5952_v45 = vmul.f32 %v9566_v61, %v5950_v58  ;;  %vm5958_vm7 = vweird.f32 %v9566_v61 }
0x1bce   :  { %vm5959_vm10 = vmor %vm5957_vm8, %vm5958_vm7 }
0x1bcf   :  { %v5953_v28 = vmul.f32 %v9566_v61, %v5952_v45 }
0x1bd1   :  { %v5954_v16 = vmul.f32 0.5, %v5953_v28 }
0x1bd3   :  { %v5955_v52 = vsub.f32 1.5, %v5954_v16 }
0x1bd5   :  { %v5956_v6 = vmul.f32 %v9566_v61, %v5955_v52 }
0x1bd7   :  { %v5960_v50 = vsel %vm5959_vm10, %v9566_v61, %v5956_v6 }
0x1bd8   :  { %v5961_v12 = vmul.f32 %v5960_v50, %v5949_v15  ;;  %v6128_v50 = vld [vmem:[%s14879_s7 + $0x84] ss:$0 sm:$0xff] }
0x1bda   :  { %8709 = vmatmul.msk.f32.vlgmr.msrb.gmra.mxu3 %vm5891_vm2, %v5961_v12 }
0x1c5d   :  { %v5982_v13 = vpop.f32.mrf.mxu3 }
0x1c5e   :  { %v5986_v20 = vperm.slane %v5982_v13, 0  ;;  %v9366_v13 = vld [vmem:[%s14882_s2 + $0x268] sm:$0xff] }
0x1c5f   :  { %6241 = vmatpush.bf16.msra.mxu0 %v9366_v13  ;;  %v9375_v13 = vld [vmem:[%s14880_s3 + $0x504] sm:$0xf] }
0x1c60   :  { %v5987_v22 = vmul.f32 %v5986_v20, %v5916_v40  ;;  %v9365_v20 = vld [vmem:[%s14882_s2 + $0x260] sm:$0xff] }
0x1c62   :  { %v5988_v56 = vadd.f32 %v5987_v22, %v5985_v46  ;;  %v9363_v46 = vld [vmem:[%s14882_s2 + $0x250] sm:$0xff]  ;;  %v9362_v22 = vld [vmem:[%s14882_s2 + $0x248] sm:$0xff] }
0x1c63   :  { %6242 = vmatpush.bf16.msra.mxu0 %v9365_v20  ;;  %v8786_v20 = vor.u32 %v9376_v53, %v8785_v29  ;;  %v14505_v29 = vld [vmem:[%s14878_s6 + $0xa70] sm:$0xff]  ;;  %v6481_v53 = vld [vmem:[%s14878_s6 + $0xa00] sm:$0xff] }
0x1c64   :  { %v5989_v60 = vsub.f32 0.0, %v5988_v56 }
0x1c65   :  { %6457 = vmatpush.bf16.msrb.mxu3 %v8786_v20  ;;  %v6479_v20 = vld [vmem:[%s14878_s6 + $0x9f0] sm:$0xff] }
0x1c66   :  { %v5990_v48 = vmul.f32 1.442695, %v5989_v60 }
0x1c67   :  { %6243 = vmatpush.bf16.msra.mxu0 %v9364_v57  ;;  %v8787_v57 = vld [vmem:[%s14880_s3 + $0x508] sm:$0xf0] }
0x1c68   :  { %9567 = vpow2.f32 %v5990_v48 }
0x1c6b   :  { %6244 = vmatpush.bf16.msra.mxu0 %v9363_v46  ;;  %v8790_v46 = vor.u32 %v9375_v13, %v8787_v57  ;;  %v6480_v13 = vld [vmem:[%s14878_s6 + $0x9f8] sm:$0xff] }
0x1c6e   :  { %v9568_v3 = vpop.eup %9567 }
0x1c6f   :  { %v5992_v63 = vadd.f32 1.0, %v9568_v3  ;;  %6245 = vmatpush.bf16.msra.mxu0 %v9362_v22  ;;  %v8777_v22 = vld [vmem:[%s14880_s3 + $0x4f0] sm:$0xf] }
0x1c71   :  { %9569 = vrcp.f32 %v5992_v63 }
0x1c73   :  { %6246 = vmatpush.bf16.msra.mxu0 %v9361_v17  ;;  %v9374_v17 = vld [vmem:[%s14880_s3 + $0x4f4] sm:$0xf0] }
0x1c77   :  { %v9570_v42 = vpop.eup %9569 }
0x1c78   :  { %v5994_v2 = vmul.f32 %v9570_v42, %v5988_v56  ;;  %v6259_v56 = vld [vmem:[%s14878_s6 + $0x9e8] sm:$0xff] }
0x1c7a   :  { %v5999_v35 = vpack.c.bf16 %v5994_v2, %v5994_v2 }
0x1c7c   :  { %8718 = vmatmul.msk.bf16.vlgmr.msrb.gmra.mxu0 %vm3822_vm9, %v5999_v35 }
0x1c7d   :  { %6470 = vmatpush.bf16.msrb.mxu0 %v8790_v46 }
0x1cf9   :  { %v6024_v39 = vpop.f32.mrf.mxu0 }
0x1cfa   :  { %v6046_v47 = vsel %vm981_vm1, %v6024_v39, 0.0 }
0x1cfb   :  { %v6047_v4 = vrot.slane %v6046_v47, 4 }
0x1cfd   :  { %v6048_v7 = vadd.f32 %v6047_v4, %v6046_v47 }
0x1cff   :  { %v6049_v44 = vrot.slane %v6048_v7, 2 }
0x1d01   :  { %v6050_v59 = vadd.f32 %v6049_v44, %v6048_v7  ;;  %v6026_v43 = vpop.f32.mrf.mxu0 }
0x1d03   :  { %v6051_v36 = vrot.slane %v6050_v59, 1 }
0x1d05   :  { %v6052_v10 = vadd.f32 %v6051_v36, %v6050_v59 }
0x1d07   :  { %6069 = vmatmul.f32.vlgmr.msra.gmra.mxu2 %v6052_v10 }
0x1d08   :  { %8757 = vmatpush.msk.msra.mxu2 %vm6297_vm13, %v6261_v34 }
0x1d8a   :  { %v6070_v0 = vpop.f32.mrf.mxu2 }
0x1d8b   :  { %v6073_v51 = vmul.f32 0.03125, %v6070_v0 }
0x1d8d   :  { %8719 = vmatmul.msk.f32.vlgmr.msra.gmra.mxu1 %vm5891_vm2, %v6073_v51 }
0x1d8e   :  { %6280 = vmatpush.msra.mxu1 %v6259_v56 }
0x1d90   :  { %6281 = vmatpush.msra.mxu1 %v6258_v25 }
0x1d92   :  { %6282 = vmatpush.msra.mxu1 %v6257_v19 }
0x1d94   :  { %6283 = vmatpush.msra.mxu1 %v6256_v11 }
0x1d96   :  { %6284 = vmatpush.msra.mxu1 %v6255_v55 }
0x1d98   :  { %6285 = vmatpush.msra.mxu1 %v6254_v54 }
0x1d9a   :  { %6286 = vmatpush.msra.mxu1 %v6253_v49 }
0x1d9c   :  { %6287 = vmatpush.msra.mxu1 %v6252_v38 }
0x1e0a   :  { %v6094_v40 = vpop.f32.mrf.mxu1 }
0x1e0b   :  { %v6097_v9 = vperm.slane %v6094_v40, 0 }
0x1e0d   :  { %v6098_v8 = vsub.f32 %v6024_v39, %v6097_v9 }
0x1e0f   :  { %v6099_v24 = vmul.f32 %v6098_v8, %v6098_v8 }
0x1e11   :  { %v6100_v31 = vsel %vm981_vm1, %v6099_v24, 0.0 }
0x1e12   :  { %v6101_v21 = vrot.slane %v6100_v31, 4 }
0x1e14   :  { %v6102_v33 = vadd.f32 %v6101_v21, %v6100_v31 }
0x1e16   :  { %v6103_v5 = vrot.slane %v6102_v33, 2 }
0x1e18   :  { %v6104_v14 = vadd.f32 %v6103_v5, %v6102_v33 }
0x1e1a   :  { %v6105_v23 = vrot.slane %v6104_v14, 1 }
0x1e1c   :  { %v6106_v62 = vadd.f32 %v6105_v23, %v6104_v14 }
0x1e1e   :  { %6123 = vmatmul.f32.vlgmr.msra.gmra.mxu3 %v6106_v62 }
0x1ea1   :  { %v6124_v58 = vpop.f32.mrf.mxu3 }
0x1ea2   :  { %v6127_v61 = vmul.f32 0.03125, %v6124_v58 }
0x1ea4   :  { %v6129_v45 = vadd.f32 1e-05, %v6127_v61 }
0x1ea6   :  { %9571 = vrsqrt.f32 %v6129_v45  ;;  %vm6136_vm11 = vweird.f32 %v6129_v45 }
0x1eac   :  { %v9572_v28 = vpop.eup %9571 }
0x1ead   :  { %v6131_v16 = vmul.f32 %v9572_v28, %v6129_v45  ;;  %vm6137_vm9 = vweird.f32 %v9572_v28 }
0x1eae   :  { %vm6138_vm12 = vmor %vm6136_vm11, %vm6137_vm9 }
0x1eaf   :  { %v6132_v52 = vmul.f32 %v9572_v28, %v6131_v16 }
0x1eb1   :  { %v6133_v15 = vmul.f32 0.5, %v6132_v52 }
0x1eb3   :  { %v6134_v6 = vsub.f32 1.5, %v6133_v15 }
0x1eb5   :  { %v6135_v12 = vmul.f32 %v9572_v28, %v6134_v6 }
0x1eb7   :  { %v6139_v41 = vsel %vm6138_vm12, %v9572_v28, %v6135_v12 }
0x1eb8   :  { %v6140_v26 = vmul.f32 %v6139_v41, %v6128_v50  ;;  %v6355_v50 = vld [vmem:[%s14879_s7 + $0x86] ss:$0 sm:$0xff] }
0x1eba   :  { %8720 = vmatmul.msk.f32.vlgmr.msrb.gmra.mxu1 %vm5891_vm2, %v6140_v26 }
0x1ebb   :  { %6342 = vmatpush.msrb.mxu1 %v6259_v56  ;;  %v9373_v56 = vld [vmem:[%s14880_s3 + $0x4f4] sm:$0xf] }
0x1ebd   :  { %6343 = vmatpush.msrb.mxu1 %v6258_v25 }
0x1ebf   :  { %6344 = vmatpush.msrb.mxu1 %v6257_v19  ;;  %v8763_v19 = vld [vmem:[%s14880_s3 + $0x4d8] sm:$0xf0] }
0x1ec1   :  { %6345 = vmatpush.msrb.mxu1 %v6256_v11 }
0x1ec3   :  { %6346 = vmatpush.msrb.mxu1 %v6255_v55  ;;  %v14346_v55 = vld [vmem:[%s14878_s6 + $0xae8] sm:$0xff] }
0x1ec5   :  { %6347 = vmatpush.msrb.mxu1 %v6254_v54  ;;  %v14351_v54 = vld [vmem:[%s14878_s6 + $0xae0] sm:$0xff] }
0x1ec7   :  { %6348 = vmatpush.msrb.mxu1 %v6253_v49 }
0x1ec9   :  { %6349 = vmatpush.msrb.mxu1 %v6252_v38  ;;  %v14357_v38 = vld [vmem:[%s14878_s6 + $0xa68] sm:$0xff] }
0x1f37   :  { %v6161_v32 = vpop.f32.mrf.mxu1 }
0x1f38   :  { %v6165_v60 = vperm.slane %v6161_v32, 0  ;;  %v8778_v32 = vor.u32 %v9374_v17, %v8777_v22 }
0x1f3a   :  { %v6166_v48 = vmul.f32 %v6165_v60, %v6098_v8  ;;  %v8779_v60 = vld [vmem:[%s14880_s3 + $0x4f8] sm:$0xf0]  ;;  %6458 = vmatpush.bf16.msrb.mxu3 %v8778_v32 }
0x1f3c   :  { %v6167_v30 = vadd.f32 %v6166_v48, %v6164_v37  ;;  %v8782_v37 = vor.u32 %v9373_v56, %v8779_v60  ;;  %v8769_v48 = vld [vmem:[%s14880_s3 + $0x4e0] sm:$0xf] }
0x1f3e   :  { %v6168_v27 = vsub.f32 0.0, %v6167_v30  ;;  %6471 = vmatpush.bf16.msrb.mxu0 %v8782_v37 }
0x1f40   :  { %v6169_v18 = vmul.f32 1.442695, %v6168_v27  ;;  %v9371_v27 = vld [vmem:[%s14880_s3 + $0x4e4] sm:$0xf] }
0x1f42   :  { %9573 = vpow2.f32 %v6169_v18 }
0x1f48   :  { %v9574_v3 = vpop.eup %9573 }
0x1f49   :  { %v6171_v63 = vadd.f32 1.0, %v9574_v3  ;;  %v8771_v3 = vld [vmem:[%s14880_s3 + $0x4e8] sm:$0xf0] }
0x1f4b   :  { %9575 = vrcp.f32 %v6171_v63  ;;  %v8774_v63 = vor.u32 %v9371_v27, %v8771_v3 }
0x1f4d   :  { %6472 = vmatpush.bf16.msrb.mxu0 %v8774_v63 }
0x1f51   :  { %v9576_v42 = vpop.eup %9575 }
0x1f52   :  { %v6173_v2 = vmul.f32 %v9576_v42, %v6167_v30  ;;  %v9372_v30 = vld [vmem:[%s14880_s3 + $0x4e4] sm:$0xf0]  ;;  %v8761_v42 = vld [vmem:[%s14880_s3 + $0x4d0] sm:$0xf] }
0x1f53   :  { %v8770_v18 = vor.u32 %v9372_v30, %v8769_v48 }
0x1f54   :  { %v6190_v35 = vpack.c.bf16 %v6173_v2, %v6173_v2  ;;  %v9370_v2 = vld [vmem:[%s14880_s3 + $0x4d4] sm:$0xf0] }
0x1f55   :  { %6459 = vmatpush.bf16.msrb.mxu3 %v8770_v18  ;;  %v8762_v25 = vor.u32 %v9370_v2, %v8761_v42 }
0x1f56   :  { %6247 = vmatmul.bf16.vlgmr.msra.gmra.mxu0 %v6190_v35  ;;  %v9369_v35 = vld [vmem:[%s14880_s3 + $0x4d4] sm:$0xf] }
0x1f57   :  { %v8766_v11 = vor.u32 %v9369_v35, %v8763_v19  ;;  %v6511_v19 = vld [vmem:[%s14880_s3 + $0x510] sm:$0x33] }
0x1f59   :  { %6460 = vmatpush.bf16.msrb.mxu3 %v8762_v25  ;;  %6473 = vmatpush.bf16.msrb.mxu0 %v8766_v11  ;;  %v6512_v11 = vunpack.c.l.bf16 %v6511_v19 }
0x1f5d   :  { %8793 = vmatpush.msk.msra.mxu3 %vm6297_vm13, %v6512_v11 }
0x1fd3   :  { %v6248_v39 = vpop.f32.mrf.mxu0 }
0x1fd4   :  { %v6262_v47 = vsel %vm5233_vm6, %v6248_v39, 0.0 }
0x1fd5   :  { %v6263_v4 = vrot.slane %v6262_v47, 4 }
0x1fd7   :  { %v6264_v7 = vadd.f32 %v6263_v4, %v6262_v47  ;;  %v6391_v47 = vld [vmem:[%s14879_s7 + $0x87] ss:$0 sm:$0xff]  ;;  %v14377_v4 = vld [vmem:[%s14878_s6 + $0xa58] sm:$0xff] }
0x1fd9   :  { %v6265_v44 = vrot.slane %v6264_v7, 2 }
0x1fdb   :  { %v6266_v59 = vadd.f32 %v6265_v44, %v6264_v7  ;;  %v6250_v43 = vpop.f32.mrf.mxu0  ;;  %v14383_v44 = vld [vmem:[%s14878_s6 + $0xad0] sm:$0xff] }
0x1fdd   :  { %v6267_v36 = vrot.slane %v6266_v59, 1 }
0x1fdf   :  { %v6268_v10 = vadd.f32 %v6267_v36, %v6266_v59  ;;  %v14390_v59 = vld [vmem:[%s14878_s6 + $0xa50] sm:$0xff]  ;;  %v14395_v36 = vld [vmem:[%s14878_s6 + $0xac8] sm:$0xff] }
0x1fe1   :  { %8753 = vmatmul.msk.f32.vlgmr.msra.gmra.mxu1 %vm617_vm0, %v6268_v10  ;;  %v14402_v10 = vld [vmem:[%s14878_s6 + $0xa48] sm:$0xff] }
0x1fe2   :  { %6548 = vmatpush.msra.mxu1 %v14346_v55 }
0x1fe4   :  { %6549 = vmatpush.msra.mxu1 %v14351_v54 }
0x205e   :  { %v6289_v0 = vpop.f32.mrf.mxu1 }
0x205f   :  { %v6292_v51 = vmul.f32 0.03125, %v6289_v0 }
0x2061   :  { %8755 = vmatmul.msk.f32.vlgmr.msrb.gmra.mxu2 %vm6293_vm14, %v6292_v51  ;;  %v14407_v51 = vld [vmem:[%s14878_s6 + $0xac0] sm:$0xff] }
0x2062   :  { %6528 = vmatpush.msrb.mxu2 %v14357_v38 }
0x2064   :  { %6529 = vmatpush.msrb.mxu2 %v14362_v1 }
0x2066   :  { %6530 = vmatpush.msrb.mxu2 %v14377_v4 }
0x2068   :  { %6531 = vmatpush.msrb.mxu2 %v14390_v59 }
0x206a   :  { %6532 = vmatpush.msrb.mxu2 %v14402_v10 }
0x20e4   :  { %v6318_v40 = vpop.f32.mrf.mxu2 }
0x20e5   :  { %v6321_v9 = vperm.slane %v6318_v40, 0  ;;  %v14414_v40 = vld [vmem:[%s14878_s6 + $0xa40] sm:$0xff] }
0x20e6   :  { %6533 = vmatpush.msrb.mxu2 %v14414_v40 }
0x20e7   :  { %v14285_v8 = vsub.f32 %v6248_v39, %v6321_v9  ;;  %v14367_v39 = vld [vmem:[%s14878_s6 + $0xad8] sm:$0xff] }
0x20e8   :  { %6550 = vmatpush.msra.mxu1 %v14367_v39 }
0x20e9   :  { %v6323_v24 = vmul.f32 %v14285_v8, %v14285_v8 }
0x20ea   :  { %6551 = vmatpush.msra.mxu1 %v14383_v44 }
0x20eb   :  { %v6324_v31 = vsel %vm5233_vm6, %v6323_v24, 0.0  ;;  %v14426_v24 = vld [vmem:[%s14878_s6 + $0xab0] sm:$0xff] }
0x20ec   :  { %v6325_v21 = vrot.slane %v6324_v31, 4  ;;  %6552 = vmatpush.msra.mxu1 %v14395_v36 }
0x20ee   :  { %v6326_v33 = vadd.f32 %v6325_v21, %v6324_v31  ;;  %6553 = vmatpush.msra.mxu1 %v14407_v51  ;;  %v14433_v31 = vld [vmem:[%s14878_s6 + $0xaa8] sm:$0xff] }
0x20f0   :  { %v6327_v5 = vrot.slane %v6326_v33, 2 }
0x20f2   :  { %v6328_v14 = vadd.f32 %v6327_v5, %v6326_v33 }
0x20f4   :  { %v6329_v23 = vrot.slane %v6328_v14, 1 }
0x20f6   :  { %v6330_v62 = vadd.f32 %v6329_v23, %v6328_v14 }
0x20f8   :  { %8756 = vmatmul.msk.f32.vlgmr.msrb.gmra.mxu1 %vm617_vm0, %v6330_v62  ;;  %v14442_v62 = vld [vmem:[%s14878_s6 + $0xa38] sm:$0xff] }
0x20f9   :  { %6534 = vmatpush.msrb.mxu2 %v14442_v62 }
0x2175   :  { %v6351_v58 = vpop.f32.mrf.mxu1 }
0x2176   :  { %v6354_v61 = vmul.f32 0.03125, %v6351_v58  ;;  %v14447_v58 = vld [vmem:[%s14878_s6 + $0xaa0] sm:$0xff] }
0x2178   :  { %v6356_v45 = vadd.f32 1e-05, %v6354_v61  ;;  %v14454_v61 = vld [vmem:[%s14878_s6 + $0xa30] sm:$0xff] }
0x2179   :  { %6535 = vmatpush.msrb.mxu2 %v14454_v61 }
0x217a   :  { %9577 = vrsqrt.f32 %v6356_v45  ;;  %vm6363_vm6 = vweird.f32 %v6356_v45 }
0x2180   :  { %v9578_v28 = vpop.eup %9577 }
0x2181   :  { %v6358_v16 = vmul.f32 %v9578_v28, %v6356_v45  ;;  %vm6364_vm15 = vweird.f32 %v9578_v28  ;;  %v14459_v45 = vld [vmem:[%s14878_s6 + $0xa98] sm:$0xff] }
0x2182   :  { %vm6365_vm3 = vmor %vm6363_vm6, %vm6364_vm15 }
0x2183   :  { %v6359_v52 = vmul.f32 %v9578_v28, %v6358_v16  ;;  %v14469_v16 = vld [vmem:[%s14878_s6 + $0xa90] sm:$0xff] }
0x2185   :  { %v6360_v15 = vmul.f32 0.5, %v6359_v52  ;;  %v6485_v52 = vld [vmem:[%s14878_s6 + $0xa20] sm:$0xff] }
0x2187   :  { %v6361_v6 = vsub.f32 1.5, %v6360_v15  ;;  %v14478_v15 = vld [vmem:[%s14878_s6 + $0xa88] sm:$0xff] }
0x2189   :  { %v6362_v12 = vmul.f32 %v9578_v28, %v6361_v6  ;;  %v6484_v6 = vld [vmem:[%s14878_s6 + $0xa18] sm:$0xff] }
0x218b   :  { %v6366_v41 = vsel %vm6365_vm3, %v9578_v28, %v6362_v12  ;;  %v6486_v28 = vld [vmem:[%s14878_s6 + $0xa28] sm:$0xff]  ;;  %v6483_v12 = vld [vmem:[%s14878_s6 + $0xa10] sm:$0xff] }
0x218c   :  { %v6367_v26 = vmul.f32 %v6366_v41, %v6355_v50  ;;  %6536 = vmatpush.msrb.mxu2 %v6486_v28  ;;  %v14487_v50 = vld [vmem:[%s14878_s6 + $0xa80] sm:$0xff]  ;;  %v14496_v41 = vld [vmem:[%s14878_s6 + $0xa78] sm:$0xff] }
0x218e   :  { %8758 = vmatmul.msk.f32.vlgmr.msra.gmra.mxu2 %vm6293_vm14, %v6367_v26  ;;  %v6482_v26 = vld [vmem:[%s14878_s6 + $0xa08] sm:$0xff] }
0x218f   :  { %6537 = vmatpush.msrb.mxu2 %v6485_v52 }
0x2191   :  { %6538 = vmatpush.msrb.mxu2 %v6484_v6 }
0x2193   :  { %6539 = vmatpush.msrb.mxu2 %v6483_v12 }
0x2195   :  { %6540 = vmatpush.msrb.mxu2 %v6482_v26 }
0x2197   :  { %6541 = vmatpush.msrb.mxu2 %v6481_v53 }
0x2199   :  { %6542 = vmatpush.msrb.mxu2 %v6480_v13 }
0x219b   :  { %6543 = vmatpush.msrb.mxu2 %v6479_v20 }
0x219d   :  { %8797 = vmatpush.msk.msra.mxu2 %vm6297_vm13, %v6512_v11  ;;  %v9393_v11 = vld [vmem:[%s14881_s4 + $0x2ec] sm:$0xf0] }
0x2211   :  { %v6388_v49 = vpop.f32.mrf.mxu2 }
0x2212   :  { %v6392_v34 = vperm.slane %v6388_v49, 0  ;;  %v6513_v49 = vunpack.c.h.bf16 %v6511_v19  ;;  %v8865_v19 = vld [vmem:[%s14881_s4 + $0x2e0] sm:$0xf] }
0x2214   :  { %v6393_v7 = vmul.f32 %v6392_v34, %v14285_v8  ;;  %v14419_v8 = vld [vmem:[%s14878_s6 + $0xab8] sm:$0xff]  ;;  %8795 = vmatpush.msk.msra.mxu0 %vm6297_vm13, %v6513_v49 }
0x2215   :  { %6554 = vmatpush.msra.mxu1 %v14419_v8 }
0x2216   :  { %v6394_v43 = vadd.f32 %v6393_v7, %v6391_v47 }
0x2217   :  { %6555 = vmatpush.msra.mxu1 %v14426_v24 }
0x2218   :  { %v6395_v0 = vsub.f32 0.0, %v6394_v43 }
0x2219   :  { %6556 = vmatpush.msra.mxu1 %v14433_v31 }
0x221a   :  { %v6396_v9 = vmul.f32 1.442695, %v6395_v0 }
0x221b   :  { %6557 = vmatpush.msra.mxu1 %v14447_v58 }
0x221c   :  { %9579 = vpow2.f32 %v6396_v9 }
0x221d   :  { %6558 = vmatpush.msra.mxu1 %v14459_v45 }
0x221f   :  { %6559 = vmatpush.msra.mxu1 %v14469_v16 }
0x2221   :  { %6560 = vmatpush.msra.mxu1 %v14478_v15 }
0x2222   :  { %v9580_v21 = vpop.eup %9579 }
0x2223   :  { %v6398_v33 = vadd.f32 1.0, %v9580_v21  ;;  %6561 = vmatpush.msra.mxu1 %v14487_v50 }
0x2225   :  { %9581 = vrcp.f32 %v6398_v33  ;;  %6562 = vmatpush.msra.mxu1 %v14496_v41 }
0x2227   :  { %6563 = vmatpush.msra.mxu1 %v14505_v29 }
0x2229   :  { %8799 = vmatpush.msk.msrb.mxu1 %vm6297_vm13, %v6513_v49  ;;  %v8866_v49 = vor.u32 %v9393_v11, %v8865_v19  ;;  %v9386_v11 = vld [vmem:[%s14881_s4 + $0x2a4] sm:$0xf] }
0x222b   :  { %v9582_v5 = vpop.eup %9581 }
0x222c   :  { %v6400_v14 = vmul.f32 %v9582_v5, %v6394_v43 }
0x222e   :  { %v6409_v23 = vpack.c.bf16 %v6400_v14, %v6400_v14 }
0x2230   :  { %8791 = vmatmul.msk.bf16.vlgmr.msrb.gmra.mxu3 %vm617_vm0, %v6409_v23  ;;  %8792 = vmatmul.msk.bf16.vlgmr.msrb.gmra.mxu0 %vm617_vm0, %v6409_v23 }
0x2231   :  { %6638 = vmatpush.msrb.mxu3 %v14357_v38  ;;  %6658 = vmatpush.msrb.mxu0 %v14346_v55 }
0x2233   :  { %6639 = vmatpush.msrb.mxu3 %v14362_v1  ;;  %6659 = vmatpush.msrb.mxu0 %v14351_v54 }
0x2235   :  { %6640 = vmatpush.msrb.mxu3 %v14377_v4  ;;  %6660 = vmatpush.msrb.mxu0 %v14367_v39 }
0x2237   :  { %6641 = vmatpush.msrb.mxu3 %v14390_v59  ;;  %6661 = vmatpush.msrb.mxu0 %v14383_v44 }
0x2239   :  { %6642 = vmatpush.msrb.mxu3 %v14402_v10  ;;  %6662 = vmatpush.msrb.mxu0 %v14395_v36 }
0x223b   :  { %6643 = vmatpush.msrb.mxu3 %v14414_v40  ;;  %6663 = vmatpush.msrb.mxu0 %v14407_v51 }
0x223d   :  { %6644 = vmatpush.msrb.mxu3 %v14442_v62  ;;  %6664 = vmatpush.msrb.mxu0 %v14419_v8  ;;  %v8985_v62 = vld [vmem:[%s14881_s4 + $0x420] sm:$0xf] }
0x223f   :  { %6645 = vmatpush.msrb.mxu3 %v14454_v61  ;;  %6665 = vmatpush.msrb.mxu0 %v14426_v24  ;;  %v8973_v61 = vld [vmem:[%s14881_s4 + $0x400] sm:$0xf] }
0x2241   :  { %6646 = vmatpush.msrb.mxu3 %v6486_v28  ;;  %6666 = vmatpush.msrb.mxu0 %v14433_v31  ;;  %v9420_v28 = vld [vmem:[%s14881_s4 + $0x40c] sm:$0xf0] }
0x2243   :  { %6647 = vmatpush.msrb.mxu3 %v6485_v52  ;;  %6667 = vmatpush.msrb.mxu0 %v14447_v58  ;;  %v9423_v58 = vld [vmem:[%s14881_s4 + $0x42c] sm:$0xf0] }
0x2244   :  { %v9399_v52 = vld [vmem:[%s14881_s4 + $0x32c] sm:$0xf0] }
0x2245   :  { %6648 = vmatpush.msrb.mxu3 %v6484_v6  ;;  %6668 = vmatpush.msrb.mxu0 %v14459_v45  ;;  %v8986_v45 = vor.u32 %v9423_v58, %v8985_v62  ;;  %v8877_v6 = vld [vmem:[%s14881_s4 + $0x300] sm:$0xf]  ;;  %v9405_v58 = vld [vmem:[%s14881_s4 + $0x36c] sm:$0xf0] }
0x2246   :  { %v8913_v62 = vld [vmem:[%s14881_s4 + $0x360] sm:$0xf] }
0x2247   :  { %6649 = vmatpush.msrb.mxu3 %v6483_v12  ;;  %6669 = vmatpush.msrb.mxu0 %v14469_v16  ;;  %v8889_v16 = vld [vmem:[%s14881_s4 + $0x320] sm:$0xf]  ;;  %v9396_v12 = vld [vmem:[%s14881_s4 + $0x30c] sm:$0xf0] }
0x2249   :  { %6650 = vmatpush.msrb.mxu3 %v6482_v26  ;;  %6670 = vmatpush.msrb.mxu0 %v14478_v15  ;;  %v8890_v15 = vor.u32 %v9399_v52, %v8889_v16  ;;  %v9417_v26 = vld [vmem:[%s14881_s4 + $0x3ec] sm:$0xf0]  ;;  %v8829_v52 = vld [vmem:[%s14881_s4 + $0x280] sm:$0xf] }
0x224b   :  { %6651 = vmatpush.msrb.mxu3 %v6481_v53  ;;  %6671 = vmatpush.msrb.mxu0 %v14487_v50  ;;  %v8974_v50 = vor.u32 %v9420_v28, %v8973_v61  ;;  %v8914_v61 = vor.u32 %v9405_v58, %v8913_v62  ;;  %v8951_v28 = vld [vmem:[%s14881_s4 + $0x3d0] sm:$0xf0]  ;;  %v8873_v62 = vld [vmem:[%s14881_s4 + $0x2e8] sm:$0xf] }
0x224d   :  { %6652 = vmatpush.msrb.mxu3 %v6480_v13  ;;  %6672 = vmatpush.msrb.mxu0 %v14496_v41  ;;  %v8961_v41 = vld [vmem:[%s14881_s4 + $0x3e0] sm:$0xf] }
0x224f   :  { %6653 = vmatpush.msrb.mxu3 %v6479_v20  ;;  %6673 = vmatpush.msrb.mxu0 %v14505_v29  ;;  %v8878_v29 = vor.u32 %v9396_v12, %v8877_v6  ;;  %v8867_v12 = vld [vmem:[%s14881_s4 + $0x2f0] sm:$0xf0] }
0x22ad   :  { %v14517_v57 = vpop.f32.mrf.mxu0 }
0x22ae   :  { %v6521_v46 = vsel %vm981_vm1, %v14517_v57, 0.0 }
0x22af   :  { %v6522_v22 = vrot.slane %v6521_v46, 4 }
0x22b1   :  { %v6523_v17 = vadd.f32 %v6522_v22, %v6521_v46  ;;  %v8949_v22 = vld [vmem:[%s14881_s4 + $0x3c0] sm:$0xf] }
0x22b3   :  { %v6524_v56 = vrot.slane %v6523_v17, 2  ;;  %v14521_v32 = vpop.f32.mrf.mxu3 }
0x22b4   :  { %v6514_v60 = vsel %vm981_vm1, %v14521_v32, 0.0 }
0x22b5   :  { %v6525_v37 = vadd.f32 %v6524_v56, %v6523_v17  ;;  %v6515_v48 = vrot.slane %v6514_v60, 4  ;;  %v6477_v30 = vpop.f32.mrf.mxu0  ;;  %v9414_v17 = vld [vmem:[%s14881_s4 + $0x3cc] sm:$0xf0] }
0x22b7   :  { %v6526_v27 = vrot.slane %v6525_v37, 1  ;;  %v6516_v18 = vadd.f32 %v6515_v48, %v6514_v60 }
0x22b9   :  { %v6527_v3 = vadd.f32 %v6526_v27, %v6525_v37  ;;  %v6517_v63 = vrot.slane %v6516_v18, 2 }
0x22bb   :  { %v6518_v42 = vadd.f32 %v6517_v63, %v6516_v18  ;;  %v6464_v2 = vpop.f32.mrf.mxu3  ;;  %6564 = vmatmul.f32.vlgmr.msra.gmra.mxu1 %v6527_v3  ;;  %v6679_v18 = vld [vmem:[%s14879_s7 + $0xc0] ss:$0 sm:$0xff] }
0x22bc   :  { %7104 = vmatpush.bf16.msra.mxu1 %v8986_v45  ;;  %v9422_v2 = vld [vmem:[%s14881_s4 + $0x424] sm:$0xf] }
0x22bd   :  { %v6519_v35 = vrot.slane %v6518_v42, 1  ;;  %v9413_v45 = vld [vmem:[%s14881_s4 + $0x3c4] sm:$0xf] }
0x22be   :  { %v8954_v16 = vor.u32 %v9413_v45, %v8951_v28  ;;  %v8945_v28 = vld [vmem:[%s14881_s4 + $0x3a8] sm:$0xf] }
0x22bf   :  { %v6520_v25 = vadd.f32 %v6519_v35, %v6518_v42  ;;  %v8987_v35 = vld [vmem:[%s14881_s4 + $0x430] sm:$0xf0] }
0x22c0   :  { %7105 = vmatpush.bf16.msra.mxu1 %v8974_v50  ;;  %v9392_v50 = vld [vmem:[%s14881_s4 + $0x2e4] sm:$0xf] }
0x22c1   :  { %6544 = vmatmul.f32.vlgmr.msrb.gmra.mxu2 %v6520_v25  ;;  %v8990_v25 = vor.u32 %v9422_v2, %v8987_v35  ;;  %v8805_v2 = vld [vmem:[%s14881_s4 + $0x240] sm:$0xf]  ;;  %v9378_v35 = vld [vmem:[%s14881_s4 + $0x24c] sm:$0xf0] }
0x22c2   :  { %7091 = vmatpush.bf16.msrb.mxu2 %v8890_v15  ;;  %v9384_v15 = vld [vmem:[%s14881_s4 + $0x28c] sm:$0xf0]  ;;  %v8806_v19 = vor.u32 %v9378_v35, %v8805_v2 }
0x22c3   :  { %v8830_v6 = vor.u32 %v9384_v15, %v8829_v52  ;;  %v8801_v52 = vld [vmem:[%s14879_s7 + $0xc1] ss:$8 sm:$0x3] }
0x22c6   :  { %7092 = vmatpush.bf16.msrb.mxu2 %v8878_v29  ;;  %v9402_v29 = vld [vmem:[%s14881_s4 + $0x34c] sm:$0xf0] }
0x22ca   :  { %7093 = vmatpush.bf16.msrb.mxu2 %v8866_v49  ;;  %v8843_v49 = vld [vmem:[%s14881_s4 + $0x2b0] sm:$0xf0] }
0x2338   :  { %v6565_v55 = vpop.f32.mrf.mxu1 }
0x2344   :  { %v6545_v54 = vpop.f32.mrf.mxu2 }
0x2345   :  { %v6566_v38 = vadd.f32 %v6565_v55, %v6545_v54  ;;  %v8937_v55 = vld [vmem:[%s14881_s4 + $0x3a0] sm:$0xf]  ;;  %v9411_v54 = vld [vmem:[%s14881_s4 + $0x3ac] sm:$0xf0] }
0x2347   :  { %v6568_v1 = vmul.f32 0.0078125, %v6566_v38  ;;  %v9419_v38 = vld [vmem:[%s14881_s4 + $0x404] sm:$0xf] }
0x2349   :  { %8794 = vmatmul.msk.f32.vlgmr.msra.gmra.mxu3 %vm6293_vm14, %v6568_v1  ;;  %8796 = vmatmul.msk.f32.vlgmr.msra.gmra.mxu0 %vm6293_vm14, %v6568_v1  ;;  %v8975_v1 = vld [vmem:[%s14881_s4 + $0x410] sm:$0xf0] }
0x234a   :  { %7130 = vmatpush.bf16.msra.mxu0 %v8990_v25 }
0x23c6   :  { %v6615_v34 = vpop.f32.mrf.mxu0 }
0x23c7   :  { %v6619_v39 = vperm.slane %v6615_v34, 0  ;;  %v8938_v34 = vor.u32 %v9411_v54, %v8937_v55  ;;  %v8897_v55 = vld [vmem:[%s14881_s4 + $0x328] sm:$0xf]  ;;  %v8846_v54 = vor.u32 %v9386_v11, %v8843_v49  ;;  %v9382_v49 = vld [vmem:[%s14881_s4 + $0x274] sm:$0xf0] }
0x23c8   :  { %v8825_v11 = vld [vmem:[%s14881_s4 + $0x268] sm:$0xf] }
0x23c9   :  { %v14559_v47 = vsub.f32 %v14517_v57, %v6619_v39  ;;  %v8962_v57 = vor.u32 %v9417_v26, %v8961_v41  ;;  %v8978_v39 = vor.u32 %v9419_v38, %v8975_v1  ;;  %v8870_v41 = vor.u32 %v9392_v50, %v8867_v12  ;;  %v8901_v26 = vld [vmem:[%s14881_s4 + $0x340] sm:$0xf]  ;;  %v9400_v38 = vld [vmem:[%s14881_s4 + $0x334] sm:$0xf0]  ;;  %v8807_v50 = vld [vmem:[%s14881_s4 + $0x250] sm:$0xf0] }
0x23ca   :  { %v8898_v1 = vor.u32 %v9400_v38, %v8897_v55  ;;  %v8861_v12 = vld [vmem:[%s14881_s4 + $0x2c8] sm:$0xf] }
0x23cb   :  { %v6623_v4 = vmul.f32 %v14559_v47, %v14559_v47  ;;  %7106 = vmatpush.bf16.msra.mxu1 %v8962_v57  ;;  %7131 = vmatpush.bf16.msra.mxu0 %v8978_v39  ;;  %v8993_v57 = vld [vmem:[%s14881_s4 + $0x428] sm:$0xf]  ;;  %v8915_v39 = vld [vmem:[%s14881_s4 + $0x370] sm:$0xf0] }
0x23cc   :  { %v6595_v7 = vpop.f32.mrf.mxu3 }
0x23cd   :  { %v6631_v44 = vsel %vm981_vm1, %v6623_v4, 0.0  ;;  %v6618_v59 = vperm.slane %v6595_v7, 0  ;;  %v8853_v4 = vld [vmem:[%s14881_s4 + $0x2c0] sm:$0xf]  ;;  %v9390_v7 = vld [vmem:[%s14881_s4 + $0x2cc] sm:$0xf0] }
0x23ce   :  { %v6632_v43 = vrot.slane %v6631_v44, 4 }
0x23cf   :  { %v14565_v36 = vsub.f32 %v14521_v32, %v6618_v59  ;;  %v8950_v32 = vor.u32 %v9414_v17, %v8949_v22  ;;  %v9398_v59 = vld [vmem:[%s14881_s4 + $0x324] sm:$0xf]  ;;  %v9424_v22 = vld [vmem:[%s14881_s4 + $0x434] sm:$0xf0]  ;;  %v8817_v17 = vld [vmem:[%s14881_s4 + $0x260] sm:$0xf] }
0x23d0   :  { %v6633_v10 = vadd.f32 %v6632_v43, %v6631_v44  ;;  %v8854_v44 = vor.u32 %v9390_v7, %v8853_v4  ;;  %v8891_v43 = vld [vmem:[%s14881_s4 + $0x330] sm:$0xf0]  ;;  %v8969_v4 = vld [vmem:[%s14881_s4 + $0x3e8] sm:$0xf] }
0x23d1   :  { %v6622_v0 = vmul.f32 %v14565_v36, %v14565_v36  ;;  %7107 = vmatpush.bf16.msra.mxu1 %v8950_v32  ;;  %v8994_v32 = vor.u32 %v9424_v22, %v8993_v57  ;;  %v8933_v57 = vld [vmem:[%s14881_s4 + $0x388] sm:$0xf] }
0x23d2   :  { %v6634_v51 = vrot.slane %v6633_v10, 2  ;;  %7094 = vmatpush.bf16.msrb.mxu2 %v8854_v44  ;;  %v9418_v44 = vld [vmem:[%s14881_s4 + $0x3f4] sm:$0xf0] }
0x23d3   :  { %v6624_v40 = vsel %vm981_vm1, %v6622_v0, 0.0  ;;  %v8925_v0 = vld [vmem:[%s14881_s4 + $0x380] sm:$0xf] }
0x23d4   :  { %v6635_v9 = vadd.f32 %v6634_v51, %v6633_v10  ;;  %v6625_v8 = vrot.slane %v6624_v40, 4  ;;  %v8894_v10 = vor.u32 %v9398_v59, %v8891_v43  ;;  %v9408_v51 = vld [vmem:[%s14881_s4 + $0x38c] sm:$0xf0]  ;;  %v8970_v59 = vor.u32 %v9418_v44, %v8969_v4  ;;  %v9383_v43 = vld [vmem:[%s14881_s4 + $0x284] sm:$0xf] }
0x23d5   :  { %7108 = vmatpush.bf16.msra.mxu1 %v8938_v34  ;;  %v9404_v34 = vld [vmem:[%s14881_s4 + $0x364] sm:$0xf]  ;;  %v9379_v44 = vld [vmem:[%s14881_s4 + $0x254] sm:$0xf0] }
0x23d6   :  { %v6636_v24 = vrot.slane %v6635_v9, 1  ;;  %v6626_v31 = vadd.f32 %v6625_v8, %v6624_v40  ;;  %v8926_v40 = vor.u32 %v9408_v51, %v8925_v0  ;;  %v8963_v8 = vld [vmem:[%s14881_s4 + $0x3f0] sm:$0xf0]  ;;  %7117 = vmatpush.bf16.msra.mxu3 %v8894_v10  ;;  %v8918_v7 = vor.u32 %v9404_v34, %v8915_v39  ;;  %v8885_v0 = vld [vmem:[%s14881_s4 + $0x308] sm:$0xf] }
0x23d7   :  { %v8831_v10 = vld [vmem:[%s14881_s4 + $0x290] sm:$0xf0]  ;;  %v8826_v34 = vor.u32 %v9382_v49, %v8825_v11 }
0x23d8   :  { %v6637_v21 = vadd.f32 %v6636_v24, %v6635_v9  ;;  %v6627_v33 = vrot.slane %v6626_v31, 2  ;;  %v9416_v9 = vld [vmem:[%s14881_s4 + $0x3e4] sm:$0xf]  ;;  %v8834_v51 = vor.u32 %v9383_v43, %v8831_v10 }
0x23d9   :  { %v8966_v24 = vor.u32 %v9416_v9, %v8963_v8  ;;  %7109 = vmatpush.bf16.msra.mxu1 %v8926_v40  ;;  %v9397_v40 = vld [vmem:[%s14881_s4 + $0x314] sm:$0xf0]  ;;  %v9401_v8 = vld [vmem:[%s14881_s4 + $0x344] sm:$0xf] }
0x23da   :  { %v6628_v5 = vadd.f32 %v6627_v33, %v6626_v31  ;;  %6674 = vmatmul.f32.vlgmr.msrb.gmra.mxu0 %v6637_v21  ;;  %v8841_v31 = vld [vmem:[%s14881_s4 + $0x2a0] sm:$0xf]  ;;  %v9387_v21 = vld [vmem:[%s14881_s4 + $0x2ac] sm:$0xf0]  ;;  %v8886_v9 = vor.u32 %v9397_v40, %v8885_v0 }
0x23db   :  { %v8842_v33 = vor.u32 %v9387_v21, %v8841_v31  ;;  %7132 = vmatpush.bf16.msra.mxu0 %v8966_v24  ;;  %v8903_v24 = vld [vmem:[%s14881_s4 + $0x350] sm:$0xf0]  ;;  %v8957_v31 = vld [vmem:[%s14881_s4 + $0x3c8] sm:$0xf] }
0x23dc   :  { %v6629_v14 = vrot.slane %v6628_v5, 1  ;;  %v8906_v21 = vor.u32 %v9401_v8, %v8903_v24 }
0x23dd   :  { %7095 = vmatpush.bf16.msrb.mxu2 %v8842_v33  ;;  %7110 = vmatpush.bf16.msra.mxu1 %v8914_v61  ;;  %v9415_v33 = vld [vmem:[%s14881_s4 + $0x3d4] sm:$0xf0] }
0x23de   :  { %v6630_v23 = vadd.f32 %v6629_v14, %v6628_v5  ;;  %v9395_v5 = vld [vmem:[%s14881_s4 + $0x304] sm:$0xf]  ;;  %v8879_v14 = vld [vmem:[%s14881_s4 + $0x310] sm:$0xf0]  ;;  %v9394_v61 = vld [vmem:[%s14881_s4 + $0x2f4] sm:$0xf0] }
0x23df   :  { %7133 = vmatpush.bf16.msra.mxu0 %v8954_v16  ;;  %v8874_v45 = vor.u32 %v9394_v61, %v8873_v62  ;;  %v9412_v16 = vld [vmem:[%s14881_s4 + $0x3b4] sm:$0xf0] }
0x23e0   :  { %6654 = vmatmul.f32.vlgmr.msrb.gmra.mxu3 %v6630_v23  ;;  %v8882_v23 = vor.u32 %v9395_v5, %v8879_v14  ;;  %v8958_v5 = vor.u32 %v9415_v33, %v8957_v31  ;;  %v9380_v14 = vld [vmem:[%s14881_s4 + $0x264] sm:$0xf]  ;;  %v8946_v15 = vor.u32 %v9412_v16, %v8945_v28 }
0x23e1   :  { %7096 = vmatpush.bf16.msrb.mxu2 %v8830_v6  ;;  %v9377_v6 = vld [vmem:[%s14881_s4 + $0x244] sm:$0xf] }
0x23e2   :  { %7118 = vmatpush.bf16.msra.mxu3 %v8882_v23  ;;  %v8819_v23 = vld [vmem:[%s14881_s4 + $0x270] sm:$0xf0] }
0x23e3   :  { %v8822_v58 = vor.u32 %v9380_v14, %v8819_v23 }
0x23e6   :  { %7119 = vmatpush.bf16.msra.mxu3 %v8870_v41 }
0x2457   :  { %v6675_v53 = vpop.f32.mrf.mxu0 }
0x2463   :  { %v6655_v13 = vpop.f32.mrf.mxu3 }
0x2464   :  { %v6676_v20 = vadd.f32 %v6675_v53, %v6655_v13  ;;  %v8902_v53 = vor.u32 %v9402_v29, %v8901_v26  ;;  %v9410_v13 = vld [vmem:[%s14881_s4 + $0x3a4] sm:$0xf]  ;;  %v8810_v26 = vor.u32 %v9377_v6, %v8807_v50  ;;  %v9391_v29 = vld [vmem:[%s14881_s4 + $0x2d4] sm:$0xf0] }
0x2466   :  { %v6678_v46 = vmul.f32 0.0078125, %v6676_v20  ;;  %v8939_v20 = vld [vmem:[%s14881_s4 + $0x3b0] sm:$0xf0]  ;;  %7111 = vmatpush.bf16.msra.mxu1 %v8902_v53 }
0x2468   :  { %v6680_v56 = vadd.f32 1e-05, %v6678_v46  ;;  %v8942_v46 = vor.u32 %v9410_v13, %v8939_v20  ;;  %v6743_v13 = vperm.slane %v8801_v52, 1  ;;  %v8862_v20 = vor.u32 %v9391_v29, %v8861_v12 }
0x246a   :  { %9583 = vrsqrt.f32 %v6680_v56  ;;  %vm6687_vm4 = vweird.f32 %v6680_v56  ;;  %7134 = vmatpush.bf16.msra.mxu0 %v8942_v46  ;;  %v9409_v46 = vld [vmem:[%s14881_s4 + $0x394] sm:$0xf0] }
0x246b   :  { %v8934_v22 = vor.u32 %v9409_v46, %v8933_v57 }
0x2470   :  { %v9584_v60 = vpop.eup %9583 }
0x2471   :  { %v6682_v37 = vmul.f32 %v9584_v60, %v6680_v56  ;;  %vm6688_vm0 = vweird.f32 %v9584_v60  ;;  %v9381_v56 = vld [vmem:[%s14881_s4 + $0x26c] sm:$0xf0] }
0x2472   :  { %vm6689_vm5 = vmor %vm6687_vm4, %vm6688_vm0 }
0x2473   :  { %v6683_v48 = vmul.f32 %v9584_v60, %v6682_v37  ;;  %v9389_v37 = vld [vmem:[%s14881_s4 + $0x2c4] sm:$0xf] }
0x2475   :  { %v6684_v30 = vmul.f32 0.5, %v6683_v48  ;;  %v8855_v48 = vld [vmem:[%s14881_s4 + $0x2d0] sm:$0xf0] }
0x2477   :  { %v6685_v27 = vsub.f32 1.5, %v6684_v30  ;;  %v8858_v30 = vor.u32 %v9389_v37, %v8855_v48  ;;  %v8921_v48 = vld [vmem:[%s14881_s4 + $0x368] sm:$0xf] }
0x2479   :  { %v6686_v3 = vmul.f32 %v9584_v60, %v6685_v27  ;;  %v9407_v27 = vld [vmem:[%s14881_s4 + $0x384] sm:$0xf]  ;;  %7120 = vmatpush.bf16.msra.mxu3 %v8858_v30  ;;  %v8837_v30 = vld [vmem:[%s14881_s4 + $0x288] sm:$0xf] }
0x247b   :  { %v6690_v63 = vsel %vm6689_vm5, %v9584_v60, %v6686_v3  ;;  %v8818_v60 = vor.u32 %v9381_v56, %v8817_v17  ;;  %v8981_v3 = vld [vmem:[%s14881_s4 + $0x408] sm:$0xf] }
0x247c   :  { %v6691_v42 = vmul.f32 %v6690_v63, %v6679_v18  ;;  %v8927_v18 = vld [vmem:[%s14881_s4 + $0x390] sm:$0xf0]  ;;  %v8849_v56 = vld [vmem:[%s14881_s4 + $0x2a8] sm:$0xf] }
0x247d   :  { %7097 = vmatpush.bf16.msrb.mxu2 %v8818_v60  ;;  %v8930_v63 = vor.u32 %v9407_v27, %v8927_v18  ;;  %7121 = vmatpush.bf16.msra.mxu3 %v8846_v54 }
0x247e   :  { %8798 = vmatmul.msk.f32.vlgmr.msra.gmra.mxu2 %vm6293_vm14, %v6691_v42  ;;  %8800 = vmatmul.msk.f32.vlgmr.msrb.gmra.mxu1 %vm6293_vm14, %v6691_v42  ;;  %v9421_v42 = vld [vmem:[%s14881_s4 + $0x414] sm:$0xf0] }
0x247f   :  { %7156 = vmatpush.bf16.msrb.mxu1 %v8994_v32  ;;  %v8982_v25 = vor.u32 %v9421_v42, %v8981_v3  ;;  %7135 = vmatpush.bf16.msra.mxu0 %v8930_v63  ;;  %v9388_v32 = vld [vmem:[%s14881_s4 + $0x2b4] sm:$0xf0]  ;;  %v8909_v63 = vld [vmem:[%s14881_s4 + $0x348] sm:$0xf] }
0x2480   :  { %v8850_v60 = vor.u32 %v9388_v32, %v8849_v56  ;;  %v9385_v3 = vld [vmem:[%s14881_s4 + $0x294] sm:$0xf0] }
0x2481   :  { %7098 = vmatpush.bf16.msrb.mxu2 %v8806_v19  ;;  %7122 = vmatpush.bf16.msra.mxu3 %v8834_v51  ;;  %v9403_v42 = vld [vmem:[%s14881_s4 + $0x354] sm:$0xf0]  ;;  %v8838_v19 = vor.u32 %v9385_v3, %v8837_v30 }
0x2482   :  { %v8910_v38 = vor.u32 %v9403_v42, %v8909_v63 }
0x2483   :  { %7157 = vmatpush.bf16.msrb.mxu1 %v8982_v25  ;;  %7136 = vmatpush.bf16.msra.mxu0 %v8918_v7  ;;  %v6742_v25 = vperm.slane %v8801_v52, 0  ;;  %v8813_v7 = vld [vmem:[%s14881_s4 + $0x248] sm:$0xf] }
0x2485   :  { %7143 = vmatpush.bf16.msra.mxu2 %v8898_v1  ;;  %7123 = vmatpush.bf16.msra.mxu3 %v8822_v58  ;;  %v8802_v58 = vld [vmem:[%s14879_s7 + $0xc2] ss:$8 sm:$0x7] }
0x2486   :  { %v6831_v50 = vperm.slane %v8802_v58, 2 }
0x2487   :  { %7158 = vmatpush.bf16.msrb.mxu1 %v8970_v59  ;;  %7137 = vmatpush.bf16.msra.mxu0 %v8906_v21  ;;  %v8814_v59 = vor.u32 %v9379_v44, %v8813_v7 }
0x2489   :  { %7144 = vmatpush.bf16.msra.mxu2 %v8886_v9  ;;  %7124 = vmatpush.bf16.msra.mxu3 %v8810_v26 }
0x248b   :  { %7159 = vmatpush.bf16.msrb.mxu1 %v8958_v5 }
0x248d   :  { %7145 = vmatpush.bf16.msra.mxu2 %v8874_v45  ;;  %v6830_v45 = vperm.slane %v8802_v58, 1 }
0x248f   :  { %7160 = vmatpush.bf16.msrb.mxu1 %v8946_v15  ;;  %v6829_v15 = vperm.slane %v8802_v58, 0 }
0x2491   :  { %7146 = vmatpush.bf16.msra.mxu2 %v8862_v20 }
0x2493   :  { %7161 = vmatpush.bf16.msrb.mxu1 %v8934_v22 }
0x2495   :  { %7147 = vmatpush.bf16.msra.mxu2 %v8850_v60 }
0x2499   :  { %7148 = vmatpush.bf16.msra.mxu2 %v8838_v19 }
0x249d   :  { %7149 = vmatpush.bf16.msra.mxu2 %v8826_v34 }
0x24a1   :  { %7150 = vmatpush.bf16.msra.mxu2 %v8814_v59 }
0x24fb   :  { %v6732_v41 = vpop.f32.mrf.mxu1 }
0x24fc   :  { %v6738_v53 = vperm.slane %v6732_v41, 0 }
0x24fe   :  { %v6740_v17 = vmul.f32 %v6738_v53, %v14559_v47  ;;  %v9406_v47 = vld [vmem:[%s14881_s4 + $0x374] sm:$0xf0] }
0x24ff   :  { %v8922_v18 = vor.u32 %v9406_v47, %v8921_v48 }
0x2500   :  { %v6747_v37 = vadd.f32 %v6743_v13, %v6740_v17 }
0x2501   :  { %v6712_v27 = vpop.f32.mrf.mxu2  ;;  %7162 = vmatpush.bf16.msrb.mxu1 %v8922_v18 }
0x2502   :  { %v6749_v2 = vsub.f32 0.0, %v6747_v37  ;;  %v6737_v35 = vperm.slane %v6712_v27, 0 }
0x2504   :  { %v6752_v55 = vmul.f32 1.442695, %v6749_v2  ;;  %v6739_v54 = vmul.f32 %v6737_v35, %v14565_v36 }
0x2505   :  { %7163 = vmatpush.bf16.msrb.mxu1 %v8910_v38 }
0x2506   :  { %9585 = vpow2.f32 %v6752_v55  ;;  %v6746_v1 = vadd.f32 %v6742_v25, %v6739_v54 }
0x2508   :  { %v6748_v39 = vsub.f32 0.0, %v6746_v1 }
0x250a   :  { %v6750_v4 = vmul.f32 1.442695, %v6748_v39 }
0x250c   :  { %v9586_v36 = vpop.eup %9585  ;;  %9587 = vpow2.f32 %v6750_v4 }
0x250d   :  { %v6755_v43 = vadd.f32 1.0, %v9586_v36 }
0x250f   :  { %9589 = vrcp.f32 %v6755_v43 }
0x2512   :  { %v9588_v10 = vpop.eup %9587 }
0x2513   :  { %v6754_v0 = vadd.f32 1.0, %v9588_v10 }
0x2515   :  { %v9590_v51 = vpop.eup %9589  ;;  %9591 = vrcp.f32 %v6754_v0 }
0x2516   :  { %v6759_v40 = vmul.f32 %v9590_v51, %v6747_v37 }
0x2518   :  { %v6827_v9 = vpack.c.bf16 %v6759_v40, %v6759_v40 }
0x251a   :  { %7112 = vmatmul.bf16.vlgmr.msra.gmra.mxu1 %v6827_v9  ;;  %7138 = vmatmul.bf16.vlgmr.msra.gmra.mxu0 %v6827_v9 }
0x251b   :  { %v9592_v8 = vpop.eup %9591 }
0x251c   :  { %v6758_v24 = vmul.f32 %v9592_v8, %v6746_v1 }
0x251e   :  { %v6826_v31 = vpack.c.bf16 %v6758_v24, %v6758_v24 }
0x2520   :  { %7099 = vmatmul.bf16.vlgmr.msrb.gmra.mxu2 %v6826_v31  ;;  %7125 = vmatmul.bf16.vlgmr.msra.gmra.mxu3 %v6826_v31 }
0x252a   :  { %7164 = vmatmul.bf16.vlgmr.msrb.gmra.mxu1 %v6827_v9 }
0x2530   :  { %7151 = vmatmul.bf16.vlgmr.msra.gmra.mxu2 %v6826_v31 }
0x2597   :  { %v7113_v21 = vpop.f32.mrf.mxu1  ;;  %v7139_v33 = vpop.f32.mrf.mxu0 }
0x259f   :  { %v7115_v5 = vpop.f32.mrf.mxu1  ;;  %v7141_v14 = vpop.f32.mrf.mxu0 }
0x25a3   :  { %v7100_v23 = vpop.f32.mrf.mxu2  ;;  %v7126_v62 = vpop.f32.mrf.mxu3 }
0x25a4   :  { %v7127_v52 = vadd.f32 %v7126_v62, %v6830_v45  ;;  %v7101_v41 = vadd.f32 %v7100_v23, %v6829_v15 }
0x25a6   :  { %v7140_v12 = vadd.f32 %v7139_v33, %v7127_v52  ;;  %v7114_v20 = vadd.f32 %v7113_v21, %v7101_v41 }
0x25a7   :  { %v7165_v61 = vpop.f32.mrf.mxu1 }
0x25a8   :  { %v7172_v53 = vrot.slane %v7140_v12, 6 }
0x25aa   :  { %v7174_v46 = vsel %vm981_vm1, %v7114_v20, %v7172_v53 }
0x25ab   :  { %v7102_v28 = vpop.f32.mrf.mxu2  ;;  %v7128_v16 = vpop.f32.mrf.mxu3 }
0x25af   :  { %v7167_v6 = vpop.f32.mrf.mxu1 }
0x25b3   :  { %v7152_v26 = vpop.f32.mrf.mxu2 }
0x25b4   :  { %v7153_v29 = vadd.f32 %v7152_v26, %v6831_v50 }
0x25b6   :  { %v7166_v13 = vadd.f32 %v7165_v61, %v7153_v29 }
0x25b8   :  { %v7173_v57 = vrot.slane %v7166_v13, 4 }
0x25ba   :  { %v7175_v22 = vsel %vm6297_vm13, %v7174_v46, %v7173_v57 }
0x25bb   :  { %7177 = vst [vmem:[%s14885_s8] sm:$0x3f] %v7175_v22  ;;  %v7154_v17 = vpop.f32.mrf.mxu2 }

</bundles_post_ra>
